<compile_context>
chip_gen: v7x
topology: tpu7x:2x2x1
jax: 0.10.0
libtpu: 0.0.40
codegen_flags: <defaults>
</compile_context>

<pallas_src>
import functools

import jax
import jax.numpy as jnp
from jax.experimental import pallas as pl
from jax.experimental.pallas import tpu as pltpu


def _conv3d_tap_kernel(x_ref, b_ref, o_ref, *, KS, KH, KW, OS, OH, OW,
                       Cin, Cout, Sp):
    """One batch element: accumulate all KS*KH*KW taps into (OS, OH, OW*Cout).

    x_ref: (1, Sp, Hp, Wp*Cin)   padded channels-last input, W and Cin fused.
    b_ref: (KT, OW*Cin, OW*Cout) per-tap block-diagonal weights (VMEM resident).
    o_ref: (1, OS, OH, OW*Cout)  lane-dense output tile.
    """
    accs = [jnp.zeros((OH, OW * Cout), jnp.float32) for _ in range(OS)]
    for sd in range(Sp):                       # padded input depth plane
        for kh in range(KH):
            # (ks, od) pairs this input plane contributes to (stride 1).
            pairs = [(ks, sd - ks) for ks in range(KS) if 0 <= sd - ks < OS]
            if not pairs:
                continue
            slab = x_ref[0, sd, kh:kh + OH, :]            # (OH, Wp*Cin)
            for ks, od in pairs:
                for kw in range(KW):
                    t = (ks * KH + kh) * KW + kw
                    x_mat = slab[:, kw * Cin:(kw + OW) * Cin]   # (OH, OW*Cin)
                    accs[od] = accs[od] + jnp.dot(
                        x_mat, b_ref[t], preferred_element_type=jnp.float32)
    for od in range(OS):
        o_ref[0, od] = accs[od].astype(o_ref.dtype)


def basic_conv3d(x_ncdhw, weight_oidhw, stride=(1, 1, 1), padding=(1, 1, 1)):
    """BasicConv3d.forward: y = conv3d(x, weight, stride, padding, bias=False).

    x_ncdhw:      (N, Cin, S, H, W)        -- PyTorch NCDHW input
    weight_oidhw: (Cout, Cin, KS, KH, KW)  -- PyTorch conv3d weight
    returns:      (N, Cout, OS, OH, OW)    -- PyTorch NCDHW output
    """
    if isinstance(stride, int):
        stride = (stride,) * 3
    if isinstance(padding, int):
        padding = (padding,) * 3
    SS, SH, SW = stride
    PS, PH, PW = padding

    N, Cin, S, H, W = x_ncdhw.shape
    Cout, Cin_w, KS, KH, KW = weight_oidhw.shape
    assert Cin == Cin_w

    # TODO(synk): stride != (1,1,1) (and dilation/groups kwargs) are not
    # lowered to this Pallas path; BasicConv3d's default config is stride 1.
    if (SS, SH, SW) != (1, 1, 1):
        raise NotImplementedError(
            "Pallas BasicConv3d path supports stride=(1,1,1) only")

    Sp, Hp, Wp = S + 2 * PS, H + 2 * PH, W + 2 * PW
    OS, OH, OW = Sp - KS + 1, Hp - KH + 1, Wp - KW + 1
    KT = KS * KH * KW

    # ---- layout prep (each written to HBM once, input-sized) ----
    # NCDHW -> padded channels-last, with (W, Cin) fused into the lane axis so
    # every kw tap window is a contiguous lane slice inside the kernel.
    x_cl = jnp.transpose(x_ncdhw, (0, 2, 3, 4, 1))
    x_pad = jnp.pad(x_cl, ((0, 0), (PS, PS), (PH, PH), (PW, PW), (0, 0)))
    x_f = x_pad.reshape(N, Sp, Hp, Wp * Cin)

    # Per-tap block-diagonal weights:
    #   b[t, ow*Cin + ci, ow*Cout + co] = weight[co, ci, ks, kh, kw]
    # so each tap is one dense (OH, OW*Cin) x (OW*Cin, OW*Cout) MXU matmul.
    w_t = jnp.transpose(weight_oidhw, (2, 3, 4, 1, 0)).reshape(KT, Cin, Cout)
    eye = jnp.eye(OW, dtype=w_t.dtype)
    b_mat = jnp.einsum("uv,tio->tuivo", eye, w_t).reshape(
        KT, OW * Cin, OW * Cout)

    kernel = functools.partial(
        _conv3d_tap_kernel, KS=KS, KH=KH, KW=KW, OS=OS, OH=OH, OW=OW,
        Cin=Cin, Cout=Cout, Sp=Sp)

    flops = 2 * N * KT * OS * OH * (OW * Cin) * (OW * Cout)
    bytes_accessed = (x_f.size * x_f.dtype.itemsize
                      + b_mat.size * b_mat.dtype.itemsize
                      + N * OS * OH * OW * Cout
                      * jnp.dtype(x_ncdhw.dtype).itemsize)

    y = pl.pallas_call(
        kernel,
        out_shape=jax.ShapeDtypeStruct((N, OS, OH, OW * Cout), x_ncdhw.dtype),
        grid_spec=pltpu.PrefetchScalarGridSpec(
            num_scalar_prefetch=0,
            grid=(N,),
            in_specs=[
                pl.BlockSpec((1, Sp, Hp, Wp * Cin), lambda n: (n, 0, 0, 0)),
                pl.BlockSpec((KT, OW * Cin, OW * Cout), lambda n: (0, 0, 0)),
            ],
            out_specs=pl.BlockSpec((1, OS, OH, OW * Cout),
                                   lambda n: (n, 0, 0, 0)),
        ),
        compiler_params=pltpu.CompilerParams(
            dimension_semantics=("parallel",)),
        cost_estimate=pl.CostEstimate(
            flops=flops, transcendentals=0, bytes_accessed=bytes_accessed),
    )(x_f, b_mat)

    # (N, OS, OH, OW*Cout) -> (N, OS, OH, OW, Cout) is free; one small
    # output-sized transpose back to PyTorch NCDHW.
    y = y.reshape(N, OS, OH, OW, Cout)
    return jnp.transpose(y, (0, 4, 1, 2, 3))


if __name__ == "__main__":
    # Module config: BasicConv3d(in_channels=4, out_channels=8,
    #                            kernel_size=(3,3,3), stride=(1,1,1),
    #                            padding=(1,1,1), bias=False)
    N, Cin, S, H, W = 2, 4, 8, 16, 16
    Cout, Kk = 8, 3
    stride, padding = (1, 1, 1), (1, 1, 1)

    key = jax.random.PRNGKey(0)
    kx, kw_key = jax.random.split(key)
    x = jax.random.normal(kx, (N, Cin, S, H, W), dtype=jnp.float32)
    # Deterministic kaiming-uniform-ish init (bias=False).
    fan_in = Cin * Kk * Kk * Kk
    bound = (1.0 / fan_in) ** 0.5
    weight = jax.random.uniform(
        kw_key, (Cout, Cin, Kk, Kk, Kk), dtype=jnp.float32,
        minval=-bound, maxval=bound)

    y = basic_conv3d(x, weight, stride, padding)
    y = jax.block_until_ready(y)

    # Reference: XLA 3-D conv with the same semantics as nn.Conv3d (bias=False).
    y_ref = jax.lax.conv_general_dilated(
        x, weight,
        window_strides=stride,
        padding=tuple((p, p) for p in padding),
        dimension_numbers=("NCDHW", "OIDHW", "NCDHW"))

    assert y.shape == (N, Cout, S, H, W), y.shape
    assert jnp.allclose(y, y_ref, atol=1e-4, rtol=1e-4), \
        float(jnp.max(jnp.abs(y - y_ref)))

    print("KERNEL_OK")
</pallas_src>

<mosaic_0001>
module attributes {stable_mosaic.version = 11 : i64} {
  func.func @_conv3d_tap_kernel(%arg0: i32, %arg1: memref<1x10x18x72xf32, #tpu.memory_space<vmem>>, %arg2: memref<27x64x128xf32, #tpu.memory_space<vmem>>, %arg3: memref<1x8x16x128xf32, #tpu.memory_space<vmem>>) attributes {dimension_semantics = [#tpu.dimension_semantics<parallel>], iteration_bounds = array<i64: 2>, scalar_prefetch = 0 : i64, scratch_operands = 0 : i64, tpu.core_type = #tpu.core_type<tc>, window_params = [{transform_indices = @transform_0, window_bounds = array<i64: 1, 10, 18, 72>}, {pipeline_mode = #tpu.pipeline_mode<synchronous>, transform_indices = @transform_1, window_bounds = array<i64: 27, 64, 128>}, {transform_indices = @transform_2, window_bounds = array<i64: 1, 8, 16, 128>}]} {
    %cst = arith.constant 0.000000e+00 : f32
    %0 = vector.broadcast %cst : f32 to vector<16x128xf32>
    %cst_0 = arith.constant 0.000000e+00 : f32
    %1 = vector.broadcast %cst_0 : f32 to vector<16x128xf32>
    %cst_1 = arith.constant 0.000000e+00 : f32
    %2 = vector.broadcast %cst_1 : f32 to vector<16x128xf32>
    %cst_2 = arith.constant 0.000000e+00 : f32
    %3 = vector.broadcast %cst_2 : f32 to vector<16x128xf32>
    %cst_3 = arith.constant 0.000000e+00 : f32
    %4 = vector.broadcast %cst_3 : f32 to vector<16x128xf32>
    %cst_4 = arith.constant 0.000000e+00 : f32
    %5 = vector.broadcast %cst_4 : f32 to vector<16x128xf32>
    %cst_5 = arith.constant 0.000000e+00 : f32
    %6 = vector.broadcast %cst_5 : f32 to vector<16x128xf32>
    %cst_6 = arith.constant 0.000000e+00 : f32
    %7 = vector.broadcast %cst_6 : f32 to vector<16x128xf32>
    %c0 = arith.constant 0 : index
    %c0_7 = arith.constant 0 : index
    %c0_8 = arith.constant 0 : index
    %c0_9 = arith.constant 0 : index
    %8 = vector.load %arg1[%c0, %c0_7, %c0_8, %c0_9] : memref<1x10x18x72xf32, #tpu.memory_space<vmem>>, vector<1x1x16x72xf32>
    %9 = vector.shape_cast %8 : vector<1x1x16x72xf32> to vector<16x72xf32>
    %10 = vector.extract_strided_slice %9 {offsets = [0, 0], sizes = [16, 64], strides = [1, 1]} : vector<16x72xf32> to vector<16x64xf32>
    %c0_10 = arith.constant 0 : index
    %c0_11 = arith.constant 0 : index
    %c0_12 = arith.constant 0 : index
    %11 = vector.load %arg2[%c0_10, %c0_11, %c0_12] : memref<27x64x128xf32, #tpu.memory_space<vmem>>, vector<1x64x128xf32>
    %12 = vector.shape_cast %11 : vector<1x64x128xf32> to vector<64x128xf32>
    %cst_13 = arith.constant dense<0.000000e+00> : vector<16x128xf32>
    %13 = tpu.matmul %10, %12, %cst_13 {dimension_numbers = #tpu.dot_dimension_numbers<[1], [0], [0], [1], [0, 0, 1, 1], [], []>} : vector<16x64xf32>, vector<64x128xf32>, vector<16x128xf32> -> vector<16x128xf32>
    %14 = arith.addf %0, %13 : vector<16x128xf32>
    %15 = vector.extract_strided_slice %9 {offsets = [0, 4], sizes = [16, 64], strides = [1, 1]} : vector<16x72xf32> to vector<16x64xf32>
    %c1 = arith.constant 1 : index
    %c0_14 = arith.constant 0 : index
    %c0_15 = arith.constant 0 : index
    %16 = vector.load %arg2[%c1, %c0_14, %c0_15] : memref<27x64x128xf32, #tpu.memory_space<vmem>>, vector<1x64x128xf32>
    %17 = vector.shape_cast %16 : vector<1x64x128xf32> to vector<64x128xf32>
    %cst_16 = arith.constant dense<0.000000e+00> : vector<16x128xf32>
    %18 = tpu.matmul %15, %17, %cst_16 {dimension_numbers = #tpu.dot_dimension_numbers<[1], [0], [0], [1], [0, 0, 1, 1], [], []>} : vector<16x64xf32>, vector<64x128xf32>, vector<16x128xf32> -> vector<16x128xf32>
    %19 = arith.addf %14, %18 : vector<16x128xf32>
    %20 = vector.extract_strided_slice %9 {offsets = [0, 8], sizes = [16, 64], strides = [1, 1]} : vector<16x72xf32> to vector<16x64xf32>
    %c2 = arith.constant 2 : index
    %c0_17 = arith.constant 0 : index
    %c0_18 = arith.constant 0 : index
    %21 = vector.load %arg2[%c2, %c0_17, %c0_18] : memref<27x64x128xf32, #tpu.memory_space<vmem>>, vector<1x64x128xf32>
    %22 = vector.shape_cast %21 : vector<1x64x128xf32> to vector<64x128xf32>
    %cst_19 = arith.constant dense<0.000000e+00> : vector<16x128xf32>
    %23 = tpu.matmul %20, %22, %cst_19 {dimension_numbers = #tpu.dot_dimension_numbers<[1], [0], [0], [1], [0, 0, 1, 1], [], []>} : vector<16x64xf32>, vector<64x128xf32>, vector<16x128xf32> -> vector<16x128xf32>
    %24 = arith.addf %19, %23 : vector<16x128xf32>
    %c0_20 = arith.constant 0 : index
    %c0_21 = arith.constant 0 : index
    %c1_22 = arith.constant 1 : index
    %c0_23 = arith.constant 0 : index
    %25 = vector.load %arg1[%c0_20, %c0_21, %c1_22, %c0_23] : memref<1x10x18x72xf32, #tpu.memory_space<vmem>>, vector<1x1x16x72xf32>
    %26 = vector.shape_cast %25 : vector<1x1x16x72xf32> to vector<16x72xf32>
    %27 = vector.extract_strided_slice %26 {offsets = [0, 0], sizes = [16, 64], strides = [1, 1]} : vector<16x72xf32> to vector<16x64xf32>
    %c3 = arith.constant 3 : index
    %c0_24 = arith.constant 0 : index
    %c0_25 = arith.constant 0 : index
    %28 = vector.load %arg2[%c3, %c0_24, %c0_25] : memref<27x64x128xf32, #tpu.memory_space<vmem>>, vector<1x64x128xf32>
    %29 = vector.shape_cast %28 : vector<1x64x128xf32> to vector<64x128xf32>
    %cst_26 = arith.constant dense<0.000000e+00> : vector<16x128xf32>
    %30 = tpu.matmul %27, %29, %cst_26 {dimension_numbers = #tpu.dot_dimension_numbers<[1], [0], [0], [1], [0, 0, 1, 1], [], []>} : vector<16x64xf32>, vector<64x128xf32>, vector<16x128xf32> -> vector<16x128xf32>
    %31 = arith.addf %24, %30 : vector<16x128xf32>
    %32 = vector.extract_strided_slice %26 {offsets = [0, 4], sizes = [16, 64], strides = [1, 1]} : vector<16x72xf32> to vector<16x64xf32>
    %c4 = arith.constant 4 : index
    %c0_27 = arith.constant 0 : index
    %c0_28 = arith.constant 0 : index
    %33 = vector.load %arg2[%c4, %c0_27, %c0_28] : memref<27x64x128xf32, #tpu.memory_space<vmem>>, vector<1x64x128xf32>
    %34 = vector.shape_cast %33 : vector<1x64x128xf32> to vector<64x128xf32>
    %cst_29 = arith.constant dense<0.000000e+00> : vector<16x128xf32>
    %35 = tpu.matmul %32, %34, %cst_29 {dimension_numbers = #tpu.dot_dimension_numbers<[1], [0], [0], [1], [0, 0, 1, 1], [], []>} : vector<16x64xf32>, vector<64x128xf32>, vector<16x128xf32> -> vector<16x128xf32>
    %36 = arith.addf %31, %35 : vector<16x128xf32>
    %37 = vector.extract_strided_slice %26 {offsets = [0, 8], sizes = [16, 64], strides = [1, 1]} : vector<16x72xf32> to vector<16x64xf32>
    %c5 = arith.constant 5 : index
    %c0_30 = arith.constant 0 : index
    %c0_31 = arith.constant 0 : index
    %38 = vector.load %arg2[%c5, %c0_30, %c0_31] : memref<27x64x128xf32, #tpu.memory_space<vmem>>, vector<1x64x128xf32>
    %39 = vector.shape_cast %38 : vector<1x64x128xf32> to vector<64x128xf32>
    %cst_32 = arith.constant dense<0.000000e+00> : vector<16x128xf32>
    %40 = tpu.matmul %37, %39, %cst_32 {dimension_numbers = #tpu.dot_dimension_numbers<[1], [0], [0], [1], [0, 0, 1, 1], [], []>} : vector<16x64xf32>, vector<64x128xf32>, vector<16x128xf32> -> vector<16x128xf32>
    %41 = arith.addf %36, %40 : vector<16x128xf32>
    %c0_33 = arith.constant 0 : index
    %c0_34 = arith.constant 0 : index
    %c2_35 = arith.constant 2 : index
    %c0_36 = arith.constant 0 : index
    %42 = vector.load %arg1[%c0_33, %c0_34, %c2_35, %c0_36] : memref<1x10x18x72xf32, #tpu.memory_space<vmem>>, vector<1x1x16x72xf32>
    %43 = vector.shape_cast %42 : vector<1x1x16x72xf32> to vector<16x72xf32>
    %44 = vector.extract_strided_slice %43 {offsets = [0, 0], sizes = [16, 64], strides = [1, 1]} : vector<16x72xf32> to vector<16x64xf32>
    %c6 = arith.constant 6 : index
    %c0_37 = arith.constant 0 : index
    %c0_38 = arith.constant 0 : index
    %45 = vector.load %arg2[%c6, %c0_37, %c0_38] : memref<27x64x128xf32, #tpu.memory_space<vmem>>, vector<1x64x128xf32>
    %46 = vector.shape_cast %45 : vector<1x64x128xf32> to vector<64x128xf32>
    %cst_39 = arith.constant dense<0.000000e+00> : vector<16x128xf32>
    %47 = tpu.matmul %44, %46, %cst_39 {dimension_numbers = #tpu.dot_dimension_numbers<[1], [0], [0], [1], [0, 0, 1, 1], [], []>} : vector<16x64xf32>, vector<64x128xf32>, vector<16x128xf32> -> vector<16x128xf32>
    %48 = arith.addf %41, %47 : vector<16x128xf32>
    %49 = vector.extract_strided_slice %43 {offsets = [0, 4], sizes = [16, 64], strides = [1, 1]} : vector<16x72xf32> to vector<16x64xf32>
    %c7 = arith.constant 7 : index
    %c0_40 = arith.constant 0 : index
    %c0_41 = arith.constant 0 : index
    %50 = vector.load %arg2[%c7, %c0_40, %c0_41] : memref<27x64x128xf32, #tpu.memory_space<vmem>>, vector<1x64x128xf32>
    %51 = vector.shape_cast %50 : vector<1x64x128xf32> to vector<64x128xf32>
    %cst_42 = arith.constant dense<0.000000e+00> : vector<16x128xf32>
    %52 = tpu.matmul %49, %51, %cst_42 {dimension_numbers = #tpu.dot_dimension_numbers<[1], [0], [0], [1], [0, 0, 1, 1], [], []>} : vector<16x64xf32>, vector<64x128xf32>, vector<16x128xf32> -> vector<16x128xf32>
    %53 = arith.addf %48, %52 : vector<16x128xf32>
    %54 = vector.extract_strided_slice %43 {offsets = [0, 8], sizes = [16, 64], strides = [1, 1]} : vector<16x72xf32> to vector<16x64xf32>
    %c8 = arith.constant 8 : index
    %c0_43 = arith.constant 0 : index
    %c0_44 = arith.constant 0 : index
    %55 = vector.load %arg2[%c8, %c0_43, %c0_44] : memref<27x64x128xf32, #tpu.memory_space<vmem>>, vector<1x64x128xf32>
    %56 = vector.shape_cast %55 : vector<1x64x128xf32> to vector<64x128xf32>
    %cst_45 = arith.constant dense<0.000000e+00> : vector<16x128xf32>
    %57 = tpu.matmul %54, %56, %cst_45 {dimension_numbers = #tpu.dot_dimension_numbers<[1], [0], [0], [1], [0, 0, 1, 1], [], []>} : vector<16x64xf32>, vector<64x128xf32>, vector<16x128xf32> -> vector<16x128xf32>
    %58 = arith.addf %53, %57 : vector<16x128xf32>
    %c0_46 = arith.constant 0 : index
    %c1_47 = arith.constant 1 : index
    %c0_48 = arith.constant 0 : index
    %c0_49 = arith.constant 0 : index
    %59 = vector.load %arg1[%c0_46, %c1_47, %c0_48, %c0_49] : memref<1x10x18x72xf32, #tpu.memory_space<vmem>>, vector<1x1x16x72xf32>
    %60 = vector.shape_cast %59 : vector<1x1x16x72xf32> to vector<16x72xf32>
    %61 = vector.extract_strided_slice %60 {offsets = [0, 0], sizes = [16, 64], strides = [1, 1]} : vector<16x72xf32> to vector<16x64xf32>
    %c0_50 = arith.constant 0 : index
    %c0_51 = arith.constant 0 : index
    %c0_52 = arith.constant 0 : index
    %62 = vector.load %arg2[%c0_50, %c0_51, %c0_52] : memref<27x64x128xf32, #tpu.memory_space<vmem>>, vector<1x64x128xf32>
    %63 = vector.shape_cast %62 : vector<1x64x128xf32> to vector<64x128xf32>
    %cst_53 = arith.constant dense<0.000000e+00> : vector<16x128xf32>
    %64 = tpu.matmul %61, %63, %cst_53 {dimension_numbers = #tpu.dot_dimension_numbers<[1], [0], [0], [1], [0, 0, 1, 1], [], []>} : vector<16x64xf32>, vector<64x128xf32>, vector<16x128xf32> -> vector<16x128xf32>
    %65 = arith.addf %1, %64 : vector<16x128xf32>
    %66 = vector.extract_strided_slice %60 {offsets = [0, 4], sizes = [16, 64], strides = [1, 1]} : vector<16x72xf32> to vector<16x64xf32>
    %c1_54 = arith.constant 1 : index
    %c0_55 = arith.constant 0 : index
    %c0_56 = arith.constant 0 : index
    %67 = vector.load %arg2[%c1_54, %c0_55, %c0_56] : memref<27x64x128xf32, #tpu.memory_space<vmem>>, vector<1x64x128xf32>
    %68 = vector.shape_cast %67 : vector<1x64x128xf32> to vector<64x128xf32>
    %cst_57 = arith.constant dense<0.000000e+00> : vector<16x128xf32>
    %69 = tpu.matmul %66, %68, %cst_57 {dimension_numbers = #tpu.dot_dimension_numbers<[1], [0], [0], [1], [0, 0, 1, 1], [], []>} : vector<16x64xf32>, vector<64x128xf32>, vector<16x128xf32> -> vector<16x128xf32>
    %70 = arith.addf %65, %69 : vector<16x128xf32>
    %71 = vector.extract_strided_slice %60 {offsets = [0, 8], sizes = [16, 64], strides = [1, 1]} : vector<16x72xf32> to vector<16x64xf32>
    %c2_58 = arith.constant 2 : index
    %c0_59 = arith.constant 0 : index
    %c0_60 = arith.constant 0 : index
    %72 = vector.load %arg2[%c2_58, %c0_59, %c0_60] : memref<27x64x128xf32, #tpu.memory_space<vmem>>, vector<1x64x128xf32>
    %73 = vector.shape_cast %72 : vector<1x64x128xf32> to vector<64x128xf32>
    %cst_61 = arith.constant dense<0.000000e+00> : vector<16x128xf32>
    %74 = tpu.matmul %71, %73, %cst_61 {dimension_numbers = #tpu.dot_dimension_numbers<[1], [0], [0], [1], [0, 0, 1, 1], [], []>} : vector<16x64xf32>, vector<64x128xf32>, vector<16x128xf32> -> vector<16x128xf32>
    %75 = arith.addf %70, %74 : vector<16x128xf32>
    %76 = vector.extract_strided_slice %60 {offsets = [0, 0], sizes = [16, 64], strides = [1, 1]} : vector<16x72xf32> to vector<16x64xf32>
    %c9 = arith.constant 9 : index
    %c0_62 = arith.constant 0 : index
    %c0_63 = arith.constant 0 : index
    %77 = vector.load %arg2[%c9, %c0_62, %c0_63] : memref<27x64x128xf32, #tpu.memory_space<vmem>>, vector<1x64x128xf32>
    %78 = vector.shape_cast %77 : vector<1x64x128xf32> to vector<64x128xf32>
    %cst_64 = arith.constant dense<0.000000e+00> : vector<16x128xf32>
    %79 = tpu.matmul %76, %78, %cst_64 {dimension_numbers = #tpu.dot_dimension_numbers<[1], [0], [0], [1], [0, 0, 1, 1], [], []>} : vector<16x64xf32>, vector<64x128xf32>, vector<16x128xf32> -> vector<16x128xf32>
    %80 = arith.addf %58, %79 : vector<16x128xf32>
    %81 = vector.extract_strided_slice %60 {offsets = [0, 4], sizes = [16, 64], strides = [1, 1]} : vector<16x72xf32> to vector<16x64xf32>
    %c10 = arith.constant 10 : index
    %c0_65 = arith.constant 0 : index
    %c0_66 = arith.constant 0 : index
    %82 = vector.load %arg2[%c10, %c0_65, %c0_66] : memref<27x64x128xf32, #tpu.memory_space<vmem>>, vector<1x64x128xf32>
    %83 = vector.shape_cast %82 : vector<1x64x128xf32> to vector<64x128xf32>
    %cst_67 = arith.constant dense<0.000000e+00> : vector<16x128xf32>
    %84 = tpu.matmul %81, %83, %cst_67 {dimension_numbers = #tpu.dot_dimension_numbers<[1], [0], [0], [1], [0, 0, 1, 1], [], []>} : vector<16x64xf32>, vector<64x128xf32>, vector<16x128xf32> -> vector<16x128xf32>
    %85 = arith.addf %80, %84 : vector<16x128xf32>
    %86 = vector.extract_strided_slice %60 {offsets = [0, 8], sizes = [16, 64], strides = [1, 1]} : vector<16x72xf32> to vector<16x64xf32>
    %c11 = arith.constant 11 : index
    %c0_68 = arith.constant 0 : index
    %c0_69 = arith.constant 0 : index
    %87 = vector.load %arg2[%c11, %c0_68, %c0_69] : memref<27x64x128xf32, #tpu.memory_space<vmem>>, vector<1x64x128xf32>
    %88 = vector.shape_cast %87 : vector<1x64x128xf32> to vector<64x128xf32>
    %cst_70 = arith.constant dense<0.000000e+00> : vector<16x128xf32>
    %89 = tpu.matmul %86, %88, %cst_70 {dimension_numbers = #tpu.dot_dimension_numbers<[1], [0], [0], [1], [0, 0, 1, 1], [], []>} : vector<16x64xf32>, vector<64x128xf32>, vector<16x128xf32> -> vector<16x128xf32>
    %90 = arith.addf %85, %89 : vector<16x128xf32>
    %c0_71 = arith.constant 0 : index
    %c1_72 = arith.constant 1 : index
    %c1_73 = arith.constant 1 : index
    %c0_74 = arith.constant 0 : index
    %91 = vector.load %arg1[%c0_71, %c1_72, %c1_73, %c0_74] : memref<1x10x18x72xf32, #tpu.memory_space<vmem>>, vector<1x1x16x72xf32>
    %92 = vector.shape_cast %91 : vector<1x1x16x72xf32> to vector<16x72xf32>
    %93 = vector.extract_strided_slice %92 {offsets = [0, 0], sizes = [16, 64], strides = [1, 1]} : vector<16x72xf32> to vector<16x64xf32>
    %c3_75 = arith.constant 3 : index
    %c0_76 = arith.constant 0 : index
    %c0_77 = arith.constant 0 : index
    %94 = vector.load %arg2[%c3_75, %c0_76, %c0_77] : memref<27x64x128xf32, #tpu.memory_space<vmem>>, vector<1x64x128xf32>
    %95 = vector.shape_cast %94 : vector<1x64x128xf32> to vector<64x128xf32>
    %cst_78 = arith.constant dense<0.000000e+00> : vector<16x128xf32>
    %96 = tpu.matmul %93, %95, %cst_78 {dimension_numbers = #tpu.dot_dimension_numbers<[1], [0], [0], [1], [0, 0, 1, 1], [], []>} : vector<16x64xf32>, vector<64x128xf32>, vector<16x128xf32> -> vector<16x128xf32>
    %97 = arith.addf %75, %96 : vector<16x128xf32>
    %98 = vector.extract_strided_slice %92 {offsets = [0, 4], sizes = [16, 64], strides = [1, 1]} : vector<16x72xf32> to vector<16x64xf32>
    %c4_79 = arith.constant 4 : index
    %c0_80 = arith.constant 0 : index
    %c0_81 = arith.constant 0 : index
    %99 = vector.load %arg2[%c4_79, %c0_80, %c0_81] : memref<27x64x128xf32, #tpu.memory_space<vmem>>, vector<1x64x128xf32>
    %100 = vector.shape_cast %99 : vector<1x64x128xf32> to vector<64x128xf32>
    %cst_82 = arith.constant dense<0.000000e+00> : vector<16x128xf32>
    %101 = tpu.matmul %98, %100, %cst_82 {dimension_numbers = #tpu.dot_dimension_numbers<[1], [0], [0], [1], [0, 0, 1, 1], [], []>} : vector<16x64xf32>, vector<64x128xf32>, vector<16x128xf32> -> vector<16x128xf32>
    %102 = arith.addf %97, %101 : vector<16x128xf32>
    %103 = vector.extract_strided_slice %92 {offsets = [0, 8], sizes = [16, 64], strides = [1, 1]} : vector<16x72xf32> to vector<16x64xf32>
    %c5_83 = arith.constant 5 : index
    %c0_84 = arith.constant 0 : index
    %c0_85 = arith.constant 0 : index
    %104 = vector.load %arg2[%c5_83, %c0_84, %c0_85] : memref<27x64x128xf32, #tpu.memory_space<vmem>>, vector<1x64x128xf32>
    %105 = vector.shape_cast %104 : vector<1x64x128xf32> to vector<64x128xf32>
    %cst_86 = arith.constant dense<0.000000e+00> : vector<16x128xf32>
    %106 = tpu.matmul %103, %105, %cst_86 {dimension_numbers = #tpu.dot_dimension_numbers<[1], [0], [0], [1], [0, 0, 1, 1], [], []>} : vector<16x64xf32>, vector<64x128xf32>, vector<16x128xf32> -> vector<16x128xf32>
    %107 = arith.addf %102, %106 : vector<16x128xf32>
    %108 = vector.extract_strided_slice %92 {offsets = [0, 0], sizes = [16, 64], strides = [1, 1]} : vector<16x72xf32> to vector<16x64xf32>
    %c12 = arith.constant 12 : index
    %c0_87 = arith.constant 0 : index
    %c0_88 = arith.constant 0 : index
    %109 = vector.load %arg2[%c12, %c0_87, %c0_88] : memref<27x64x128xf32, #tpu.memory_space<vmem>>, vector<1x64x128xf32>
    %110 = vector.shape_cast %109 : vector<1x64x128xf32> to vector<64x128xf32>
    %cst_89 = arith.constant dense<0.000000e+00> : vector<16x128xf32>
    %111 = tpu.matmul %108, %110, %cst_89 {dimension_numbers = #tpu.dot_dimension_numbers<[1], [0], [0], [1], [0, 0, 1, 1], [], []>} : vector<16x64xf32>, vector<64x128xf32>, vector<16x128xf32> -> vector<16x128xf32>
    %112 = arith.addf %90, %111 : vector<16x128xf32>
    %113 = vector.extract_strided_slice %92 {offsets = [0, 4], sizes = [16, 64], strides = [1, 1]} : vector<16x72xf32> to vector<16x64xf32>
    %c13 = arith.constant 13 : index
    %c0_90 = arith.constant 0 : index
    %c0_91 = arith.constant 0 : index
    %114 = vector.load %arg2[%c13, %c0_90, %c0_91] : memref<27x64x128xf32, #tpu.memory_space<vmem>>, vector<1x64x128xf32>
    %115 = vector.shape_cast %114 : vector<1x64x128xf32> to vector<64x128xf32>
    %cst_92 = arith.constant dense<0.000000e+00> : vector<16x128xf32>
    %116 = tpu.matmul %113, %115, %cst_92 {dimension_numbers = #tpu.dot_dimension_numbers<[1], [0], [0], [1], [0, 0, 1, 1], [], []>} : vector<16x64xf32>, vector<64x128xf32>, vector<16x128xf32> -> vector<16x128xf32>
    %117 = arith.addf %112, %116 : vector<16x128xf32>
    %118 = vector.extract_strided_slice %92 {offsets = [0, 8], sizes = [16, 64], strides = [1, 1]} : vector<16x72xf32> to vector<16x64xf32>
    %c14 = arith.constant 14 : index
    %c0_93 = arith.constant 0 : index
    %c0_94 = arith.constant 0 : index
    %119 = vector.load %arg2[%c14, %c0_93, %c0_94] : memref<27x64x128xf32, #tpu.memory_space<vmem>>, vector<1x64x128xf32>
    %120 = vector.shape_cast %119 : vector<1x64x128xf32> to vector<64x128xf32>
    %cst_95 = arith.constant dense<0.000000e+00> : vector<16x128xf32>
    %121 = tpu.matmul %118, %120, %cst_95 {dimension_numbers = #tpu.dot_dimension_numbers<[1], [0], [0], [1], [0, 0, 1, 1], [], []>} : vector<16x64xf32>, vector<64x128xf32>, vector<16x128xf32> -> vector<16x128xf32>
    %122 = arith.addf %117, %121 : vector<16x128xf32>
    %c0_96 = arith.constant 0 : index
    %c1_97 = arith.constant 1 : index
    %c2_98 = arith.constant 2 : index
    %c0_99 = arith.constant 0 : index
    %123 = vector.load %arg1[%c0_96, %c1_97, %c2_98, %c0_99] : memref<1x10x18x72xf32, #tpu.memory_space<vmem>>, vector<1x1x16x72xf32>
    %124 = vector.shape_cast %123 : vector<1x1x16x72xf32> to vector<16x72xf32>
    %125 = vector.extract_strided_slice %124 {offsets = [0, 0], sizes = [16, 64], strides = [1, 1]} : vector<16x72xf32> to vector<16x64xf32>
    %c6_100 = arith.constant 6 : index
    %c0_101 = arith.constant 0 : index
    %c0_102 = arith.constant 0 : index
    %126 = vector.load %arg2[%c6_100, %c0_101, %c0_102] : memref<27x64x128xf32, #tpu.memory_space<vmem>>, vector<1x64x128xf32>
    %127 = vector.shape_cast %126 : vector<1x64x128xf32> to vector<64x128xf32>
    %cst_103 = arith.constant dense<0.000000e+00> : vector<16x128xf32>
    %128 = tpu.matmul %125, %127, %cst_103 {dimension_numbers = #tpu.dot_dimension_numbers<[1], [0], [0], [1], [0, 0, 1, 1], [], []>} : vector<16x64xf32>, vector<64x128xf32>, vector<16x128xf32> -> vector<16x128xf32>
    %129 = arith.addf %107, %128 : vector<16x128xf32>
    %130 = vector.extract_strided_slice %124 {offsets = [0, 4], sizes = [16, 64], strides = [1, 1]} : vector<16x72xf32> to vector<16x64xf32>
    %c7_104 = arith.constant 7 : index
    %c0_105 = arith.constant 0 : index
    %c0_106 = arith.constant 0 : index
    %131 = vector.load %arg2[%c7_104, %c0_105, %c0_106] : memref<27x64x128xf32, #tpu.memory_space<vmem>>, vector<1x64x128xf32>
    %132 = vector.shape_cast %131 : vector<1x64x128xf32> to vector<64x128xf32>
    %cst_107 = arith.constant dense<0.000000e+00> : vector<16x128xf32>
    %133 = tpu.matmul %130, %132, %cst_107 {dimension_numbers = #tpu.dot_dimension_numbers<[1], [0], [0], [1], [0, 0, 1, 1], [], []>} : vector<16x64xf32>, vector<64x128xf32>, vector<16x128xf32> -> vector<16x128xf32>
    %134 = arith.addf %129, %133 : vector<16x128xf32>
    %135 = vector.extract_strided_slice %124 {offsets = [0, 8], sizes = [16, 64], strides = [1, 1]} : vector<16x72xf32> to vector<16x64xf32>
    %c8_108 = arith.constant 8 : index
    %c0_109 = arith.constant 0 : index
    %c0_110 = arith.constant 0 : index
    %136 = vector.load %arg2[%c8_108, %c0_109, %c0_110] : memref<27x64x128xf32, #tpu.memory_space<vmem>>, vector<1x64x128xf32>
    %137 = vector.shape_cast %136 : vector<1x64x128xf32> to vector<64x128xf32>
    %cst_111 = arith.constant dense<0.000000e+00> : vector<16x128xf32>
    %138 = tpu.matmul %135, %137, %cst_111 {dimension_numbers = #tpu.dot_dimension_numbers<[1], [0], [0], [1], [0, 0, 1, 1], [], []>} : vector<16x64xf32>, vector<64x128xf32>, vector<16x128xf32> -> vector<16x128xf32>
    %139 = arith.addf %134, %138 : vector<16x128xf32>
    %140 = vector.extract_strided_slice %124 {offsets = [0, 0], sizes = [16, 64], strides = [1, 1]} : vector<16x72xf32> to vector<16x64xf32>
    %c15 = arith.constant 15 : index
    %c0_112 = arith.constant 0 : index
    %c0_113 = arith.constant 0 : index
    %141 = vector.load %arg2[%c15, %c0_112, %c0_113] : memref<27x64x128xf32, #tpu.memory_space<vmem>>, vector<1x64x128xf32>
    %142 = vector.shape_cast %141 : vector<1x64x128xf32> to vector<64x128xf32>
    %cst_114 = arith.constant dense<0.000000e+00> : vector<16x128xf32>
    %143 = tpu.matmul %140, %142, %cst_114 {dimension_numbers = #tpu.dot_dimension_numbers<[1], [0], [0], [1], [0, 0, 1, 1], [], []>} : vector<16x64xf32>, vector<64x128xf32>, vector<16x128xf32> -> vector<16x128xf32>
    %144 = arith.addf %122, %143 : vector<16x128xf32>
    %145 = vector.extract_strided_slice %124 {offsets = [0, 4], sizes = [16, 64], strides = [1, 1]} : vector<16x72xf32> to vector<16x64xf32>
    %c16 = arith.constant 16 : index
    %c0_115 = arith.constant 0 : index
    %c0_116 = arith.constant 0 : index
    %146 = vector.load %arg2[%c16, %c0_115, %c0_116] : memref<27x64x128xf32, #tpu.memory_space<vmem>>, vector<1x64x128xf32>
    %147 = vector.shape_cast %146 : vector<1x64x128xf32> to vector<64x128xf32>
    %cst_117 = arith.constant dense<0.000000e+00> : vector<16x128xf32>
    %148 = tpu.matmul %145, %147, %cst_117 {dimension_numbers = #tpu.dot_dimension_numbers<[1], [0], [0], [1], [0, 0, 1, 1], [], []>} : vector<16x64xf32>, vector<64x128xf32>, vector<16x128xf32> -> vector<16x128xf32>
    %149 = arith.addf %144, %148 : vector<16x128xf32>
    %150 = vector.extract_strided_slice %124 {offsets = [0, 8], sizes = [16, 64], strides = [1, 1]} : vector<16x72xf32> to vector<16x64xf32>
    %c17 = arith.constant 17 : index
    %c0_118 = arith.constant 0 : index
    %c0_119 = arith.constant 0 : index
    %151 = vector.load %arg2[%c17, %c0_118, %c0_119] : memref<27x64x128xf32, #tpu.memory_space<vmem>>, vector<1x64x128xf32>
    %152 = vector.shape_cast %151 : vector<1x64x128xf32> to vector<64x128xf32>
    %cst_120 = arith.constant dense<0.000000e+00> : vector<16x128xf32>
    %153 = tpu.matmul %150, %152, %cst_120 {dimension_numbers = #tpu.dot_dimension_numbers<[1], [0], [0], [1], [0, 0, 1, 1], [], []>} : vector<16x64xf32>, vector<64x128xf32>, vector<16x128xf32> -> vector<16x128xf32>
    %154 = arith.addf %149, %153 : vector<16x128xf32>
    %c0_121 = arith.constant 0 : index
    %c2_122 = arith.constant 2 : index
    %c0_123 = arith.constant 0 : index
    %c0_124 = arith.constant 0 : index
    %155 = vector.load %arg1[%c0_121, %c2_122, %c0_123, %c0_124] : memref<1x10x18x72xf32, #tpu.memory_space<vmem>>, vector<1x1x16x72xf32>
    %156 = vector.shape_cast %155 : vector<1x1x16x72xf32> to vector<16x72xf32>
    %157 = vector.extract_strided_slice %156 {offsets = [0, 0], sizes = [16, 64], strides = [1, 1]} : vector<16x72xf32> to vector<16x64xf32>
    %c0_125 = arith.constant 0 : index
    %c0_126 = arith.constant 0 : index
    %c0_127 = arith.constant 0 : index
    %158 = vector.load %arg2[%c0_125, %c0_126, %c0_127] : memref<27x64x128xf32, #tpu.memory_space<vmem>>, vector<1x64x128xf32>
    %159 = vector.shape_cast %158 : vector<1x64x128xf32> to vector<64x128xf32>
    %cst_128 = arith.constant dense<0.000000e+00> : vector<16x128xf32>
    %160 = tpu.matmul %157, %159, %cst_128 {dimension_numbers = #tpu.dot_dimension_numbers<[1], [0], [0], [1], [0, 0, 1, 1], [], []>} : vector<16x64xf32>, vector<64x128xf32>, vector<16x128xf32> -> vector<16x128xf32>
    %161 = arith.addf %2, %160 : vector<16x128xf32>
    %162 = vector.extract_strided_slice %156 {offsets = [0, 4], sizes = [16, 64], strides = [1, 1]} : vector<16x72xf32> to vector<16x64xf32>
    %c1_129 = arith.constant 1 : index
    %c0_130 = arith.constant 0 : index
    %c0_131 = arith.constant 0 : index
    %163 = vector.load %arg2[%c1_129, %c0_130, %c0_131] : memref<27x64x128xf32, #tpu.memory_space<vmem>>, vector<1x64x128xf32>
    %164 = vector.shape_cast %163 : vector<1x64x128xf32> to vector<64x128xf32>
    %cst_132 = arith.constant dense<0.000000e+00> : vector<16x128xf32>
    %165 = tpu.matmul %162, %164, %cst_132 {dimension_numbers = #tpu.dot_dimension_numbers<[1], [0], [0], [1], [0, 0, 1, 1], [], []>} : vector<16x64xf32>, vector<64x128xf32>, vector<16x128xf32> -> vector<16x128xf32>
    %166 = arith.addf %161, %165 : vector<16x128xf32>
    %167 = vector.extract_strided_slice %156 {offsets = [0, 8], sizes = [16, 64], strides = [1, 1]} : vector<16x72xf32> to vector<16x64xf32>
    %c2_133 = arith.constant 2 : index
    %c0_134 = arith.constant 0 : index
    %c0_135 = arith.constant 0 : index
    %168 = vector.load %arg2[%c2_133, %c0_134, %c0_135] : memref<27x64x128xf32, #tpu.memory_space<vmem>>, vector<1x64x128xf32>
    %169 = vector.shape_cast %168 : vector<1x64x128xf32> to vector<64x128xf32>
    %cst_136 = arith.constant dense<0.000000e+00> : vector<16x128xf32>
    %170 = tpu.matmul %167, %169, %cst_136 {dimension_numbers = #tpu.dot_dimension_numbers<[1], [0], [0], [1], [0, 0, 1, 1], [], []>} : vector<16x64xf32>, vector<64x128xf32>, vector<16x128xf32> -> vector<16x128xf32>
    %171 = arith.addf %166, %170 : vector<16x128xf32>
    %172 = vector.extract_strided_slice %156 {offsets = [0, 0], sizes = [16, 64], strides = [1, 1]} : vector<16x72xf32> to vector<16x64xf32>
    %c9_137 = arith.constant 9 : index
    %c0_138 = arith.constant 0 : index
    %c0_139 = arith.constant 0 : index
    %173 = vector.load %arg2[%c9_137, %c0_138, %c0_139] : memref<27x64x128xf32, #tpu.memory_space<vmem>>, vector<1x64x128xf32>
    %174 = vector.shape_cast %173 : vector<1x64x128xf32> to vector<64x128xf32>
    %cst_140 = arith.constant dense<0.000000e+00> : vector<16x128xf32>
    %175 = tpu.matmul %172, %174, %cst_140 {dimension_numbers = #tpu.dot_dimension_numbers<[1], [0], [0], [1], [0, 0, 1, 1], [], []>} : vector<16x64xf32>, vector<64x128xf32>, vector<16x128xf32> -> vector<16x128xf32>
    %176 = arith.addf %139, %175 : vector<16x128xf32>
    %177 = vector.extract_strided_slice %156 {offsets = [0, 4], sizes = [16, 64], strides = [1, 1]} : vector<16x72xf32> to vector<16x64xf32>
    %c10_141 = arith.constant 10 : index
    %c0_142 = arith.constant 0 : index
    %c0_143 = arith.constant 0 : index
    %178 = vector.load %arg2[%c10_141, %c0_142, %c0_143] : memref<27x64x128xf32, #tpu.memory_space<vmem>>, vector<1x64x128xf32>
    %179 = vector.shape_cast %178 : vector<1x64x128xf32> to vector<64x128xf32>
    %cst_144 = arith.constant dense<0.000000e+00> : vector<16x128xf32>
    %180 = tpu.matmul %177, %179, %cst_144 {dimension_numbers = #tpu.dot_dimension_numbers<[1], [0], [0], [1], [0, 0, 1, 1], [], []>} : vector<16x64xf32>, vector<64x128xf32>, vector<16x128xf32> -> vector<16x128xf32>
    %181 = arith.addf %176, %180 : vector<16x128xf32>
    %182 = vector.extract_strided_slice %156 {offsets = [0, 8], sizes = [16, 64], strides = [1, 1]} : vector<16x72xf32> to vector<16x64xf32>
    %c11_145 = arith.constant 11 : index
    %c0_146 = arith.constant 0 : index
    %c0_147 = arith.constant 0 : index
    %183 = vector.load %arg2[%c11_145, %c0_146, %c0_147] : memref<27x64x128xf32, #tpu.memory_space<vmem>>, vector<1x64x128xf32>
    %184 = vector.shape_cast %183 : vector<1x64x128xf32> to vector<64x128xf32>
    %cst_148 = arith.constant dense<0.000000e+00> : vector<16x128xf32>
    %185 = tpu.matmul %182, %184, %cst_148 {dimension_numbers = #tpu.dot_dimension_numbers<[1], [0], [0], [1], [0, 0, 1, 1], [], []>} : vector<16x64xf32>, vector<64x128xf32>, vector<16x128xf32> -> vector<16x128xf32>
    %186 = arith.addf %181, %185 : vector<16x128xf32>
    %187 = vector.extract_strided_slice %156 {offsets = [0, 0], sizes = [16, 64], strides = [1, 1]} : vector<16x72xf32> to vector<16x64xf32>
    %c18 = arith.constant 18 : index
    %c0_149 = arith.constant 0 : index
    %c0_150 = arith.constant 0 : index
    %188 = vector.load %arg2[%c18, %c0_149, %c0_150] : memref<27x64x128xf32, #tpu.memory_space<vmem>>, vector<1x64x128xf32>
    %189 = vector.shape_cast %188 : vector<1x64x128xf32> to vector<64x128xf32>
    %cst_151 = arith.constant dense<0.000000e+00> : vector<16x128xf32>
    %190 = tpu.matmul %187, %189, %cst_151 {dimension_numbers = #tpu.dot_dimension_numbers<[1], [0], [0], [1], [0, 0, 1, 1], [], []>} : vector<16x64xf32>, vector<64x128xf32>, vector<16x128xf32> -> vector<16x128xf32>
    %191 = arith.addf %154, %190 : vector<16x128xf32>
    %192 = vector.extract_strided_slice %156 {offsets = [0, 4], sizes = [16, 64], strides = [1, 1]} : vector<16x72xf32> to vector<16x64xf32>
    %c19 = arith.constant 19 : index
    %c0_152 = arith.constant 0 : index
    %c0_153 = arith.constant 0 : index
    %193 = vector.load %arg2[%c19, %c0_152, %c0_153] : memref<27x64x128xf32, #tpu.memory_space<vmem>>, vector<1x64x128xf32>
    %194 = vector.shape_cast %193 : vector<1x64x128xf32> to vector<64x128xf32>
    %cst_154 = arith.constant dense<0.000000e+00> : vector<16x128xf32>
    %195 = tpu.matmul %192, %194, %cst_154 {dimension_numbers = #tpu.dot_dimension_numbers<[1], [0], [0], [1], [0, 0, 1, 1], [], []>} : vector<16x64xf32>, vector<64x128xf32>, vector<16x128xf32> -> vector<16x128xf32>
    %196 = arith.addf %191, %195 : vector<16x128xf32>
    %197 = vector.extract_strided_slice %156 {offsets = [0, 8], sizes = [16, 64], strides = [1, 1]} : vector<16x72xf32> to vector<16x64xf32>
    %c20 = arith.constant 20 : index
    %c0_155 = arith.constant 0 : index
    %c0_156 = arith.constant 0 : index
    %198 = vector.load %arg2[%c20, %c0_155, %c0_156] : memref<27x64x128xf32, #tpu.memory_space<vmem>>, vector<1x64x128xf32>
    %199 = vector.shape_cast %198 : vector<1x64x128xf32> to vector<64x128xf32>
    %cst_157 = arith.constant dense<0.000000e+00> : vector<16x128xf32>
    %200 = tpu.matmul %197, %199, %cst_157 {dimension_numbers = #tpu.dot_dimension_numbers<[1], [0], [0], [1], [0, 0, 1, 1], [], []>} : vector<16x64xf32>, vector<64x128xf32>, vector<16x128xf32> -> vector<16x128xf32>
    %201 = arith.addf %196, %200 : vector<16x128xf32>
    %c0_158 = arith.constant 0 : index
    %c2_159 = arith.constant 2 : index
    %c1_160 = arith.constant 1 : index
    %c0_161 = arith.constant 0 : index
    %202 = vector.load %arg1[%c0_158, %c2_159, %c1_160, %c0_161] : memref<1x10x18x72xf32, #tpu.memory_space<vmem>>, vector<1x1x16x72xf32>
    %203 = vector.shape_cast %202 : vector<1x1x16x72xf32> to vector<16x72xf32>
    %204 = vector.extract_strided_slice %203 {offsets = [0, 0], sizes = [16, 64], strides = [1, 1]} : vector<16x72xf32> to vector<16x64xf32>
    %c3_162 = arith.constant 3 : index
    %c0_163 = arith.constant 0 : index
    %c0_164 = arith.constant 0 : index
    %205 = vector.load %arg2[%c3_162, %c0_163, %c0_164] : memref<27x64x128xf32, #tpu.memory_space<vmem>>, vector<1x64x128xf32>
    %206 = vector.shape_cast %205 : vector<1x64x128xf32> to vector<64x128xf32>
    %cst_165 = arith.constant dense<0.000000e+00> : vector<16x128xf32>
    %207 = tpu.matmul %204, %206, %cst_165 {dimension_numbers = #tpu.dot_dimension_numbers<[1], [0], [0], [1], [0, 0, 1, 1], [], []>} : vector<16x64xf32>, vector<64x128xf32>, vector<16x128xf32> -> vector<16x128xf32>
    %208 = arith.addf %171, %207 : vector<16x128xf32>
    %209 = vector.extract_strided_slice %203 {offsets = [0, 4], sizes = [16, 64], strides = [1, 1]} : vector<16x72xf32> to vector<16x64xf32>
    %c4_166 = arith.constant 4 : index
    %c0_167 = arith.constant 0 : index
    %c0_168 = arith.constant 0 : index
    %210 = vector.load %arg2[%c4_166, %c0_167, %c0_168] : memref<27x64x128xf32, #tpu.memory_space<vmem>>, vector<1x64x128xf32>
    %211 = vector.shape_cast %210 : vector<1x64x128xf32> to vector<64x128xf32>
    %cst_169 = arith.constant dense<0.000000e+00> : vector<16x128xf32>
    %212 = tpu.matmul %209, %211, %cst_169 {dimension_numbers = #tpu.dot_dimension_numbers<[1], [0], [0], [1], [0, 0, 1, 1], [], []>} : vector<16x64xf32>, vector<64x128xf32>, vector<16x128xf32> -> vector<16x128xf32>
    %213 = arith.addf %208, %212 : vector<16x128xf32>
    %214 = vector.extract_strided_slice %203 {offsets = [0, 8], sizes = [16, 64], strides = [1, 1]} : vector<16x72xf32> to vector<16x64xf32>
    %c5_170 = arith.constant 5 : index
    %c0_171 = arith.constant 0 : index
    %c0_172 = arith.constant 0 : index
    %215 = vector.load %arg2[%c5_170, %c0_171, %c0_172] : memref<27x64x128xf32, #tpu.memory_space<vmem>>, vector<1x64x128xf32>
    %216 = vector.shape_cast %215 : vector<1x64x128xf32> to vector<64x128xf32>
    %cst_173 = arith.constant dense<0.000000e+00> : vector<16x128xf32>
    %217 = tpu.matmul %214, %216, %cst_173 {dimension_numbers = #tpu.dot_dimension_numbers<[1], [0], [0], [1], [0, 0, 1, 1], [], []>} : vector<16x64xf32>, vector<64x128xf32>, vector<16x128xf32> -> vector<16x128xf32>
    %218 = arith.addf %213, %217 : vector<16x128xf32>
    %219 = vector.extract_strided_slice %203 {offsets = [0, 0], sizes = [16, 64], strides = [1, 1]} : vector<16x72xf32> to vector<16x64xf32>
    %c12_174 = arith.constant 12 : index
    %c0_175 = arith.constant 0 : index
    %c0_176 = arith.constant 0 : index
    %220 = vector.load %arg2[%c12_174, %c0_175, %c0_176] : memref<27x64x128xf32, #tpu.memory_space<vmem>>, vector<1x64x128xf32>
    %221 = vector.shape_cast %220 : vector<1x64x128xf32> to vector<64x128xf32>
    %cst_177 = arith.constant dense<0.000000e+00> : vector<16x128xf32>
    %222 = tpu.matmul %219, %221, %cst_177 {dimension_numbers = #tpu.dot_dimension_numbers<[1], [0], [0], [1], [0, 0, 1, 1], [], []>} : vector<16x64xf32>, vector<64x128xf32>, vector<16x128xf32> -> vector<16x128xf32>
    %223 = arith.addf %186, %222 : vector<16x128xf32>
    %224 = vector.extract_strided_slice %203 {offsets = [0, 4], sizes = [16, 64], strides = [1, 1]} : vector<16x72xf32> to vector<16x64xf32>
    %c13_178 = arith.constant 13 : index
    %c0_179 = arith.constant 0 : index
    %c0_180 = arith.constant 0 : index
    %225 = vector.load %arg2[%c13_178, %c0_179, %c0_180] : memref<27x64x128xf32, #tpu.memory_space<vmem>>, vector<1x64x128xf32>
    %226 = vector.shape_cast %225 : vector<1x64x128xf32> to vector<64x128xf32>
    %cst_181 = arith.constant dense<0.000000e+00> : vector<16x128xf32>
    %227 = tpu.matmul %224, %226, %cst_181 {dimension_numbers = #tpu.dot_dimension_numbers<[1], [0], [0], [1], [0, 0, 1, 1], [], []>} : vector<16x64xf32>, vector<64x128xf32>, vector<16x128xf32> -> vector<16x128xf32>
    %228 = arith.addf %223, %227 : vector<16x128xf32>
    %229 = vector.extract_strided_slice %203 {offsets = [0, 8], sizes = [16, 64], strides = [1, 1]} : vector<16x72xf32> to vector<16x64xf32>
    %c14_182 = arith.constant 14 : index
    %c0_183 = arith.constant 0 : index
    %c0_184 = arith.constant 0 : index
    %230 = vector.load %arg2[%c14_182, %c0_183, %c0_184] : memref<27x64x128xf32, #tpu.memory_space<vmem>>, vector<1x64x128xf32>
    %231 = vector.shape_cast %230 : vector<1x64x128xf32> to vector<64x128xf32>
    %cst_185 = arith.constant dense<0.000000e+00> : vector<16x128xf32>
    %232 = tpu.matmul %229, %231, %cst_185 {dimension_numbers = #tpu.dot_dimension_numbers<[1], [0], [0], [1], [0, 0, 1, 1], [], []>} : vector<16x64xf32>, vector<64x128xf32>, vector<16x128xf32> -> vector<16x128xf32>
    %233 = arith.addf %228, %232 : vector<16x128xf32>
    %234 = vector.extract_strided_slice %203 {offsets = [0, 0], sizes = [16, 64], strides = [1, 1]} : vector<16x72xf32> to vector<16x64xf32>
    %c21 = arith.constant 21 : index
    %c0_186 = arith.constant 0 : index
    %c0_187 = arith.constant 0 : index
    %235 = vector.load %arg2[%c21, %c0_186, %c0_187] : memref<27x64x128xf32, #tpu.memory_space<vmem>>, vector<1x64x128xf32>
    %236 = vector.shape_cast %235 : vector<1x64x128xf32> to vector<64x128xf32>
    %cst_188 = arith.constant dense<0.000000e+00> : vector<16x128xf32>
    %237 = tpu.matmul %234, %236, %cst_188 {dimension_numbers = #tpu.dot_dimension_numbers<[1], [0], [0], [1], [0, 0, 1, 1], [], []>} : vector<16x64xf32>, vector<64x128xf32>, vector<16x128xf32> -> vector<16x128xf32>
    %238 = arith.addf %201, %237 : vector<16x128xf32>
    %239 = vector.extract_strided_slice %203 {offsets = [0, 4], sizes = [16, 64], strides = [1, 1]} : vector<16x72xf32> to vector<16x64xf32>
    %c22 = arith.constant 22 : index
    %c0_189 = arith.constant 0 : index
    %c0_190 = arith.constant 0 : index
    %240 = vector.load %arg2[%c22, %c0_189, %c0_190] : memref<27x64x128xf32, #tpu.memory_space<vmem>>, vector<1x64x128xf32>
    %241 = vector.shape_cast %240 : vector<1x64x128xf32> to vector<64x128xf32>
    %cst_191 = arith.constant dense<0.000000e+00> : vector<16x128xf32>
    %242 = tpu.matmul %239, %241, %cst_191 {dimension_numbers = #tpu.dot_dimension_numbers<[1], [0], [0], [1], [0, 0, 1, 1], [], []>} : vector<16x64xf32>, vector<64x128xf32>, vector<16x128xf32> -> vector<16x128xf32>
    %243 = arith.addf %238, %242 : vector<16x128xf32>
    %244 = vector.extract_strided_slice %203 {offsets = [0, 8], sizes = [16, 64], strides = [1, 1]} : vector<16x72xf32> to vector<16x64xf32>
    %c23 = arith.constant 23 : index
    %c0_192 = arith.constant 0 : index
    %c0_193 = arith.constant 0 : index
    %245 = vector.load %arg2[%c23, %c0_192, %c0_193] : memref<27x64x128xf32, #tpu.memory_space<vmem>>, vector<1x64x128xf32>
    %246 = vector.shape_cast %245 : vector<1x64x128xf32> to vector<64x128xf32>
    %cst_194 = arith.constant dense<0.000000e+00> : vector<16x128xf32>
    %247 = tpu.matmul %244, %246, %cst_194 {dimension_numbers = #tpu.dot_dimension_numbers<[1], [0], [0], [1], [0, 0, 1, 1], [], []>} : vector<16x64xf32>, vector<64x128xf32>, vector<16x128xf32> -> vector<16x128xf32>
    %248 = arith.addf %243, %247 : vector<16x128xf32>
    %c0_195 = arith.constant 0 : index
    %c2_196 = arith.constant 2 : index
    %c2_197 = arith.constant 2 : index
    %c0_198 = arith.constant 0 : index
    %249 = vector.load %arg1[%c0_195, %c2_196, %c2_197, %c0_198] : memref<1x10x18x72xf32, #tpu.memory_space<vmem>>, vector<1x1x16x72xf32>
    %250 = vector.shape_cast %249 : vector<1x1x16x72xf32> to vector<16x72xf32>
    %251 = vector.extract_strided_slice %250 {offsets = [0, 0], sizes = [16, 64], strides = [1, 1]} : vector<16x72xf32> to vector<16x64xf32>
    %c6_199 = arith.constant 6 : index
    %c0_200 = arith.constant 0 : index
    %c0_201 = arith.constant 0 : index
    %252 = vector.load %arg2[%c6_199, %c0_200, %c0_201] : memref<27x64x128xf32, #tpu.memory_space<vmem>>, vector<1x64x128xf32>
    %253 = vector.shape_cast %252 : vector<1x64x128xf32> to vector<64x128xf32>
    %cst_202 = arith.constant dense<0.000000e+00> : vector<16x128xf32>
    %254 = tpu.matmul %251, %253, %cst_202 {dimension_numbers = #tpu.dot_dimension_numbers<[1], [0], [0], [1], [0, 0, 1, 1], [], []>} : vector<16x64xf32>, vector<64x128xf32>, vector<16x128xf32> -> vector<16x128xf32>
    %255 = arith.addf %218, %254 : vector<16x128xf32>
    %256 = vector.extract_strided_slice %250 {offsets = [0, 4], sizes = [16, 64], strides = [1, 1]} : vector<16x72xf32> to vector<16x64xf32>
    %c7_203 = arith.constant 7 : index
    %c0_204 = arith.constant 0 : index
    %c0_205 = arith.constant 0 : index
    %257 = vector.load %arg2[%c7_203, %c0_204, %c0_205] : memref<27x64x128xf32, #tpu.memory_space<vmem>>, vector<1x64x128xf32>
    %258 = vector.shape_cast %257 : vector<1x64x128xf32> to vector<64x128xf32>
    %cst_206 = arith.constant dense<0.000000e+00> : vector<16x128xf32>
    %259 = tpu.matmul %256, %258, %cst_206 {dimension_numbers = #tpu.dot_dimension_numbers<[1], [0], [0], [1], [0, 0, 1, 1], [], []>} : vector<16x64xf32>, vector<64x128xf32>, vector<16x128xf32> -> vector<16x128xf32>
    %260 = arith.addf %255, %259 : vector<16x128xf32>
    %261 = vector.extract_strided_slice %250 {offsets = [0, 8], sizes = [16, 64], strides = [1, 1]} : vector<16x72xf32> to vector<16x64xf32>
    %c8_207 = arith.constant 8 : index
    %c0_208 = arith.constant 0 : index
    %c0_209 = arith.constant 0 : index
    %262 = vector.load %arg2[%c8_207, %c0_208, %c0_209] : memref<27x64x128xf32, #tpu.memory_space<vmem>>, vector<1x64x128xf32>
    %263 = vector.shape_cast %262 : vector<1x64x128xf32> to vector<64x128xf32>
    %cst_210 = arith.constant dense<0.000000e+00> : vector<16x128xf32>
    %264 = tpu.matmul %261, %263, %cst_210 {dimension_numbers = #tpu.dot_dimension_numbers<[1], [0], [0], [1], [0, 0, 1, 1], [], []>} : vector<16x64xf32>, vector<64x128xf32>, vector<16x128xf32> -> vector<16x128xf32>
    %265 = arith.addf %260, %264 : vector<16x128xf32>
    %266 = vector.extract_strided_slice %250 {offsets = [0, 0], sizes = [16, 64], strides = [1, 1]} : vector<16x72xf32> to vector<16x64xf32>
    %c15_211 = arith.constant 15 : index
    %c0_212 = arith.constant 0 : index
    %c0_213 = arith.constant 0 : index
    %267 = vector.load %arg2[%c15_211, %c0_212, %c0_213] : memref<27x64x128xf32, #tpu.memory_space<vmem>>, vector<1x64x128xf32>
    %268 = vector.shape_cast %267 : vector<1x64x128xf32> to vector<64x128xf32>
    %cst_214 = arith.constant dense<0.000000e+00> : vector<16x128xf32>
    %269 = tpu.matmul %266, %268, %cst_214 {dimension_numbers = #tpu.dot_dimension_numbers<[1], [0], [0], [1], [0, 0, 1, 1], [], []>} : vector<16x64xf32>, vector<64x128xf32>, vector<16x128xf32> -> vector<16x128xf32>
    %270 = arith.addf %233, %269 : vector<16x128xf32>
    %271 = vector.extract_strided_slice %250 {offsets = [0, 4], sizes = [16, 64], strides = [1, 1]} : vector<16x72xf32> to vector<16x64xf32>
    %c16_215 = arith.constant 16 : index
    %c0_216 = arith.constant 0 : index
    %c0_217 = arith.constant 0 : index
    %272 = vector.load %arg2[%c16_215, %c0_216, %c0_217] : memref<27x64x128xf32, #tpu.memory_space<vmem>>, vector<1x64x128xf32>
    %273 = vector.shape_cast %272 : vector<1x64x128xf32> to vector<64x128xf32>
    %cst_218 = arith.constant dense<0.000000e+00> : vector<16x128xf32>
    %274 = tpu.matmul %271, %273, %cst_218 {dimension_numbers = #tpu.dot_dimension_numbers<[1], [0], [0], [1], [0, 0, 1, 1], [], []>} : vector<16x64xf32>, vector<64x128xf32>, vector<16x128xf32> -> vector<16x128xf32>
    %275 = arith.addf %270, %274 : vector<16x128xf32>
    %276 = vector.extract_strided_slice %250 {offsets = [0, 8], sizes = [16, 64], strides = [1, 1]} : vector<16x72xf32> to vector<16x64xf32>
    %c17_219 = arith.constant 17 : index
    %c0_220 = arith.constant 0 : index
    %c0_221 = arith.constant 0 : index
    %277 = vector.load %arg2[%c17_219, %c0_220, %c0_221] : memref<27x64x128xf32, #tpu.memory_space<vmem>>, vector<1x64x128xf32>
    %278 = vector.shape_cast %277 : vector<1x64x128xf32> to vector<64x128xf32>
    %cst_222 = arith.constant dense<0.000000e+00> : vector<16x128xf32>
    %279 = tpu.matmul %276, %278, %cst_222 {dimension_numbers = #tpu.dot_dimension_numbers<[1], [0], [0], [1], [0, 0, 1, 1], [], []>} : vector<16x64xf32>, vector<64x128xf32>, vector<16x128xf32> -> vector<16x128xf32>
    %280 = arith.addf %275, %279 : vector<16x128xf32>
    %281 = vector.extract_strided_slice %250 {offsets = [0, 0], sizes = [16, 64], strides = [1, 1]} : vector<16x72xf32> to vector<16x64xf32>
    %c24 = arith.constant 24 : index
    %c0_223 = arith.constant 0 : index
    %c0_224 = arith.constant 0 : index
    %282 = vector.load %arg2[%c24, %c0_223, %c0_224] : memref<27x64x128xf32, #tpu.memory_space<vmem>>, vector<1x64x128xf32>
    %283 = vector.shape_cast %282 : vector<1x64x128xf32> to vector<64x128xf32>
    %cst_225 = arith.constant dense<0.000000e+00> : vector<16x128xf32>
    %284 = tpu.matmul %281, %283, %cst_225 {dimension_numbers = #tpu.dot_dimension_numbers<[1], [0], [0], [1], [0, 0, 1, 1], [], []>} : vector<16x64xf32>, vector<64x128xf32>, vector<16x128xf32> -> vector<16x128xf32>
    %285 = arith.addf %248, %284 : vector<16x128xf32>
    %286 = vector.extract_strided_slice %250 {offsets = [0, 4], sizes = [16, 64], strides = [1, 1]} : vector<16x72xf32> to vector<16x64xf32>
    %c25 = arith.constant 25 : index
    %c0_226 = arith.constant 0 : index
    %c0_227 = arith.constant 0 : index
    %287 = vector.load %arg2[%c25, %c0_226, %c0_227] : memref<27x64x128xf32, #tpu.memory_space<vmem>>, vector<1x64x128xf32>
    %288 = vector.shape_cast %287 : vector<1x64x128xf32> to vector<64x128xf32>
    %cst_228 = arith.constant dense<0.000000e+00> : vector<16x128xf32>
    %289 = tpu.matmul %286, %288, %cst_228 {dimension_numbers = #tpu.dot_dimension_numbers<[1], [0], [0], [1], [0, 0, 1, 1], [], []>} : vector<16x64xf32>, vector<64x128xf32>, vector<16x128xf32> -> vector<16x128xf32>
    %290 = arith.addf %285, %289 : vector<16x128xf32>
    %291 = vector.extract_strided_slice %250 {offsets = [0, 8], sizes = [16, 64], strides = [1, 1]} : vector<16x72xf32> to vector<16x64xf32>
    %c26 = arith.constant 26 : index
    %c0_229 = arith.constant 0 : index
    %c0_230 = arith.constant 0 : index
    %292 = vector.load %arg2[%c26, %c0_229, %c0_230] : memref<27x64x128xf32, #tpu.memory_space<vmem>>, vector<1x64x128xf32>
    %293 = vector.shape_cast %292 : vector<1x64x128xf32> to vector<64x128xf32>
    %cst_231 = arith.constant dense<0.000000e+00> : vector<16x128xf32>
    %294 = tpu.matmul %291, %293, %cst_231 {dimension_numbers = #tpu.dot_dimension_numbers<[1], [0], [0], [1], [0, 0, 1, 1], [], []>} : vector<16x64xf32>, vector<64x128xf32>, vector<16x128xf32> -> vector<16x128xf32>
    %295 = arith.addf %290, %294 : vector<16x128xf32>
    %c0_232 = arith.constant 0 : index
    %c3_233 = arith.constant 3 : index
    %c0_234 = arith.constant 0 : index
    %c0_235 = arith.constant 0 : index
    %296 = vector.load %arg1[%c0_232, %c3_233, %c0_234, %c0_235] : memref<1x10x18x72xf32, #tpu.memory_space<vmem>>, vector<1x1x16x72xf32>
    %297 = vector.shape_cast %296 : vector<1x1x16x72xf32> to vector<16x72xf32>
    %298 = vector.extract_strided_slice %297 {offsets = [0, 0], sizes = [16, 64], strides = [1, 1]} : vector<16x72xf32> to vector<16x64xf32>
    %c0_236 = arith.constant 0 : index
    %c0_237 = arith.constant 0 : index
    %c0_238 = arith.constant 0 : index
    %299 = vector.load %arg2[%c0_236, %c0_237, %c0_238] : memref<27x64x128xf32, #tpu.memory_space<vmem>>, vector<1x64x128xf32>
    %300 = vector.shape_cast %299 : vector<1x64x128xf32> to vector<64x128xf32>
    %cst_239 = arith.constant dense<0.000000e+00> : vector<16x128xf32>
    %301 = tpu.matmul %298, %300, %cst_239 {dimension_numbers = #tpu.dot_dimension_numbers<[1], [0], [0], [1], [0, 0, 1, 1], [], []>} : vector<16x64xf32>, vector<64x128xf32>, vector<16x128xf32> -> vector<16x128xf32>
    %302 = arith.addf %3, %301 : vector<16x128xf32>
    %303 = vector.extract_strided_slice %297 {offsets = [0, 4], sizes = [16, 64], strides = [1, 1]} : vector<16x72xf32> to vector<16x64xf32>
    %c1_240 = arith.constant 1 : index
    %c0_241 = arith.constant 0 : index
    %c0_242 = arith.constant 0 : index
    %304 = vector.load %arg2[%c1_240, %c0_241, %c0_242] : memref<27x64x128xf32, #tpu.memory_space<vmem>>, vector<1x64x128xf32>
    %305 = vector.shape_cast %304 : vector<1x64x128xf32> to vector<64x128xf32>
    %cst_243 = arith.constant dense<0.000000e+00> : vector<16x128xf32>
    %306 = tpu.matmul %303, %305, %cst_243 {dimension_numbers = #tpu.dot_dimension_numbers<[1], [0], [0], [1], [0, 0, 1, 1], [], []>} : vector<16x64xf32>, vector<64x128xf32>, vector<16x128xf32> -> vector<16x128xf32>
    %307 = arith.addf %302, %306 : vector<16x128xf32>
    %308 = vector.extract_strided_slice %297 {offsets = [0, 8], sizes = [16, 64], strides = [1, 1]} : vector<16x72xf32> to vector<16x64xf32>
    %c2_244 = arith.constant 2 : index
    %c0_245 = arith.constant 0 : index
    %c0_246 = arith.constant 0 : index
    %309 = vector.load %arg2[%c2_244, %c0_245, %c0_246] : memref<27x64x128xf32, #tpu.memory_space<vmem>>, vector<1x64x128xf32>
    %310 = vector.shape_cast %309 : vector<1x64x128xf32> to vector<64x128xf32>
    %cst_247 = arith.constant dense<0.000000e+00> : vector<16x128xf32>
    %311 = tpu.matmul %308, %310, %cst_247 {dimension_numbers = #tpu.dot_dimension_numbers<[1], [0], [0], [1], [0, 0, 1, 1], [], []>} : vector<16x64xf32>, vector<64x128xf32>, vector<16x128xf32> -> vector<16x128xf32>
    %312 = arith.addf %307, %311 : vector<16x128xf32>
    %313 = vector.extract_strided_slice %297 {offsets = [0, 0], sizes = [16, 64], strides = [1, 1]} : vector<16x72xf32> to vector<16x64xf32>
    %c9_248 = arith.constant 9 : index
    %c0_249 = arith.constant 0 : index
    %c0_250 = arith.constant 0 : index
    %314 = vector.load %arg2[%c9_248, %c0_249, %c0_250] : memref<27x64x128xf32, #tpu.memory_space<vmem>>, vector<1x64x128xf32>
    %315 = vector.shape_cast %314 : vector<1x64x128xf32> to vector<64x128xf32>
    %cst_251 = arith.constant dense<0.000000e+00> : vector<16x128xf32>
    %316 = tpu.matmul %313, %315, %cst_251 {dimension_numbers = #tpu.dot_dimension_numbers<[1], [0], [0], [1], [0, 0, 1, 1], [], []>} : vector<16x64xf32>, vector<64x128xf32>, vector<16x128xf32> -> vector<16x128xf32>
    %317 = arith.addf %265, %316 : vector<16x128xf32>
    %318 = vector.extract_strided_slice %297 {offsets = [0, 4], sizes = [16, 64], strides = [1, 1]} : vector<16x72xf32> to vector<16x64xf32>
    %c10_252 = arith.constant 10 : index
    %c0_253 = arith.constant 0 : index
    %c0_254 = arith.constant 0 : index
    %319 = vector.load %arg2[%c10_252, %c0_253, %c0_254] : memref<27x64x128xf32, #tpu.memory_space<vmem>>, vector<1x64x128xf32>
    %320 = vector.shape_cast %319 : vector<1x64x128xf32> to vector<64x128xf32>
    %cst_255 = arith.constant dense<0.000000e+00> : vector<16x128xf32>
    %321 = tpu.matmul %318, %320, %cst_255 {dimension_numbers = #tpu.dot_dimension_numbers<[1], [0], [0], [1], [0, 0, 1, 1], [], []>} : vector<16x64xf32>, vector<64x128xf32>, vector<16x128xf32> -> vector<16x128xf32>
    %322 = arith.addf %317, %321 : vector<16x128xf32>
    %323 = vector.extract_strided_slice %297 {offsets = [0, 8], sizes = [16, 64], strides = [1, 1]} : vector<16x72xf32> to vector<16x64xf32>
    %c11_256 = arith.constant 11 : index
    %c0_257 = arith.constant 0 : index
    %c0_258 = arith.constant 0 : index
    %324 = vector.load %arg2[%c11_256, %c0_257, %c0_258] : memref<27x64x128xf32, #tpu.memory_space<vmem>>, vector<1x64x128xf32>
    %325 = vector.shape_cast %324 : vector<1x64x128xf32> to vector<64x128xf32>
    %cst_259 = arith.constant dense<0.000000e+00> : vector<16x128xf32>
    %326 = tpu.matmul %323, %325, %cst_259 {dimension_numbers = #tpu.dot_dimension_numbers<[1], [0], [0], [1], [0, 0, 1, 1], [], []>} : vector<16x64xf32>, vector<64x128xf32>, vector<16x128xf32> -> vector<16x128xf32>
    %327 = arith.addf %322, %326 : vector<16x128xf32>
    %328 = vector.extract_strided_slice %297 {offsets = [0, 0], sizes = [16, 64], strides = [1, 1]} : vector<16x72xf32> to vector<16x64xf32>
    %c18_260 = arith.constant 18 : index
    %c0_261 = arith.constant 0 : index
    %c0_262 = arith.constant 0 : index
    %329 = vector.load %arg2[%c18_260, %c0_261, %c0_262] : memref<27x64x128xf32, #tpu.memory_space<vmem>>, vector<1x64x128xf32>
    %330 = vector.shape_cast %329 : vector<1x64x128xf32> to vector<64x128xf32>
    %cst_263 = arith.constant dense<0.000000e+00> : vector<16x128xf32>
    %331 = tpu.matmul %328, %330, %cst_263 {dimension_numbers = #tpu.dot_dimension_numbers<[1], [0], [0], [1], [0, 0, 1, 1], [], []>} : vector<16x64xf32>, vector<64x128xf32>, vector<16x128xf32> -> vector<16x128xf32>
    %332 = arith.addf %280, %331 : vector<16x128xf32>
    %333 = vector.extract_strided_slice %297 {offsets = [0, 4], sizes = [16, 64], strides = [1, 1]} : vector<16x72xf32> to vector<16x64xf32>
    %c19_264 = arith.constant 19 : index
    %c0_265 = arith.constant 0 : index
    %c0_266 = arith.constant 0 : index
    %334 = vector.load %arg2[%c19_264, %c0_265, %c0_266] : memref<27x64x128xf32, #tpu.memory_space<vmem>>, vector<1x64x128xf32>
    %335 = vector.shape_cast %334 : vector<1x64x128xf32> to vector<64x128xf32>
    %cst_267 = arith.constant dense<0.000000e+00> : vector<16x128xf32>
    %336 = tpu.matmul %333, %335, %cst_267 {dimension_numbers = #tpu.dot_dimension_numbers<[1], [0], [0], [1], [0, 0, 1, 1], [], []>} : vector<16x64xf32>, vector<64x128xf32>, vector<16x128xf32> -> vector<16x128xf32>
    %337 = arith.addf %332, %336 : vector<16x128xf32>
    %338 = vector.extract_strided_slice %297 {offsets = [0, 8], sizes = [16, 64], strides = [1, 1]} : vector<16x72xf32> to vector<16x64xf32>
    %c20_268 = arith.constant 20 : index
    %c0_269 = arith.constant 0 : index
    %c0_270 = arith.constant 0 : index
    %339 = vector.load %arg2[%c20_268, %c0_269, %c0_270] : memref<27x64x128xf32, #tpu.memory_space<vmem>>, vector<1x64x128xf32>
    %340 = vector.shape_cast %339 : vector<1x64x128xf32> to vector<64x128xf32>
    %cst_271 = arith.constant dense<0.000000e+00> : vector<16x128xf32>
    %341 = tpu.matmul %338, %340, %cst_271 {dimension_numbers = #tpu.dot_dimension_numbers<[1], [0], [0], [1], [0, 0, 1, 1], [], []>} : vector<16x64xf32>, vector<64x128xf32>, vector<16x128xf32> -> vector<16x128xf32>
    %342 = arith.addf %337, %341 : vector<16x128xf32>
    %c0_272 = arith.constant 0 : index
    %c3_273 = arith.constant 3 : index
    %c1_274 = arith.constant 1 : index
    %c0_275 = arith.constant 0 : index
    %343 = vector.load %arg1[%c0_272, %c3_273, %c1_274, %c0_275] : memref<1x10x18x72xf32, #tpu.memory_space<vmem>>, vector<1x1x16x72xf32>
    %344 = vector.shape_cast %343 : vector<1x1x16x72xf32> to vector<16x72xf32>
    %345 = vector.extract_strided_slice %344 {offsets = [0, 0], sizes = [16, 64], strides = [1, 1]} : vector<16x72xf32> to vector<16x64xf32>
    %c3_276 = arith.constant 3 : index
    %c0_277 = arith.constant 0 : index
    %c0_278 = arith.constant 0 : index
    %346 = vector.load %arg2[%c3_276, %c0_277, %c0_278] : memref<27x64x128xf32, #tpu.memory_space<vmem>>, vector<1x64x128xf32>
    %347 = vector.shape_cast %346 : vector<1x64x128xf32> to vector<64x128xf32>
    %cst_279 = arith.constant dense<0.000000e+00> : vector<16x128xf32>
    %348 = tpu.matmul %345, %347, %cst_279 {dimension_numbers = #tpu.dot_dimension_numbers<[1], [0], [0], [1], [0, 0, 1, 1], [], []>} : vector<16x64xf32>, vector<64x128xf32>, vector<16x128xf32> -> vector<16x128xf32>
    %349 = arith.addf %312, %348 : vector<16x128xf32>
    %350 = vector.extract_strided_slice %344 {offsets = [0, 4], sizes = [16, 64], strides = [1, 1]} : vector<16x72xf32> to vector<16x64xf32>
    %c4_280 = arith.constant 4 : index
    %c0_281 = arith.constant 0 : index
    %c0_282 = arith.constant 0 : index
    %351 = vector.load %arg2[%c4_280, %c0_281, %c0_282] : memref<27x64x128xf32, #tpu.memory_space<vmem>>, vector<1x64x128xf32>
    %352 = vector.shape_cast %351 : vector<1x64x128xf32> to vector<64x128xf32>
    %cst_283 = arith.constant dense<0.000000e+00> : vector<16x128xf32>
    %353 = tpu.matmul %350, %352, %cst_283 {dimension_numbers = #tpu.dot_dimension_numbers<[1], [0], [0], [1], [0, 0, 1, 1], [], []>} : vector<16x64xf32>, vector<64x128xf32>, vector<16x128xf32> -> vector<16x128xf32>
    %354 = arith.addf %349, %353 : vector<16x128xf32>
    %355 = vector.extract_strided_slice %344 {offsets = [0, 8], sizes = [16, 64], strides = [1, 1]} : vector<16x72xf32> to vector<16x64xf32>
    %c5_284 = arith.constant 5 : index
    %c0_285 = arith.constant 0 : index
    %c0_286 = arith.constant 0 : index
    %356 = vector.load %arg2[%c5_284, %c0_285, %c0_286] : memref<27x64x128xf32, #tpu.memory_space<vmem>>, vector<1x64x128xf32>
    %357 = vector.shape_cast %356 : vector<1x64x128xf32> to vector<64x128xf32>
    %cst_287 = arith.constant dense<0.000000e+00> : vector<16x128xf32>
    %358 = tpu.matmul %355, %357, %cst_287 {dimension_numbers = #tpu.dot_dimension_numbers<[1], [0], [0], [1], [0, 0, 1, 1], [], []>} : vector<16x64xf32>, vector<64x128xf32>, vector<16x128xf32> -> vector<16x128xf32>
    %359 = arith.addf %354, %358 : vector<16x128xf32>
    %360 = vector.extract_strided_slice %344 {offsets = [0, 0], sizes = [16, 64], strides = [1, 1]} : vector<16x72xf32> to vector<16x64xf32>
    %c12_288 = arith.constant 12 : index
    %c0_289 = arith.constant 0 : index
    %c0_290 = arith.constant 0 : index
    %361 = vector.load %arg2[%c12_288, %c0_289, %c0_290] : memref<27x64x128xf32, #tpu.memory_space<vmem>>, vector<1x64x128xf32>
    %362 = vector.shape_cast %361 : vector<1x64x128xf32> to vector<64x128xf32>
    %cst_291 = arith.constant dense<0.000000e+00> : vector<16x128xf32>
    %363 = tpu.matmul %360, %362, %cst_291 {dimension_numbers = #tpu.dot_dimension_numbers<[1], [0], [0], [1], [0, 0, 1, 1], [], []>} : vector<16x64xf32>, vector<64x128xf32>, vector<16x128xf32> -> vector<16x128xf32>
    %364 = arith.addf %327, %363 : vector<16x128xf32>
    %365 = vector.extract_strided_slice %344 {offsets = [0, 4], sizes = [16, 64], strides = [1, 1]} : vector<16x72xf32> to vector<16x64xf32>
    %c13_292 = arith.constant 13 : index
    %c0_293 = arith.constant 0 : index
    %c0_294 = arith.constant 0 : index
    %366 = vector.load %arg2[%c13_292, %c0_293, %c0_294] : memref<27x64x128xf32, #tpu.memory_space<vmem>>, vector<1x64x128xf32>
    %367 = vector.shape_cast %366 : vector<1x64x128xf32> to vector<64x128xf32>
    %cst_295 = arith.constant dense<0.000000e+00> : vector<16x128xf32>
    %368 = tpu.matmul %365, %367, %cst_295 {dimension_numbers = #tpu.dot_dimension_numbers<[1], [0], [0], [1], [0, 0, 1, 1], [], []>} : vector<16x64xf32>, vector<64x128xf32>, vector<16x128xf32> -> vector<16x128xf32>
    %369 = arith.addf %364, %368 : vector<16x128xf32>
    %370 = vector.extract_strided_slice %344 {offsets = [0, 8], sizes = [16, 64], strides = [1, 1]} : vector<16x72xf32> to vector<16x64xf32>
    %c14_296 = arith.constant 14 : index
    %c0_297 = arith.constant 0 : index
    %c0_298 = arith.constant 0 : index
    %371 = vector.load %arg2[%c14_296, %c0_297, %c0_298] : memref<27x64x128xf32, #tpu.memory_space<vmem>>, vector<1x64x128xf32>
    %372 = vector.shape_cast %371 : vector<1x64x128xf32> to vector<64x128xf32>
    %cst_299 = arith.constant dense<0.000000e+00> : vector<16x128xf32>
    %373 = tpu.matmul %370, %372, %cst_299 {dimension_numbers = #tpu.dot_dimension_numbers<[1], [0], [0], [1], [0, 0, 1, 1], [], []>} : vector<16x64xf32>, vector<64x128xf32>, vector<16x128xf32> -> vector<16x128xf32>
    %374 = arith.addf %369, %373 : vector<16x128xf32>
    %375 = vector.extract_strided_slice %344 {offsets = [0, 0], sizes = [16, 64], strides = [1, 1]} : vector<16x72xf32> to vector<16x64xf32>
    %c21_300 = arith.constant 21 : index
    %c0_301 = arith.constant 0 : index
    %c0_302 = arith.constant 0 : index
    %376 = vector.load %arg2[%c21_300, %c0_301, %c0_302] : memref<27x64x128xf32, #tpu.memory_space<vmem>>, vector<1x64x128xf32>
    %377 = vector.shape_cast %376 : vector<1x64x128xf32> to vector<64x128xf32>
    %cst_303 = arith.constant dense<0.000000e+00> : vector<16x128xf32>
    %378 = tpu.matmul %375, %377, %cst_303 {dimension_numbers = #tpu.dot_dimension_numbers<[1], [0], [0], [1], [0, 0, 1, 1], [], []>} : vector<16x64xf32>, vector<64x128xf32>, vector<16x128xf32> -> vector<16x128xf32>
    %379 = arith.addf %342, %378 : vector<16x128xf32>
    %380 = vector.extract_strided_slice %344 {offsets = [0, 4], sizes = [16, 64], strides = [1, 1]} : vector<16x72xf32> to vector<16x64xf32>
    %c22_304 = arith.constant 22 : index
    %c0_305 = arith.constant 0 : index
    %c0_306 = arith.constant 0 : index
    %381 = vector.load %arg2[%c22_304, %c0_305, %c0_306] : memref<27x64x128xf32, #tpu.memory_space<vmem>>, vector<1x64x128xf32>
    %382 = vector.shape_cast %381 : vector<1x64x128xf32> to vector<64x128xf32>
    %cst_307 = arith.constant dense<0.000000e+00> : vector<16x128xf32>
    %383 = tpu.matmul %380, %382, %cst_307 {dimension_numbers = #tpu.dot_dimension_numbers<[1], [0], [0], [1], [0, 0, 1, 1], [], []>} : vector<16x64xf32>, vector<64x128xf32>, vector<16x128xf32> -> vector<16x128xf32>
    %384 = arith.addf %379, %383 : vector<16x128xf32>
    %385 = vector.extract_strided_slice %344 {offsets = [0, 8], sizes = [16, 64], strides = [1, 1]} : vector<16x72xf32> to vector<16x64xf32>
    %c23_308 = arith.constant 23 : index
    %c0_309 = arith.constant 0 : index
    %c0_310 = arith.constant 0 : index
    %386 = vector.load %arg2[%c23_308, %c0_309, %c0_310] : memref<27x64x128xf32, #tpu.memory_space<vmem>>, vector<1x64x128xf32>
    %387 = vector.shape_cast %386 : vector<1x64x128xf32> to vector<64x128xf32>
    %cst_311 = arith.constant dense<0.000000e+00> : vector<16x128xf32>
    %388 = tpu.matmul %385, %387, %cst_311 {dimension_numbers = #tpu.dot_dimension_numbers<[1], [0], [0], [1], [0, 0, 1, 1], [], []>} : vector<16x64xf32>, vector<64x128xf32>, vector<16x128xf32> -> vector<16x128xf32>
    %389 = arith.addf %384, %388 : vector<16x128xf32>
    %c0_312 = arith.constant 0 : index
    %c3_313 = arith.constant 3 : index
    %c2_314 = arith.constant 2 : index
    %c0_315 = arith.constant 0 : index
    %390 = vector.load %arg1[%c0_312, %c3_313, %c2_314, %c0_315] : memref<1x10x18x72xf32, #tpu.memory_space<vmem>>, vector<1x1x16x72xf32>
    %391 = vector.shape_cast %390 : vector<1x1x16x72xf32> to vector<16x72xf32>
    %392 = vector.extract_strided_slice %391 {offsets = [0, 0], sizes = [16, 64], strides = [1, 1]} : vector<16x72xf32> to vector<16x64xf32>
    %c6_316 = arith.constant 6 : index
    %c0_317 = arith.constant 0 : index
    %c0_318 = arith.constant 0 : index
    %393 = vector.load %arg2[%c6_316, %c0_317, %c0_318] : memref<27x64x128xf32, #tpu.memory_space<vmem>>, vector<1x64x128xf32>
    %394 = vector.shape_cast %393 : vector<1x64x128xf32> to vector<64x128xf32>
    %cst_319 = arith.constant dense<0.000000e+00> : vector<16x128xf32>
    %395 = tpu.matmul %392, %394, %cst_319 {dimension_numbers = #tpu.dot_dimension_numbers<[1], [0], [0], [1], [0, 0, 1, 1], [], []>} : vector<16x64xf32>, vector<64x128xf32>, vector<16x128xf32> -> vector<16x128xf32>
    %396 = arith.addf %359, %395 : vector<16x128xf32>
    %397 = vector.extract_strided_slice %391 {offsets = [0, 4], sizes = [16, 64], strides = [1, 1]} : vector<16x72xf32> to vector<16x64xf32>
    %c7_320 = arith.constant 7 : index
    %c0_321 = arith.constant 0 : index
    %c0_322 = arith.constant 0 : index
    %398 = vector.load %arg2[%c7_320, %c0_321, %c0_322] : memref<27x64x128xf32, #tpu.memory_space<vmem>>, vector<1x64x128xf32>
    %399 = vector.shape_cast %398 : vector<1x64x128xf32> to vector<64x128xf32>
    %cst_323 = arith.constant dense<0.000000e+00> : vector<16x128xf32>
    %400 = tpu.matmul %397, %399, %cst_323 {dimension_numbers = #tpu.dot_dimension_numbers<[1], [0], [0], [1], [0, 0, 1, 1], [], []>} : vector<16x64xf32>, vector<64x128xf32>, vector<16x128xf32> -> vector<16x128xf32>
    %401 = arith.addf %396, %400 : vector<16x128xf32>
    %402 = vector.extract_strided_slice %391 {offsets = [0, 8], sizes = [16, 64], strides = [1, 1]} : vector<16x72xf32> to vector<16x64xf32>
    %c8_324 = arith.constant 8 : index
    %c0_325 = arith.constant 0 : index
    %c0_326 = arith.constant 0 : index
    %403 = vector.load %arg2[%c8_324, %c0_325, %c0_326] : memref<27x64x128xf32, #tpu.memory_space<vmem>>, vector<1x64x128xf32>
    %404 = vector.shape_cast %403 : vector<1x64x128xf32> to vector<64x128xf32>
    %cst_327 = arith.constant dense<0.000000e+00> : vector<16x128xf32>
    %405 = tpu.matmul %402, %404, %cst_327 {dimension_numbers = #tpu.dot_dimension_numbers<[1], [0], [0], [1], [0, 0, 1, 1], [], []>} : vector<16x64xf32>, vector<64x128xf32>, vector<16x128xf32> -> vector<16x128xf32>
    %406 = arith.addf %401, %405 : vector<16x128xf32>
    %407 = vector.extract_strided_slice %391 {offsets = [0, 0], sizes = [16, 64], strides = [1, 1]} : vector<16x72xf32> to vector<16x64xf32>
    %c15_328 = arith.constant 15 : index
    %c0_329 = arith.constant 0 : index
    %c0_330 = arith.constant 0 : index
    %408 = vector.load %arg2[%c15_328, %c0_329, %c0_330] : memref<27x64x128xf32, #tpu.memory_space<vmem>>, vector<1x64x128xf32>
    %409 = vector.shape_cast %408 : vector<1x64x128xf32> to vector<64x128xf32>
    %cst_331 = arith.constant dense<0.000000e+00> : vector<16x128xf32>
    %410 = tpu.matmul %407, %409, %cst_331 {dimension_numbers = #tpu.dot_dimension_numbers<[1], [0], [0], [1], [0, 0, 1, 1], [], []>} : vector<16x64xf32>, vector<64x128xf32>, vector<16x128xf32> -> vector<16x128xf32>
    %411 = arith.addf %374, %410 : vector<16x128xf32>
    %412 = vector.extract_strided_slice %391 {offsets = [0, 4], sizes = [16, 64], strides = [1, 1]} : vector<16x72xf32> to vector<16x64xf32>
    %c16_332 = arith.constant 16 : index
    %c0_333 = arith.constant 0 : index
    %c0_334 = arith.constant 0 : index
    %413 = vector.load %arg2[%c16_332, %c0_333, %c0_334] : memref<27x64x128xf32, #tpu.memory_space<vmem>>, vector<1x64x128xf32>
    %414 = vector.shape_cast %413 : vector<1x64x128xf32> to vector<64x128xf32>
    %cst_335 = arith.constant dense<0.000000e+00> : vector<16x128xf32>
    %415 = tpu.matmul %412, %414, %cst_335 {dimension_numbers = #tpu.dot_dimension_numbers<[1], [0], [0], [1], [0, 0, 1, 1], [], []>} : vector<16x64xf32>, vector<64x128xf32>, vector<16x128xf32> -> vector<16x128xf32>
    %416 = arith.addf %411, %415 : vector<16x128xf32>
    %417 = vector.extract_strided_slice %391 {offsets = [0, 8], sizes = [16, 64], strides = [1, 1]} : vector<16x72xf32> to vector<16x64xf32>
    %c17_336 = arith.constant 17 : index
    %c0_337 = arith.constant 0 : index
    %c0_338 = arith.constant 0 : index
    %418 = vector.load %arg2[%c17_336, %c0_337, %c0_338] : memref<27x64x128xf32, #tpu.memory_space<vmem>>, vector<1x64x128xf32>
    %419 = vector.shape_cast %418 : vector<1x64x128xf32> to vector<64x128xf32>
    %cst_339 = arith.constant dense<0.000000e+00> : vector<16x128xf32>
    %420 = tpu.matmul %417, %419, %cst_339 {dimension_numbers = #tpu.dot_dimension_numbers<[1], [0], [0], [1], [0, 0, 1, 1], [], []>} : vector<16x64xf32>, vector<64x128xf32>, vector<16x128xf32> -> vector<16x128xf32>
    %421 = arith.addf %416, %420 : vector<16x128xf32>
    %422 = vector.extract_strided_slice %391 {offsets = [0, 0], sizes = [16, 64], strides = [1, 1]} : vector<16x72xf32> to vector<16x64xf32>
    %c24_340 = arith.constant 24 : index
    %c0_341 = arith.constant 0 : index
    %c0_342 = arith.constant 0 : index
    %423 = vector.load %arg2[%c24_340, %c0_341, %c0_342] : memref<27x64x128xf32, #tpu.memory_space<vmem>>, vector<1x64x128xf32>
    %424 = vector.shape_cast %423 : vector<1x64x128xf32> to vector<64x128xf32>
    %cst_343 = arith.constant dense<0.000000e+00> : vector<16x128xf32>
    %425 = tpu.matmul %422, %424, %cst_343 {dimension_numbers = #tpu.dot_dimension_numbers<[1], [0], [0], [1], [0, 0, 1, 1], [], []>} : vector<16x64xf32>, vector<64x128xf32>, vector<16x128xf32> -> vector<16x128xf32>
    %426 = arith.addf %389, %425 : vector<16x128xf32>
    %427 = vector.extract_strided_slice %391 {offsets = [0, 4], sizes = [16, 64], strides = [1, 1]} : vector<16x72xf32> to vector<16x64xf32>
    %c25_344 = arith.constant 25 : index
    %c0_345 = arith.constant 0 : index
    %c0_346 = arith.constant 0 : index
    %428 = vector.load %arg2[%c25_344, %c0_345, %c0_346] : memref<27x64x128xf32, #tpu.memory_space<vmem>>, vector<1x64x128xf32>
    %429 = vector.shape_cast %428 : vector<1x64x128xf32> to vector<64x128xf32>
    %cst_347 = arith.constant dense<0.000000e+00> : vector<16x128xf32>
    %430 = tpu.matmul %427, %429, %cst_347 {dimension_numbers = #tpu.dot_dimension_numbers<[1], [0], [0], [1], [0, 0, 1, 1], [], []>} : vector<16x64xf32>, vector<64x128xf32>, vector<16x128xf32> -> vector<16x128xf32>
    %431 = arith.addf %426, %430 : vector<16x128xf32>
    %432 = vector.extract_strided_slice %391 {offsets = [0, 8], sizes = [16, 64], strides = [1, 1]} : vector<16x72xf32> to vector<16x64xf32>
    %c26_348 = arith.constant 26 : index
    %c0_349 = arith.constant 0 : index
    %c0_350 = arith.constant 0 : index
    %433 = vector.load %arg2[%c26_348, %c0_349, %c0_350] : memref<27x64x128xf32, #tpu.memory_space<vmem>>, vector<1x64x128xf32>
    %434 = vector.shape_cast %433 : vector<1x64x128xf32> to vector<64x128xf32>
    %cst_351 = arith.constant dense<0.000000e+00> : vector<16x128xf32>
    %435 = tpu.matmul %432, %434, %cst_351 {dimension_numbers = #tpu.dot_dimension_numbers<[1], [0], [0], [1], [0, 0, 1, 1], [], []>} : vector<16x64xf32>, vector<64x128xf32>, vector<16x128xf32> -> vector<16x128xf32>
    %436 = arith.addf %431, %435 : vector<16x128xf32>
    %c0_352 = arith.constant 0 : index
    %c4_353 = arith.constant 4 : index
    %c0_354 = arith.constant 0 : index
    %c0_355 = arith.constant 0 : index
    %437 = vector.load %arg1[%c0_352, %c4_353, %c0_354, %c0_355] : memref<1x10x18x72xf32, #tpu.memory_space<vmem>>, vector<1x1x16x72xf32>
    %438 = vector.shape_cast %437 : vector<1x1x16x72xf32> to vector<16x72xf32>
    %439 = vector.extract_strided_slice %438 {offsets = [0, 0], sizes = [16, 64], strides = [1, 1]} : vector<16x72xf32> to vector<16x64xf32>
    %c0_356 = arith.constant 0 : index
    %c0_357 = arith.constant 0 : index
    %c0_358 = arith.constant 0 : index
    %440 = vector.load %arg2[%c0_356, %c0_357, %c0_358] : memref<27x64x128xf32, #tpu.memory_space<vmem>>, vector<1x64x128xf32>
    %441 = vector.shape_cast %440 : vector<1x64x128xf32> to vector<64x128xf32>
    %cst_359 = arith.constant dense<0.000000e+00> : vector<16x128xf32>
    %442 = tpu.matmul %439, %441, %cst_359 {dimension_numbers = #tpu.dot_dimension_numbers<[1], [0], [0], [1], [0, 0, 1, 1], [], []>} : vector<16x64xf32>, vector<64x128xf32>, vector<16x128xf32> -> vector<16x128xf32>
    %443 = arith.addf %4, %442 : vector<16x128xf32>
    %444 = vector.extract_strided_slice %438 {offsets = [0, 4], sizes = [16, 64], strides = [1, 1]} : vector<16x72xf32> to vector<16x64xf32>
    %c1_360 = arith.constant 1 : index
    %c0_361 = arith.constant 0 : index
    %c0_362 = arith.constant 0 : index
    %445 = vector.load %arg2[%c1_360, %c0_361, %c0_362] : memref<27x64x128xf32, #tpu.memory_space<vmem>>, vector<1x64x128xf32>
    %446 = vector.shape_cast %445 : vector<1x64x128xf32> to vector<64x128xf32>
    %cst_363 = arith.constant dense<0.000000e+00> : vector<16x128xf32>
    %447 = tpu.matmul %444, %446, %cst_363 {dimension_numbers = #tpu.dot_dimension_numbers<[1], [0], [0], [1], [0, 0, 1, 1], [], []>} : vector<16x64xf32>, vector<64x128xf32>, vector<16x128xf32> -> vector<16x128xf32>
    %448 = arith.addf %443, %447 : vector<16x128xf32>
    %449 = vector.extract_strided_slice %438 {offsets = [0, 8], sizes = [16, 64], strides = [1, 1]} : vector<16x72xf32> to vector<16x64xf32>
    %c2_364 = arith.constant 2 : index
    %c0_365 = arith.constant 0 : index
    %c0_366 = arith.constant 0 : index
    %450 = vector.load %arg2[%c2_364, %c0_365, %c0_366] : memref<27x64x128xf32, #tpu.memory_space<vmem>>, vector<1x64x128xf32>
    %451 = vector.shape_cast %450 : vector<1x64x128xf32> to vector<64x128xf32>
    %cst_367 = arith.constant dense<0.000000e+00> : vector<16x128xf32>
    %452 = tpu.matmul %449, %451, %cst_367 {dimension_numbers = #tpu.dot_dimension_numbers<[1], [0], [0], [1], [0, 0, 1, 1], [], []>} : vector<16x64xf32>, vector<64x128xf32>, vector<16x128xf32> -> vector<16x128xf32>
    %453 = arith.addf %448, %452 : vector<16x128xf32>
    %454 = vector.extract_strided_slice %438 {offsets = [0, 0], sizes = [16, 64], strides = [1, 1]} : vector<16x72xf32> to vector<16x64xf32>
    %c9_368 = arith.constant 9 : index
    %c0_369 = arith.constant 0 : index
    %c0_370 = arith.constant 0 : index
    %455 = vector.load %arg2[%c9_368, %c0_369, %c0_370] : memref<27x64x128xf32, #tpu.memory_space<vmem>>, vector<1x64x128xf32>
    %456 = vector.shape_cast %455 : vector<1x64x128xf32> to vector<64x128xf32>
    %cst_371 = arith.constant dense<0.000000e+00> : vector<16x128xf32>
    %457 = tpu.matmul %454, %456, %cst_371 {dimension_numbers = #tpu.dot_dimension_numbers<[1], [0], [0], [1], [0, 0, 1, 1], [], []>} : vector<16x64xf32>, vector<64x128xf32>, vector<16x128xf32> -> vector<16x128xf32>
    %458 = arith.addf %406, %457 : vector<16x128xf32>
    %459 = vector.extract_strided_slice %438 {offsets = [0, 4], sizes = [16, 64], strides = [1, 1]} : vector<16x72xf32> to vector<16x64xf32>
    %c10_372 = arith.constant 10 : index
    %c0_373 = arith.constant 0 : index
    %c0_374 = arith.constant 0 : index
    %460 = vector.load %arg2[%c10_372, %c0_373, %c0_374] : memref<27x64x128xf32, #tpu.memory_space<vmem>>, vector<1x64x128xf32>
    %461 = vector.shape_cast %460 : vector<1x64x128xf32> to vector<64x128xf32>
    %cst_375 = arith.constant dense<0.000000e+00> : vector<16x128xf32>
    %462 = tpu.matmul %459, %461, %cst_375 {dimension_numbers = #tpu.dot_dimension_numbers<[1], [0], [0], [1], [0, 0, 1, 1], [], []>} : vector<16x64xf32>, vector<64x128xf32>, vector<16x128xf32> -> vector<16x128xf32>
    %463 = arith.addf %458, %462 : vector<16x128xf32>
    %464 = vector.extract_strided_slice %438 {offsets = [0, 8], sizes = [16, 64], strides = [1, 1]} : vector<16x72xf32> to vector<16x64xf32>
    %c11_376 = arith.constant 11 : index
    %c0_377 = arith.constant 0 : index
    %c0_378 = arith.constant 0 : index
    %465 = vector.load %arg2[%c11_376, %c0_377, %c0_378] : memref<27x64x128xf32, #tpu.memory_space<vmem>>, vector<1x64x128xf32>
    %466 = vector.shape_cast %465 : vector<1x64x128xf32> to vector<64x128xf32>
    %cst_379 = arith.constant dense<0.000000e+00> : vector<16x128xf32>
    %467 = tpu.matmul %464, %466, %cst_379 {dimension_numbers = #tpu.dot_dimension_numbers<[1], [0], [0], [1], [0, 0, 1, 1], [], []>} : vector<16x64xf32>, vector<64x128xf32>, vector<16x128xf32> -> vector<16x128xf32>
    %468 = arith.addf %463, %467 : vector<16x128xf32>
    %469 = vector.extract_strided_slice %438 {offsets = [0, 0], sizes = [16, 64], strides = [1, 1]} : vector<16x72xf32> to vector<16x64xf32>
    %c18_380 = arith.constant 18 : index
    %c0_381 = arith.constant 0 : index
    %c0_382 = arith.constant 0 : index
    %470 = vector.load %arg2[%c18_380, %c0_381, %c0_382] : memref<27x64x128xf32, #tpu.memory_space<vmem>>, vector<1x64x128xf32>
    %471 = vector.shape_cast %470 : vector<1x64x128xf32> to vector<64x128xf32>
    %cst_383 = arith.constant dense<0.000000e+00> : vector<16x128xf32>
    %472 = tpu.matmul %469, %471, %cst_383 {dimension_numbers = #tpu.dot_dimension_numbers<[1], [0], [0], [1], [0, 0, 1, 1], [], []>} : vector<16x64xf32>, vector<64x128xf32>, vector<16x128xf32> -> vector<16x128xf32>
    %473 = arith.addf %421, %472 : vector<16x128xf32>
    %474 = vector.extract_strided_slice %438 {offsets = [0, 4], sizes = [16, 64], strides = [1, 1]} : vector<16x72xf32> to vector<16x64xf32>
    %c19_384 = arith.constant 19 : index
    %c0_385 = arith.constant 0 : index
    %c0_386 = arith.constant 0 : index
    %475 = vector.load %arg2[%c19_384, %c0_385, %c0_386] : memref<27x64x128xf32, #tpu.memory_space<vmem>>, vector<1x64x128xf32>
    %476 = vector.shape_cast %475 : vector<1x64x128xf32> to vector<64x128xf32>
    %cst_387 = arith.constant dense<0.000000e+00> : vector<16x128xf32>
    %477 = tpu.matmul %474, %476, %cst_387 {dimension_numbers = #tpu.dot_dimension_numbers<[1], [0], [0], [1], [0, 0, 1, 1], [], []>} : vector<16x64xf32>, vector<64x128xf32>, vector<16x128xf32> -> vector<16x128xf32>
    %478 = arith.addf %473, %477 : vector<16x128xf32>
    %479 = vector.extract_strided_slice %438 {offsets = [0, 8], sizes = [16, 64], strides = [1, 1]} : vector<16x72xf32> to vector<16x64xf32>
    %c20_388 = arith.constant 20 : index
    %c0_389 = arith.constant 0 : index
    %c0_390 = arith.constant 0 : index
    %480 = vector.load %arg2[%c20_388, %c0_389, %c0_390] : memref<27x64x128xf32, #tpu.memory_space<vmem>>, vector<1x64x128xf32>
    %481 = vector.shape_cast %480 : vector<1x64x128xf32> to vector<64x128xf32>
    %cst_391 = arith.constant dense<0.000000e+00> : vector<16x128xf32>
    %482 = tpu.matmul %479, %481, %cst_391 {dimension_numbers = #tpu.dot_dimension_numbers<[1], [0], [0], [1], [0, 0, 1, 1], [], []>} : vector<16x64xf32>, vector<64x128xf32>, vector<16x128xf32> -> vector<16x128xf32>
    %483 = arith.addf %478, %482 : vector<16x128xf32>
    %c0_392 = arith.constant 0 : index
    %c4_393 = arith.constant 4 : index
    %c1_394 = arith.constant 1 : index
    %c0_395 = arith.constant 0 : index
    %484 = vector.load %arg1[%c0_392, %c4_393, %c1_394, %c0_395] : memref<1x10x18x72xf32, #tpu.memory_space<vmem>>, vector<1x1x16x72xf32>
    %485 = vector.shape_cast %484 : vector<1x1x16x72xf32> to vector<16x72xf32>
    %486 = vector.extract_strided_slice %485 {offsets = [0, 0], sizes = [16, 64], strides = [1, 1]} : vector<16x72xf32> to vector<16x64xf32>
    %c3_396 = arith.constant 3 : index
    %c0_397 = arith.constant 0 : index
    %c0_398 = arith.constant 0 : index
    %487 = vector.load %arg2[%c3_396, %c0_397, %c0_398] : memref<27x64x128xf32, #tpu.memory_space<vmem>>, vector<1x64x128xf32>
    %488 = vector.shape_cast %487 : vector<1x64x128xf32> to vector<64x128xf32>
    %cst_399 = arith.constant dense<0.000000e+00> : vector<16x128xf32>
    %489 = tpu.matmul %486, %488, %cst_399 {dimension_numbers = #tpu.dot_dimension_numbers<[1], [0], [0], [1], [0, 0, 1, 1], [], []>} : vector<16x64xf32>, vector<64x128xf32>, vector<16x128xf32> -> vector<16x128xf32>
    %490 = arith.addf %453, %489 : vector<16x128xf32>
    %491 = vector.extract_strided_slice %485 {offsets = [0, 4], sizes = [16, 64], strides = [1, 1]} : vector<16x72xf32> to vector<16x64xf32>
    %c4_400 = arith.constant 4 : index
    %c0_401 = arith.constant 0 : index
    %c0_402 = arith.constant 0 : index
    %492 = vector.load %arg2[%c4_400, %c0_401, %c0_402] : memref<27x64x128xf32, #tpu.memory_space<vmem>>, vector<1x64x128xf32>
    %493 = vector.shape_cast %492 : vector<1x64x128xf32> to vector<64x128xf32>
    %cst_403 = arith.constant dense<0.000000e+00> : vector<16x128xf32>
    %494 = tpu.matmul %491, %493, %cst_403 {dimension_numbers = #tpu.dot_dimension_numbers<[1], [0], [0], [1], [0, 0, 1, 1], [], []>} : vector<16x64xf32>, vector<64x128xf32>, vector<16x128xf32> -> vector<16x128xf32>
    %495 = arith.addf %490, %494 : vector<16x128xf32>
    %496 = vector.extract_strided_slice %485 {offsets = [0, 8], sizes = [16, 64], strides = [1, 1]} : vector<16x72xf32> to vector<16x64xf32>
    %c5_404 = arith.constant 5 : index
    %c0_405 = arith.constant 0 : index
    %c0_406 = arith.constant 0 : index
    %497 = vector.load %arg2[%c5_404, %c0_405, %c0_406] : memref<27x64x128xf32, #tpu.memory_space<vmem>>, vector<1x64x128xf32>
    %498 = vector.shape_cast %497 : vector<1x64x128xf32> to vector<64x128xf32>
    %cst_407 = arith.constant dense<0.000000e+00> : vector<16x128xf32>
    %499 = tpu.matmul %496, %498, %cst_407 {dimension_numbers = #tpu.dot_dimension_numbers<[1], [0], [0], [1], [0, 0, 1, 1], [], []>} : vector<16x64xf32>, vector<64x128xf32>, vector<16x128xf32> -> vector<16x128xf32>
    %500 = arith.addf %495, %499 : vector<16x128xf32>
    %501 = vector.extract_strided_slice %485 {offsets = [0, 0], sizes = [16, 64], strides = [1, 1]} : vector<16x72xf32> to vector<16x64xf32>
    %c12_408 = arith.constant 12 : index
    %c0_409 = arith.constant 0 : index
    %c0_410 = arith.constant 0 : index
    %502 = vector.load %arg2[%c12_408, %c0_409, %c0_410] : memref<27x64x128xf32, #tpu.memory_space<vmem>>, vector<1x64x128xf32>
    %503 = vector.shape_cast %502 : vector<1x64x128xf32> to vector<64x128xf32>
    %cst_411 = arith.constant dense<0.000000e+00> : vector<16x128xf32>
    %504 = tpu.matmul %501, %503, %cst_411 {dimension_numbers = #tpu.dot_dimension_numbers<[1], [0], [0], [1], [0, 0, 1, 1], [], []>} : vector<16x64xf32>, vector<64x128xf32>, vector<16x128xf32> -> vector<16x128xf32>
    %505 = arith.addf %468, %504 : vector<16x128xf32>
    %506 = vector.extract_strided_slice %485 {offsets = [0, 4], sizes = [16, 64], strides = [1, 1]} : vector<16x72xf32> to vector<16x64xf32>
    %c13_412 = arith.constant 13 : index
    %c0_413 = arith.constant 0 : index
    %c0_414 = arith.constant 0 : index
    %507 = vector.load %arg2[%c13_412, %c0_413, %c0_414] : memref<27x64x128xf32, #tpu.memory_space<vmem>>, vector<1x64x128xf32>
    %508 = vector.shape_cast %507 : vector<1x64x128xf32> to vector<64x128xf32>
    %cst_415 = arith.constant dense<0.000000e+00> : vector<16x128xf32>
    %509 = tpu.matmul %506, %508, %cst_415 {dimension_numbers = #tpu.dot_dimension_numbers<[1], [0], [0], [1], [0, 0, 1, 1], [], []>} : vector<16x64xf32>, vector<64x128xf32>, vector<16x128xf32> -> vector<16x128xf32>
    %510 = arith.addf %505, %509 : vector<16x128xf32>
    %511 = vector.extract_strided_slice %485 {offsets = [0, 8], sizes = [16, 64], strides = [1, 1]} : vector<16x72xf32> to vector<16x64xf32>
    %c14_416 = arith.constant 14 : index
    %c0_417 = arith.constant 0 : index
    %c0_418 = arith.constant 0 : index
    %512 = vector.load %arg2[%c14_416, %c0_417, %c0_418] : memref<27x64x128xf32, #tpu.memory_space<vmem>>, vector<1x64x128xf32>
    %513 = vector.shape_cast %512 : vector<1x64x128xf32> to vector<64x128xf32>
    %cst_419 = arith.constant dense<0.000000e+00> : vector<16x128xf32>
    %514 = tpu.matmul %511, %513, %cst_419 {dimension_numbers = #tpu.dot_dimension_numbers<[1], [0], [0], [1], [0, 0, 1, 1], [], []>} : vector<16x64xf32>, vector<64x128xf32>, vector<16x128xf32> -> vector<16x128xf32>
    %515 = arith.addf %510, %514 : vector<16x128xf32>
    %516 = vector.extract_strided_slice %485 {offsets = [0, 0], sizes = [16, 64], strides = [1, 1]} : vector<16x72xf32> to vector<16x64xf32>
    %c21_420 = arith.constant 21 : index
    %c0_421 = arith.constant 0 : index
    %c0_422 = arith.constant 0 : index
    %517 = vector.load %arg2[%c21_420, %c0_421, %c0_422] : memref<27x64x128xf32, #tpu.memory_space<vmem>>, vector<1x64x128xf32>
    %518 = vector.shape_cast %517 : vector<1x64x128xf32> to vector<64x128xf32>
    %cst_423 = arith.constant dense<0.000000e+00> : vector<16x128xf32>
    %519 = tpu.matmul %516, %518, %cst_423 {dimension_numbers = #tpu.dot_dimension_numbers<[1], [0], [0], [1], [0, 0, 1, 1], [], []>} : vector<16x64xf32>, vector<64x128xf32>, vector<16x128xf32> -> vector<16x128xf32>
    %520 = arith.addf %483, %519 : vector<16x128xf32>
    %521 = vector.extract_strided_slice %485 {offsets = [0, 4], sizes = [16, 64], strides = [1, 1]} : vector<16x72xf32> to vector<16x64xf32>
    %c22_424 = arith.constant 22 : index
    %c0_425 = arith.constant 0 : index
    %c0_426 = arith.constant 0 : index
    %522 = vector.load %arg2[%c22_424, %c0_425, %c0_426] : memref<27x64x128xf32, #tpu.memory_space<vmem>>, vector<1x64x128xf32>
    %523 = vector.shape_cast %522 : vector<1x64x128xf32> to vector<64x128xf32>
    %cst_427 = arith.constant dense<0.000000e+00> : vector<16x128xf32>
    %524 = tpu.matmul %521, %523, %cst_427 {dimension_numbers = #tpu.dot_dimension_numbers<[1], [0], [0], [1], [0, 0, 1, 1], [], []>} : vector<16x64xf32>, vector<64x128xf32>, vector<16x128xf32> -> vector<16x128xf32>
    %525 = arith.addf %520, %524 : vector<16x128xf32>
    %526 = vector.extract_strided_slice %485 {offsets = [0, 8], sizes = [16, 64], strides = [1, 1]} : vector<16x72xf32> to vector<16x64xf32>
    %c23_428 = arith.constant 23 : index
    %c0_429 = arith.constant 0 : index
    %c0_430 = arith.constant 0 : index
    %527 = vector.load %arg2[%c23_428, %c0_429, %c0_430] : memref<27x64x128xf32, #tpu.memory_space<vmem>>, vector<1x64x128xf32>
    %528 = vector.shape_cast %527 : vector<1x64x128xf32> to vector<64x128xf32>
    %cst_431 = arith.constant dense<0.000000e+00> : vector<16x128xf32>
    %529 = tpu.matmul %526, %528, %cst_431 {dimension_numbers = #tpu.dot_dimension_numbers<[1], [0], [0], [1], [0, 0, 1, 1], [], []>} : vector<16x64xf32>, vector<64x128xf32>, vector<16x128xf32> -> vector<16x128xf32>
    %530 = arith.addf %525, %529 : vector<16x128xf32>
    %c0_432 = arith.constant 0 : index
    %c4_433 = arith.constant 4 : index
    %c2_434 = arith.constant 2 : index
    %c0_435 = arith.constant 0 : index
    %531 = vector.load %arg1[%c0_432, %c4_433, %c2_434, %c0_435] : memref<1x10x18x72xf32, #tpu.memory_space<vmem>>, vector<1x1x16x72xf32>
    %532 = vector.shape_cast %531 : vector<1x1x16x72xf32> to vector<16x72xf32>
    %533 = vector.extract_strided_slice %532 {offsets = [0, 0], sizes = [16, 64], strides = [1, 1]} : vector<16x72xf32> to vector<16x64xf32>
    %c6_436 = arith.constant 6 : index
    %c0_437 = arith.constant 0 : index
    %c0_438 = arith.constant 0 : index
    %534 = vector.load %arg2[%c6_436, %c0_437, %c0_438] : memref<27x64x128xf32, #tpu.memory_space<vmem>>, vector<1x64x128xf32>
    %535 = vector.shape_cast %534 : vector<1x64x128xf32> to vector<64x128xf32>
    %cst_439 = arith.constant dense<0.000000e+00> : vector<16x128xf32>
    %536 = tpu.matmul %533, %535, %cst_439 {dimension_numbers = #tpu.dot_dimension_numbers<[1], [0], [0], [1], [0, 0, 1, 1], [], []>} : vector<16x64xf32>, vector<64x128xf32>, vector<16x128xf32> -> vector<16x128xf32>
    %537 = arith.addf %500, %536 : vector<16x128xf32>
    %538 = vector.extract_strided_slice %532 {offsets = [0, 4], sizes = [16, 64], strides = [1, 1]} : vector<16x72xf32> to vector<16x64xf32>
    %c7_440 = arith.constant 7 : index
    %c0_441 = arith.constant 0 : index
    %c0_442 = arith.constant 0 : index
    %539 = vector.load %arg2[%c7_440, %c0_441, %c0_442] : memref<27x64x128xf32, #tpu.memory_space<vmem>>, vector<1x64x128xf32>
    %540 = vector.shape_cast %539 : vector<1x64x128xf32> to vector<64x128xf32>
    %cst_443 = arith.constant dense<0.000000e+00> : vector<16x128xf32>
    %541 = tpu.matmul %538, %540, %cst_443 {dimension_numbers = #tpu.dot_dimension_numbers<[1], [0], [0], [1], [0, 0, 1, 1], [], []>} : vector<16x64xf32>, vector<64x128xf32>, vector<16x128xf32> -> vector<16x128xf32>
    %542 = arith.addf %537, %541 : vector<16x128xf32>
    %543 = vector.extract_strided_slice %532 {offsets = [0, 8], sizes = [16, 64], strides = [1, 1]} : vector<16x72xf32> to vector<16x64xf32>
    %c8_444 = arith.constant 8 : index
    %c0_445 = arith.constant 0 : index
    %c0_446 = arith.constant 0 : index
    %544 = vector.load %arg2[%c8_444, %c0_445, %c0_446] : memref<27x64x128xf32, #tpu.memory_space<vmem>>, vector<1x64x128xf32>
    %545 = vector.shape_cast %544 : vector<1x64x128xf32> to vector<64x128xf32>
    %cst_447 = arith.constant dense<0.000000e+00> : vector<16x128xf32>
    %546 = tpu.matmul %543, %545, %cst_447 {dimension_numbers = #tpu.dot_dimension_numbers<[1], [0], [0], [1], [0, 0, 1, 1], [], []>} : vector<16x64xf32>, vector<64x128xf32>, vector<16x128xf32> -> vector<16x128xf32>
    %547 = arith.addf %542, %546 : vector<16x128xf32>
    %548 = vector.extract_strided_slice %532 {offsets = [0, 0], sizes = [16, 64], strides = [1, 1]} : vector<16x72xf32> to vector<16x64xf32>
    %c15_448 = arith.constant 15 : index
    %c0_449 = arith.constant 0 : index
    %c0_450 = arith.constant 0 : index
    %549 = vector.load %arg2[%c15_448, %c0_449, %c0_450] : memref<27x64x128xf32, #tpu.memory_space<vmem>>, vector<1x64x128xf32>
    %550 = vector.shape_cast %549 : vector<1x64x128xf32> to vector<64x128xf32>
    %cst_451 = arith.constant dense<0.000000e+00> : vector<16x128xf32>
    %551 = tpu.matmul %548, %550, %cst_451 {dimension_numbers = #tpu.dot_dimension_numbers<[1], [0], [0], [1], [0, 0, 1, 1], [], []>} : vector<16x64xf32>, vector<64x128xf32>, vector<16x128xf32> -> vector<16x128xf32>
    %552 = arith.addf %515, %551 : vector<16x128xf32>
    %553 = vector.extract_strided_slice %532 {offsets = [0, 4], sizes = [16, 64], strides = [1, 1]} : vector<16x72xf32> to vector<16x64xf32>
    %c16_452 = arith.constant 16 : index
    %c0_453 = arith.constant 0 : index
    %c0_454 = arith.constant 0 : index
    %554 = vector.load %arg2[%c16_452, %c0_453, %c0_454] : memref<27x64x128xf32, #tpu.memory_space<vmem>>, vector<1x64x128xf32>
    %555 = vector.shape_cast %554 : vector<1x64x128xf32> to vector<64x128xf32>
    %cst_455 = arith.constant dense<0.000000e+00> : vector<16x128xf32>
    %556 = tpu.matmul %553, %555, %cst_455 {dimension_numbers = #tpu.dot_dimension_numbers<[1], [0], [0], [1], [0, 0, 1, 1], [], []>} : vector<16x64xf32>, vector<64x128xf32>, vector<16x128xf32> -> vector<16x128xf32>
    %557 = arith.addf %552, %556 : vector<16x128xf32>
    %558 = vector.extract_strided_slice %532 {offsets = [0, 8], sizes = [16, 64], strides = [1, 1]} : vector<16x72xf32> to vector<16x64xf32>
    %c17_456 = arith.constant 17 : index
    %c0_457 = arith.constant 0 : index
    %c0_458 = arith.constant 0 : index
    %559 = vector.load %arg2[%c17_456, %c0_457, %c0_458] : memref<27x64x128xf32, #tpu.memory_space<vmem>>, vector<1x64x128xf32>
    %560 = vector.shape_cast %559 : vector<1x64x128xf32> to vector<64x128xf32>
    %cst_459 = arith.constant dense<0.000000e+00> : vector<16x128xf32>
    %561 = tpu.matmul %558, %560, %cst_459 {dimension_numbers = #tpu.dot_dimension_numbers<[1], [0], [0], [1], [0, 0, 1, 1], [], []>} : vector<16x64xf32>, vector<64x128xf32>, vector<16x128xf32> -> vector<16x128xf32>
    %562 = arith.addf %557, %561 : vector<16x128xf32>
    %563 = vector.extract_strided_slice %532 {offsets = [0, 0], sizes = [16, 64], strides = [1, 1]} : vector<16x72xf32> to vector<16x64xf32>
    %c24_460 = arith.constant 24 : index
    %c0_461 = arith.constant 0 : index
    %c0_462 = arith.constant 0 : index
    %564 = vector.load %arg2[%c24_460, %c0_461, %c0_462] : memref<27x64x128xf32, #tpu.memory_space<vmem>>, vector<1x64x128xf32>
    %565 = vector.shape_cast %564 : vector<1x64x128xf32> to vector<64x128xf32>
    %cst_463 = arith.constant dense<0.000000e+00> : vector<16x128xf32>
    %566 = tpu.matmul %563, %565, %cst_463 {dimension_numbers = #tpu.dot_dimension_numbers<[1], [0], [0], [1], [0, 0, 1, 1], [], []>} : vector<16x64xf32>, vector<64x128xf32>, vector<16x128xf32> -> vector<16x128xf32>
    %567 = arith.addf %530, %566 : vector<16x128xf32>
    %568 = vector.extract_strided_slice %532 {offsets = [0, 4], sizes = [16, 64], strides = [1, 1]} : vector<16x72xf32> to vector<16x64xf32>
    %c25_464 = arith.constant 25 : index
    %c0_465 = arith.constant 0 : index
    %c0_466 = arith.constant 0 : index
    %569 = vector.load %arg2[%c25_464, %c0_465, %c0_466] : memref<27x64x128xf32, #tpu.memory_space<vmem>>, vector<1x64x128xf32>
    %570 = vector.shape_cast %569 : vector<1x64x128xf32> to vector<64x128xf32>
    %cst_467 = arith.constant dense<0.000000e+00> : vector<16x128xf32>
    %571 = tpu.matmul %568, %570, %cst_467 {dimension_numbers = #tpu.dot_dimension_numbers<[1], [0], [0], [1], [0, 0, 1, 1], [], []>} : vector<16x64xf32>, vector<64x128xf32>, vector<16x128xf32> -> vector<16x128xf32>
    %572 = arith.addf %567, %571 : vector<16x128xf32>
    %573 = vector.extract_strided_slice %532 {offsets = [0, 8], sizes = [16, 64], strides = [1, 1]} : vector<16x72xf32> to vector<16x64xf32>
    %c26_468 = arith.constant 26 : index
    %c0_469 = arith.constant 0 : index
    %c0_470 = arith.constant 0 : index
    %574 = vector.load %arg2[%c26_468, %c0_469, %c0_470] : memref<27x64x128xf32, #tpu.memory_space<vmem>>, vector<1x64x128xf32>
    %575 = vector.shape_cast %574 : vector<1x64x128xf32> to vector<64x128xf32>
    %cst_471 = arith.constant dense<0.000000e+00> : vector<16x128xf32>
    %576 = tpu.matmul %573, %575, %cst_471 {dimension_numbers = #tpu.dot_dimension_numbers<[1], [0], [0], [1], [0, 0, 1, 1], [], []>} : vector<16x64xf32>, vector<64x128xf32>, vector<16x128xf32> -> vector<16x128xf32>
    %577 = arith.addf %572, %576 : vector<16x128xf32>
    %c0_472 = arith.constant 0 : index
    %c5_473 = arith.constant 5 : index
    %c0_474 = arith.constant 0 : index
    %c0_475 = arith.constant 0 : index
    %578 = vector.load %arg1[%c0_472, %c5_473, %c0_474, %c0_475] : memref<1x10x18x72xf32, #tpu.memory_space<vmem>>, vector<1x1x16x72xf32>
    %579 = vector.shape_cast %578 : vector<1x1x16x72xf32> to vector<16x72xf32>
    %580 = vector.extract_strided_slice %579 {offsets = [0, 0], sizes = [16, 64], strides = [1, 1]} : vector<16x72xf32> to vector<16x64xf32>
    %c0_476 = arith.constant 0 : index
    %c0_477 = arith.constant 0 : index
    %c0_478 = arith.constant 0 : index
    %581 = vector.load %arg2[%c0_476, %c0_477, %c0_478] : memref<27x64x128xf32, #tpu.memory_space<vmem>>, vector<1x64x128xf32>
    %582 = vector.shape_cast %581 : vector<1x64x128xf32> to vector<64x128xf32>
    %cst_479 = arith.constant dense<0.000000e+00> : vector<16x128xf32>
    %583 = tpu.matmul %580, %582, %cst_479 {dimension_numbers = #tpu.dot_dimension_numbers<[1], [0], [0], [1], [0, 0, 1, 1], [], []>} : vector<16x64xf32>, vector<64x128xf32>, vector<16x128xf32> -> vector<16x128xf32>
    %584 = arith.addf %5, %583 : vector<16x128xf32>
    %585 = vector.extract_strided_slice %579 {offsets = [0, 4], sizes = [16, 64], strides = [1, 1]} : vector<16x72xf32> to vector<16x64xf32>
    %c1_480 = arith.constant 1 : index
    %c0_481 = arith.constant 0 : index
    %c0_482 = arith.constant 0 : index
    %586 = vector.load %arg2[%c1_480, %c0_481, %c0_482] : memref<27x64x128xf32, #tpu.memory_space<vmem>>, vector<1x64x128xf32>
    %587 = vector.shape_cast %586 : vector<1x64x128xf32> to vector<64x128xf32>
    %cst_483 = arith.constant dense<0.000000e+00> : vector<16x128xf32>
    %588 = tpu.matmul %585, %587, %cst_483 {dimension_numbers = #tpu.dot_dimension_numbers<[1], [0], [0], [1], [0, 0, 1, 1], [], []>} : vector<16x64xf32>, vector<64x128xf32>, vector<16x128xf32> -> vector<16x128xf32>
    %589 = arith.addf %584, %588 : vector<16x128xf32>
    %590 = vector.extract_strided_slice %579 {offsets = [0, 8], sizes = [16, 64], strides = [1, 1]} : vector<16x72xf32> to vector<16x64xf32>
    %c2_484 = arith.constant 2 : index
    %c0_485 = arith.constant 0 : index
    %c0_486 = arith.constant 0 : index
    %591 = vector.load %arg2[%c2_484, %c0_485, %c0_486] : memref<27x64x128xf32, #tpu.memory_space<vmem>>, vector<1x64x128xf32>
    %592 = vector.shape_cast %591 : vector<1x64x128xf32> to vector<64x128xf32>
    %cst_487 = arith.constant dense<0.000000e+00> : vector<16x128xf32>
    %593 = tpu.matmul %590, %592, %cst_487 {dimension_numbers = #tpu.dot_dimension_numbers<[1], [0], [0], [1], [0, 0, 1, 1], [], []>} : vector<16x64xf32>, vector<64x128xf32>, vector<16x128xf32> -> vector<16x128xf32>
    %594 = arith.addf %589, %593 : vector<16x128xf32>
    %595 = vector.extract_strided_slice %579 {offsets = [0, 0], sizes = [16, 64], strides = [1, 1]} : vector<16x72xf32> to vector<16x64xf32>
    %c9_488 = arith.constant 9 : index
    %c0_489 = arith.constant 0 : index
    %c0_490 = arith.constant 0 : index
    %596 = vector.load %arg2[%c9_488, %c0_489, %c0_490] : memref<27x64x128xf32, #tpu.memory_space<vmem>>, vector<1x64x128xf32>
    %597 = vector.shape_cast %596 : vector<1x64x128xf32> to vector<64x128xf32>
    %cst_491 = arith.constant dense<0.000000e+00> : vector<16x128xf32>
    %598 = tpu.matmul %595, %597, %cst_491 {dimension_numbers = #tpu.dot_dimension_numbers<[1], [0], [0], [1], [0, 0, 1, 1], [], []>} : vector<16x64xf32>, vector<64x128xf32>, vector<16x128xf32> -> vector<16x128xf32>
    %599 = arith.addf %547, %598 : vector<16x128xf32>
    %600 = vector.extract_strided_slice %579 {offsets = [0, 4], sizes = [16, 64], strides = [1, 1]} : vector<16x72xf32> to vector<16x64xf32>
    %c10_492 = arith.constant 10 : index
    %c0_493 = arith.constant 0 : index
    %c0_494 = arith.constant 0 : index
    %601 = vector.load %arg2[%c10_492, %c0_493, %c0_494] : memref<27x64x128xf32, #tpu.memory_space<vmem>>, vector<1x64x128xf32>
    %602 = vector.shape_cast %601 : vector<1x64x128xf32> to vector<64x128xf32>
    %cst_495 = arith.constant dense<0.000000e+00> : vector<16x128xf32>
    %603 = tpu.matmul %600, %602, %cst_495 {dimension_numbers = #tpu.dot_dimension_numbers<[1], [0], [0], [1], [0, 0, 1, 1], [], []>} : vector<16x64xf32>, vector<64x128xf32>, vector<16x128xf32> -> vector<16x128xf32>
    %604 = arith.addf %599, %603 : vector<16x128xf32>
    %605 = vector.extract_strided_slice %579 {offsets = [0, 8], sizes = [16, 64], strides = [1, 1]} : vector<16x72xf32> to vector<16x64xf32>
    %c11_496 = arith.constant 11 : index
    %c0_497 = arith.constant 0 : index
    %c0_498 = arith.constant 0 : index
    %606 = vector.load %arg2[%c11_496, %c0_497, %c0_498] : memref<27x64x128xf32, #tpu.memory_space<vmem>>, vector<1x64x128xf32>
    %607 = vector.shape_cast %606 : vector<1x64x128xf32> to vector<64x128xf32>
    %cst_499 = arith.constant dense<0.000000e+00> : vector<16x128xf32>
    %608 = tpu.matmul %605, %607, %cst_499 {dimension_numbers = #tpu.dot_dimension_numbers<[1], [0], [0], [1], [0, 0, 1, 1], [], []>} : vector<16x64xf32>, vector<64x128xf32>, vector<16x128xf32> -> vector<16x128xf32>
    %609 = arith.addf %604, %608 : vector<16x128xf32>
    %610 = vector.extract_strided_slice %579 {offsets = [0, 0], sizes = [16, 64], strides = [1, 1]} : vector<16x72xf32> to vector<16x64xf32>
    %c18_500 = arith.constant 18 : index
    %c0_501 = arith.constant 0 : index
    %c0_502 = arith.constant 0 : index
    %611 = vector.load %arg2[%c18_500, %c0_501, %c0_502] : memref<27x64x128xf32, #tpu.memory_space<vmem>>, vector<1x64x128xf32>
    %612 = vector.shape_cast %611 : vector<1x64x128xf32> to vector<64x128xf32>
    %cst_503 = arith.constant dense<0.000000e+00> : vector<16x128xf32>
    %613 = tpu.matmul %610, %612, %cst_503 {dimension_numbers = #tpu.dot_dimension_numbers<[1], [0], [0], [1], [0, 0, 1, 1], [], []>} : vector<16x64xf32>, vector<64x128xf32>, vector<16x128xf32> -> vector<16x128xf32>
    %614 = arith.addf %562, %613 : vector<16x128xf32>
    %615 = vector.extract_strided_slice %579 {offsets = [0, 4], sizes = [16, 64], strides = [1, 1]} : vector<16x72xf32> to vector<16x64xf32>
    %c19_504 = arith.constant 19 : index
    %c0_505 = arith.constant 0 : index
    %c0_506 = arith.constant 0 : index
    %616 = vector.load %arg2[%c19_504, %c0_505, %c0_506] : memref<27x64x128xf32, #tpu.memory_space<vmem>>, vector<1x64x128xf32>
    %617 = vector.shape_cast %616 : vector<1x64x128xf32> to vector<64x128xf32>
    %cst_507 = arith.constant dense<0.000000e+00> : vector<16x128xf32>
    %618 = tpu.matmul %615, %617, %cst_507 {dimension_numbers = #tpu.dot_dimension_numbers<[1], [0], [0], [1], [0, 0, 1, 1], [], []>} : vector<16x64xf32>, vector<64x128xf32>, vector<16x128xf32> -> vector<16x128xf32>
    %619 = arith.addf %614, %618 : vector<16x128xf32>
    %620 = vector.extract_strided_slice %579 {offsets = [0, 8], sizes = [16, 64], strides = [1, 1]} : vector<16x72xf32> to vector<16x64xf32>
    %c20_508 = arith.constant 20 : index
    %c0_509 = arith.constant 0 : index
    %c0_510 = arith.constant 0 : index
    %621 = vector.load %arg2[%c20_508, %c0_509, %c0_510] : memref<27x64x128xf32, #tpu.memory_space<vmem>>, vector<1x64x128xf32>
    %622 = vector.shape_cast %621 : vector<1x64x128xf32> to vector<64x128xf32>
    %cst_511 = arith.constant dense<0.000000e+00> : vector<16x128xf32>
    %623 = tpu.matmul %620, %622, %cst_511 {dimension_numbers = #tpu.dot_dimension_numbers<[1], [0], [0], [1], [0, 0, 1, 1], [], []>} : vector<16x64xf32>, vector<64x128xf32>, vector<16x128xf32> -> vector<16x128xf32>
    %624 = arith.addf %619, %623 : vector<16x128xf32>
    %c0_512 = arith.constant 0 : index
    %c5_513 = arith.constant 5 : index
    %c1_514 = arith.constant 1 : index
    %c0_515 = arith.constant 0 : index
    %625 = vector.load %arg1[%c0_512, %c5_513, %c1_514, %c0_515] : memref<1x10x18x72xf32, #tpu.memory_space<vmem>>, vector<1x1x16x72xf32>
    %626 = vector.shape_cast %625 : vector<1x1x16x72xf32> to vector<16x72xf32>
    %627 = vector.extract_strided_slice %626 {offsets = [0, 0], sizes = [16, 64], strides = [1, 1]} : vector<16x72xf32> to vector<16x64xf32>
    %c3_516 = arith.constant 3 : index
    %c0_517 = arith.constant 0 : index
    %c0_518 = arith.constant 0 : index
    %628 = vector.load %arg2[%c3_516, %c0_517, %c0_518] : memref<27x64x128xf32, #tpu.memory_space<vmem>>, vector<1x64x128xf32>
    %629 = vector.shape_cast %628 : vector<1x64x128xf32> to vector<64x128xf32>
    %cst_519 = arith.constant dense<0.000000e+00> : vector<16x128xf32>
    %630 = tpu.matmul %627, %629, %cst_519 {dimension_numbers = #tpu.dot_dimension_numbers<[1], [0], [0], [1], [0, 0, 1, 1], [], []>} : vector<16x64xf32>, vector<64x128xf32>, vector<16x128xf32> -> vector<16x128xf32>
    %631 = arith.addf %594, %630 : vector<16x128xf32>
    %632 = vector.extract_strided_slice %626 {offsets = [0, 4], sizes = [16, 64], strides = [1, 1]} : vector<16x72xf32> to vector<16x64xf32>
    %c4_520 = arith.constant 4 : index
    %c0_521 = arith.constant 0 : index
    %c0_522 = arith.constant 0 : index
    %633 = vector.load %arg2[%c4_520, %c0_521, %c0_522] : memref<27x64x128xf32, #tpu.memory_space<vmem>>, vector<1x64x128xf32>
    %634 = vector.shape_cast %633 : vector<1x64x128xf32> to vector<64x128xf32>
    %cst_523 = arith.constant dense<0.000000e+00> : vector<16x128xf32>
    %635 = tpu.matmul %632, %634, %cst_523 {dimension_numbers = #tpu.dot_dimension_numbers<[1], [0], [0], [1], [0, 0, 1, 1], [], []>} : vector<16x64xf32>, vector<64x128xf32>, vector<16x128xf32> -> vector<16x128xf32>
    %636 = arith.addf %631, %635 : vector<16x128xf32>
    %637 = vector.extract_strided_slice %626 {offsets = [0, 8], sizes = [16, 64], strides = [1, 1]} : vector<16x72xf32> to vector<16x64xf32>
    %c5_524 = arith.constant 5 : index
    %c0_525 = arith.constant 0 : index
    %c0_526 = arith.constant 0 : index
    %638 = vector.load %arg2[%c5_524, %c0_525, %c0_526] : memref<27x64x128xf32, #tpu.memory_space<vmem>>, vector<1x64x128xf32>
    %639 = vector.shape_cast %638 : vector<1x64x128xf32> to vector<64x128xf32>
    %cst_527 = arith.constant dense<0.000000e+00> : vector<16x128xf32>
    %640 = tpu.matmul %637, %639, %cst_527 {dimension_numbers = #tpu.dot_dimension_numbers<[1], [0], [0], [1], [0, 0, 1, 1], [], []>} : vector<16x64xf32>, vector<64x128xf32>, vector<16x128xf32> -> vector<16x128xf32>
    %641 = arith.addf %636, %640 : vector<16x128xf32>
    %642 = vector.extract_strided_slice %626 {offsets = [0, 0], sizes = [16, 64], strides = [1, 1]} : vector<16x72xf32> to vector<16x64xf32>
    %c12_528 = arith.constant 12 : index
    %c0_529 = arith.constant 0 : index
    %c0_530 = arith.constant 0 : index
    %643 = vector.load %arg2[%c12_528, %c0_529, %c0_530] : memref<27x64x128xf32, #tpu.memory_space<vmem>>, vector<1x64x128xf32>
    %644 = vector.shape_cast %643 : vector<1x64x128xf32> to vector<64x128xf32>
    %cst_531 = arith.constant dense<0.000000e+00> : vector<16x128xf32>
    %645 = tpu.matmul %642, %644, %cst_531 {dimension_numbers = #tpu.dot_dimension_numbers<[1], [0], [0], [1], [0, 0, 1, 1], [], []>} : vector<16x64xf32>, vector<64x128xf32>, vector<16x128xf32> -> vector<16x128xf32>
    %646 = arith.addf %609, %645 : vector<16x128xf32>
    %647 = vector.extract_strided_slice %626 {offsets = [0, 4], sizes = [16, 64], strides = [1, 1]} : vector<16x72xf32> to vector<16x64xf32>
    %c13_532 = arith.constant 13 : index
    %c0_533 = arith.constant 0 : index
    %c0_534 = arith.constant 0 : index
    %648 = vector.load %arg2[%c13_532, %c0_533, %c0_534] : memref<27x64x128xf32, #tpu.memory_space<vmem>>, vector<1x64x128xf32>
    %649 = vector.shape_cast %648 : vector<1x64x128xf32> to vector<64x128xf32>
    %cst_535 = arith.constant dense<0.000000e+00> : vector<16x128xf32>
    %650 = tpu.matmul %647, %649, %cst_535 {dimension_numbers = #tpu.dot_dimension_numbers<[1], [0], [0], [1], [0, 0, 1, 1], [], []>} : vector<16x64xf32>, vector<64x128xf32>, vector<16x128xf32> -> vector<16x128xf32>
    %651 = arith.addf %646, %650 : vector<16x128xf32>
    %652 = vector.extract_strided_slice %626 {offsets = [0, 8], sizes = [16, 64], strides = [1, 1]} : vector<16x72xf32> to vector<16x64xf32>
    %c14_536 = arith.constant 14 : index
    %c0_537 = arith.constant 0 : index
    %c0_538 = arith.constant 0 : index
    %653 = vector.load %arg2[%c14_536, %c0_537, %c0_538] : memref<27x64x128xf32, #tpu.memory_space<vmem>>, vector<1x64x128xf32>
    %654 = vector.shape_cast %653 : vector<1x64x128xf32> to vector<64x128xf32>
    %cst_539 = arith.constant dense<0.000000e+00> : vector<16x128xf32>
    %655 = tpu.matmul %652, %654, %cst_539 {dimension_numbers = #tpu.dot_dimension_numbers<[1], [0], [0], [1], [0, 0, 1, 1], [], []>} : vector<16x64xf32>, vector<64x128xf32>, vector<16x128xf32> -> vector<16x128xf32>
    %656 = arith.addf %651, %655 : vector<16x128xf32>
    %657 = vector.extract_strided_slice %626 {offsets = [0, 0], sizes = [16, 64], strides = [1, 1]} : vector<16x72xf32> to vector<16x64xf32>
    %c21_540 = arith.constant 21 : index
    %c0_541 = arith.constant 0 : index
    %c0_542 = arith.constant 0 : index
    %658 = vector.load %arg2[%c21_540, %c0_541, %c0_542] : memref<27x64x128xf32, #tpu.memory_space<vmem>>, vector<1x64x128xf32>
    %659 = vector.shape_cast %658 : vector<1x64x128xf32> to vector<64x128xf32>
    %cst_543 = arith.constant dense<0.000000e+00> : vector<16x128xf32>
    %660 = tpu.matmul %657, %659, %cst_543 {dimension_numbers = #tpu.dot_dimension_numbers<[1], [0], [0], [1], [0, 0, 1, 1], [], []>} : vector<16x64xf32>, vector<64x128xf32>, vector<16x128xf32> -> vector<16x128xf32>
    %661 = arith.addf %624, %660 : vector<16x128xf32>
    %662 = vector.extract_strided_slice %626 {offsets = [0, 4], sizes = [16, 64], strides = [1, 1]} : vector<16x72xf32> to vector<16x64xf32>
    %c22_544 = arith.constant 22 : index
    %c0_545 = arith.constant 0 : index
    %c0_546 = arith.constant 0 : index
    %663 = vector.load %arg2[%c22_544, %c0_545, %c0_546] : memref<27x64x128xf32, #tpu.memory_space<vmem>>, vector<1x64x128xf32>
    %664 = vector.shape_cast %663 : vector<1x64x128xf32> to vector<64x128xf32>
    %cst_547 = arith.constant dense<0.000000e+00> : vector<16x128xf32>
    %665 = tpu.matmul %662, %664, %cst_547 {dimension_numbers = #tpu.dot_dimension_numbers<[1], [0], [0], [1], [0, 0, 1, 1], [], []>} : vector<16x64xf32>, vector<64x128xf32>, vector<16x128xf32> -> vector<16x128xf32>
    %666 = arith.addf %661, %665 : vector<16x128xf32>
    %667 = vector.extract_strided_slice %626 {offsets = [0, 8], sizes = [16, 64], strides = [1, 1]} : vector<16x72xf32> to vector<16x64xf32>
    %c23_548 = arith.constant 23 : index
    %c0_549 = arith.constant 0 : index
    %c0_550 = arith.constant 0 : index
    %668 = vector.load %arg2[%c23_548, %c0_549, %c0_550] : memref<27x64x128xf32, #tpu.memory_space<vmem>>, vector<1x64x128xf32>
    %669 = vector.shape_cast %668 : vector<1x64x128xf32> to vector<64x128xf32>
    %cst_551 = arith.constant dense<0.000000e+00> : vector<16x128xf32>
    %670 = tpu.matmul %667, %669, %cst_551 {dimension_numbers = #tpu.dot_dimension_numbers<[1], [0], [0], [1], [0, 0, 1, 1], [], []>} : vector<16x64xf32>, vector<64x128xf32>, vector<16x128xf32> -> vector<16x128xf32>
    %671 = arith.addf %666, %670 : vector<16x128xf32>
    %c0_552 = arith.constant 0 : index
    %c5_553 = arith.constant 5 : index
    %c2_554 = arith.constant 2 : index
    %c0_555 = arith.constant 0 : index
    %672 = vector.load %arg1[%c0_552, %c5_553, %c2_554, %c0_555] : memref<1x10x18x72xf32, #tpu.memory_space<vmem>>, vector<1x1x16x72xf32>
    %673 = vector.shape_cast %672 : vector<1x1x16x72xf32> to vector<16x72xf32>
    %674 = vector.extract_strided_slice %673 {offsets = [0, 0], sizes = [16, 64], strides = [1, 1]} : vector<16x72xf32> to vector<16x64xf32>
    %c6_556 = arith.constant 6 : index
    %c0_557 = arith.constant 0 : index
    %c0_558 = arith.constant 0 : index
    %675 = vector.load %arg2[%c6_556, %c0_557, %c0_558] : memref<27x64x128xf32, #tpu.memory_space<vmem>>, vector<1x64x128xf32>
    %676 = vector.shape_cast %675 : vector<1x64x128xf32> to vector<64x128xf32>
    %cst_559 = arith.constant dense<0.000000e+00> : vector<16x128xf32>
    %677 = tpu.matmul %674, %676, %cst_559 {dimension_numbers = #tpu.dot_dimension_numbers<[1], [0], [0], [1], [0, 0, 1, 1], [], []>} : vector<16x64xf32>, vector<64x128xf32>, vector<16x128xf32> -> vector<16x128xf32>
    %678 = arith.addf %641, %677 : vector<16x128xf32>
    %679 = vector.extract_strided_slice %673 {offsets = [0, 4], sizes = [16, 64], strides = [1, 1]} : vector<16x72xf32> to vector<16x64xf32>
    %c7_560 = arith.constant 7 : index
    %c0_561 = arith.constant 0 : index
    %c0_562 = arith.constant 0 : index
    %680 = vector.load %arg2[%c7_560, %c0_561, %c0_562] : memref<27x64x128xf32, #tpu.memory_space<vmem>>, vector<1x64x128xf32>
    %681 = vector.shape_cast %680 : vector<1x64x128xf32> to vector<64x128xf32>
    %cst_563 = arith.constant dense<0.000000e+00> : vector<16x128xf32>
    %682 = tpu.matmul %679, %681, %cst_563 {dimension_numbers = #tpu.dot_dimension_numbers<[1], [0], [0], [1], [0, 0, 1, 1], [], []>} : vector<16x64xf32>, vector<64x128xf32>, vector<16x128xf32> -> vector<16x128xf32>
    %683 = arith.addf %678, %682 : vector<16x128xf32>
    %684 = vector.extract_strided_slice %673 {offsets = [0, 8], sizes = [16, 64], strides = [1, 1]} : vector<16x72xf32> to vector<16x64xf32>
    %c8_564 = arith.constant 8 : index
    %c0_565 = arith.constant 0 : index
    %c0_566 = arith.constant 0 : index
    %685 = vector.load %arg2[%c8_564, %c0_565, %c0_566] : memref<27x64x128xf32, #tpu.memory_space<vmem>>, vector<1x64x128xf32>
    %686 = vector.shape_cast %685 : vector<1x64x128xf32> to vector<64x128xf32>
    %cst_567 = arith.constant dense<0.000000e+00> : vector<16x128xf32>
    %687 = tpu.matmul %684, %686, %cst_567 {dimension_numbers = #tpu.dot_dimension_numbers<[1], [0], [0], [1], [0, 0, 1, 1], [], []>} : vector<16x64xf32>, vector<64x128xf32>, vector<16x128xf32> -> vector<16x128xf32>
    %688 = arith.addf %683, %687 : vector<16x128xf32>
    %689 = vector.extract_strided_slice %673 {offsets = [0, 0], sizes = [16, 64], strides = [1, 1]} : vector<16x72xf32> to vector<16x64xf32>
    %c15_568 = arith.constant 15 : index
    %c0_569 = arith.constant 0 : index
    %c0_570 = arith.constant 0 : index
    %690 = vector.load %arg2[%c15_568, %c0_569, %c0_570] : memref<27x64x128xf32, #tpu.memory_space<vmem>>, vector<1x64x128xf32>
    %691 = vector.shape_cast %690 : vector<1x64x128xf32> to vector<64x128xf32>
    %cst_571 = arith.constant dense<0.000000e+00> : vector<16x128xf32>
    %692 = tpu.matmul %689, %691, %cst_571 {dimension_numbers = #tpu.dot_dimension_numbers<[1], [0], [0], [1], [0, 0, 1, 1], [], []>} : vector<16x64xf32>, vector<64x128xf32>, vector<16x128xf32> -> vector<16x128xf32>
    %693 = arith.addf %656, %692 : vector<16x128xf32>
    %694 = vector.extract_strided_slice %673 {offsets = [0, 4], sizes = [16, 64], strides = [1, 1]} : vector<16x72xf32> to vector<16x64xf32>
    %c16_572 = arith.constant 16 : index
    %c0_573 = arith.constant 0 : index
    %c0_574 = arith.constant 0 : index
    %695 = vector.load %arg2[%c16_572, %c0_573, %c0_574] : memref<27x64x128xf32, #tpu.memory_space<vmem>>, vector<1x64x128xf32>
    %696 = vector.shape_cast %695 : vector<1x64x128xf32> to vector<64x128xf32>
    %cst_575 = arith.constant dense<0.000000e+00> : vector<16x128xf32>
    %697 = tpu.matmul %694, %696, %cst_575 {dimension_numbers = #tpu.dot_dimension_numbers<[1], [0], [0], [1], [0, 0, 1, 1], [], []>} : vector<16x64xf32>, vector<64x128xf32>, vector<16x128xf32> -> vector<16x128xf32>
    %698 = arith.addf %693, %697 : vector<16x128xf32>
    %699 = vector.extract_strided_slice %673 {offsets = [0, 8], sizes = [16, 64], strides = [1, 1]} : vector<16x72xf32> to vector<16x64xf32>
    %c17_576 = arith.constant 17 : index
    %c0_577 = arith.constant 0 : index
    %c0_578 = arith.constant 0 : index
    %700 = vector.load %arg2[%c17_576, %c0_577, %c0_578] : memref<27x64x128xf32, #tpu.memory_space<vmem>>, vector<1x64x128xf32>
    %701 = vector.shape_cast %700 : vector<1x64x128xf32> to vector<64x128xf32>
    %cst_579 = arith.constant dense<0.000000e+00> : vector<16x128xf32>
    %702 = tpu.matmul %699, %701, %cst_579 {dimension_numbers = #tpu.dot_dimension_numbers<[1], [0], [0], [1], [0, 0, 1, 1], [], []>} : vector<16x64xf32>, vector<64x128xf32>, vector<16x128xf32> -> vector<16x128xf32>
    %703 = arith.addf %698, %702 : vector<16x128xf32>
    %704 = vector.extract_strided_slice %673 {offsets = [0, 0], sizes = [16, 64], strides = [1, 1]} : vector<16x72xf32> to vector<16x64xf32>
    %c24_580 = arith.constant 24 : index
    %c0_581 = arith.constant 0 : index
    %c0_582 = arith.constant 0 : index
    %705 = vector.load %arg2[%c24_580, %c0_581, %c0_582] : memref<27x64x128xf32, #tpu.memory_space<vmem>>, vector<1x64x128xf32>
    %706 = vector.shape_cast %705 : vector<1x64x128xf32> to vector<64x128xf32>
    %cst_583 = arith.constant dense<0.000000e+00> : vector<16x128xf32>
    %707 = tpu.matmul %704, %706, %cst_583 {dimension_numbers = #tpu.dot_dimension_numbers<[1], [0], [0], [1], [0, 0, 1, 1], [], []>} : vector<16x64xf32>, vector<64x128xf32>, vector<16x128xf32> -> vector<16x128xf32>
    %708 = arith.addf %671, %707 : vector<16x128xf32>
    %709 = vector.extract_strided_slice %673 {offsets = [0, 4], sizes = [16, 64], strides = [1, 1]} : vector<16x72xf32> to vector<16x64xf32>
    %c25_584 = arith.constant 25 : index
    %c0_585 = arith.constant 0 : index
    %c0_586 = arith.constant 0 : index
    %710 = vector.load %arg2[%c25_584, %c0_585, %c0_586] : memref<27x64x128xf32, #tpu.memory_space<vmem>>, vector<1x64x128xf32>
    %711 = vector.shape_cast %710 : vector<1x64x128xf32> to vector<64x128xf32>
    %cst_587 = arith.constant dense<0.000000e+00> : vector<16x128xf32>
    %712 = tpu.matmul %709, %711, %cst_587 {dimension_numbers = #tpu.dot_dimension_numbers<[1], [0], [0], [1], [0, 0, 1, 1], [], []>} : vector<16x64xf32>, vector<64x128xf32>, vector<16x128xf32> -> vector<16x128xf32>
    %713 = arith.addf %708, %712 : vector<16x128xf32>
    %714 = vector.extract_strided_slice %673 {offsets = [0, 8], sizes = [16, 64], strides = [1, 1]} : vector<16x72xf32> to vector<16x64xf32>
    %c26_588 = arith.constant 26 : index
    %c0_589 = arith.constant 0 : index
    %c0_590 = arith.constant 0 : index
    %715 = vector.load %arg2[%c26_588, %c0_589, %c0_590] : memref<27x64x128xf32, #tpu.memory_space<vmem>>, vector<1x64x128xf32>
    %716 = vector.shape_cast %715 : vector<1x64x128xf32> to vector<64x128xf32>
    %cst_591 = arith.constant dense<0.000000e+00> : vector<16x128xf32>
    %717 = tpu.matmul %714, %716, %cst_591 {dimension_numbers = #tpu.dot_dimension_numbers<[1], [0], [0], [1], [0, 0, 1, 1], [], []>} : vector<16x64xf32>, vector<64x128xf32>, vector<16x128xf32> -> vector<16x128xf32>
    %718 = arith.addf %713, %717 : vector<16x128xf32>
    %c0_592 = arith.constant 0 : index
    %c6_593 = arith.constant 6 : index
    %c0_594 = arith.constant 0 : index
    %c0_595 = arith.constant 0 : index
    %719 = vector.load %arg1[%c0_592, %c6_593, %c0_594, %c0_595] : memref<1x10x18x72xf32, #tpu.memory_space<vmem>>, vector<1x1x16x72xf32>
    %720 = vector.shape_cast %719 : vector<1x1x16x72xf32> to vector<16x72xf32>
    %721 = vector.extract_strided_slice %720 {offsets = [0, 0], sizes = [16, 64], strides = [1, 1]} : vector<16x72xf32> to vector<16x64xf32>
    %c0_596 = arith.constant 0 : index
    %c0_597 = arith.constant 0 : index
    %c0_598 = arith.constant 0 : index
    %722 = vector.load %arg2[%c0_596, %c0_597, %c0_598] : memref<27x64x128xf32, #tpu.memory_space<vmem>>, vector<1x64x128xf32>
    %723 = vector.shape_cast %722 : vector<1x64x128xf32> to vector<64x128xf32>
    %cst_599 = arith.constant dense<0.000000e+00> : vector<16x128xf32>
    %724 = tpu.matmul %721, %723, %cst_599 {dimension_numbers = #tpu.dot_dimension_numbers<[1], [0], [0], [1], [0, 0, 1, 1], [], []>} : vector<16x64xf32>, vector<64x128xf32>, vector<16x128xf32> -> vector<16x128xf32>
    %725 = arith.addf %6, %724 : vector<16x128xf32>
    %726 = vector.extract_strided_slice %720 {offsets = [0, 4], sizes = [16, 64], strides = [1, 1]} : vector<16x72xf32> to vector<16x64xf32>
    %c1_600 = arith.constant 1 : index
    %c0_601 = arith.constant 0 : index
    %c0_602 = arith.constant 0 : index
    %727 = vector.load %arg2[%c1_600, %c0_601, %c0_602] : memref<27x64x128xf32, #tpu.memory_space<vmem>>, vector<1x64x128xf32>
    %728 = vector.shape_cast %727 : vector<1x64x128xf32> to vector<64x128xf32>
    %cst_603 = arith.constant dense<0.000000e+00> : vector<16x128xf32>
    %729 = tpu.matmul %726, %728, %cst_603 {dimension_numbers = #tpu.dot_dimension_numbers<[1], [0], [0], [1], [0, 0, 1, 1], [], []>} : vector<16x64xf32>, vector<64x128xf32>, vector<16x128xf32> -> vector<16x128xf32>
    %730 = arith.addf %725, %729 : vector<16x128xf32>
    %731 = vector.extract_strided_slice %720 {offsets = [0, 8], sizes = [16, 64], strides = [1, 1]} : vector<16x72xf32> to vector<16x64xf32>
    %c2_604 = arith.constant 2 : index
    %c0_605 = arith.constant 0 : index
    %c0_606 = arith.constant 0 : index
    %732 = vector.load %arg2[%c2_604, %c0_605, %c0_606] : memref<27x64x128xf32, #tpu.memory_space<vmem>>, vector<1x64x128xf32>
    %733 = vector.shape_cast %732 : vector<1x64x128xf32> to vector<64x128xf32>
    %cst_607 = arith.constant dense<0.000000e+00> : vector<16x128xf32>
    %734 = tpu.matmul %731, %733, %cst_607 {dimension_numbers = #tpu.dot_dimension_numbers<[1], [0], [0], [1], [0, 0, 1, 1], [], []>} : vector<16x64xf32>, vector<64x128xf32>, vector<16x128xf32> -> vector<16x128xf32>
    %735 = arith.addf %730, %734 : vector<16x128xf32>
    %736 = vector.extract_strided_slice %720 {offsets = [0, 0], sizes = [16, 64], strides = [1, 1]} : vector<16x72xf32> to vector<16x64xf32>
    %c9_608 = arith.constant 9 : index
    %c0_609 = arith.constant 0 : index
    %c0_610 = arith.constant 0 : index
    %737 = vector.load %arg2[%c9_608, %c0_609, %c0_610] : memref<27x64x128xf32, #tpu.memory_space<vmem>>, vector<1x64x128xf32>
    %738 = vector.shape_cast %737 : vector<1x64x128xf32> to vector<64x128xf32>
    %cst_611 = arith.constant dense<0.000000e+00> : vector<16x128xf32>
    %739 = tpu.matmul %736, %738, %cst_611 {dimension_numbers = #tpu.dot_dimension_numbers<[1], [0], [0], [1], [0, 0, 1, 1], [], []>} : vector<16x64xf32>, vector<64x128xf32>, vector<16x128xf32> -> vector<16x128xf32>
    %740 = arith.addf %688, %739 : vector<16x128xf32>
    %741 = vector.extract_strided_slice %720 {offsets = [0, 4], sizes = [16, 64], strides = [1, 1]} : vector<16x72xf32> to vector<16x64xf32>
    %c10_612 = arith.constant 10 : index
    %c0_613 = arith.constant 0 : index
    %c0_614 = arith.constant 0 : index
    %742 = vector.load %arg2[%c10_612, %c0_613, %c0_614] : memref<27x64x128xf32, #tpu.memory_space<vmem>>, vector<1x64x128xf32>
    %743 = vector.shape_cast %742 : vector<1x64x128xf32> to vector<64x128xf32>
    %cst_615 = arith.constant dense<0.000000e+00> : vector<16x128xf32>
    %744 = tpu.matmul %741, %743, %cst_615 {dimension_numbers = #tpu.dot_dimension_numbers<[1], [0], [0], [1], [0, 0, 1, 1], [], []>} : vector<16x64xf32>, vector<64x128xf32>, vector<16x128xf32> -> vector<16x128xf32>
    %745 = arith.addf %740, %744 : vector<16x128xf32>
    %746 = vector.extract_strided_slice %720 {offsets = [0, 8], sizes = [16, 64], strides = [1, 1]} : vector<16x72xf32> to vector<16x64xf32>
    %c11_616 = arith.constant 11 : index
    %c0_617 = arith.constant 0 : index
    %c0_618 = arith.constant 0 : index
    %747 = vector.load %arg2[%c11_616, %c0_617, %c0_618] : memref<27x64x128xf32, #tpu.memory_space<vmem>>, vector<1x64x128xf32>
    %748 = vector.shape_cast %747 : vector<1x64x128xf32> to vector<64x128xf32>
    %cst_619 = arith.constant dense<0.000000e+00> : vector<16x128xf32>
    %749 = tpu.matmul %746, %748, %cst_619 {dimension_numbers = #tpu.dot_dimension_numbers<[1], [0], [0], [1], [0, 0, 1, 1], [], []>} : vector<16x64xf32>, vector<64x128xf32>, vector<16x128xf32> -> vector<16x128xf32>
    %750 = arith.addf %745, %749 : vector<16x128xf32>
    %751 = vector.extract_strided_slice %720 {offsets = [0, 0], sizes = [16, 64], strides = [1, 1]} : vector<16x72xf32> to vector<16x64xf32>
    %c18_620 = arith.constant 18 : index
    %c0_621 = arith.constant 0 : index
    %c0_622 = arith.constant 0 : index
    %752 = vector.load %arg2[%c18_620, %c0_621, %c0_622] : memref<27x64x128xf32, #tpu.memory_space<vmem>>, vector<1x64x128xf32>
    %753 = vector.shape_cast %752 : vector<1x64x128xf32> to vector<64x128xf32>
    %cst_623 = arith.constant dense<0.000000e+00> : vector<16x128xf32>
    %754 = tpu.matmul %751, %753, %cst_623 {dimension_numbers = #tpu.dot_dimension_numbers<[1], [0], [0], [1], [0, 0, 1, 1], [], []>} : vector<16x64xf32>, vector<64x128xf32>, vector<16x128xf32> -> vector<16x128xf32>
    %755 = arith.addf %703, %754 : vector<16x128xf32>
    %756 = vector.extract_strided_slice %720 {offsets = [0, 4], sizes = [16, 64], strides = [1, 1]} : vector<16x72xf32> to vector<16x64xf32>
    %c19_624 = arith.constant 19 : index
    %c0_625 = arith.constant 0 : index
    %c0_626 = arith.constant 0 : index
    %757 = vector.load %arg2[%c19_624, %c0_625, %c0_626] : memref<27x64x128xf32, #tpu.memory_space<vmem>>, vector<1x64x128xf32>
    %758 = vector.shape_cast %757 : vector<1x64x128xf32> to vector<64x128xf32>
    %cst_627 = arith.constant dense<0.000000e+00> : vector<16x128xf32>
    %759 = tpu.matmul %756, %758, %cst_627 {dimension_numbers = #tpu.dot_dimension_numbers<[1], [0], [0], [1], [0, 0, 1, 1], [], []>} : vector<16x64xf32>, vector<64x128xf32>, vector<16x128xf32> -> vector<16x128xf32>
    %760 = arith.addf %755, %759 : vector<16x128xf32>
    %761 = vector.extract_strided_slice %720 {offsets = [0, 8], sizes = [16, 64], strides = [1, 1]} : vector<16x72xf32> to vector<16x64xf32>
    %c20_628 = arith.constant 20 : index
    %c0_629 = arith.constant 0 : index
    %c0_630 = arith.constant 0 : index
    %762 = vector.load %arg2[%c20_628, %c0_629, %c0_630] : memref<27x64x128xf32, #tpu.memory_space<vmem>>, vector<1x64x128xf32>
    %763 = vector.shape_cast %762 : vector<1x64x128xf32> to vector<64x128xf32>
    %cst_631 = arith.constant dense<0.000000e+00> : vector<16x128xf32>
    %764 = tpu.matmul %761, %763, %cst_631 {dimension_numbers = #tpu.dot_dimension_numbers<[1], [0], [0], [1], [0, 0, 1, 1], [], []>} : vector<16x64xf32>, vector<64x128xf32>, vector<16x128xf32> -> vector<16x128xf32>
    %765 = arith.addf %760, %764 : vector<16x128xf32>
    %c0_632 = arith.constant 0 : index
    %c6_633 = arith.constant 6 : index
    %c1_634 = arith.constant 1 : index
    %c0_635 = arith.constant 0 : index
    %766 = vector.load %arg1[%c0_632, %c6_633, %c1_634, %c0_635] : memref<1x10x18x72xf32, #tpu.memory_space<vmem>>, vector<1x1x16x72xf32>
    %767 = vector.shape_cast %766 : vector<1x1x16x72xf32> to vector<16x72xf32>
    %768 = vector.extract_strided_slice %767 {offsets = [0, 0], sizes = [16, 64], strides = [1, 1]} : vector<16x72xf32> to vector<16x64xf32>
    %c3_636 = arith.constant 3 : index
    %c0_637 = arith.constant 0 : index
    %c0_638 = arith.constant 0 : index
    %769 = vector.load %arg2[%c3_636, %c0_637, %c0_638] : memref<27x64x128xf32, #tpu.memory_space<vmem>>, vector<1x64x128xf32>
    %770 = vector.shape_cast %769 : vector<1x64x128xf32> to vector<64x128xf32>
    %cst_639 = arith.constant dense<0.000000e+00> : vector<16x128xf32>
    %771 = tpu.matmul %768, %770, %cst_639 {dimension_numbers = #tpu.dot_dimension_numbers<[1], [0], [0], [1], [0, 0, 1, 1], [], []>} : vector<16x64xf32>, vector<64x128xf32>, vector<16x128xf32> -> vector<16x128xf32>
    %772 = arith.addf %735, %771 : vector<16x128xf32>
    %773 = vector.extract_strided_slice %767 {offsets = [0, 4], sizes = [16, 64], strides = [1, 1]} : vector<16x72xf32> to vector<16x64xf32>
    %c4_640 = arith.constant 4 : index
    %c0_641 = arith.constant 0 : index
    %c0_642 = arith.constant 0 : index
    %774 = vector.load %arg2[%c4_640, %c0_641, %c0_642] : memref<27x64x128xf32, #tpu.memory_space<vmem>>, vector<1x64x128xf32>
    %775 = vector.shape_cast %774 : vector<1x64x128xf32> to vector<64x128xf32>
    %cst_643 = arith.constant dense<0.000000e+00> : vector<16x128xf32>
    %776 = tpu.matmul %773, %775, %cst_643 {dimension_numbers = #tpu.dot_dimension_numbers<[1], [0], [0], [1], [0, 0, 1, 1], [], []>} : vector<16x64xf32>, vector<64x128xf32>, vector<16x128xf32> -> vector<16x128xf32>
    %777 = arith.addf %772, %776 : vector<16x128xf32>
    %778 = vector.extract_strided_slice %767 {offsets = [0, 8], sizes = [16, 64], strides = [1, 1]} : vector<16x72xf32> to vector<16x64xf32>
    %c5_644 = arith.constant 5 : index
    %c0_645 = arith.constant 0 : index
    %c0_646 = arith.constant 0 : index
    %779 = vector.load %arg2[%c5_644, %c0_645, %c0_646] : memref<27x64x128xf32, #tpu.memory_space<vmem>>, vector<1x64x128xf32>
    %780 = vector.shape_cast %779 : vector<1x64x128xf32> to vector<64x128xf32>
    %cst_647 = arith.constant dense<0.000000e+00> : vector<16x128xf32>
    %781 = tpu.matmul %778, %780, %cst_647 {dimension_numbers = #tpu.dot_dimension_numbers<[1], [0], [0], [1], [0, 0, 1, 1], [], []>} : vector<16x64xf32>, vector<64x128xf32>, vector<16x128xf32> -> vector<16x128xf32>
    %782 = arith.addf %777, %781 : vector<16x128xf32>
    %783 = vector.extract_strided_slice %767 {offsets = [0, 0], sizes = [16, 64], strides = [1, 1]} : vector<16x72xf32> to vector<16x64xf32>
    %c12_648 = arith.constant 12 : index
    %c0_649 = arith.constant 0 : index
    %c0_650 = arith.constant 0 : index
    %784 = vector.load %arg2[%c12_648, %c0_649, %c0_650] : memref<27x64x128xf32, #tpu.memory_space<vmem>>, vector<1x64x128xf32>
    %785 = vector.shape_cast %784 : vector<1x64x128xf32> to vector<64x128xf32>
    %cst_651 = arith.constant dense<0.000000e+00> : vector<16x128xf32>
    %786 = tpu.matmul %783, %785, %cst_651 {dimension_numbers = #tpu.dot_dimension_numbers<[1], [0], [0], [1], [0, 0, 1, 1], [], []>} : vector<16x64xf32>, vector<64x128xf32>, vector<16x128xf32> -> vector<16x128xf32>
    %787 = arith.addf %750, %786 : vector<16x128xf32>
    %788 = vector.extract_strided_slice %767 {offsets = [0, 4], sizes = [16, 64], strides = [1, 1]} : vector<16x72xf32> to vector<16x64xf32>
    %c13_652 = arith.constant 13 : index
    %c0_653 = arith.constant 0 : index
    %c0_654 = arith.constant 0 : index
    %789 = vector.load %arg2[%c13_652, %c0_653, %c0_654] : memref<27x64x128xf32, #tpu.memory_space<vmem>>, vector<1x64x128xf32>
    %790 = vector.shape_cast %789 : vector<1x64x128xf32> to vector<64x128xf32>
    %cst_655 = arith.constant dense<0.000000e+00> : vector<16x128xf32>
    %791 = tpu.matmul %788, %790, %cst_655 {dimension_numbers = #tpu.dot_dimension_numbers<[1], [0], [0], [1], [0, 0, 1, 1], [], []>} : vector<16x64xf32>, vector<64x128xf32>, vector<16x128xf32> -> vector<16x128xf32>
    %792 = arith.addf %787, %791 : vector<16x128xf32>
    %793 = vector.extract_strided_slice %767 {offsets = [0, 8], sizes = [16, 64], strides = [1, 1]} : vector<16x72xf32> to vector<16x64xf32>
    %c14_656 = arith.constant 14 : index
    %c0_657 = arith.constant 0 : index
    %c0_658 = arith.constant 0 : index
    %794 = vector.load %arg2[%c14_656, %c0_657, %c0_658] : memref<27x64x128xf32, #tpu.memory_space<vmem>>, vector<1x64x128xf32>
    %795 = vector.shape_cast %794 : vector<1x64x128xf32> to vector<64x128xf32>
    %cst_659 = arith.constant dense<0.000000e+00> : vector<16x128xf32>
    %796 = tpu.matmul %793, %795, %cst_659 {dimension_numbers = #tpu.dot_dimension_numbers<[1], [0], [0], [1], [0, 0, 1, 1], [], []>} : vector<16x64xf32>, vector<64x128xf32>, vector<16x128xf32> -> vector<16x128xf32>
    %797 = arith.addf %792, %796 : vector<16x128xf32>
    %798 = vector.extract_strided_slice %767 {offsets = [0, 0], sizes = [16, 64], strides = [1, 1]} : vector<16x72xf32> to vector<16x64xf32>
    %c21_660 = arith.constant 21 : index
    %c0_661 = arith.constant 0 : index
    %c0_662 = arith.constant 0 : index
    %799 = vector.load %arg2[%c21_660, %c0_661, %c0_662] : memref<27x64x128xf32, #tpu.memory_space<vmem>>, vector<1x64x128xf32>
    %800 = vector.shape_cast %799 : vector<1x64x128xf32> to vector<64x128xf32>
    %cst_663 = arith.constant dense<0.000000e+00> : vector<16x128xf32>
    %801 = tpu.matmul %798, %800, %cst_663 {dimension_numbers = #tpu.dot_dimension_numbers<[1], [0], [0], [1], [0, 0, 1, 1], [], []>} : vector<16x64xf32>, vector<64x128xf32>, vector<16x128xf32> -> vector<16x128xf32>
    %802 = arith.addf %765, %801 : vector<16x128xf32>
    %803 = vector.extract_strided_slice %767 {offsets = [0, 4], sizes = [16, 64], strides = [1, 1]} : vector<16x72xf32> to vector<16x64xf32>
    %c22_664 = arith.constant 22 : index
    %c0_665 = arith.constant 0 : index
    %c0_666 = arith.constant 0 : index
    %804 = vector.load %arg2[%c22_664, %c0_665, %c0_666] : memref<27x64x128xf32, #tpu.memory_space<vmem>>, vector<1x64x128xf32>
    %805 = vector.shape_cast %804 : vector<1x64x128xf32> to vector<64x128xf32>
    %cst_667 = arith.constant dense<0.000000e+00> : vector<16x128xf32>
    %806 = tpu.matmul %803, %805, %cst_667 {dimension_numbers = #tpu.dot_dimension_numbers<[1], [0], [0], [1], [0, 0, 1, 1], [], []>} : vector<16x64xf32>, vector<64x128xf32>, vector<16x128xf32> -> vector<16x128xf32>
    %807 = arith.addf %802, %806 : vector<16x128xf32>
    %808 = vector.extract_strided_slice %767 {offsets = [0, 8], sizes = [16, 64], strides = [1, 1]} : vector<16x72xf32> to vector<16x64xf32>
    %c23_668 = arith.constant 23 : index
    %c0_669 = arith.constant 0 : index
    %c0_670 = arith.constant 0 : index
    %809 = vector.load %arg2[%c23_668, %c0_669, %c0_670] : memref<27x64x128xf32, #tpu.memory_space<vmem>>, vector<1x64x128xf32>
    %810 = vector.shape_cast %809 : vector<1x64x128xf32> to vector<64x128xf32>
    %cst_671 = arith.constant dense<0.000000e+00> : vector<16x128xf32>
    %811 = tpu.matmul %808, %810, %cst_671 {dimension_numbers = #tpu.dot_dimension_numbers<[1], [0], [0], [1], [0, 0, 1, 1], [], []>} : vector<16x64xf32>, vector<64x128xf32>, vector<16x128xf32> -> vector<16x128xf32>
    %812 = arith.addf %807, %811 : vector<16x128xf32>
    %c0_672 = arith.constant 0 : index
    %c6_673 = arith.constant 6 : index
    %c2_674 = arith.constant 2 : index
    %c0_675 = arith.constant 0 : index
    %813 = vector.load %arg1[%c0_672, %c6_673, %c2_674, %c0_675] : memref<1x10x18x72xf32, #tpu.memory_space<vmem>>, vector<1x1x16x72xf32>
    %814 = vector.shape_cast %813 : vector<1x1x16x72xf32> to vector<16x72xf32>
    %815 = vector.extract_strided_slice %814 {offsets = [0, 0], sizes = [16, 64], strides = [1, 1]} : vector<16x72xf32> to vector<16x64xf32>
    %c6_676 = arith.constant 6 : index
    %c0_677 = arith.constant 0 : index
    %c0_678 = arith.constant 0 : index
    %816 = vector.load %arg2[%c6_676, %c0_677, %c0_678] : memref<27x64x128xf32, #tpu.memory_space<vmem>>, vector<1x64x128xf32>
    %817 = vector.shape_cast %816 : vector<1x64x128xf32> to vector<64x128xf32>
    %cst_679 = arith.constant dense<0.000000e+00> : vector<16x128xf32>
    %818 = tpu.matmul %815, %817, %cst_679 {dimension_numbers = #tpu.dot_dimension_numbers<[1], [0], [0], [1], [0, 0, 1, 1], [], []>} : vector<16x64xf32>, vector<64x128xf32>, vector<16x128xf32> -> vector<16x128xf32>
    %819 = arith.addf %782, %818 : vector<16x128xf32>
    %820 = vector.extract_strided_slice %814 {offsets = [0, 4], sizes = [16, 64], strides = [1, 1]} : vector<16x72xf32> to vector<16x64xf32>
    %c7_680 = arith.constant 7 : index
    %c0_681 = arith.constant 0 : index
    %c0_682 = arith.constant 0 : index
    %821 = vector.load %arg2[%c7_680, %c0_681, %c0_682] : memref<27x64x128xf32, #tpu.memory_space<vmem>>, vector<1x64x128xf32>
    %822 = vector.shape_cast %821 : vector<1x64x128xf32> to vector<64x128xf32>
    %cst_683 = arith.constant dense<0.000000e+00> : vector<16x128xf32>
    %823 = tpu.matmul %820, %822, %cst_683 {dimension_numbers = #tpu.dot_dimension_numbers<[1], [0], [0], [1], [0, 0, 1, 1], [], []>} : vector<16x64xf32>, vector<64x128xf32>, vector<16x128xf32> -> vector<16x128xf32>
    %824 = arith.addf %819, %823 : vector<16x128xf32>
    %825 = vector.extract_strided_slice %814 {offsets = [0, 8], sizes = [16, 64], strides = [1, 1]} : vector<16x72xf32> to vector<16x64xf32>
    %c8_684 = arith.constant 8 : index
    %c0_685 = arith.constant 0 : index
    %c0_686 = arith.constant 0 : index
    %826 = vector.load %arg2[%c8_684, %c0_685, %c0_686] : memref<27x64x128xf32, #tpu.memory_space<vmem>>, vector<1x64x128xf32>
    %827 = vector.shape_cast %826 : vector<1x64x128xf32> to vector<64x128xf32>
    %cst_687 = arith.constant dense<0.000000e+00> : vector<16x128xf32>
    %828 = tpu.matmul %825, %827, %cst_687 {dimension_numbers = #tpu.dot_dimension_numbers<[1], [0], [0], [1], [0, 0, 1, 1], [], []>} : vector<16x64xf32>, vector<64x128xf32>, vector<16x128xf32> -> vector<16x128xf32>
    %829 = arith.addf %824, %828 : vector<16x128xf32>
    %830 = vector.extract_strided_slice %814 {offsets = [0, 0], sizes = [16, 64], strides = [1, 1]} : vector<16x72xf32> to vector<16x64xf32>
    %c15_688 = arith.constant 15 : index
    %c0_689 = arith.constant 0 : index
    %c0_690 = arith.constant 0 : index
    %831 = vector.load %arg2[%c15_688, %c0_689, %c0_690] : memref<27x64x128xf32, #tpu.memory_space<vmem>>, vector<1x64x128xf32>
    %832 = vector.shape_cast %831 : vector<1x64x128xf32> to vector<64x128xf32>
    %cst_691 = arith.constant dense<0.000000e+00> : vector<16x128xf32>
    %833 = tpu.matmul %830, %832, %cst_691 {dimension_numbers = #tpu.dot_dimension_numbers<[1], [0], [0], [1], [0, 0, 1, 1], [], []>} : vector<16x64xf32>, vector<64x128xf32>, vector<16x128xf32> -> vector<16x128xf32>
    %834 = arith.addf %797, %833 : vector<16x128xf32>
    %835 = vector.extract_strided_slice %814 {offsets = [0, 4], sizes = [16, 64], strides = [1, 1]} : vector<16x72xf32> to vector<16x64xf32>
    %c16_692 = arith.constant 16 : index
    %c0_693 = arith.constant 0 : index
    %c0_694 = arith.constant 0 : index
    %836 = vector.load %arg2[%c16_692, %c0_693, %c0_694] : memref<27x64x128xf32, #tpu.memory_space<vmem>>, vector<1x64x128xf32>
    %837 = vector.shape_cast %836 : vector<1x64x128xf32> to vector<64x128xf32>
    %cst_695 = arith.constant dense<0.000000e+00> : vector<16x128xf32>
    %838 = tpu.matmul %835, %837, %cst_695 {dimension_numbers = #tpu.dot_dimension_numbers<[1], [0], [0], [1], [0, 0, 1, 1], [], []>} : vector<16x64xf32>, vector<64x128xf32>, vector<16x128xf32> -> vector<16x128xf32>
    %839 = arith.addf %834, %838 : vector<16x128xf32>
    %840 = vector.extract_strided_slice %814 {offsets = [0, 8], sizes = [16, 64], strides = [1, 1]} : vector<16x72xf32> to vector<16x64xf32>
    %c17_696 = arith.constant 17 : index
    %c0_697 = arith.constant 0 : index
    %c0_698 = arith.constant 0 : index
    %841 = vector.load %arg2[%c17_696, %c0_697, %c0_698] : memref<27x64x128xf32, #tpu.memory_space<vmem>>, vector<1x64x128xf32>
    %842 = vector.shape_cast %841 : vector<1x64x128xf32> to vector<64x128xf32>
    %cst_699 = arith.constant dense<0.000000e+00> : vector<16x128xf32>
    %843 = tpu.matmul %840, %842, %cst_699 {dimension_numbers = #tpu.dot_dimension_numbers<[1], [0], [0], [1], [0, 0, 1, 1], [], []>} : vector<16x64xf32>, vector<64x128xf32>, vector<16x128xf32> -> vector<16x128xf32>
    %844 = arith.addf %839, %843 : vector<16x128xf32>
    %845 = vector.extract_strided_slice %814 {offsets = [0, 0], sizes = [16, 64], strides = [1, 1]} : vector<16x72xf32> to vector<16x64xf32>
    %c24_700 = arith.constant 24 : index
    %c0_701 = arith.constant 0 : index
    %c0_702 = arith.constant 0 : index
    %846 = vector.load %arg2[%c24_700, %c0_701, %c0_702] : memref<27x64x128xf32, #tpu.memory_space<vmem>>, vector<1x64x128xf32>
    %847 = vector.shape_cast %846 : vector<1x64x128xf32> to vector<64x128xf32>
    %cst_703 = arith.constant dense<0.000000e+00> : vector<16x128xf32>
    %848 = tpu.matmul %845, %847, %cst_703 {dimension_numbers = #tpu.dot_dimension_numbers<[1], [0], [0], [1], [0, 0, 1, 1], [], []>} : vector<16x64xf32>, vector<64x128xf32>, vector<16x128xf32> -> vector<16x128xf32>
    %849 = arith.addf %812, %848 : vector<16x128xf32>
    %850 = vector.extract_strided_slice %814 {offsets = [0, 4], sizes = [16, 64], strides = [1, 1]} : vector<16x72xf32> to vector<16x64xf32>
    %c25_704 = arith.constant 25 : index
    %c0_705 = arith.constant 0 : index
    %c0_706 = arith.constant 0 : index
    %851 = vector.load %arg2[%c25_704, %c0_705, %c0_706] : memref<27x64x128xf32, #tpu.memory_space<vmem>>, vector<1x64x128xf32>
    %852 = vector.shape_cast %851 : vector<1x64x128xf32> to vector<64x128xf32>
    %cst_707 = arith.constant dense<0.000000e+00> : vector<16x128xf32>
    %853 = tpu.matmul %850, %852, %cst_707 {dimension_numbers = #tpu.dot_dimension_numbers<[1], [0], [0], [1], [0, 0, 1, 1], [], []>} : vector<16x64xf32>, vector<64x128xf32>, vector<16x128xf32> -> vector<16x128xf32>
    %854 = arith.addf %849, %853 : vector<16x128xf32>
    %855 = vector.extract_strided_slice %814 {offsets = [0, 8], sizes = [16, 64], strides = [1, 1]} : vector<16x72xf32> to vector<16x64xf32>
    %c26_708 = arith.constant 26 : index
    %c0_709 = arith.constant 0 : index
    %c0_710 = arith.constant 0 : index
    %856 = vector.load %arg2[%c26_708, %c0_709, %c0_710] : memref<27x64x128xf32, #tpu.memory_space<vmem>>, vector<1x64x128xf32>
    %857 = vector.shape_cast %856 : vector<1x64x128xf32> to vector<64x128xf32>
    %cst_711 = arith.constant dense<0.000000e+00> : vector<16x128xf32>
    %858 = tpu.matmul %855, %857, %cst_711 {dimension_numbers = #tpu.dot_dimension_numbers<[1], [0], [0], [1], [0, 0, 1, 1], [], []>} : vector<16x64xf32>, vector<64x128xf32>, vector<16x128xf32> -> vector<16x128xf32>
    %859 = arith.addf %854, %858 : vector<16x128xf32>
    %c0_712 = arith.constant 0 : index
    %c7_713 = arith.constant 7 : index
    %c0_714 = arith.constant 0 : index
    %c0_715 = arith.constant 0 : index
    %860 = vector.load %arg1[%c0_712, %c7_713, %c0_714, %c0_715] : memref<1x10x18x72xf32, #tpu.memory_space<vmem>>, vector<1x1x16x72xf32>
    %861 = vector.shape_cast %860 : vector<1x1x16x72xf32> to vector<16x72xf32>
    %862 = vector.extract_strided_slice %861 {offsets = [0, 0], sizes = [16, 64], strides = [1, 1]} : vector<16x72xf32> to vector<16x64xf32>
    %c0_716 = arith.constant 0 : index
    %c0_717 = arith.constant 0 : index
    %c0_718 = arith.constant 0 : index
    %863 = vector.load %arg2[%c0_716, %c0_717, %c0_718] : memref<27x64x128xf32, #tpu.memory_space<vmem>>, vector<1x64x128xf32>
    %864 = vector.shape_cast %863 : vector<1x64x128xf32> to vector<64x128xf32>
    %cst_719 = arith.constant dense<0.000000e+00> : vector<16x128xf32>
    %865 = tpu.matmul %862, %864, %cst_719 {dimension_numbers = #tpu.dot_dimension_numbers<[1], [0], [0], [1], [0, 0, 1, 1], [], []>} : vector<16x64xf32>, vector<64x128xf32>, vector<16x128xf32> -> vector<16x128xf32>
    %866 = arith.addf %7, %865 : vector<16x128xf32>
    %867 = vector.extract_strided_slice %861 {offsets = [0, 4], sizes = [16, 64], strides = [1, 1]} : vector<16x72xf32> to vector<16x64xf32>
    %c1_720 = arith.constant 1 : index
    %c0_721 = arith.constant 0 : index
    %c0_722 = arith.constant 0 : index
    %868 = vector.load %arg2[%c1_720, %c0_721, %c0_722] : memref<27x64x128xf32, #tpu.memory_space<vmem>>, vector<1x64x128xf32>
    %869 = vector.shape_cast %868 : vector<1x64x128xf32> to vector<64x128xf32>
    %cst_723 = arith.constant dense<0.000000e+00> : vector<16x128xf32>
    %870 = tpu.matmul %867, %869, %cst_723 {dimension_numbers = #tpu.dot_dimension_numbers<[1], [0], [0], [1], [0, 0, 1, 1], [], []>} : vector<16x64xf32>, vector<64x128xf32>, vector<16x128xf32> -> vector<16x128xf32>
    %871 = arith.addf %866, %870 : vector<16x128xf32>
    %872 = vector.extract_strided_slice %861 {offsets = [0, 8], sizes = [16, 64], strides = [1, 1]} : vector<16x72xf32> to vector<16x64xf32>
    %c2_724 = arith.constant 2 : index
    %c0_725 = arith.constant 0 : index
    %c0_726 = arith.constant 0 : index
    %873 = vector.load %arg2[%c2_724, %c0_725, %c0_726] : memref<27x64x128xf32, #tpu.memory_space<vmem>>, vector<1x64x128xf32>
    %874 = vector.shape_cast %873 : vector<1x64x128xf32> to vector<64x128xf32>
    %cst_727 = arith.constant dense<0.000000e+00> : vector<16x128xf32>
    %875 = tpu.matmul %872, %874, %cst_727 {dimension_numbers = #tpu.dot_dimension_numbers<[1], [0], [0], [1], [0, 0, 1, 1], [], []>} : vector<16x64xf32>, vector<64x128xf32>, vector<16x128xf32> -> vector<16x128xf32>
    %876 = arith.addf %871, %875 : vector<16x128xf32>
    %877 = vector.extract_strided_slice %861 {offsets = [0, 0], sizes = [16, 64], strides = [1, 1]} : vector<16x72xf32> to vector<16x64xf32>
    %c9_728 = arith.constant 9 : index
    %c0_729 = arith.constant 0 : index
    %c0_730 = arith.constant 0 : index
    %878 = vector.load %arg2[%c9_728, %c0_729, %c0_730] : memref<27x64x128xf32, #tpu.memory_space<vmem>>, vector<1x64x128xf32>
    %879 = vector.shape_cast %878 : vector<1x64x128xf32> to vector<64x128xf32>
    %cst_731 = arith.constant dense<0.000000e+00> : vector<16x128xf32>
    %880 = tpu.matmul %877, %879, %cst_731 {dimension_numbers = #tpu.dot_dimension_numbers<[1], [0], [0], [1], [0, 0, 1, 1], [], []>} : vector<16x64xf32>, vector<64x128xf32>, vector<16x128xf32> -> vector<16x128xf32>
    %881 = arith.addf %829, %880 : vector<16x128xf32>
    %882 = vector.extract_strided_slice %861 {offsets = [0, 4], sizes = [16, 64], strides = [1, 1]} : vector<16x72xf32> to vector<16x64xf32>
    %c10_732 = arith.constant 10 : index
    %c0_733 = arith.constant 0 : index
    %c0_734 = arith.constant 0 : index
    %883 = vector.load %arg2[%c10_732, %c0_733, %c0_734] : memref<27x64x128xf32, #tpu.memory_space<vmem>>, vector<1x64x128xf32>
    %884 = vector.shape_cast %883 : vector<1x64x128xf32> to vector<64x128xf32>
    %cst_735 = arith.constant dense<0.000000e+00> : vector<16x128xf32>
    %885 = tpu.matmul %882, %884, %cst_735 {dimension_numbers = #tpu.dot_dimension_numbers<[1], [0], [0], [1], [0, 0, 1, 1], [], []>} : vector<16x64xf32>, vector<64x128xf32>, vector<16x128xf32> -> vector<16x128xf32>
    %886 = arith.addf %881, %885 : vector<16x128xf32>
    %887 = vector.extract_strided_slice %861 {offsets = [0, 8], sizes = [16, 64], strides = [1, 1]} : vector<16x72xf32> to vector<16x64xf32>
    %c11_736 = arith.constant 11 : index
    %c0_737 = arith.constant 0 : index
    %c0_738 = arith.constant 0 : index
    %888 = vector.load %arg2[%c11_736, %c0_737, %c0_738] : memref<27x64x128xf32, #tpu.memory_space<vmem>>, vector<1x64x128xf32>
    %889 = vector.shape_cast %888 : vector<1x64x128xf32> to vector<64x128xf32>
    %cst_739 = arith.constant dense<0.000000e+00> : vector<16x128xf32>
    %890 = tpu.matmul %887, %889, %cst_739 {dimension_numbers = #tpu.dot_dimension_numbers<[1], [0], [0], [1], [0, 0, 1, 1], [], []>} : vector<16x64xf32>, vector<64x128xf32>, vector<16x128xf32> -> vector<16x128xf32>
    %891 = arith.addf %886, %890 : vector<16x128xf32>
    %892 = vector.extract_strided_slice %861 {offsets = [0, 0], sizes = [16, 64], strides = [1, 1]} : vector<16x72xf32> to vector<16x64xf32>
    %c18_740 = arith.constant 18 : index
    %c0_741 = arith.constant 0 : index
    %c0_742 = arith.constant 0 : index
    %893 = vector.load %arg2[%c18_740, %c0_741, %c0_742] : memref<27x64x128xf32, #tpu.memory_space<vmem>>, vector<1x64x128xf32>
    %894 = vector.shape_cast %893 : vector<1x64x128xf32> to vector<64x128xf32>
    %cst_743 = arith.constant dense<0.000000e+00> : vector<16x128xf32>
    %895 = tpu.matmul %892, %894, %cst_743 {dimension_numbers = #tpu.dot_dimension_numbers<[1], [0], [0], [1], [0, 0, 1, 1], [], []>} : vector<16x64xf32>, vector<64x128xf32>, vector<16x128xf32> -> vector<16x128xf32>
    %896 = arith.addf %844, %895 : vector<16x128xf32>
    %897 = vector.extract_strided_slice %861 {offsets = [0, 4], sizes = [16, 64], strides = [1, 1]} : vector<16x72xf32> to vector<16x64xf32>
    %c19_744 = arith.constant 19 : index
    %c0_745 = arith.constant 0 : index
    %c0_746 = arith.constant 0 : index
    %898 = vector.load %arg2[%c19_744, %c0_745, %c0_746] : memref<27x64x128xf32, #tpu.memory_space<vmem>>, vector<1x64x128xf32>
    %899 = vector.shape_cast %898 : vector<1x64x128xf32> to vector<64x128xf32>
    %cst_747 = arith.constant dense<0.000000e+00> : vector<16x128xf32>
    %900 = tpu.matmul %897, %899, %cst_747 {dimension_numbers = #tpu.dot_dimension_numbers<[1], [0], [0], [1], [0, 0, 1, 1], [], []>} : vector<16x64xf32>, vector<64x128xf32>, vector<16x128xf32> -> vector<16x128xf32>
    %901 = arith.addf %896, %900 : vector<16x128xf32>
    %902 = vector.extract_strided_slice %861 {offsets = [0, 8], sizes = [16, 64], strides = [1, 1]} : vector<16x72xf32> to vector<16x64xf32>
    %c20_748 = arith.constant 20 : index
    %c0_749 = arith.constant 0 : index
    %c0_750 = arith.constant 0 : index
    %903 = vector.load %arg2[%c20_748, %c0_749, %c0_750] : memref<27x64x128xf32, #tpu.memory_space<vmem>>, vector<1x64x128xf32>
    %904 = vector.shape_cast %903 : vector<1x64x128xf32> to vector<64x128xf32>
    %cst_751 = arith.constant dense<0.000000e+00> : vector<16x128xf32>
    %905 = tpu.matmul %902, %904, %cst_751 {dimension_numbers = #tpu.dot_dimension_numbers<[1], [0], [0], [1], [0, 0, 1, 1], [], []>} : vector<16x64xf32>, vector<64x128xf32>, vector<16x128xf32> -> vector<16x128xf32>
    %906 = arith.addf %901, %905 : vector<16x128xf32>
    %c0_752 = arith.constant 0 : index
    %c7_753 = arith.constant 7 : index
    %c1_754 = arith.constant 1 : index
    %c0_755 = arith.constant 0 : index
    %907 = vector.load %arg1[%c0_752, %c7_753, %c1_754, %c0_755] : memref<1x10x18x72xf32, #tpu.memory_space<vmem>>, vector<1x1x16x72xf32>
    %908 = vector.shape_cast %907 : vector<1x1x16x72xf32> to vector<16x72xf32>
    %909 = vector.extract_strided_slice %908 {offsets = [0, 0], sizes = [16, 64], strides = [1, 1]} : vector<16x72xf32> to vector<16x64xf32>
    %c3_756 = arith.constant 3 : index
    %c0_757 = arith.constant 0 : index
    %c0_758 = arith.constant 0 : index
    %910 = vector.load %arg2[%c3_756, %c0_757, %c0_758] : memref<27x64x128xf32, #tpu.memory_space<vmem>>, vector<1x64x128xf32>
    %911 = vector.shape_cast %910 : vector<1x64x128xf32> to vector<64x128xf32>
    %cst_759 = arith.constant dense<0.000000e+00> : vector<16x128xf32>
    %912 = tpu.matmul %909, %911, %cst_759 {dimension_numbers = #tpu.dot_dimension_numbers<[1], [0], [0], [1], [0, 0, 1, 1], [], []>} : vector<16x64xf32>, vector<64x128xf32>, vector<16x128xf32> -> vector<16x128xf32>
    %913 = arith.addf %876, %912 : vector<16x128xf32>
    %914 = vector.extract_strided_slice %908 {offsets = [0, 4], sizes = [16, 64], strides = [1, 1]} : vector<16x72xf32> to vector<16x64xf32>
    %c4_760 = arith.constant 4 : index
    %c0_761 = arith.constant 0 : index
    %c0_762 = arith.constant 0 : index
    %915 = vector.load %arg2[%c4_760, %c0_761, %c0_762] : memref<27x64x128xf32, #tpu.memory_space<vmem>>, vector<1x64x128xf32>
    %916 = vector.shape_cast %915 : vector<1x64x128xf32> to vector<64x128xf32>
    %cst_763 = arith.constant dense<0.000000e+00> : vector<16x128xf32>
    %917 = tpu.matmul %914, %916, %cst_763 {dimension_numbers = #tpu.dot_dimension_numbers<[1], [0], [0], [1], [0, 0, 1, 1], [], []>} : vector<16x64xf32>, vector<64x128xf32>, vector<16x128xf32> -> vector<16x128xf32>
    %918 = arith.addf %913, %917 : vector<16x128xf32>
    %919 = vector.extract_strided_slice %908 {offsets = [0, 8], sizes = [16, 64], strides = [1, 1]} : vector<16x72xf32> to vector<16x64xf32>
    %c5_764 = arith.constant 5 : index
    %c0_765 = arith.constant 0 : index
    %c0_766 = arith.constant 0 : index
    %920 = vector.load %arg2[%c5_764, %c0_765, %c0_766] : memref<27x64x128xf32, #tpu.memory_space<vmem>>, vector<1x64x128xf32>
    %921 = vector.shape_cast %920 : vector<1x64x128xf32> to vector<64x128xf32>
    %cst_767 = arith.constant dense<0.000000e+00> : vector<16x128xf32>
    %922 = tpu.matmul %919, %921, %cst_767 {dimension_numbers = #tpu.dot_dimension_numbers<[1], [0], [0], [1], [0, 0, 1, 1], [], []>} : vector<16x64xf32>, vector<64x128xf32>, vector<16x128xf32> -> vector<16x128xf32>
    %923 = arith.addf %918, %922 : vector<16x128xf32>
    %924 = vector.extract_strided_slice %908 {offsets = [0, 0], sizes = [16, 64], strides = [1, 1]} : vector<16x72xf32> to vector<16x64xf32>
    %c12_768 = arith.constant 12 : index
    %c0_769 = arith.constant 0 : index
    %c0_770 = arith.constant 0 : index
    %925 = vector.load %arg2[%c12_768, %c0_769, %c0_770] : memref<27x64x128xf32, #tpu.memory_space<vmem>>, vector<1x64x128xf32>
    %926 = vector.shape_cast %925 : vector<1x64x128xf32> to vector<64x128xf32>
    %cst_771 = arith.constant dense<0.000000e+00> : vector<16x128xf32>
    %927 = tpu.matmul %924, %926, %cst_771 {dimension_numbers = #tpu.dot_dimension_numbers<[1], [0], [0], [1], [0, 0, 1, 1], [], []>} : vector<16x64xf32>, vector<64x128xf32>, vector<16x128xf32> -> vector<16x128xf32>
    %928 = arith.addf %891, %927 : vector<16x128xf32>
    %929 = vector.extract_strided_slice %908 {offsets = [0, 4], sizes = [16, 64], strides = [1, 1]} : vector<16x72xf32> to vector<16x64xf32>
    %c13_772 = arith.constant 13 : index
    %c0_773 = arith.constant 0 : index
    %c0_774 = arith.constant 0 : index
    %930 = vector.load %arg2[%c13_772, %c0_773, %c0_774] : memref<27x64x128xf32, #tpu.memory_space<vmem>>, vector<1x64x128xf32>
    %931 = vector.shape_cast %930 : vector<1x64x128xf32> to vector<64x128xf32>
    %cst_775 = arith.constant dense<0.000000e+00> : vector<16x128xf32>
    %932 = tpu.matmul %929, %931, %cst_775 {dimension_numbers = #tpu.dot_dimension_numbers<[1], [0], [0], [1], [0, 0, 1, 1], [], []>} : vector<16x64xf32>, vector<64x128xf32>, vector<16x128xf32> -> vector<16x128xf32>
    %933 = arith.addf %928, %932 : vector<16x128xf32>
    %934 = vector.extract_strided_slice %908 {offsets = [0, 8], sizes = [16, 64], strides = [1, 1]} : vector<16x72xf32> to vector<16x64xf32>
    %c14_776 = arith.constant 14 : index
    %c0_777 = arith.constant 0 : index
    %c0_778 = arith.constant 0 : index
    %935 = vector.load %arg2[%c14_776, %c0_777, %c0_778] : memref<27x64x128xf32, #tpu.memory_space<vmem>>, vector<1x64x128xf32>
    %936 = vector.shape_cast %935 : vector<1x64x128xf32> to vector<64x128xf32>
    %cst_779 = arith.constant dense<0.000000e+00> : vector<16x128xf32>
    %937 = tpu.matmul %934, %936, %cst_779 {dimension_numbers = #tpu.dot_dimension_numbers<[1], [0], [0], [1], [0, 0, 1, 1], [], []>} : vector<16x64xf32>, vector<64x128xf32>, vector<16x128xf32> -> vector<16x128xf32>
    %938 = arith.addf %933, %937 : vector<16x128xf32>
    %939 = vector.extract_strided_slice %908 {offsets = [0, 0], sizes = [16, 64], strides = [1, 1]} : vector<16x72xf32> to vector<16x64xf32>
    %c21_780 = arith.constant 21 : index
    %c0_781 = arith.constant 0 : index
    %c0_782 = arith.constant 0 : index
    %940 = vector.load %arg2[%c21_780, %c0_781, %c0_782] : memref<27x64x128xf32, #tpu.memory_space<vmem>>, vector<1x64x128xf32>
    %941 = vector.shape_cast %940 : vector<1x64x128xf32> to vector<64x128xf32>
    %cst_783 = arith.constant dense<0.000000e+00> : vector<16x128xf32>
    %942 = tpu.matmul %939, %941, %cst_783 {dimension_numbers = #tpu.dot_dimension_numbers<[1], [0], [0], [1], [0, 0, 1, 1], [], []>} : vector<16x64xf32>, vector<64x128xf32>, vector<16x128xf32> -> vector<16x128xf32>
    %943 = arith.addf %906, %942 : vector<16x128xf32>
    %944 = vector.extract_strided_slice %908 {offsets = [0, 4], sizes = [16, 64], strides = [1, 1]} : vector<16x72xf32> to vector<16x64xf32>
    %c22_784 = arith.constant 22 : index
    %c0_785 = arith.constant 0 : index
    %c0_786 = arith.constant 0 : index
    %945 = vector.load %arg2[%c22_784, %c0_785, %c0_786] : memref<27x64x128xf32, #tpu.memory_space<vmem>>, vector<1x64x128xf32>
    %946 = vector.shape_cast %945 : vector<1x64x128xf32> to vector<64x128xf32>
    %cst_787 = arith.constant dense<0.000000e+00> : vector<16x128xf32>
    %947 = tpu.matmul %944, %946, %cst_787 {dimension_numbers = #tpu.dot_dimension_numbers<[1], [0], [0], [1], [0, 0, 1, 1], [], []>} : vector<16x64xf32>, vector<64x128xf32>, vector<16x128xf32> -> vector<16x128xf32>
    %948 = arith.addf %943, %947 : vector<16x128xf32>
    %949 = vector.extract_strided_slice %908 {offsets = [0, 8], sizes = [16, 64], strides = [1, 1]} : vector<16x72xf32> to vector<16x64xf32>
    %c23_788 = arith.constant 23 : index
    %c0_789 = arith.constant 0 : index
    %c0_790 = arith.constant 0 : index
    %950 = vector.load %arg2[%c23_788, %c0_789, %c0_790] : memref<27x64x128xf32, #tpu.memory_space<vmem>>, vector<1x64x128xf32>
    %951 = vector.shape_cast %950 : vector<1x64x128xf32> to vector<64x128xf32>
    %cst_791 = arith.constant dense<0.000000e+00> : vector<16x128xf32>
    %952 = tpu.matmul %949, %951, %cst_791 {dimension_numbers = #tpu.dot_dimension_numbers<[1], [0], [0], [1], [0, 0, 1, 1], [], []>} : vector<16x64xf32>, vector<64x128xf32>, vector<16x128xf32> -> vector<16x128xf32>
    %953 = arith.addf %948, %952 : vector<16x128xf32>
    %c0_792 = arith.constant 0 : index
    %c7_793 = arith.constant 7 : index
    %c2_794 = arith.constant 2 : index
    %c0_795 = arith.constant 0 : index
    %954 = vector.load %arg1[%c0_792, %c7_793, %c2_794, %c0_795] : memref<1x10x18x72xf32, #tpu.memory_space<vmem>>, vector<1x1x16x72xf32>
    %955 = vector.shape_cast %954 : vector<1x1x16x72xf32> to vector<16x72xf32>
    %956 = vector.extract_strided_slice %955 {offsets = [0, 0], sizes = [16, 64], strides = [1, 1]} : vector<16x72xf32> to vector<16x64xf32>
    %c6_796 = arith.constant 6 : index
    %c0_797 = arith.constant 0 : index
    %c0_798 = arith.constant 0 : index
    %957 = vector.load %arg2[%c6_796, %c0_797, %c0_798] : memref<27x64x128xf32, #tpu.memory_space<vmem>>, vector<1x64x128xf32>
    %958 = vector.shape_cast %957 : vector<1x64x128xf32> to vector<64x128xf32>
    %cst_799 = arith.constant dense<0.000000e+00> : vector<16x128xf32>
    %959 = tpu.matmul %956, %958, %cst_799 {dimension_numbers = #tpu.dot_dimension_numbers<[1], [0], [0], [1], [0, 0, 1, 1], [], []>} : vector<16x64xf32>, vector<64x128xf32>, vector<16x128xf32> -> vector<16x128xf32>
    %960 = arith.addf %923, %959 : vector<16x128xf32>
    %961 = vector.extract_strided_slice %955 {offsets = [0, 4], sizes = [16, 64], strides = [1, 1]} : vector<16x72xf32> to vector<16x64xf32>
    %c7_800 = arith.constant 7 : index
    %c0_801 = arith.constant 0 : index
    %c0_802 = arith.constant 0 : index
    %962 = vector.load %arg2[%c7_800, %c0_801, %c0_802] : memref<27x64x128xf32, #tpu.memory_space<vmem>>, vector<1x64x128xf32>
    %963 = vector.shape_cast %962 : vector<1x64x128xf32> to vector<64x128xf32>
    %cst_803 = arith.constant dense<0.000000e+00> : vector<16x128xf32>
    %964 = tpu.matmul %961, %963, %cst_803 {dimension_numbers = #tpu.dot_dimension_numbers<[1], [0], [0], [1], [0, 0, 1, 1], [], []>} : vector<16x64xf32>, vector<64x128xf32>, vector<16x128xf32> -> vector<16x128xf32>
    %965 = arith.addf %960, %964 : vector<16x128xf32>
    %966 = vector.extract_strided_slice %955 {offsets = [0, 8], sizes = [16, 64], strides = [1, 1]} : vector<16x72xf32> to vector<16x64xf32>
    %c8_804 = arith.constant 8 : index
    %c0_805 = arith.constant 0 : index
    %c0_806 = arith.constant 0 : index
    %967 = vector.load %arg2[%c8_804, %c0_805, %c0_806] : memref<27x64x128xf32, #tpu.memory_space<vmem>>, vector<1x64x128xf32>
    %968 = vector.shape_cast %967 : vector<1x64x128xf32> to vector<64x128xf32>
    %cst_807 = arith.constant dense<0.000000e+00> : vector<16x128xf32>
    %969 = tpu.matmul %966, %968, %cst_807 {dimension_numbers = #tpu.dot_dimension_numbers<[1], [0], [0], [1], [0, 0, 1, 1], [], []>} : vector<16x64xf32>, vector<64x128xf32>, vector<16x128xf32> -> vector<16x128xf32>
    %970 = arith.addf %965, %969 : vector<16x128xf32>
    %971 = vector.extract_strided_slice %955 {offsets = [0, 0], sizes = [16, 64], strides = [1, 1]} : vector<16x72xf32> to vector<16x64xf32>
    %c15_808 = arith.constant 15 : index
    %c0_809 = arith.constant 0 : index
    %c0_810 = arith.constant 0 : index
    %972 = vector.load %arg2[%c15_808, %c0_809, %c0_810] : memref<27x64x128xf32, #tpu.memory_space<vmem>>, vector<1x64x128xf32>
    %973 = vector.shape_cast %972 : vector<1x64x128xf32> to vector<64x128xf32>
    %cst_811 = arith.constant dense<0.000000e+00> : vector<16x128xf32>
    %974 = tpu.matmul %971, %973, %cst_811 {dimension_numbers = #tpu.dot_dimension_numbers<[1], [0], [0], [1], [0, 0, 1, 1], [], []>} : vector<16x64xf32>, vector<64x128xf32>, vector<16x128xf32> -> vector<16x128xf32>
    %975 = arith.addf %938, %974 : vector<16x128xf32>
    %976 = vector.extract_strided_slice %955 {offsets = [0, 4], sizes = [16, 64], strides = [1, 1]} : vector<16x72xf32> to vector<16x64xf32>
    %c16_812 = arith.constant 16 : index
    %c0_813 = arith.constant 0 : index
    %c0_814 = arith.constant 0 : index
    %977 = vector.load %arg2[%c16_812, %c0_813, %c0_814] : memref<27x64x128xf32, #tpu.memory_space<vmem>>, vector<1x64x128xf32>
    %978 = vector.shape_cast %977 : vector<1x64x128xf32> to vector<64x128xf32>
    %cst_815 = arith.constant dense<0.000000e+00> : vector<16x128xf32>
    %979 = tpu.matmul %976, %978, %cst_815 {dimension_numbers = #tpu.dot_dimension_numbers<[1], [0], [0], [1], [0, 0, 1, 1], [], []>} : vector<16x64xf32>, vector<64x128xf32>, vector<16x128xf32> -> vector<16x128xf32>
    %980 = arith.addf %975, %979 : vector<16x128xf32>
    %981 = vector.extract_strided_slice %955 {offsets = [0, 8], sizes = [16, 64], strides = [1, 1]} : vector<16x72xf32> to vector<16x64xf32>
    %c17_816 = arith.constant 17 : index
    %c0_817 = arith.constant 0 : index
    %c0_818 = arith.constant 0 : index
    %982 = vector.load %arg2[%c17_816, %c0_817, %c0_818] : memref<27x64x128xf32, #tpu.memory_space<vmem>>, vector<1x64x128xf32>
    %983 = vector.shape_cast %982 : vector<1x64x128xf32> to vector<64x128xf32>
    %cst_819 = arith.constant dense<0.000000e+00> : vector<16x128xf32>
    %984 = tpu.matmul %981, %983, %cst_819 {dimension_numbers = #tpu.dot_dimension_numbers<[1], [0], [0], [1], [0, 0, 1, 1], [], []>} : vector<16x64xf32>, vector<64x128xf32>, vector<16x128xf32> -> vector<16x128xf32>
    %985 = arith.addf %980, %984 : vector<16x128xf32>
    %986 = vector.extract_strided_slice %955 {offsets = [0, 0], sizes = [16, 64], strides = [1, 1]} : vector<16x72xf32> to vector<16x64xf32>
    %c24_820 = arith.constant 24 : index
    %c0_821 = arith.constant 0 : index
    %c0_822 = arith.constant 0 : index
    %987 = vector.load %arg2[%c24_820, %c0_821, %c0_822] : memref<27x64x128xf32, #tpu.memory_space<vmem>>, vector<1x64x128xf32>
    %988 = vector.shape_cast %987 : vector<1x64x128xf32> to vector<64x128xf32>
    %cst_823 = arith.constant dense<0.000000e+00> : vector<16x128xf32>
    %989 = tpu.matmul %986, %988, %cst_823 {dimension_numbers = #tpu.dot_dimension_numbers<[1], [0], [0], [1], [0, 0, 1, 1], [], []>} : vector<16x64xf32>, vector<64x128xf32>, vector<16x128xf32> -> vector<16x128xf32>
    %990 = arith.addf %953, %989 : vector<16x128xf32>
    %991 = vector.extract_strided_slice %955 {offsets = [0, 4], sizes = [16, 64], strides = [1, 1]} : vector<16x72xf32> to vector<16x64xf32>
    %c25_824 = arith.constant 25 : index
    %c0_825 = arith.constant 0 : index
    %c0_826 = arith.constant 0 : index
    %992 = vector.load %arg2[%c25_824, %c0_825, %c0_826] : memref<27x64x128xf32, #tpu.memory_space<vmem>>, vector<1x64x128xf32>
    %993 = vector.shape_cast %992 : vector<1x64x128xf32> to vector<64x128xf32>
    %cst_827 = arith.constant dense<0.000000e+00> : vector<16x128xf32>
    %994 = tpu.matmul %991, %993, %cst_827 {dimension_numbers = #tpu.dot_dimension_numbers<[1], [0], [0], [1], [0, 0, 1, 1], [], []>} : vector<16x64xf32>, vector<64x128xf32>, vector<16x128xf32> -> vector<16x128xf32>
    %995 = arith.addf %990, %994 : vector<16x128xf32>
    %996 = vector.extract_strided_slice %955 {offsets = [0, 8], sizes = [16, 64], strides = [1, 1]} : vector<16x72xf32> to vector<16x64xf32>
    %c26_828 = arith.constant 26 : index
    %c0_829 = arith.constant 0 : index
    %c0_830 = arith.constant 0 : index
    %997 = vector.load %arg2[%c26_828, %c0_829, %c0_830] : memref<27x64x128xf32, #tpu.memory_space<vmem>>, vector<1x64x128xf32>
    %998 = vector.shape_cast %997 : vector<1x64x128xf32> to vector<64x128xf32>
    %cst_831 = arith.constant dense<0.000000e+00> : vector<16x128xf32>
    %999 = tpu.matmul %996, %998, %cst_831 {dimension_numbers = #tpu.dot_dimension_numbers<[1], [0], [0], [1], [0, 0, 1, 1], [], []>} : vector<16x64xf32>, vector<64x128xf32>, vector<16x128xf32> -> vector<16x128xf32>
    %1000 = arith.addf %995, %999 : vector<16x128xf32>
    %c0_832 = arith.constant 0 : index
    %c8_833 = arith.constant 8 : index
    %c0_834 = arith.constant 0 : index
    %c0_835 = arith.constant 0 : index
    %1001 = vector.load %arg1[%c0_832, %c8_833, %c0_834, %c0_835] : memref<1x10x18x72xf32, #tpu.memory_space<vmem>>, vector<1x1x16x72xf32>
    %1002 = vector.shape_cast %1001 : vector<1x1x16x72xf32> to vector<16x72xf32>
    %1003 = vector.extract_strided_slice %1002 {offsets = [0, 0], sizes = [16, 64], strides = [1, 1]} : vector<16x72xf32> to vector<16x64xf32>
    %c9_836 = arith.constant 9 : index
    %c0_837 = arith.constant 0 : index
    %c0_838 = arith.constant 0 : index
    %1004 = vector.load %arg2[%c9_836, %c0_837, %c0_838] : memref<27x64x128xf32, #tpu.memory_space<vmem>>, vector<1x64x128xf32>
    %1005 = vector.shape_cast %1004 : vector<1x64x128xf32> to vector<64x128xf32>
    %cst_839 = arith.constant dense<0.000000e+00> : vector<16x128xf32>
    %1006 = tpu.matmul %1003, %1005, %cst_839 {dimension_numbers = #tpu.dot_dimension_numbers<[1], [0], [0], [1], [0, 0, 1, 1], [], []>} : vector<16x64xf32>, vector<64x128xf32>, vector<16x128xf32> -> vector<16x128xf32>
    %1007 = arith.addf %970, %1006 : vector<16x128xf32>
    %1008 = vector.extract_strided_slice %1002 {offsets = [0, 4], sizes = [16, 64], strides = [1, 1]} : vector<16x72xf32> to vector<16x64xf32>
    %c10_840 = arith.constant 10 : index
    %c0_841 = arith.constant 0 : index
    %c0_842 = arith.constant 0 : index
    %1009 = vector.load %arg2[%c10_840, %c0_841, %c0_842] : memref<27x64x128xf32, #tpu.memory_space<vmem>>, vector<1x64x128xf32>
    %1010 = vector.shape_cast %1009 : vector<1x64x128xf32> to vector<64x128xf32>
    %cst_843 = arith.constant dense<0.000000e+00> : vector<16x128xf32>
    %1011 = tpu.matmul %1008, %1010, %cst_843 {dimension_numbers = #tpu.dot_dimension_numbers<[1], [0], [0], [1], [0, 0, 1, 1], [], []>} : vector<16x64xf32>, vector<64x128xf32>, vector<16x128xf32> -> vector<16x128xf32>
    %1012 = arith.addf %1007, %1011 : vector<16x128xf32>
    %1013 = vector.extract_strided_slice %1002 {offsets = [0, 8], sizes = [16, 64], strides = [1, 1]} : vector<16x72xf32> to vector<16x64xf32>
    %c11_844 = arith.constant 11 : index
    %c0_845 = arith.constant 0 : index
    %c0_846 = arith.constant 0 : index
    %1014 = vector.load %arg2[%c11_844, %c0_845, %c0_846] : memref<27x64x128xf32, #tpu.memory_space<vmem>>, vector<1x64x128xf32>
    %1015 = vector.shape_cast %1014 : vector<1x64x128xf32> to vector<64x128xf32>
    %cst_847 = arith.constant dense<0.000000e+00> : vector<16x128xf32>
    %1016 = tpu.matmul %1013, %1015, %cst_847 {dimension_numbers = #tpu.dot_dimension_numbers<[1], [0], [0], [1], [0, 0, 1, 1], [], []>} : vector<16x64xf32>, vector<64x128xf32>, vector<16x128xf32> -> vector<16x128xf32>
    %1017 = arith.addf %1012, %1016 : vector<16x128xf32>
    %1018 = vector.extract_strided_slice %1002 {offsets = [0, 0], sizes = [16, 64], strides = [1, 1]} : vector<16x72xf32> to vector<16x64xf32>
    %c18_848 = arith.constant 18 : index
    %c0_849 = arith.constant 0 : index
    %c0_850 = arith.constant 0 : index
    %1019 = vector.load %arg2[%c18_848, %c0_849, %c0_850] : memref<27x64x128xf32, #tpu.memory_space<vmem>>, vector<1x64x128xf32>
    %1020 = vector.shape_cast %1019 : vector<1x64x128xf32> to vector<64x128xf32>
    %cst_851 = arith.constant dense<0.000000e+00> : vector<16x128xf32>
    %1021 = tpu.matmul %1018, %1020, %cst_851 {dimension_numbers = #tpu.dot_dimension_numbers<[1], [0], [0], [1], [0, 0, 1, 1], [], []>} : vector<16x64xf32>, vector<64x128xf32>, vector<16x128xf32> -> vector<16x128xf32>
    %1022 = arith.addf %985, %1021 : vector<16x128xf32>
    %1023 = vector.extract_strided_slice %1002 {offsets = [0, 4], sizes = [16, 64], strides = [1, 1]} : vector<16x72xf32> to vector<16x64xf32>
    %c19_852 = arith.constant 19 : index
    %c0_853 = arith.constant 0 : index
    %c0_854 = arith.constant 0 : index
    %1024 = vector.load %arg2[%c19_852, %c0_853, %c0_854] : memref<27x64x128xf32, #tpu.memory_space<vmem>>, vector<1x64x128xf32>
    %1025 = vector.shape_cast %1024 : vector<1x64x128xf32> to vector<64x128xf32>
    %cst_855 = arith.constant dense<0.000000e+00> : vector<16x128xf32>
    %1026 = tpu.matmul %1023, %1025, %cst_855 {dimension_numbers = #tpu.dot_dimension_numbers<[1], [0], [0], [1], [0, 0, 1, 1], [], []>} : vector<16x64xf32>, vector<64x128xf32>, vector<16x128xf32> -> vector<16x128xf32>
    %1027 = arith.addf %1022, %1026 : vector<16x128xf32>
    %1028 = vector.extract_strided_slice %1002 {offsets = [0, 8], sizes = [16, 64], strides = [1, 1]} : vector<16x72xf32> to vector<16x64xf32>
    %c20_856 = arith.constant 20 : index
    %c0_857 = arith.constant 0 : index
    %c0_858 = arith.constant 0 : index
    %1029 = vector.load %arg2[%c20_856, %c0_857, %c0_858] : memref<27x64x128xf32, #tpu.memory_space<vmem>>, vector<1x64x128xf32>
    %1030 = vector.shape_cast %1029 : vector<1x64x128xf32> to vector<64x128xf32>
    %cst_859 = arith.constant dense<0.000000e+00> : vector<16x128xf32>
    %1031 = tpu.matmul %1028, %1030, %cst_859 {dimension_numbers = #tpu.dot_dimension_numbers<[1], [0], [0], [1], [0, 0, 1, 1], [], []>} : vector<16x64xf32>, vector<64x128xf32>, vector<16x128xf32> -> vector<16x128xf32>
    %1032 = arith.addf %1027, %1031 : vector<16x128xf32>
    %c0_860 = arith.constant 0 : index
    %c8_861 = arith.constant 8 : index
    %c1_862 = arith.constant 1 : index
    %c0_863 = arith.constant 0 : index
    %1033 = vector.load %arg1[%c0_860, %c8_861, %c1_862, %c0_863] : memref<1x10x18x72xf32, #tpu.memory_space<vmem>>, vector<1x1x16x72xf32>
    %1034 = vector.shape_cast %1033 : vector<1x1x16x72xf32> to vector<16x72xf32>
    %1035 = vector.extract_strided_slice %1034 {offsets = [0, 0], sizes = [16, 64], strides = [1, 1]} : vector<16x72xf32> to vector<16x64xf32>
    %c12_864 = arith.constant 12 : index
    %c0_865 = arith.constant 0 : index
    %c0_866 = arith.constant 0 : index
    %1036 = vector.load %arg2[%c12_864, %c0_865, %c0_866] : memref<27x64x128xf32, #tpu.memory_space<vmem>>, vector<1x64x128xf32>
    %1037 = vector.shape_cast %1036 : vector<1x64x128xf32> to vector<64x128xf32>
    %cst_867 = arith.constant dense<0.000000e+00> : vector<16x128xf32>
    %1038 = tpu.matmul %1035, %1037, %cst_867 {dimension_numbers = #tpu.dot_dimension_numbers<[1], [0], [0], [1], [0, 0, 1, 1], [], []>} : vector<16x64xf32>, vector<64x128xf32>, vector<16x128xf32> -> vector<16x128xf32>
    %1039 = arith.addf %1017, %1038 : vector<16x128xf32>
    %1040 = vector.extract_strided_slice %1034 {offsets = [0, 4], sizes = [16, 64], strides = [1, 1]} : vector<16x72xf32> to vector<16x64xf32>
    %c13_868 = arith.constant 13 : index
    %c0_869 = arith.constant 0 : index
    %c0_870 = arith.constant 0 : index
    %1041 = vector.load %arg2[%c13_868, %c0_869, %c0_870] : memref<27x64x128xf32, #tpu.memory_space<vmem>>, vector<1x64x128xf32>
    %1042 = vector.shape_cast %1041 : vector<1x64x128xf32> to vector<64x128xf32>
    %cst_871 = arith.constant dense<0.000000e+00> : vector<16x128xf32>
    %1043 = tpu.matmul %1040, %1042, %cst_871 {dimension_numbers = #tpu.dot_dimension_numbers<[1], [0], [0], [1], [0, 0, 1, 1], [], []>} : vector<16x64xf32>, vector<64x128xf32>, vector<16x128xf32> -> vector<16x128xf32>
    %1044 = arith.addf %1039, %1043 : vector<16x128xf32>
    %1045 = vector.extract_strided_slice %1034 {offsets = [0, 8], sizes = [16, 64], strides = [1, 1]} : vector<16x72xf32> to vector<16x64xf32>
    %c14_872 = arith.constant 14 : index
    %c0_873 = arith.constant 0 : index
    %c0_874 = arith.constant 0 : index
    %1046 = vector.load %arg2[%c14_872, %c0_873, %c0_874] : memref<27x64x128xf32, #tpu.memory_space<vmem>>, vector<1x64x128xf32>
    %1047 = vector.shape_cast %1046 : vector<1x64x128xf32> to vector<64x128xf32>
    %cst_875 = arith.constant dense<0.000000e+00> : vector<16x128xf32>
    %1048 = tpu.matmul %1045, %1047, %cst_875 {dimension_numbers = #tpu.dot_dimension_numbers<[1], [0], [0], [1], [0, 0, 1, 1], [], []>} : vector<16x64xf32>, vector<64x128xf32>, vector<16x128xf32> -> vector<16x128xf32>
    %1049 = arith.addf %1044, %1048 : vector<16x128xf32>
    %1050 = vector.extract_strided_slice %1034 {offsets = [0, 0], sizes = [16, 64], strides = [1, 1]} : vector<16x72xf32> to vector<16x64xf32>
    %c21_876 = arith.constant 21 : index
    %c0_877 = arith.constant 0 : index
    %c0_878 = arith.constant 0 : index
    %1051 = vector.load %arg2[%c21_876, %c0_877, %c0_878] : memref<27x64x128xf32, #tpu.memory_space<vmem>>, vector<1x64x128xf32>
    %1052 = vector.shape_cast %1051 : vector<1x64x128xf32> to vector<64x128xf32>
    %cst_879 = arith.constant dense<0.000000e+00> : vector<16x128xf32>
    %1053 = tpu.matmul %1050, %1052, %cst_879 {dimension_numbers = #tpu.dot_dimension_numbers<[1], [0], [0], [1], [0, 0, 1, 1], [], []>} : vector<16x64xf32>, vector<64x128xf32>, vector<16x128xf32> -> vector<16x128xf32>
    %1054 = arith.addf %1032, %1053 : vector<16x128xf32>
    %1055 = vector.extract_strided_slice %1034 {offsets = [0, 4], sizes = [16, 64], strides = [1, 1]} : vector<16x72xf32> to vector<16x64xf32>
    %c22_880 = arith.constant 22 : index
    %c0_881 = arith.constant 0 : index
    %c0_882 = arith.constant 0 : index
    %1056 = vector.load %arg2[%c22_880, %c0_881, %c0_882] : memref<27x64x128xf32, #tpu.memory_space<vmem>>, vector<1x64x128xf32>
    %1057 = vector.shape_cast %1056 : vector<1x64x128xf32> to vector<64x128xf32>
    %cst_883 = arith.constant dense<0.000000e+00> : vector<16x128xf32>
    %1058 = tpu.matmul %1055, %1057, %cst_883 {dimension_numbers = #tpu.dot_dimension_numbers<[1], [0], [0], [1], [0, 0, 1, 1], [], []>} : vector<16x64xf32>, vector<64x128xf32>, vector<16x128xf32> -> vector<16x128xf32>
    %1059 = arith.addf %1054, %1058 : vector<16x128xf32>
    %1060 = vector.extract_strided_slice %1034 {offsets = [0, 8], sizes = [16, 64], strides = [1, 1]} : vector<16x72xf32> to vector<16x64xf32>
    %c23_884 = arith.constant 23 : index
    %c0_885 = arith.constant 0 : index
    %c0_886 = arith.constant 0 : index
    %1061 = vector.load %arg2[%c23_884, %c0_885, %c0_886] : memref<27x64x128xf32, #tpu.memory_space<vmem>>, vector<1x64x128xf32>
    %1062 = vector.shape_cast %1061 : vector<1x64x128xf32> to vector<64x128xf32>
    %cst_887 = arith.constant dense<0.000000e+00> : vector<16x128xf32>
    %1063 = tpu.matmul %1060, %1062, %cst_887 {dimension_numbers = #tpu.dot_dimension_numbers<[1], [0], [0], [1], [0, 0, 1, 1], [], []>} : vector<16x64xf32>, vector<64x128xf32>, vector<16x128xf32> -> vector<16x128xf32>
    %1064 = arith.addf %1059, %1063 : vector<16x128xf32>
    %c0_888 = arith.constant 0 : index
    %c8_889 = arith.constant 8 : index
    %c2_890 = arith.constant 2 : index
    %c0_891 = arith.constant 0 : index
    %1065 = vector.load %arg1[%c0_888, %c8_889, %c2_890, %c0_891] : memref<1x10x18x72xf32, #tpu.memory_space<vmem>>, vector<1x1x16x72xf32>
    %1066 = vector.shape_cast %1065 : vector<1x1x16x72xf32> to vector<16x72xf32>
    %1067 = vector.extract_strided_slice %1066 {offsets = [0, 0], sizes = [16, 64], strides = [1, 1]} : vector<16x72xf32> to vector<16x64xf32>
    %c15_892 = arith.constant 15 : index
    %c0_893 = arith.constant 0 : index
    %c0_894 = arith.constant 0 : index
    %1068 = vector.load %arg2[%c15_892, %c0_893, %c0_894] : memref<27x64x128xf32, #tpu.memory_space<vmem>>, vector<1x64x128xf32>
    %1069 = vector.shape_cast %1068 : vector<1x64x128xf32> to vector<64x128xf32>
    %cst_895 = arith.constant dense<0.000000e+00> : vector<16x128xf32>
    %1070 = tpu.matmul %1067, %1069, %cst_895 {dimension_numbers = #tpu.dot_dimension_numbers<[1], [0], [0], [1], [0, 0, 1, 1], [], []>} : vector<16x64xf32>, vector<64x128xf32>, vector<16x128xf32> -> vector<16x128xf32>
    %1071 = arith.addf %1049, %1070 : vector<16x128xf32>
    %1072 = vector.extract_strided_slice %1066 {offsets = [0, 4], sizes = [16, 64], strides = [1, 1]} : vector<16x72xf32> to vector<16x64xf32>
    %c16_896 = arith.constant 16 : index
    %c0_897 = arith.constant 0 : index
    %c0_898 = arith.constant 0 : index
    %1073 = vector.load %arg2[%c16_896, %c0_897, %c0_898] : memref<27x64x128xf32, #tpu.memory_space<vmem>>, vector<1x64x128xf32>
    %1074 = vector.shape_cast %1073 : vector<1x64x128xf32> to vector<64x128xf32>
    %cst_899 = arith.constant dense<0.000000e+00> : vector<16x128xf32>
    %1075 = tpu.matmul %1072, %1074, %cst_899 {dimension_numbers = #tpu.dot_dimension_numbers<[1], [0], [0], [1], [0, 0, 1, 1], [], []>} : vector<16x64xf32>, vector<64x128xf32>, vector<16x128xf32> -> vector<16x128xf32>
    %1076 = arith.addf %1071, %1075 : vector<16x128xf32>
    %1077 = vector.extract_strided_slice %1066 {offsets = [0, 8], sizes = [16, 64], strides = [1, 1]} : vector<16x72xf32> to vector<16x64xf32>
    %c17_900 = arith.constant 17 : index
    %c0_901 = arith.constant 0 : index
    %c0_902 = arith.constant 0 : index
    %1078 = vector.load %arg2[%c17_900, %c0_901, %c0_902] : memref<27x64x128xf32, #tpu.memory_space<vmem>>, vector<1x64x128xf32>
    %1079 = vector.shape_cast %1078 : vector<1x64x128xf32> to vector<64x128xf32>
    %cst_903 = arith.constant dense<0.000000e+00> : vector<16x128xf32>
    %1080 = tpu.matmul %1077, %1079, %cst_903 {dimension_numbers = #tpu.dot_dimension_numbers<[1], [0], [0], [1], [0, 0, 1, 1], [], []>} : vector<16x64xf32>, vector<64x128xf32>, vector<16x128xf32> -> vector<16x128xf32>
    %1081 = arith.addf %1076, %1080 : vector<16x128xf32>
    %1082 = vector.extract_strided_slice %1066 {offsets = [0, 0], sizes = [16, 64], strides = [1, 1]} : vector<16x72xf32> to vector<16x64xf32>
    %c24_904 = arith.constant 24 : index
    %c0_905 = arith.constant 0 : index
    %c0_906 = arith.constant 0 : index
    %1083 = vector.load %arg2[%c24_904, %c0_905, %c0_906] : memref<27x64x128xf32, #tpu.memory_space<vmem>>, vector<1x64x128xf32>
    %1084 = vector.shape_cast %1083 : vector<1x64x128xf32> to vector<64x128xf32>
    %cst_907 = arith.constant dense<0.000000e+00> : vector<16x128xf32>
    %1085 = tpu.matmul %1082, %1084, %cst_907 {dimension_numbers = #tpu.dot_dimension_numbers<[1], [0], [0], [1], [0, 0, 1, 1], [], []>} : vector<16x64xf32>, vector<64x128xf32>, vector<16x128xf32> -> vector<16x128xf32>
    %1086 = arith.addf %1064, %1085 : vector<16x128xf32>
    %1087 = vector.extract_strided_slice %1066 {offsets = [0, 4], sizes = [16, 64], strides = [1, 1]} : vector<16x72xf32> to vector<16x64xf32>
    %c25_908 = arith.constant 25 : index
    %c0_909 = arith.constant 0 : index
    %c0_910 = arith.constant 0 : index
    %1088 = vector.load %arg2[%c25_908, %c0_909, %c0_910] : memref<27x64x128xf32, #tpu.memory_space<vmem>>, vector<1x64x128xf32>
    %1089 = vector.shape_cast %1088 : vector<1x64x128xf32> to vector<64x128xf32>
    %cst_911 = arith.constant dense<0.000000e+00> : vector<16x128xf32>
    %1090 = tpu.matmul %1087, %1089, %cst_911 {dimension_numbers = #tpu.dot_dimension_numbers<[1], [0], [0], [1], [0, 0, 1, 1], [], []>} : vector<16x64xf32>, vector<64x128xf32>, vector<16x128xf32> -> vector<16x128xf32>
    %1091 = arith.addf %1086, %1090 : vector<16x128xf32>
    %1092 = vector.extract_strided_slice %1066 {offsets = [0, 8], sizes = [16, 64], strides = [1, 1]} : vector<16x72xf32> to vector<16x64xf32>
    %c26_912 = arith.constant 26 : index
    %c0_913 = arith.constant 0 : index
    %c0_914 = arith.constant 0 : index
    %1093 = vector.load %arg2[%c26_912, %c0_913, %c0_914] : memref<27x64x128xf32, #tpu.memory_space<vmem>>, vector<1x64x128xf32>
    %1094 = vector.shape_cast %1093 : vector<1x64x128xf32> to vector<64x128xf32>
    %cst_915 = arith.constant dense<0.000000e+00> : vector<16x128xf32>
    %1095 = tpu.matmul %1092, %1094, %cst_915 {dimension_numbers = #tpu.dot_dimension_numbers<[1], [0], [0], [1], [0, 0, 1, 1], [], []>} : vector<16x64xf32>, vector<64x128xf32>, vector<16x128xf32> -> vector<16x128xf32>
    %1096 = arith.addf %1091, %1095 : vector<16x128xf32>
    %c0_916 = arith.constant 0 : index
    %c9_917 = arith.constant 9 : index
    %c0_918 = arith.constant 0 : index
    %c0_919 = arith.constant 0 : index
    %1097 = vector.load %arg1[%c0_916, %c9_917, %c0_918, %c0_919] : memref<1x10x18x72xf32, #tpu.memory_space<vmem>>, vector<1x1x16x72xf32>
    %1098 = vector.shape_cast %1097 : vector<1x1x16x72xf32> to vector<16x72xf32>
    %1099 = vector.extract_strided_slice %1098 {offsets = [0, 0], sizes = [16, 64], strides = [1, 1]} : vector<16x72xf32> to vector<16x64xf32>
    %c18_920 = arith.constant 18 : index
    %c0_921 = arith.constant 0 : index
    %c0_922 = arith.constant 0 : index
    %1100 = vector.load %arg2[%c18_920, %c0_921, %c0_922] : memref<27x64x128xf32, #tpu.memory_space<vmem>>, vector<1x64x128xf32>
    %1101 = vector.shape_cast %1100 : vector<1x64x128xf32> to vector<64x128xf32>
    %cst_923 = arith.constant dense<0.000000e+00> : vector<16x128xf32>
    %1102 = tpu.matmul %1099, %1101, %cst_923 {dimension_numbers = #tpu.dot_dimension_numbers<[1], [0], [0], [1], [0, 0, 1, 1], [], []>} : vector<16x64xf32>, vector<64x128xf32>, vector<16x128xf32> -> vector<16x128xf32>
    %1103 = arith.addf %1081, %1102 : vector<16x128xf32>
    %1104 = vector.extract_strided_slice %1098 {offsets = [0, 4], sizes = [16, 64], strides = [1, 1]} : vector<16x72xf32> to vector<16x64xf32>
    %c19_924 = arith.constant 19 : index
    %c0_925 = arith.constant 0 : index
    %c0_926 = arith.constant 0 : index
    %1105 = vector.load %arg2[%c19_924, %c0_925, %c0_926] : memref<27x64x128xf32, #tpu.memory_space<vmem>>, vector<1x64x128xf32>
    %1106 = vector.shape_cast %1105 : vector<1x64x128xf32> to vector<64x128xf32>
    %cst_927 = arith.constant dense<0.000000e+00> : vector<16x128xf32>
    %1107 = tpu.matmul %1104, %1106, %cst_927 {dimension_numbers = #tpu.dot_dimension_numbers<[1], [0], [0], [1], [0, 0, 1, 1], [], []>} : vector<16x64xf32>, vector<64x128xf32>, vector<16x128xf32> -> vector<16x128xf32>
    %1108 = arith.addf %1103, %1107 : vector<16x128xf32>
    %1109 = vector.extract_strided_slice %1098 {offsets = [0, 8], sizes = [16, 64], strides = [1, 1]} : vector<16x72xf32> to vector<16x64xf32>
    %c20_928 = arith.constant 20 : index
    %c0_929 = arith.constant 0 : index
    %c0_930 = arith.constant 0 : index
    %1110 = vector.load %arg2[%c20_928, %c0_929, %c0_930] : memref<27x64x128xf32, #tpu.memory_space<vmem>>, vector<1x64x128xf32>
    %1111 = vector.shape_cast %1110 : vector<1x64x128xf32> to vector<64x128xf32>
    %cst_931 = arith.constant dense<0.000000e+00> : vector<16x128xf32>
    %1112 = tpu.matmul %1109, %1111, %cst_931 {dimension_numbers = #tpu.dot_dimension_numbers<[1], [0], [0], [1], [0, 0, 1, 1], [], []>} : vector<16x64xf32>, vector<64x128xf32>, vector<16x128xf32> -> vector<16x128xf32>
    %1113 = arith.addf %1108, %1112 : vector<16x128xf32>
    %c0_932 = arith.constant 0 : index
    %c9_933 = arith.constant 9 : index
    %c1_934 = arith.constant 1 : index
    %c0_935 = arith.constant 0 : index
    %1114 = vector.load %arg1[%c0_932, %c9_933, %c1_934, %c0_935] : memref<1x10x18x72xf32, #tpu.memory_space<vmem>>, vector<1x1x16x72xf32>
    %1115 = vector.shape_cast %1114 : vector<1x1x16x72xf32> to vector<16x72xf32>
    %1116 = vector.extract_strided_slice %1115 {offsets = [0, 0], sizes = [16, 64], strides = [1, 1]} : vector<16x72xf32> to vector<16x64xf32>
    %c21_936 = arith.constant 21 : index
    %c0_937 = arith.constant 0 : index
    %c0_938 = arith.constant 0 : index
    %1117 = vector.load %arg2[%c21_936, %c0_937, %c0_938] : memref<27x64x128xf32, #tpu.memory_space<vmem>>, vector<1x64x128xf32>
    %1118 = vector.shape_cast %1117 : vector<1x64x128xf32> to vector<64x128xf32>
    %cst_939 = arith.constant dense<0.000000e+00> : vector<16x128xf32>
    %1119 = tpu.matmul %1116, %1118, %cst_939 {dimension_numbers = #tpu.dot_dimension_numbers<[1], [0], [0], [1], [0, 0, 1, 1], [], []>} : vector<16x64xf32>, vector<64x128xf32>, vector<16x128xf32> -> vector<16x128xf32>
    %1120 = arith.addf %1113, %1119 : vector<16x128xf32>
    %1121 = vector.extract_strided_slice %1115 {offsets = [0, 4], sizes = [16, 64], strides = [1, 1]} : vector<16x72xf32> to vector<16x64xf32>
    %c22_940 = arith.constant 22 : index
    %c0_941 = arith.constant 0 : index
    %c0_942 = arith.constant 0 : index
    %1122 = vector.load %arg2[%c22_940, %c0_941, %c0_942] : memref<27x64x128xf32, #tpu.memory_space<vmem>>, vector<1x64x128xf32>
    %1123 = vector.shape_cast %1122 : vector<1x64x128xf32> to vector<64x128xf32>
    %cst_943 = arith.constant dense<0.000000e+00> : vector<16x128xf32>
    %1124 = tpu.matmul %1121, %1123, %cst_943 {dimension_numbers = #tpu.dot_dimension_numbers<[1], [0], [0], [1], [0, 0, 1, 1], [], []>} : vector<16x64xf32>, vector<64x128xf32>, vector<16x128xf32> -> vector<16x128xf32>
    %1125 = arith.addf %1120, %1124 : vector<16x128xf32>
    %1126 = vector.extract_strided_slice %1115 {offsets = [0, 8], sizes = [16, 64], strides = [1, 1]} : vector<16x72xf32> to vector<16x64xf32>
    %c23_944 = arith.constant 23 : index
    %c0_945 = arith.constant 0 : index
    %c0_946 = arith.constant 0 : index
    %1127 = vector.load %arg2[%c23_944, %c0_945, %c0_946] : memref<27x64x128xf32, #tpu.memory_space<vmem>>, vector<1x64x128xf32>
    %1128 = vector.shape_cast %1127 : vector<1x64x128xf32> to vector<64x128xf32>
    %cst_947 = arith.constant dense<0.000000e+00> : vector<16x128xf32>
    %1129 = tpu.matmul %1126, %1128, %cst_947 {dimension_numbers = #tpu.dot_dimension_numbers<[1], [0], [0], [1], [0, 0, 1, 1], [], []>} : vector<16x64xf32>, vector<64x128xf32>, vector<16x128xf32> -> vector<16x128xf32>
    %1130 = arith.addf %1125, %1129 : vector<16x128xf32>
    %c0_948 = arith.constant 0 : index
    %c9_949 = arith.constant 9 : index
    %c2_950 = arith.constant 2 : index
    %c0_951 = arith.constant 0 : index
    %1131 = vector.load %arg1[%c0_948, %c9_949, %c2_950, %c0_951] : memref<1x10x18x72xf32, #tpu.memory_space<vmem>>, vector<1x1x16x72xf32>
    %1132 = vector.shape_cast %1131 : vector<1x1x16x72xf32> to vector<16x72xf32>
    %1133 = vector.extract_strided_slice %1132 {offsets = [0, 0], sizes = [16, 64], strides = [1, 1]} : vector<16x72xf32> to vector<16x64xf32>
    %c24_952 = arith.constant 24 : index
    %c0_953 = arith.constant 0 : index
    %c0_954 = arith.constant 0 : index
    %1134 = vector.load %arg2[%c24_952, %c0_953, %c0_954] : memref<27x64x128xf32, #tpu.memory_space<vmem>>, vector<1x64x128xf32>
    %1135 = vector.shape_cast %1134 : vector<1x64x128xf32> to vector<64x128xf32>
    %cst_955 = arith.constant dense<0.000000e+00> : vector<16x128xf32>
    %1136 = tpu.matmul %1133, %1135, %cst_955 {dimension_numbers = #tpu.dot_dimension_numbers<[1], [0], [0], [1], [0, 0, 1, 1], [], []>} : vector<16x64xf32>, vector<64x128xf32>, vector<16x128xf32> -> vector<16x128xf32>
    %1137 = arith.addf %1130, %1136 : vector<16x128xf32>
    %1138 = vector.extract_strided_slice %1132 {offsets = [0, 4], sizes = [16, 64], strides = [1, 1]} : vector<16x72xf32> to vector<16x64xf32>
    %c25_956 = arith.constant 25 : index
    %c0_957 = arith.constant 0 : index
    %c0_958 = arith.constant 0 : index
    %1139 = vector.load %arg2[%c25_956, %c0_957, %c0_958] : memref<27x64x128xf32, #tpu.memory_space<vmem>>, vector<1x64x128xf32>
    %1140 = vector.shape_cast %1139 : vector<1x64x128xf32> to vector<64x128xf32>
    %cst_959 = arith.constant dense<0.000000e+00> : vector<16x128xf32>
    %1141 = tpu.matmul %1138, %1140, %cst_959 {dimension_numbers = #tpu.dot_dimension_numbers<[1], [0], [0], [1], [0, 0, 1, 1], [], []>} : vector<16x64xf32>, vector<64x128xf32>, vector<16x128xf32> -> vector<16x128xf32>
    %1142 = arith.addf %1137, %1141 : vector<16x128xf32>
    %1143 = vector.extract_strided_slice %1132 {offsets = [0, 8], sizes = [16, 64], strides = [1, 1]} : vector<16x72xf32> to vector<16x64xf32>
    %c26_960 = arith.constant 26 : index
    %c0_961 = arith.constant 0 : index
    %c0_962 = arith.constant 0 : index
    %1144 = vector.load %arg2[%c26_960, %c0_961, %c0_962] : memref<27x64x128xf32, #tpu.memory_space<vmem>>, vector<1x64x128xf32>
    %1145 = vector.shape_cast %1144 : vector<1x64x128xf32> to vector<64x128xf32>
    %cst_963 = arith.constant dense<0.000000e+00> : vector<16x128xf32>
    %1146 = tpu.matmul %1143, %1145, %cst_963 {dimension_numbers = #tpu.dot_dimension_numbers<[1], [0], [0], [1], [0, 0, 1, 1], [], []>} : vector<16x64xf32>, vector<64x128xf32>, vector<16x128xf32> -> vector<16x128xf32>
    %1147 = arith.addf %1142, %1146 : vector<16x128xf32>
    %c0_964 = arith.constant 0 : index
    %c0_965 = arith.constant 0 : index
    %c0_966 = arith.constant 0 : index
    %c0_967 = arith.constant 0 : index
    %1148 = vector.load %arg3[%c0_964, %c0_965, %c0_966, %c0_967] : memref<1x8x16x128xf32, #tpu.memory_space<vmem>>, vector<1x1x16x128xf32>
    %1149 = vector.shape_cast %1148 : vector<1x1x16x128xf32> to vector<16x128xf32>
    %1150 = vector.shape_cast %295 : vector<16x128xf32> to vector<1x1x16x128xf32>
    tpu.vector_store %arg3[%c0_964, %c0_965, %c0_966, %c0_967], %1150 {strides = array<i32>} : memref<1x8x16x128xf32, #tpu.memory_space<vmem>>, vector<1x1x16x128xf32>,
    %c0_968 = arith.constant 0 : index
    %c1_969 = arith.constant 1 : index
    %c0_970 = arith.constant 0 : index
    %c0_971 = arith.constant 0 : index
    %1151 = vector.load %arg3[%c0_968, %c1_969, %c0_970, %c0_971] : memref<1x8x16x128xf32, #tpu.memory_space<vmem>>, vector<1x1x16x128xf32>
    %1152 = vector.shape_cast %1151 : vector<1x1x16x128xf32> to vector<16x128xf32>
    %1153 = vector.shape_cast %436 : vector<16x128xf32> to vector<1x1x16x128xf32>
    tpu.vector_store %arg3[%c0_968, %c1_969, %c0_970, %c0_971], %1153 {strides = array<i32>} : memref<1x8x16x128xf32, #tpu.memory_space<vmem>>, vector<1x1x16x128xf32>,
    %c0_972 = arith.constant 0 : index
    %c2_973 = arith.constant 2 : index
    %c0_974 = arith.constant 0 : index
    %c0_975 = arith.constant 0 : index
    %1154 = vector.load %arg3[%c0_972, %c2_973, %c0_974, %c0_975] : memref<1x8x16x128xf32, #tpu.memory_space<vmem>>, vector<1x1x16x128xf32>
    %1155 = vector.shape_cast %1154 : vector<1x1x16x128xf32> to vector<16x128xf32>
    %1156 = vector.shape_cast %577 : vector<16x128xf32> to vector<1x1x16x128xf32>
    tpu.vector_store %arg3[%c0_972, %c2_973, %c0_974, %c0_975], %1156 {strides = array<i32>} : memref<1x8x16x128xf32, #tpu.memory_space<vmem>>, vector<1x1x16x128xf32>,
    %c0_976 = arith.constant 0 : index
    %c3_977 = arith.constant 3 : index
    %c0_978 = arith.constant 0 : index
    %c0_979 = arith.constant 0 : index
    %1157 = vector.load %arg3[%c0_976, %c3_977, %c0_978, %c0_979] : memref<1x8x16x128xf32, #tpu.memory_space<vmem>>, vector<1x1x16x128xf32>
    %1158 = vector.shape_cast %1157 : vector<1x1x16x128xf32> to vector<16x128xf32>
    %1159 = vector.shape_cast %718 : vector<16x128xf32> to vector<1x1x16x128xf32>
    tpu.vector_store %arg3[%c0_976, %c3_977, %c0_978, %c0_979], %1159 {strides = array<i32>} : memref<1x8x16x128xf32, #tpu.memory_space<vmem>>, vector<1x1x16x128xf32>,
    %c0_980 = arith.constant 0 : index
    %c4_981 = arith.constant 4 : index
    %c0_982 = arith.constant 0 : index
    %c0_983 = arith.constant 0 : index
    %1160 = vector.load %arg3[%c0_980, %c4_981, %c0_982, %c0_983] : memref<1x8x16x128xf32, #tpu.memory_space<vmem>>, vector<1x1x16x128xf32>
    %1161 = vector.shape_cast %1160 : vector<1x1x16x128xf32> to vector<16x128xf32>
    %1162 = vector.shape_cast %859 : vector<16x128xf32> to vector<1x1x16x128xf32>
    tpu.vector_store %arg3[%c0_980, %c4_981, %c0_982, %c0_983], %1162 {strides = array<i32>} : memref<1x8x16x128xf32, #tpu.memory_space<vmem>>, vector<1x1x16x128xf32>,
    %c0_984 = arith.constant 0 : index
    %c5_985 = arith.constant 5 : index
    %c0_986 = arith.constant 0 : index
    %c0_987 = arith.constant 0 : index
    %1163 = vector.load %arg3[%c0_984, %c5_985, %c0_986, %c0_987] : memref<1x8x16x128xf32, #tpu.memory_space<vmem>>, vector<1x1x16x128xf32>
    %1164 = vector.shape_cast %1163 : vector<1x1x16x128xf32> to vector<16x128xf32>
    %1165 = vector.shape_cast %1000 : vector<16x128xf32> to vector<1x1x16x128xf32>
    tpu.vector_store %arg3[%c0_984, %c5_985, %c0_986, %c0_987], %1165 {strides = array<i32>} : memref<1x8x16x128xf32, #tpu.memory_space<vmem>>, vector<1x1x16x128xf32>,
    %c0_988 = arith.constant 0 : index
    %c6_989 = arith.constant 6 : index
    %c0_990 = arith.constant 0 : index
    %c0_991 = arith.constant 0 : index
    %1166 = vector.load %arg3[%c0_988, %c6_989, %c0_990, %c0_991] : memref<1x8x16x128xf32, #tpu.memory_space<vmem>>, vector<1x1x16x128xf32>
    %1167 = vector.shape_cast %1166 : vector<1x1x16x128xf32> to vector<16x128xf32>
    %1168 = vector.shape_cast %1096 : vector<16x128xf32> to vector<1x1x16x128xf32>
    tpu.vector_store %arg3[%c0_988, %c6_989, %c0_990, %c0_991], %1168 {strides = array<i32>} : memref<1x8x16x128xf32, #tpu.memory_space<vmem>>, vector<1x1x16x128xf32>,
    %c0_992 = arith.constant 0 : index
    %c7_993 = arith.constant 7 : index
    %c0_994 = arith.constant 0 : index
    %c0_995 = arith.constant 0 : index
    %1169 = vector.load %arg3[%c0_992, %c7_993, %c0_994, %c0_995] : memref<1x8x16x128xf32, #tpu.memory_space<vmem>>, vector<1x1x16x128xf32>
    %1170 = vector.shape_cast %1169 : vector<1x1x16x128xf32> to vector<16x128xf32>
    %1171 = vector.shape_cast %1147 : vector<16x128xf32> to vector<1x1x16x128xf32>
    tpu.vector_store %arg3[%c0_992, %c7_993, %c0_994, %c0_995], %1171 {strides = array<i32>} : memref<1x8x16x128xf32, #tpu.memory_space<vmem>>, vector<1x1x16x128xf32>,
    return
  }
  func.func @transform_0(%arg0: i32) -> (i32, i32, i32, i32) {
    %c0_i32 = arith.constant 0 : i32
    %c0_i32_0 = arith.constant 0 : i32
    %c0_i32_1 = arith.constant 0 : i32
    %c0_i32_2 = arith.constant 0 : i32
    return %arg0, %c0_i32, %c0_i32_0, %c0_i32_1 : i32, i32, i32, i32
  }
  func.func @transform_1(%arg0: i32) -> (i32, i32, i32) {
    %c0_i32 = arith.constant 0 : i32
    %c0_i32_0 = arith.constant 0 : i32
    %c0_i32_1 = arith.constant 0 : i32
    %c0_i32_2 = arith.constant 0 : i32
    return %c0_i32, %c0_i32_0, %c0_i32_1 : i32, i32, i32
  }
  func.func @transform_2(%arg0: i32) -> (i32, i32, i32, i32) {
    %c0_i32 = arith.constant 0 : i32
    %c0_i32_0 = arith.constant 0 : i32
    %c0_i32_1 = arith.constant 0 : i32
    %c0_i32_2 = arith.constant 0 : i32
    return %arg0, %c0_i32, %c0_i32_0, %c0_i32_1 : i32, i32, i32, i32
  }
}

</mosaic_0001>

<bundles_post_ra>
// kernel: tpu_custom_call.1
= control target key start
LH: loop header
LB: loop body
LE: loop exit
PB: predicated region body
PF: predicated region fallthrough
CT: control target
= control target key end

     0   :  { %7 = vsyncpa [#allocation3], 0  ;;  %s32280_s0 = inlined_call_operand.vmem [shape: f32[2,10,18,72], index: 0, kind: input, shape index: {}]   ;;  %s32281_s1 = inlined_call_operand.hbm [shape: f32[27,64,128], index: 1, kind: input, shape index: {}]   ;;  %s32282_s2 = inlined_call_operand.hbm [shape: f32[2,8,16,128], index: 2, kind: output, shape index: {}]  }
   0x1   :  { %8 = vsyncpa [#allocation4], 0 }
   0x2   :  { %10 = vsyncpa [#allocation4 + $0x1], 0  ;;  %s28694_s9 = smov 0   ;;  %s28696_s10 = smov 0  }
   0x3   :  { %s28698_s11 = smov 0   ;;  %s28700_s12 = smov 0  }
   0x4 LB: > { %s28715_s13 = sadd.s32 4294967295, %s28669_s12   ;;  %s17840_s14 = sadd.s32 4294967294, %s28669_s12   ;;  %s28669_s12 = sphi %s28700_s12, %s33075_s12   ;;  %s28665_s11 = sphi %s28698_s11, %s33074_s11   ;;  %s28661_s10 = sphi %s28696_s10, %s33073_s10   ;;  %s28657_s9 = sphi %s28694_s9, %s33072_s9  }
   0x5   : > { %s28719_s15 = sadd.s32 1, %s28669_s12   ;;  %s70_s16 = sadd.s32 1, %s28665_s11 }
   0x6   : > { %s67_s17 = ssub.s32 %s28669_s12, %s28719_s15  ;;  %p80_p0 = scmp.ne.s32.totalorder %s28665_s11, %s28661_s10 }
   0x7   : > { %p68_p1 = scmp.eq.s32.totalorder %s67_s17, 0  ;;  %p81_p2 = scmp.eq.s32.totalorder %s28715_s13, 1 }
   0x8   : > { %p86_p3 = scmp.ne.s32.totalorder %s28661_s10, %s28657_s9  ;;  %p87_p4 = scmp.eq.s32.totalorder %s17840_s14, 1 }
   0x9   : > { %s28730_s18 = scalar_select %p68_p1, %s28665_s11, %s70_s16  }
   0xa   : > { %p28732_p5 = por %p81_p2, %p80_p0  ;;  %p28736_p6 = por %p87_p4, %p86_p3 }
   0xb   : > { %p17841_p7 = scmp.ge.s32.totalorder %s28669_s12, 1  ;;  %p94_p8 = scmp.lt.s32.totalorder %s28669_s12, 3 }
   0xc   : > { %s32668_s19 = scalar_select %p28732_p5, 1, 0 }
   0xd   : > { %s32669_s20 = scalar_select %p28736_p6, 1, 0 }
   0xe   : > { %p32283_p9 = scmp.eq.s32.totalorder %s28715_s13, 0  ;;  %p28743_p10 = pnand %p17841_p7, %p94_p8 }
   0xf   : > { %s28671_s22 = smov [#allocation2]   ;;  %s28575_s27 = scalar_lea.hbm %s32281_s1, 27648 }
  0x10   : > { %s32670_s21 = scalar_select %p28743_p10, 1, 0 }
  0x11   : > { %s106_s23 = sshll.u32 %s28671_s22, 4  ;;  %p28497_p11 = pneg %p28743_p10  ;;  %s107_s23 = int_to_ptr.vmem [resolvable:$true] %s106_s23 }
  0x12   : > { %p28576_p13 = scmp.ne.s32.totalorder %s32281_s1, %s28575_s27  ;;  %p28582_p3 = scmp.lt.u32.totalorder %s28575_s27, %s32281_s1 }
  0x13   : > { %p28751_p12 = pnand %p32283_p9, %p28497_p11 }
  0x15   : > { %p28577_p0 = pneg %p28751_p12 }
  0x17   : > { %p28578_p1 = pnand %p28577_p0, %p28576_p13 }
  0x19   : > { %p28579_p2 = pneg %p28578_p1 }
  0x1b   : > { %p28584_p4 = pnand %p28582_p3, %p28579_p2 }
  0x1d   : > { %28587 = shalt.err (!%p28584_p4)
}
  0x1e   : > { %s28588_s4 = scalar_lea.vmem %s107_s23, 27648  ;;  %p28596_p9 = scmp.lt.s32.totalorder %s107_s23, %s107_s23 }
  0x1f   : > { %p28589_p7 = scmp.ne.s32.totalorder %s107_s23, %s28588_s4  ;;  %p28597_p6 = scmp.lt.s32.totalorder %s28588_s4, %s28588_s4 }
  0x21   : > { %p28591_p8 = pnand %p28589_p7, %p28577_p0  ;;  %p28598_p5 = por %p28597_p6, %p28596_p9 }
  0x23   : > { %p28592_p11 = pneg %p28591_p8 }
  0x25   : > { %p28599_p10 = pnand %p28598_p5, %p28592_p11 }
  0x27   : > { %28602 = shalt.err (!%p28599_p10)
}
  0x28   : > { %s28672_s5 = smov 128   ;;  %s28673_s6 = smov 8  }
  0x29   : > { %28500 = dma.hbm_to_vmem [thread:$0]  (!%p28751_p12), %s32281_s1, 27648, %s107_s23, [#allocation3], %s28672_s5, %s28672_s5, %s28673_s6  }
  0x2a   : > { %p32672_p13 = scmp.ne.s32.totalorder %s32670_s21, 0 }
  0x2c   : > { %130 = sbr.rel (%p32672_p13) target bundleno = 2123 (0x84b), region = 28 }
  0x33   : > { %p32673_p1 = scmp.eq.s32.totalorder %s28715_s13, 0 }
  0x35   : > { %28648 = dma.done.wait (%p32673_p1), [#allocation3], 27648   ;;  %p32674_p0 = pmov %p32673_p1 }
  0x36   : > { %p152_p5 = scmp.lt.s32.totalorder %s28715_s13, 1  ;;  %s28674_s21 = smov 124   ;;  %v168_v2 = vld [vmem:[#allocation2 + $0x40] sm:$0xff]  ;;  %v169_v5 = vld [vmem:[#allocation2 + $0x48] sm:$0xff]  ;;  %v170_v6 = vld [vmem:[#allocation2 + $0x50] sm:$0xff]  ;;  %vm182_vm0 = vcmask 523264  }
  0x37   : > { %28650 = vsyncadd (%p32674_p0), [#allocation3], 4294939648  ;;  %v171_v7 = vld [vmem:[#allocation2 + $0x58] sm:$0xff]  ;;  %v28800_v8 = vpack.c.bf16 %v169_v5, %v168_v2  ;;  %v172_v10 = vld [vmem:[#allocation2 + $0x60] sm:$0xff]  ;;  %s28675_s23 = smov 120   ;;  %s149_s25 = sand.u32 1, %s28661_s10  }
  0x38   : > { %s153_s14 = scalar_select %p152_p5, %s28715_s13, 1  ;;  %v28802_v9 = vpack.c.bf16 %v171_v7, %v170_v6  ;;  %v173_v11 = vld [vmem:[#allocation2 + $0x68] sm:$0xff]  ;;  %v174_v13 = vld [vmem:[#allocation2 + $0x70] sm:$0xff]  ;;  %v175_v14 = vld [vmem:[#allocation2 + $0x78] sm:$0xff] }
  0x39   : > { %32675 = vst [vmem:[#allocation8_spill] sm:$0xff] %v28800_v8  ;;  %24619 = vmatprep.subr.bf16.mxu0 %v28800_v8  ;;  %24763 = vmatprep.subr.bf16.mxu1 %v28800_v8  ;;  %v28813_v12 = vpack.c.bf16 %v173_v11, %v172_v10  ;;  %v28823_v15 = vpack.c.bf16 %v175_v14, %v174_v13  ;;  %v159_v16 = vld [vmem:[#allocation2] sm:$0xff]  ;;  %v160_v17 = vld [vmem:[#allocation2 + $0x8] sm:$0xff]  ;;  %v161_v29 = vld [vmem:[#allocation2 + $0x10] sm:$0xff]  ;;  %s17846_s26 = sshll.u32 %s149_s25, 7  ;;  %s18353_s28 = sshll.u32 %s28715_s13, 11 }
  0x3a   : > { %s28490_s16 = smul.u32 240, %s153_s14  ;;  %32676 = vst [vmem:[#allocation9_spill] sm:$0xff] %v28802_v9  ;;  %24621 = vmatpush3.bf16.msra.mxu0 %v28800_v8  ;;  %24765 = vmatpush3.bf16.msra.mxu1 %v28800_v8  ;;  %v28839_v20 = vpack.c.bf16 %v160_v17, %v159_v16  ;;  %v162_v30 = vld [vmem:[#allocation2 + $0x18] sm:$0xff]  ;;  %v163_v34 = vld [vmem:[#allocation2 + $0x20] sm:$0xff]  ;;  %v164_v35 = vld [vmem:[#allocation2 + $0x28] sm:$0xff]  ;;  %s30271_s27 = scalar_lea.vmem [#allocation5], %s17846_s26 }
  0x3b   : > { %24623 = vmatprep.subr.bf16.mxu0 %v28802_v9  ;;  %32677 = vst [vmem:[#allocation10_spill] sm:$0xff] %v28813_v12  ;;  %24767 = vmatprep.subr.bf16.mxu1 %v28802_v9  ;;  %32678 = vst [vmem:[#allocation11_spill] sm:$0xff] %v28823_v15  ;;  %v28910_v33 = vpack.c.bf16 %v162_v30, %v161_v29  ;;  %v28922_v38 = vpack.c.bf16 %v164_v35, %v163_v34  ;;  %v165_v39 = vld [vmem:[#allocation2 + $0x30] sm:$0xff]  ;;  %v166_v40 = vld [vmem:[#allocation2 + $0x38] sm:$0xff]  ;;  %s17766_s29 = sshll.u32 %s30271_s27, 4  ;;  %s32231_s4 = scalar_lea.hbm %s32282_s2, %s18353_s28  ;;  %s32233_s29 = int_to_ptr.vmem [resolvable:$true] %s17766_s29 }
  0x3c   : > { %s28782_s24 = scalar_lea.vmem %s32280_s0, %s28490_s16  ;;  %32679 = vst [vmem:[#allocation12_spill] sm:$0xff] %v28839_v20  ;;  %v28932_v41 = vpack.c.bf16 %v166_v40, %v165_v39  ;;  %v342_v42 = vld [vmem:[#allocation2 + $0x80] sm:$0xff]  ;;  %v343_v43 = vld [vmem:[#allocation2 + $0x88] sm:$0xff]  ;;  %v344_v45 = vld [vmem:[#allocation2 + $0x90] sm:$0xff]  ;;  %s32239_s5 = scalar_lea.sflag [#allocation4], %s149_s25 }
  0x3d   : > { %v28785_v0 = vld [vmem:[%s28782_s24] sm:$0xff]  ;;  %v28788_v1 = vld [vmem:[%s28782_s24 + $0x8] sm:$0xff]  ;;  %v28795_v3 = vld [vmem:[%s28782_s24 + $0x18] sm:$0xff]  ;;  %32680 = vst [vmem:[#allocation13_spill] sm:$0xff] %v28910_v33  ;;  %v28940_v44 = vpack.c.bf16 %v343_v43, %v342_v42  ;;  %s28603_s13 = scalar_lea.vmem %s32233_s29, 2048  ;;  %p33070_p9 = scmp.ne.s32.totalorder %s32668_s19, 0 }
  0x3e   : > { %178 = vrot.lane.b32.xlu0 %v28785_v0, %s28674_s21  ;;  %180 = vrot.lane.b32.xlu1 %v28788_v1, %s28674_s21  ;;  %v28798_v4 = vld [vmem:[%s28782_s24 + $0x20] sm:$0xff]  ;;  %v28847_v21 = vld [vmem:[%s28782_s24 + $0x9] sm:$0xff]  ;;  %32681 = vst [vmem:[#allocation14_spill] sm:$0xff] %v28922_v38  ;;  %32682 = vst [vmem:[#allocation15_spill] sm:$0xff] %v28932_v41  ;;  %p28604_p6 = scmp.ne.s32.totalorder %s32233_s29, %s28603_s13  ;;  %s28676_s6 = smov [#allocation5]  }
  0x3f   : > { %24625 = vmatpush3.bf16.msra.mxu0 %v28802_v9  ;;  %24769 = vmatpush3.bf16.msra.mxu1 %v28802_v9  ;;  %v28831_v18 = vld [vmem:[%s28782_s24 + $0x1] sm:$0xff]  ;;  %v28834_v19 = vld [vmem:[%s28782_s24 + $0x19] sm:$0xff]  ;;  %v28879_v25 = vld [vmem:[%s28782_s24 + $0xa] sm:$0xff]  ;;  %32683 = vst [vmem:[#allocation16_spill] sm:$0xff] %v28940_v44  ;;  %s28607_s7 = sshll.u32 %s28676_s6, 4  ;;  %s28608_s7 = int_to_ptr.vmem [resolvable:$false] %s28607_s7 }
  0x40   : > { %24627 = vmatprep.subr.bf16.mxu0 %v28813_v12  ;;  %24771 = vmatprep.subr.bf16.mxu1 %v28813_v12  ;;  %v28850_v22 = vld [vmem:[%s28782_s24 + $0x21] sm:$0xff]  ;;  %v28897_v27 = vld [vmem:[%s28782_s24 + $0x30] sm:$0xff]  ;;  %v28900_v28 = vld [vmem:[%s28782_s24 + $0x38] sm:$0xff]  ;;  %p28605_p10 = pnand %p28604_p6, %p33070_p9  ;;  %s28609_s8 = scalar_lea.vmem %s28608_s7, 4096 }
  0x41   : > { %v28869_v23 = vld [vmem:[%s28782_s24 + $0x2] sm:$0xff]  ;;  %v28872_v24 = vld [vmem:[%s28782_s24 + $0x1a] sm:$0xff]  ;;  %v28951_v50 = vld [vmem:[%s28782_s24 + $0x31] sm:$0xff]  ;;  %p28610_p2 = scmp.lt.s32.totalorder %s32233_s29, %s28608_s7  ;;  %p28611_p3 = scmp.lt.s32.totalorder %s28609_s8, %s28603_s13 }
  0x42   : > { %1004 = vrot.lane.b32.xlu0 %v28795_v3, %s28674_s21  ;;  %1006 = vrot.lane.b32.xlu1 %v28798_v4, %s28674_s21  ;;  %v28882_v26 = vld [vmem:[%s28782_s24 + $0x22] sm:$0xff]  ;;  %v345_v46 = vld [vmem:[#allocation2 + $0x98] sm:$0xff]  ;;  %v348_v54 = vld [vmem:[#allocation2 + $0xb0] sm:$0xff]  ;;  %p28606_p12 = pneg %p28605_p10 }
  0x43   : > { %24629 = vmatpush3.bf16.msra.mxu0 %v28813_v12  ;;  %24773 = vmatpush3.bf16.msra.mxu1 %v28813_v12  ;;  %v28946_v47 = vpack.c.bf16 %v345_v46, %v344_v45  ;;  %v346_v48 = vld [vmem:[#allocation2 + $0xa0] sm:$0xff]  ;;  %v347_v49 = vld [vmem:[#allocation2 + $0xa8] sm:$0xff]  ;;  %v349_v55 = vld [vmem:[#allocation2 + $0xb8] sm:$0xff]  ;;  %p28612_p4 = por %p28611_p3, %p28610_p2 }
  0x44   : > { %24631 = vmatprep.subr.bf16.mxu0 %v28823_v15  ;;  %24775 = vmatprep.subr.bf16.mxu1 %v28823_v15  ;;  %v28957_v51 = vpack.c.bf16 %v347_v49, %v346_v48  ;;  %v28960_v53 = vld [vmem:[%s28782_s24 + $0x39] sm:$0xff]  ;;  %v28975_v57 = vpack.c.bf16 %v349_v55, %v348_v54  ;;  %v439_v59 = vld [vmem:[#allocation2 + $0xc8] sm:$0xff]  ;;  %v440_v61 = vld [vmem:[#allocation2 + $0xd0] sm:$0xff] }
  0x45   : > { %32684 = vst [vmem:[#allocation17_spill] sm:$0xff] %v28946_v47  ;;  %v438_v58 = vld [vmem:[#allocation2 + $0xc0] sm:$0xff]  ;;  %v441_v62 = vld [vmem:[#allocation2 + $0xd8] sm:$0xff]  ;;  %v443_v2 = vld [vmem:[#allocation2 + $0xe8] sm:$0xff]  ;;  %p28613_p7 = pnand %p28612_p4, %p28606_p12 }
  0x46   : > { %350 = vrot.lane.b32.xlu0 %v28785_v0, %s28675_s23  ;;  %1166 = vrot.lane.b32.xlu1 %v28795_v3, %s28675_s23  ;;  %32685 = vst [vmem:[#allocation18_spill] sm:$0xff] %v28957_v51  ;;  %32686 = vst [vmem:[#allocation19_spill] sm:$0xff] %v28975_v57  ;;  %v28987_v60 = vpack.c.bf16 %v439_v59, %v438_v58  ;;  %v444_v7 = vld [vmem:[#allocation2 + $0xf0] sm:$0xff]  ;;  %v445_v10 = vld [vmem:[#allocation2 + $0xf8] sm:$0xff] }
  0x47   : > { %24633 = vmatpush3.bf16.msra.mxu0 %v28823_v15  ;;  %24777 = vmatpush3.bf16.msra.mxu1 %v28823_v15  ;;  %v29012_v11 = vpack.c.bf16 %v445_v10, %v444_v7  ;;  %v530_v13 = vld [vmem:[#allocation2 + $0x100] sm:$0xff]  ;;  %v531_v14 = vld [vmem:[#allocation2 + $0x108] sm:$0xff]  ;;  %v532_v17 = vld [vmem:[#allocation2 + $0x110] sm:$0xff] }
  0x48   : > { %24635 = vmatprep.subr.bf16.mxu0 %v28839_v20  ;;  %24779 = vmatprep.subr.bf16.mxu1 %v28839_v20  ;;  %32687 = vst [vmem:[#allocation20_spill] sm:$0xff] %v28987_v60  ;;  %v29020_v16 = vpack.c.bf16 %v531_v14, %v530_v13  ;;  %v534_v30 = vld [vmem:[#allocation2 + $0x120] sm:$0xff]  ;;  %v536_v35 = vld [vmem:[#allocation2 + $0x130] sm:$0xff]  ;;  %v537_v39 = vld [vmem:[#allocation2 + $0x138] sm:$0xff] }
  0x49   : > { %32690 = vst [vmem:[#allocation23_spill] sm:$0xff] %v29012_v11  ;;  %v624_v42 = vld [vmem:[#allocation2 + $0x140] sm:$0xff]  ;;  %v625_v43 = vld [vmem:[#allocation2 + $0x148] sm:$0xff]  ;;  %v626_v46 = vld [vmem:[#allocation2 + $0x150] sm:$0xff] }
  0x4a   : > { %352 = vrot.lane.b32.xlu0 %v28788_v1, %s28675_s23  ;;  %1168 = vrot.lane.b32.xlu1 %v28798_v4, %s28675_s23  ;;  %32691 = vst [vmem:[#allocation24_spill] sm:$0xff] %v29020_v16  ;;  %v29053_v45 = vpack.c.bf16 %v625_v43, %v624_v42  ;;  %v627_v48 = vld [vmem:[#allocation2 + $0x158] sm:$0xff]  ;;  %v628_v54 = vld [vmem:[#allocation2 + $0x160] sm:$0xff]  ;;  %v629_v55 = vld [vmem:[#allocation2 + $0x168] sm:$0xff] }
  0x4b   : > { %v29068_v59 = vpack.c.bf16 %v629_v55, %v628_v54  ;;  %v720_v7 = vld [vmem:[#allocation2 + $0x180] sm:$0xff]  ;;  %v721_v10 = vld [vmem:[#allocation2 + $0x188] sm:$0xff]  ;;  %v722_v14 = vld [vmem:[#allocation2 + $0x190] sm:$0xff] }
  0x4c   : > { %32695 = vst [vmem:[#allocation28_spill] sm:$0xff] %v29053_v45  ;;  %v29087_v13 = vpack.c.bf16 %v721_v10, %v720_v7  ;;  %v726_v42 = vld [vmem:[#allocation2 + $0x1b0] sm:$0xff]  ;;  %v727_v43 = vld [vmem:[#allocation2 + $0x1b8] sm:$0xff] }
  0x4d   : > { %32697 = vst [vmem:[#allocation30_spill] sm:$0xff] %v29068_v59  ;;  %v814_v54 = vld [vmem:[#allocation2 + $0x1d0] sm:$0xff]  ;;  %v815_v55 = vld [vmem:[#allocation2 + $0x1d8] sm:$0xff] }
  0x4e   : > { %538 = vrot.lane.b32.xlu0 %v28831_v18, %s28674_s21  ;;  %1594 = vrot.lane.b32.xlu1 %v28834_v19, %s28674_s21  ;;  %v818_v10 = vld [vmem:[#allocation2 + $0x1f0] sm:$0xff] }
  0x52   : > { %540 = vrot.lane.b32.xlu0 %v28847_v21, %s28674_s21  ;;  %1596 = vrot.lane.b32.xlu1 %v28850_v22, %s28674_s21 }
  0x56   : > { %632 = vrot.lane.b32.xlu0 %v28831_v18, %s28675_s23  ;;  %1679 = vrot.lane.b32.xlu1 %v28834_v19, %s28675_s23 }
  0x5a   : > { %634 = vrot.lane.b32.xlu0 %v28847_v21, %s28675_s23  ;;  %1681 = vrot.lane.b32.xlu1 %v28850_v22, %s28675_s23 }
  0x5e   : > { %820 = vrot.lane.b32.xlu0 %v28869_v23, %s28674_s21  ;;  %2107 = vrot.lane.b32.xlu1 %v28872_v24, %s28674_s21 }
  0x62   : > { %822 = vrot.lane.b32.xlu0 %v28879_v25, %s28674_s21  ;;  %2109 = vrot.lane.b32.xlu1 %v28882_v26, %s28674_s21 }
  0x66   : > { %914 = vrot.lane.b32.xlu0 %v28869_v23, %s28675_s23  ;;  %2192 = vrot.lane.b32.xlu1 %v28872_v24, %s28675_s23 }
  0x6a   : > { %916 = vrot.lane.b32.xlu0 %v28879_v25, %s28675_s23  ;;  %2194 = vrot.lane.b32.xlu1 %v28882_v26, %s28675_s23 }
  0x6e   : > { %2540 = vrot.lane.b32.xlu0 %v28897_v27, %s28674_s21  ;;  %2542 = vrot.lane.b32.xlu1 %v28900_v28, %s28674_s21 }
  0x72   : > { %2702 = vrot.lane.b32.xlu0 %v28897_v27, %s28675_s23  ;;  %2704 = vrot.lane.b32.xlu1 %v28900_v28, %s28675_s23 }
  0x76   : > { %3361 = vrot.lane.b32.xlu0 %v28951_v50, %s28674_s21  ;;  %3363 = vrot.lane.b32.xlu1 %v28960_v53, %s28674_s21 }
  0x7a   : > { %3446 = vrot.lane.b32.xlu0 %v28951_v50, %s28675_s23  ;;  %3448 = vrot.lane.b32.xlu1 %v28960_v53, %s28675_s23 }
  0xb0   : > { %v179_v31 = vpop.permute.xlu0 %178  ;;  %v181_v32 = vpop.permute.xlu1 %180 }
  0xb1   : > { %20530 = vmatprep.mubr.msk.f32.mxu0 %vm182_vm0, %v179_v31  ;;  %v535_v31 = vld [vmem:[#allocation2 + $0x128] sm:$0xff] }
  0xb2   : > { %20531 = vmatmul.mubr.msk.f32.vlgmr.msra.gmra.mrb[0].mxu0 %vm182_vm0, %v181_v32  ;;  %v29034_v32 = vpack.c.bf16 %v535_v31, %v534_v30  ;;  %v724_v31 = vld [vmem:[#allocation2 + $0x1a0] sm:$0xff] }
  0xb3   : > { %24637 = vmatpush3.bf16.msra.mxu0 %v28839_v20  ;;  %20549 = vmatprep.mubr.msk.f32.mxu0 %vm182_vm0, %v28785_v0  ;;  %v28993_v0 = vpack.c.bf16 %v441_v62, %v440_v61  ;;  %v630_v62 = vld [vmem:[#allocation2 + $0x170] sm:$0xff] }
  0xb4   : > { %v28917_v36 = vpop.permute.xlu0 %1004  ;;  %v28919_v37 = vpop.permute.xlu1 %1006  ;;  %24639 = vmatprep.subr.bf16.mxu0 %v28910_v33  ;;  %32693 = vst [vmem:[#allocation26_spill] sm:$0xff] %v29034_v32 }
  0xb5   : > { %20701 = vmatprep.mubr.msk.f32.mxu1 %vm182_vm0, %v28917_v36  ;;  %32688 = vst [vmem:[#allocation21_spill] sm:$0xff] %v28993_v0 }
  0xb6   : > { %20702 = vmatmul.mubr.msk.f32.vlgmr.msra.gmra.mrb[0].mxu1 %vm182_vm0, %v28919_v37 }
  0xb7   : > { %24641 = vmatpush3.bf16.msra.mxu0 %v28910_v33  ;;  %24781 = vmatpush3.bf16.msra.mxu1 %v28839_v20 }
  0xb8   : > { %24643 = vmatprep.subr.bf16.mxu0 %v28922_v38  ;;  %24783 = vmatprep.subr.bf16.mxu1 %v28910_v33  ;;  %v351_v52 = vpop.permute.xlu0 %350  ;;  %v28967_v56 = vpop.permute.xlu1 %1166 }
  0xb9   : > { %20720 = vmatprep.mubr.msk.f32.mxu1 %vm182_vm0, %v28795_v3 }
  0xbb   : > { %24645 = vmatpush3.bf16.msra.mxu0 %v28922_v38  ;;  %24785 = vmatpush3.bf16.msra.mxu1 %v28910_v33 }
  0xbc   : > { %24647 = vmatprep.subr.bf16.mxu0 %v28932_v41  ;;  %24787 = vmatprep.subr.bf16.mxu1 %v28922_v38  ;;  %v353_v63 = vpop.permute.xlu0 %352  ;;  %v28998_v5 = vpop.permute.xlu1 %1168 }
  0xbf   : > { %24649 = vmatpush3.bf16.msra.mxu0 %v28932_v41  ;;  %24789 = vmatpush3.bf16.msra.mxu1 %v28922_v38 }
  0xc0   : > { %24651 = vmatprep.subr.bf16.mxu0 %v28940_v44  ;;  %24791 = vmatprep.subr.bf16.mxu1 %v28932_v41  ;;  %v539_v34 = vpop.permute.xlu0 %538  ;;  %v29039_v40 = vpop.permute.xlu1 %1594 }
  0xc2   : > { %20550 = vmatmul.mubr.msk.f32.vlgmr.msra.gmra.mrb[0].mxu0 %vm182_vm0, %v28788_v1  ;;  %v442_v1 = vld [vmem:[#allocation2 + $0xe0] sm:$0xff] }
  0xc3   : > { %24653 = vmatpush3.bf16.msra.mxu0 %v28940_v44  ;;  %24793 = vmatpush3.bf16.msra.mxu1 %v28932_v41  ;;  %v29002_v6 = vpack.c.bf16 %v443_v2, %v442_v1 }
  0xc4   : > { %24655 = vmatprep.subr.bf16.mxu0 %v28946_v47  ;;  %24795 = vmatprep.subr.bf16.mxu1 %v28940_v44  ;;  %v541_v49 = vpop.permute.xlu0 %540  ;;  %v29062_v58 = vpop.permute.xlu1 %1596 }
  0xc5   : > { %20568 = vmatprep.mubr.msk.f32.mxu0 %vm182_vm0, %v351_v52  ;;  %32689 = vst [vmem:[#allocation22_spill] sm:$0xff] %v29002_v6  ;;  %v29059_v52 = vpack.c.bf16 %v627_v48, %v626_v46  ;;  %v29112_v46 = vpack.c.bf16 %v727_v43, %v726_v42  ;;  %v812_v48 = vld [vmem:[#allocation2 + $0x1c0] sm:$0xff]  ;;  %v909_v42 = vld [vmem:[#allocation2 + $0x218] sm:$0xff] }
  0xc6   : > { %20721 = vmatmul.mubr.msk.f32.vlgmr.msra.gmra.mrb[0].mxu1 %vm182_vm0, %v28798_v4 }
  0xc7   : > { %24657 = vmatpush3.bf16.msra.mxu0 %v28946_v47  ;;  %24797 = vmatpush3.bf16.msra.mxu1 %v28940_v44  ;;  %32696 = vst [vmem:[#allocation29_spill] sm:$0xff] %v29059_v52  ;;  %32701 = vst [vmem:[#allocation34_spill] sm:$0xff] %v29112_v46 }
  0xc8   : > { %24659 = vmatprep.subr.bf16.mxu0 %v28957_v51  ;;  %24799 = vmatprep.subr.bf16.mxu1 %v28946_v47  ;;  %v633_v61 = vpop.permute.xlu0 %632  ;;  %v29073_v1 = vpop.permute.xlu1 %1679 }
  0xc9   : > { %20739 = vmatprep.mubr.msk.f32.mxu1 %vm182_vm0, %v28967_v56 }
  0xcb   : > { %24661 = vmatpush3.bf16.msra.mxu0 %v28957_v51  ;;  %24801 = vmatpush3.bf16.msra.mxu1 %v28946_v47 }
  0xcc   : > { %24663 = vmatprep.subr.bf16.mxu0 %v28975_v57  ;;  %24803 = vmatprep.subr.bf16.mxu1 %v28957_v51 }
  0xcf   : > { %24665 = vmatpush3.bf16.msra.mxu0 %v28975_v57  ;;  %24805 = vmatpush3.bf16.msra.mxu1 %v28957_v51 }
  0xd0   : > { %24667 = vmatprep.subr.bf16.mxu0 %v28987_v60  ;;  %24807 = vmatprep.subr.bf16.mxu1 %v28975_v57 }
  0xd2   : > { %20569 = vmatmul.mubr.msk.f32.vlgmr.msra.gmra.mrb[0].mxu0 %vm182_vm0, %v353_v63  ;;  %v631_v63 = vld [vmem:[#allocation2 + $0x178] sm:$0xff] }
  0xd3   : > { %24669 = vmatpush3.bf16.msra.mxu0 %v28987_v60  ;;  %24809 = vmatpush3.bf16.msra.mxu1 %v28975_v57  ;;  %v29079_v2 = vpack.c.bf16 %v631_v63, %v630_v62  ;;  %v817_v62 = vld [vmem:[#allocation2 + $0x1e8] sm:$0xff] }
  0xd4   : > { %24671 = vmatprep.subr.bf16.mxu0 %v28993_v0  ;;  %24859 = vmatprep.subr.bf16.mxu1 %v28987_v60 }
  0xd5   : > { %20587 = vmatprep.mubr.msk.f32.mxu0 %vm182_vm0, %v28831_v18  ;;  %v533_v18 = vld [vmem:[#allocation2 + $0x118] sm:$0xff]  ;;  %32698 = vst [vmem:[#allocation31_spill] sm:$0xff] %v29079_v2 }
  0xd6   : > { %20740 = vmatmul.mubr.msk.f32.vlgmr.msra.gmra.mrb[0].mxu1 %vm182_vm0, %v28998_v5  ;;  %v29026_v29 = vpack.c.bf16 %v533_v18, %v532_v17  ;;  %v723_v17 = vld [vmem:[#allocation2 + $0x198] sm:$0xff]  ;;  %v635_v18 = vpop.permute.xlu0 %634 }
  0xd7   : > { %24673 = vmatpush3.bf16.msra.mxu0 %v28993_v0  ;;  %24861 = vmatpush3.bf16.msra.mxu1 %v28987_v60  ;;  %v29093_v30 = vpack.c.bf16 %v723_v17, %v722_v14  ;;  %v819_v14 = vld [vmem:[#allocation2 + $0x1f8] sm:$0xff] }
  0xd8   : > { %24675 = vmatprep.subr.bf16.mxu0 %v29002_v6  ;;  %24863 = vmatprep.subr.bf16.mxu1 %v28993_v0  ;;  %32692 = vst [vmem:[#allocation25_spill] sm:$0xff] %v29026_v29 }
  0xd9   : > { %20815 = vmatprep.mubr.msk.f32.mxu1 %vm182_vm0, %v28834_v19  ;;  %32699 = vst [vmem:[#allocation32_spill] sm:$0xff] %v29093_v30 }
  0xda   : > { %v821_v7 = vpop.permute.xlu0 %820 }
  0xdb   : > { %24677 = vmatpush3.bf16.msra.mxu0 %v29002_v6  ;;  %24865 = vmatpush3.bf16.msra.mxu1 %v28993_v0 }
  0xdc   : > { %24679 = vmatprep.subr.bf16.mxu0 %v29012_v11  ;;  %24867 = vmatprep.subr.bf16.mxu1 %v29002_v6 }
  0xde   : > { %v823_v43 = vpop.permute.xlu0 %822 }
  0xdf   : > { %24681 = vmatpush3.bf16.msra.mxu0 %v29012_v11  ;;  %24869 = vmatpush3.bf16.msra.mxu1 %v29002_v6 }
  0xe0   : > { %24683 = vmatprep.subr.bf16.mxu0 %v29020_v16  ;;  %24871 = vmatprep.subr.bf16.mxu1 %v29012_v11 }
  0xe2   : > { %20588 = vmatmul.mubr.msk.f32.vlgmr.msra.gmra.mrb[0].mxu0 %vm182_vm0, %v28847_v21  ;;  %v29045_v21 = vpack.c.bf16 %v537_v39, %v536_v35  ;;  %v29098_v35 = vpop.permute.xlu1 %1681 }
  0xe3   : > { %24685 = vmatpush3.bf16.msra.mxu0 %v29020_v16  ;;  %24873 = vmatpush3.bf16.msra.mxu1 %v29012_v11 }
  0xe4   : > { %24687 = vmatprep.subr.bf16.mxu0 %v29026_v29  ;;  %24875 = vmatprep.subr.bf16.mxu1 %v29020_v16  ;;  %32694 = vst [vmem:[#allocation27_spill] sm:$0xff] %v29045_v21 }
  0xe5   : > { %20606 = vmatprep.mubr.msk.f32.mxu0 %vm182_vm0, %v539_v34  ;;  %v725_v34 = vld [vmem:[#allocation2 + $0x1a8] sm:$0xff] }
  0xe6   : > { %20816 = vmatmul.mubr.msk.f32.vlgmr.msra.gmra.mrb[0].mxu1 %vm182_vm0, %v28850_v22  ;;  %v29102_v39 = vpack.c.bf16 %v725_v34, %v724_v31  ;;  %v29139_v17 = vpop.permute.xlu1 %2107  ;;  %v907_v31 = vld [vmem:[#allocation2 + $0x208] sm:$0xff]  ;;  %v908_v34 = vld [vmem:[#allocation2 + $0x210] sm:$0xff] }
  0xe7   : > { %24689 = vmatpush3.bf16.msra.mxu0 %v29026_v29  ;;  %24877 = vmatpush3.bf16.msra.mxu1 %v29020_v16 }
  0xe8   : > { %24691 = vmatprep.subr.bf16.mxu0 %v29034_v32  ;;  %24879 = vmatprep.subr.bf16.mxu1 %v29026_v29  ;;  %32700 = vst [vmem:[#allocation33_spill] sm:$0xff] %v29102_v39 }
  0xe9   : > { %20834 = vmatprep.mubr.msk.f32.mxu1 %vm182_vm0, %v29039_v40 }
  0xeb   : > { %24693 = vmatpush3.bf16.msra.mxu0 %v29034_v32  ;;  %24881 = vmatpush3.bf16.msra.mxu1 %v29026_v29 }
  0xec   : > { %24695 = vmatprep.subr.bf16.mxu0 %v29045_v21  ;;  %24883 = vmatprep.subr.bf16.mxu1 %v29034_v32 }
  0xef   : > { %24697 = vmatpush3.bf16.msra.mxu0 %v29045_v21  ;;  %24885 = vmatpush3.bf16.msra.mxu1 %v29034_v32 }
  0xf0   : > { %24699 = vmatprep.subr.bf16.mxu0 %v29053_v45  ;;  %24887 = vmatprep.subr.bf16.mxu1 %v29045_v21 }
  0xf2   : > { %20607 = vmatmul.mubr.msk.f32.vlgmr.msra.gmra.mrb[0].mxu0 %vm182_vm0, %v541_v49  ;;  %v813_v49 = vld [vmem:[#allocation2 + $0x1c8] sm:$0xff] }
  0xf3   : > { %24701 = vmatpush3.bf16.msra.mxu0 %v29053_v45  ;;  %24889 = vmatpush3.bf16.msra.mxu1 %v29045_v21 }
  0xf4   : > { %24703 = vmatprep.subr.bf16.mxu0 %v29059_v52  ;;  %24891 = vmatprep.subr.bf16.mxu1 %v29053_v45 }
  0xf5   : > { %20625 = vmatprep.mubr.msk.f32.mxu0 %vm182_vm0, %v633_v61  ;;  %v816_v61 = vld [vmem:[#allocation2 + $0x1e0] sm:$0xff] }
  0xf6   : > { %20835 = vmatmul.mubr.msk.f32.vlgmr.msra.gmra.mrb[0].mxu1 %vm182_vm0, %v29062_v58  ;;  %v29134_v63 = vpack.c.bf16 %v817_v62, %v816_v61  ;;  %v29165_v61 = vld [vmem:[%s28782_s24 + $0x32] sm:$0xff] }
  0xf7   : > { %24705 = vmatpush3.bf16.msra.mxu0 %v29059_v52  ;;  %24893 = vmatpush3.bf16.msra.mxu1 %v29053_v45 }
  0xf8   : > { %24707 = vmatprep.subr.bf16.mxu0 %v29068_v59  ;;  %24895 = vmatprep.subr.bf16.mxu1 %v29059_v52  ;;  %32704 = vst [vmem:[#allocation37_spill] sm:$0xff] %v29134_v63 }
  0xf9   : > { %20853 = vmatprep.mubr.msk.f32.mxu1 %vm182_vm0, %v29073_v1  ;;  %4105 = vrot.lane.b32.xlu0 %v29165_v61, %s28674_s21 }
  0xfb   : > { %24709 = vmatpush3.bf16.msra.mxu0 %v29068_v59  ;;  %24897 = vmatpush3.bf16.msra.mxu1 %v29059_v52 }
  0xfc   : > { %24711 = vmatprep.subr.bf16.mxu0 %v29079_v2  ;;  %24899 = vmatprep.subr.bf16.mxu1 %v29068_v59 }
  0xfd   : > { %4190 = vrot.lane.b32.xlu0 %v29165_v61, %s28675_s23 }
  0xff   : > { %24713 = vmatpush3.bf16.msra.mxu0 %v29079_v2  ;;  %24901 = vmatpush3.bf16.msra.mxu1 %v29068_v59 }
 0x100   : > { %24715 = vmatprep.subr.bf16.mxu0 %v29087_v13  ;;  %24903 = vmatprep.subr.bf16.mxu1 %v29079_v2 }
 0x102   : > { %20626 = vmatmul.mubr.msk.f32.vlgmr.msra.gmra.mrb[0].mxu0 %vm182_vm0, %v635_v18  ;;  %v906_v18 = vld [vmem:[#allocation2 + $0x200] sm:$0xff] }
 0x103   : > { %24717 = vmatpush3.bf16.msra.mxu0 %v29087_v13  ;;  %24905 = vmatpush3.bf16.msra.mxu1 %v29079_v2 }
 0x104   : > { %24719 = vmatprep.subr.bf16.mxu0 %v29093_v30  ;;  %24955 = vmatprep.subr.bf16.mxu1 %v29087_v13 }
 0x105   : > { %20644 = vmatprep.mubr.msk.f32.mxu0 %vm182_vm0, %v28869_v23  ;;  %v29120_v23 = vpack.c.bf16 %v813_v49, %v812_v48  ;;  %v29159_v48 = vpack.c.bf16 %v909_v42, %v908_v34  ;;  %v910_v49 = vld [vmem:[#allocation2 + $0x220] sm:$0xff] }
 0x106   : > { %20854 = vmatmul.mubr.msk.f32.vlgmr.msra.gmra.mrb[0].mxu1 %vm182_vm0, %v29098_v35  ;;  %v1252_v42 = vld [vmem:[#allocation2 + $0x240] sm:$0xff] }
 0x107   : > { %24721 = vmatpush3.bf16.msra.mxu0 %v29093_v30  ;;  %24957 = vmatpush3.bf16.msra.mxu1 %v29087_v13  ;;  %32702 = vst [vmem:[#allocation35_spill] sm:$0xff] %v29120_v23  ;;  %32707 = vst [vmem:[#allocation40_spill] sm:$0xff] %v29159_v48 }
 0x108   : > { %24723 = vmatprep.subr.bf16.mxu0 %v29102_v39  ;;  %24959 = vmatprep.subr.bf16.mxu1 %v29093_v30 }
 0x109   : > { %20929 = vmatprep.mubr.msk.f32.mxu1 %vm182_vm0, %v28872_v24  ;;  %v29126_v24 = vpack.c.bf16 %v815_v55, %v814_v54  ;;  %v911_v54 = vld [vmem:[#allocation2 + $0x228] sm:$0xff]  ;;  %v29162_v55 = vpop.permute.xlu1 %2109 }
 0x10a   : > { %v29171_v62 = vpack.c.bf16 %v911_v54, %v910_v49  ;;  %v1254_v54 = vld [vmem:[#allocation2 + $0x250] sm:$0xff] }
 0x10b   : > { %24725 = vmatpush3.bf16.msra.mxu0 %v29102_v39  ;;  %24961 = vmatpush3.bf16.msra.mxu1 %v29093_v30  ;;  %32703 = vst [vmem:[#allocation36_spill] sm:$0xff] %v29126_v24 }
 0x10c   : > { %24727 = vmatprep.subr.bf16.mxu0 %v29112_v46  ;;  %24963 = vmatprep.subr.bf16.mxu1 %v29102_v39  ;;  %32708 = vst [vmem:[#allocation41_spill] sm:$0xff] %v29171_v62 }
 0x10f   : > { %24729 = vmatpush3.bf16.msra.mxu0 %v29112_v46  ;;  %24965 = vmatpush3.bf16.msra.mxu1 %v29102_v39 }
 0x110   : > { %24731 = vmatprep.subr.bf16.mxu0 %v29120_v23  ;;  %24967 = vmatprep.subr.bf16.mxu1 %v29112_v46 }
 0x112   : > { %20645 = vmatmul.mubr.msk.f32.vlgmr.msra.gmra.mrb[0].mxu0 %vm182_vm0, %v28879_v25  ;;  %v29145_v25 = vpack.c.bf16 %v819_v14, %v818_v10  ;;  %v29174_v10 = vld [vmem:[%s28782_s24 + $0x3a] sm:$0xff]  ;;  %v912_v14 = vld [vmem:[#allocation2 + $0x230] sm:$0xff] }
 0x113   : > { %24733 = vmatpush3.bf16.msra.mxu0 %v29120_v23  ;;  %24969 = vmatpush3.bf16.msra.mxu1 %v29112_v46 }
 0x114   : > { %24735 = vmatprep.subr.bf16.mxu0 %v29126_v24  ;;  %24971 = vmatprep.subr.bf16.mxu1 %v29120_v23  ;;  %32705 = vst [vmem:[#allocation38_spill] sm:$0xff] %v29145_v25 }
 0x115   : > { %20663 = vmatprep.mubr.msk.f32.mxu0 %vm182_vm0, %v821_v7  ;;  %v915_v7 = vpop.permute.xlu0 %914  ;;  %4107 = vrot.lane.b32.xlu1 %v29174_v10, %s28674_s21 }
 0x116   : > { %20930 = vmatmul.mubr.msk.f32.vlgmr.msra.gmra.mrb[0].mxu1 %vm182_vm0, %v28882_v26  ;;  %v29153_v26 = vpack.c.bf16 %v907_v31, %v906_v18  ;;  %v913_v18 = vld [vmem:[#allocation2 + $0x238] sm:$0xff]  ;;  %v29181_v31 = vpop.permute.xlu1 %2192 }
 0x117   : > { %24737 = vmatpush3.bf16.msra.mxu0 %v29126_v24  ;;  %24973 = vmatpush3.bf16.msra.mxu1 %v29120_v23  ;;  %v29189_v34 = vpack.c.bf16 %v913_v18, %v912_v14 }
 0x118   : > { %24739 = vmatprep.subr.bf16.mxu0 %v29134_v63  ;;  %24975 = vmatprep.subr.bf16.mxu1 %v29126_v24  ;;  %32706 = vst [vmem:[#allocation39_spill] sm:$0xff] %v29153_v26 }
 0x119   : > { %20948 = vmatprep.mubr.msk.f32.mxu1 %vm182_vm0, %v29139_v17  ;;  %32709 = vst [vmem:[#allocation42_spill] sm:$0xff] %v29189_v34  ;;  %4192 = vrot.lane.b32.xlu1 %v29174_v10, %s28675_s23  ;;  %v917_v14 = vpop.permute.xlu0 %916 }
 0x11b   : > { %24741 = vmatpush3.bf16.msra.mxu0 %v29134_v63  ;;  %24977 = vmatpush3.bf16.msra.mxu1 %v29126_v24 }
 0x11c   : > { %24743 = vmatprep.subr.bf16.mxu0 %v29145_v25  ;;  %24979 = vmatprep.subr.bf16.mxu1 %v29134_v63 }
 0x11f   : > { %24745 = vmatpush3.bf16.msra.mxu0 %v29145_v25  ;;  %24981 = vmatpush3.bf16.msra.mxu1 %v29134_v63 }
 0x120   : > { %24747 = vmatprep.subr.bf16.mxu0 %v29153_v26  ;;  %24983 = vmatprep.subr.bf16.mxu1 %v29145_v25 }
 0x122   : > { %20664 = vmatmul.mubr.msk.f32.vlgmr.msra.gmra.mrb[0].mxu0 %vm182_vm0, %v823_v43  ;;  %v1253_v43 = vld [vmem:[#allocation2 + $0x248] sm:$0xff] }
 0x123   : > { %24749 = vmatpush3.bf16.msra.mxu0 %v29153_v26  ;;  %24985 = vmatpush3.bf16.msra.mxu1 %v29145_v25  ;;  %v29201_v49 = vpack.c.bf16 %v1253_v43, %v1252_v42  ;;  %v29212_v42 = vpop.permute.xlu1 %2194  ;;  %v1259_v25 = vld [vmem:[#allocation2 + $0x278] sm:$0xff] }
 0x124   : > { %24751 = vmatprep.subr.bf16.mxu0 %v29159_v48  ;;  %24987 = vmatprep.subr.bf16.mxu1 %v29153_v26 }
 0x125   : > { %20682 = vmatprep.mubr.msk.f32.mxu0 %vm182_vm0, %v915_v7  ;;  %32710 = vst [vmem:[#allocation43_spill] sm:$0xff] %v29201_v49  ;;  %v1255_v7 = vld [vmem:[#allocation2 + $0x258] sm:$0xff] }
 0x126   : > { %20949 = vmatmul.mubr.msk.f32.vlgmr.msra.gmra.mrb[0].mxu1 %vm182_vm0, %v29162_v55  ;;  %v29207_v18 = vpack.c.bf16 %v1255_v7, %v1254_v54  ;;  %v29222_v54 = vpop.permute.xlu0 %2540  ;;  %v1339_v7 = vld [vmem:[#allocation2 + $0x288] sm:$0xff] }
 0x127   : > { %24753 = vmatpush3.bf16.msra.mxu0 %v29159_v48  ;;  %24989 = vmatpush3.bf16.msra.mxu1 %v29153_v26  ;;  %v1257_v26 = vld [vmem:[#allocation2 + $0x268] sm:$0xff] }
 0x128   : > { %24755 = vmatprep.subr.bf16.mxu0 %v29171_v62  ;;  %24991 = vmatprep.subr.bf16.mxu1 %v29159_v48  ;;  %32711 = vst [vmem:[#allocation44_spill] sm:$0xff] %v29207_v18 }
 0x129   : > { %20967 = vmatprep.mubr.msk.f32.mxu1 %vm182_vm0, %v29181_v31 }
 0x12b   : > { %24757 = vmatpush3.bf16.msra.mxu0 %v29171_v62  ;;  %24993 = vmatpush3.bf16.msra.mxu1 %v29159_v48  ;;  %v1256_v48 = vld [vmem:[#allocation2 + $0x260] sm:$0xff] }
 0x12c   : > { %24759 = vmatprep.subr.bf16.mxu0 %v29189_v34  ;;  %24995 = vmatprep.subr.bf16.mxu1 %v29171_v62  ;;  %v29216_v43 = vpack.c.bf16 %v1257_v26, %v1256_v48  ;;  %v1338_v48 = vld [vmem:[#allocation2 + $0x280] sm:$0xff] }
 0x12e   : > { %32712 = vst [vmem:[#allocation45_spill] sm:$0xff] %v29216_v43 }
 0x12f   : > { %24761 = vmatpush3.bf16.msra.mxu0 %v29189_v34  ;;  %24997 = vmatpush3.bf16.msra.mxu1 %v29171_v62  ;;  %v1258_v62 = vld [vmem:[#allocation2 + $0x270] sm:$0xff] }
 0x130   : > { %24811 = vmatprep.subr.bf16.mxu0 %v29201_v49  ;;  %24999 = vmatprep.subr.bf16.mxu1 %v29189_v34  ;;  %v29228_v26 = vpack.c.bf16 %v1259_v25, %v1258_v62  ;;  %v1342_v62 = vld [vmem:[#allocation2 + $0x2a0] sm:$0xff] }
 0x132   : > { %20683 = vmatmul.mubr.msk.f32.vlgmr.msra.gmra.mrb[0].mxu0 %vm182_vm0, %v917_v14  ;;  %32713 = vst [vmem:[#allocation46_spill] sm:$0xff] %v29228_v26  ;;  %v1340_v14 = vld [vmem:[#allocation2 + $0x290] sm:$0xff] }
 0x133   : > { %24813 = vmatpush3.bf16.msra.mxu0 %v29201_v49  ;;  %25001 = vmatpush3.bf16.msra.mxu1 %v29189_v34 }
 0x134   : > { %24815 = vmatprep.subr.bf16.mxu0 %v29207_v18  ;;  %25051 = vmatprep.subr.bf16.mxu1 %v28800_v8 }
 0x135   : > { %20758 = vmatprep.mubr.msk.f32.mxu0 %vm182_vm0, %v28795_v3  ;;  %v29236_v3 = vpack.c.bf16 %v1339_v7, %v1338_v48  ;;  %v29250_v48 = vpop.permute.xlu1 %2542 }
 0x136   : > { %20968 = vmatmul.mubr.msk.f32.vlgmr.msra.gmra.mrb[0].mxu1 %vm182_vm0, %v29212_v42 }
 0x137   : > { %24817 = vmatpush3.bf16.msra.mxu0 %v29207_v18  ;;  %25053 = vmatpush3.bf16.msra.mxu1 %v28800_v8  ;;  %32714 = vst [vmem:[#allocation47_spill] sm:$0xff] %v29236_v3  ;;  %v1341_v8 = vld [vmem:[#allocation2 + $0x298] sm:$0xff] }
 0x138   : > { %24819 = vmatprep.subr.bf16.mxu0 %v29216_v43  ;;  %25055 = vmatprep.subr.bf16.mxu1 %v28802_v9  ;;  %v29242_v25 = vpack.c.bf16 %v1341_v8, %v1340_v14  ;;  %v1344_v8 = vld [vmem:[#allocation2 + $0x2b0] sm:$0xff]  ;;  %v1345_v14 = vld [vmem:[#allocation2 + $0x2b8] sm:$0xff] }
 0x139   : > { %21043 = vmatprep.mubr.msk.f32.mxu1 %vm182_vm0, %v29222_v54 }
 0x13a   : > { %32715 = vst [vmem:[#allocation48_spill] sm:$0xff] %v29242_v25 }
 0x13b   : > { %24821 = vmatpush3.bf16.msra.mxu0 %v29216_v43  ;;  %25057 = vmatpush3.bf16.msra.mxu1 %v28802_v9  ;;  %v1343_v9 = vld [vmem:[#allocation2 + $0x2a8] sm:$0xff] }
 0x13c   : > { %24823 = vmatprep.subr.bf16.mxu0 %v29228_v26  ;;  %25059 = vmatprep.subr.bf16.mxu1 %v28813_v12  ;;  %v29253_v7 = vpack.c.bf16 %v1343_v9, %v1342_v62  ;;  %v1425_v9 = vld [vmem:[#allocation2 + $0x2c8] sm:$0xff] }
 0x13e   : > { %32716 = vst [vmem:[#allocation49_spill] sm:$0xff] %v29253_v7 }
 0x13f   : > { %24825 = vmatpush3.bf16.msra.mxu0 %v29228_v26  ;;  %25061 = vmatpush3.bf16.msra.mxu1 %v28813_v12 }
 0x140   : > { %24827 = vmatprep.subr.bf16.mxu0 %v29236_v3  ;;  %25063 = vmatprep.subr.bf16.mxu1 %v28823_v15 }
 0x142   : > { %20759 = vmatmul.mubr.msk.f32.vlgmr.msra.gmra.mrb[0].mxu0 %vm182_vm0, %v28798_v4  ;;  %v29261_v4 = vpack.c.bf16 %v1345_v14, %v1344_v8  ;;  %v1427_v8 = vld [vmem:[#allocation2 + $0x2d8] sm:$0xff] }
 0x143   : > { %24829 = vmatpush3.bf16.msra.mxu0 %v29236_v3  ;;  %20777 = vmatprep.mubr.msk.f32.mxu0 %vm182_vm0, %v28917_v36  ;;  %v1424_v36 = vld [vmem:[#allocation2 + $0x2c0] sm:$0xff] }
 0x144   : > { %25065 = vmatpush3.bf16.msra.mxu1 %v28823_v15  ;;  %24831 = vmatprep.subr.bf16.mxu0 %v29242_v25  ;;  %32717 = vst [vmem:[#allocation50_spill] sm:$0xff] %v29261_v4  ;;  %v29269_v62 = vpack.c.bf16 %v1425_v9, %v1424_v36  ;;  %v1428_v15 = vld [vmem:[#allocation2 + $0x2e0] sm:$0xff]  ;;  %v1431_v9 = vld [vmem:[#allocation2 + $0x2f8] sm:$0xff] }
 0x145   : > { %25067 = vmatprep.subr.bf16.mxu1 %v28839_v20 }
 0x146   : > { %32718 = vst [vmem:[#allocation51_spill] sm:$0xff] %v29269_v62 }
 0x147   : > { %24833 = vmatpush3.bf16.msra.mxu0 %v29242_v25  ;;  %21044 = vmatmul.mubr.msk.f32.vlgmr.msra.gmra.mrb[2].mxu1 %vm182_vm0, %v29250_v48 }
 0x148   : > { %25069 = vmatpush3.bf16.msra.mxu1 %v28839_v20  ;;  %24835 = vmatprep.subr.bf16.mxu0 %v29253_v7  ;;  %v1426_v20 = vld [vmem:[#allocation2 + $0x2d0] sm:$0xff] }
 0x149   : > { %25071 = vmatprep.subr.bf16.mxu1 %v28910_v33  ;;  %21062 = vmatprep.mubr.msk.f32.mxu1 %vm182_vm0, %v28897_v27  ;;  %v29275_v14 = vpack.c.bf16 %v1427_v8, %v1426_v20  ;;  %v1430_v20 = vld [vmem:[#allocation2 + $0x2f0] sm:$0xff]  ;;  %v29288_v8 = vpop.permute.xlu0 %2702 }
 0x14b   : > { %24837 = vmatpush3.bf16.msra.mxu0 %v29253_v7  ;;  %32719 = vst [vmem:[#allocation52_spill] sm:$0xff] %v29275_v14 }
 0x14c   : > { %25073 = vmatpush3.bf16.msra.mxu1 %v28910_v33  ;;  %24839 = vmatprep.subr.bf16.mxu0 %v29261_v4  ;;  %v1429_v33 = vld [vmem:[#allocation2 + $0x2e8] sm:$0xff] }
 0x14d   : > { %25075 = vmatprep.subr.bf16.mxu1 %v28922_v38  ;;  %v29285_v36 = vpack.c.bf16 %v1429_v33, %v1428_v15  ;;  %v1765_v15 = vld [vmem:[#allocation2 + $0x300] sm:$0xff]  ;;  %v1766_v33 = vld [vmem:[#allocation2 + $0x308] sm:$0xff] }
 0x14f   : > { %24841 = vmatpush3.bf16.msra.mxu0 %v29261_v4  ;;  %32720 = vst [vmem:[#allocation53_spill] sm:$0xff] %v29285_v36 }
 0x150   : > { %25077 = vmatpush3.bf16.msra.mxu1 %v28922_v38  ;;  %24843 = vmatprep.subr.bf16.mxu0 %v29269_v62  ;;  %v1939_v38 = vld [vmem:[#allocation2 + $0x390] sm:$0xff] }
 0x151   : > { %25079 = vmatprep.subr.bf16.mxu1 %v28932_v41 }
 0x152   : > { %20778 = vmatmul.mubr.msk.f32.vlgmr.msra.gmra.mrb[0].mxu0 %vm182_vm0, %v28919_v37  ;;  %v29295_v37 = vpack.c.bf16 %v1431_v9, %v1430_v20  ;;  %v1768_v20 = vld [vmem:[#allocation2 + $0x318] sm:$0xff] }
 0x153   : > { %24845 = vmatpush3.bf16.msra.mxu0 %v29269_v62  ;;  %20796 = vmatprep.mubr.msk.f32.mxu0 %vm182_vm0, %v28967_v56  ;;  %v29303_v56 = vpack.c.bf16 %v1766_v33, %v1765_v15  ;;  %v29318_v15 = vpop.permute.xlu1 %2704  ;;  %v1771_v33 = vld [vmem:[#allocation2 + $0x330] sm:$0xff] }
 0x154   : > { %25081 = vmatpush3.bf16.msra.mxu1 %v28932_v41  ;;  %24847 = vmatprep.subr.bf16.mxu0 %v29275_v14  ;;  %32721 = vst [vmem:[#allocation54_spill] sm:$0xff] %v29295_v37  ;;  %v1769_v41 = vld [vmem:[#allocation2 + $0x320] sm:$0xff] }
 0x155   : > { %25083 = vmatprep.subr.bf16.mxu1 %v28940_v44  ;;  %32722 = vst [vmem:[#allocation55_spill] sm:$0xff] %v29303_v56 }
 0x157   : > { %24849 = vmatpush3.bf16.msra.mxu0 %v29275_v14  ;;  %21063 = vmatmul.mubr.msk.f32.vlgmr.msra.gmra.mrb[2].mxu1 %vm182_vm0, %v28900_v28 }
 0x158   : > { %25085 = vmatpush3.bf16.msra.mxu1 %v28940_v44  ;;  %24851 = vmatprep.subr.bf16.mxu0 %v29285_v36  ;;  %v1767_v44 = vld [vmem:[#allocation2 + $0x310] sm:$0xff] }
 0x159   : > { %25087 = vmatprep.subr.bf16.mxu1 %v28946_v47  ;;  %21081 = vmatprep.mubr.msk.f32.mxu1 %vm182_vm0, %v29288_v8  ;;  %v29309_v9 = vpack.c.bf16 %v1768_v20, %v1767_v44  ;;  %v1772_v20 = vld [vmem:[#allocation2 + $0x338] sm:$0xff] }
 0x15b   : > { %24853 = vmatpush3.bf16.msra.mxu0 %v29285_v36  ;;  %32723 = vst [vmem:[#allocation56_spill] sm:$0xff] %v29309_v9 }
 0x15c   : > { %25089 = vmatpush3.bf16.msra.mxu1 %v28946_v47  ;;  %24855 = vmatprep.subr.bf16.mxu0 %v29295_v37  ;;  %v1770_v47 = vld [vmem:[#allocation2 + $0x328] sm:$0xff] }
 0x15d   : > { %25091 = vmatprep.subr.bf16.mxu1 %v28957_v51  ;;  %v29321_v44 = vpack.c.bf16 %v1770_v47, %v1769_v41  ;;  %v1851_v41 = vld [vmem:[#allocation2 + $0x340] sm:$0xff]  ;;  %v1852_v47 = vld [vmem:[#allocation2 + $0x348] sm:$0xff] }
 0x15f   : > { %24857 = vmatpush3.bf16.msra.mxu0 %v29295_v37  ;;  %32724 = vst [vmem:[#allocation57_spill] sm:$0xff] %v29321_v44 }
 0x160   : > { %25093 = vmatpush3.bf16.msra.mxu1 %v28957_v51  ;;  %24907 = vmatprep.subr.bf16.mxu0 %v29303_v56  ;;  %v29351_v51 = vld [vmem:[%s28782_s24 + $0x50] sm:$0xff] }
 0x161   : > { %25095 = vmatprep.subr.bf16.mxu1 %v28975_v57  ;;  %32728 = vst [vmem:[#allocation61_spill] sm:$0xff] %v29351_v51  ;;  %4771 = vrot.lane.b32.xlu1 %v29351_v51, %s28674_s21 }
 0x162   : > { %20797 = vmatmul.mubr.msk.f32.vlgmr.msra.gmra.mrb[0].mxu0 %vm182_vm0, %v28998_v5  ;;  %v29337_v5 = vpack.c.bf16 %v1852_v47, %v1851_v41  ;;  %v1855_v41 = vld [vmem:[#allocation2 + $0x360] sm:$0xff]  ;;  %v1856_v47 = vld [vmem:[#allocation2 + $0x368] sm:$0xff] }
 0x163   : > { %24909 = vmatpush3.bf16.msra.mxu0 %v29303_v56  ;;  %20872 = vmatprep.mubr.msk.f32.mxu0 %vm182_vm0, %v28834_v19  ;;  %v29329_v19 = vpack.c.bf16 %v1772_v20, %v1771_v33  ;;  %v1853_v33 = vld [vmem:[#allocation2 + $0x350] sm:$0xff]  ;;  %v1854_v20 = vld [vmem:[#allocation2 + $0x358] sm:$0xff] }
 0x164   : > { %25097 = vmatpush3.bf16.msra.mxu1 %v28975_v57  ;;  %24911 = vmatprep.subr.bf16.mxu0 %v29309_v9  ;;  %32726 = vst [vmem:[#allocation59_spill] sm:$0xff] %v29337_v5  ;;  %v29341_v57 = vld [vmem:[%s28782_s24 + $0x48] sm:$0xff] }
 0x165   : > { %25099 = vmatprep.subr.bf16.mxu1 %v29201_v49  ;;  %32725 = vst [vmem:[#allocation58_spill] sm:$0xff] %v29329_v19  ;;  %4769 = vrot.lane.b32.xlu0 %v29341_v57, %s28674_s21 }
 0x166   : > { %4933 = vrot.lane.b32.xlu1 %v29351_v51, %s28675_s23  ;;  %v1940_v51 = vld [vmem:[#allocation2 + $0x398] sm:$0xff] }
 0x167   : > { %24913 = vmatpush3.bf16.msra.mxu0 %v29309_v9  ;;  %21082 = vmatmul.mubr.msk.f32.vlgmr.msra.gmra.mrb[2].mxu1 %vm182_vm0, %v29318_v15 }
 0x168   : > { %25101 = vmatpush3.bf16.msra.mxu1 %v29201_v49  ;;  %24915 = vmatprep.subr.bf16.mxu0 %v29321_v44 }
 0x169   : > { %25103 = vmatprep.subr.bf16.mxu1 %v29207_v18  ;;  %21100 = vmatprep.mubr.msk.f32.mxu1 %vm182_vm0, %v28897_v27  ;;  %v29348_v27 = vpack.c.bf16 %v1854_v20, %v1853_v33  ;;  %v29366_v33 = vpack.c.bf16 %v1856_v47, %v1855_v41  ;;  %v1857_v20 = vld [vmem:[#allocation2 + $0x370] sm:$0xff]  ;;  %v1937_v41 = vld [vmem:[#allocation2 + $0x380] sm:$0xff]  ;;  %v1938_v47 = vld [vmem:[#allocation2 + $0x388] sm:$0xff] }
 0x16a   : > { %4931 = vrot.lane.b32.xlu0 %v29341_v57, %s28675_s23 }
 0x16b   : > { %24917 = vmatpush3.bf16.msra.mxu0 %v29321_v44  ;;  %32727 = vst [vmem:[#allocation60_spill] sm:$0xff] %v29348_v27  ;;  %32729 = vst [vmem:[#allocation62_spill] sm:$0xff] %v29366_v33 }
 0x16c   : > { %25105 = vmatpush3.bf16.msra.mxu1 %v29207_v18  ;;  %24919 = vmatprep.subr.bf16.mxu0 %v29329_v19 }
 0x16d   : > { %25107 = vmatprep.subr.bf16.mxu1 %v29216_v43 }
 0x16f   : > { %24921 = vmatpush3.bf16.msra.mxu0 %v29329_v19 }
 0x170   : > { %25109 = vmatpush3.bf16.msra.mxu1 %v29216_v43  ;;  %24923 = vmatprep.subr.bf16.mxu0 %v29337_v5 }
 0x171   : > { %25111 = vmatprep.subr.bf16.mxu1 %v29228_v26 }
 0x172   : > { %20873 = vmatmul.mubr.msk.f32.vlgmr.msra.gmra.mrb[0].mxu0 %vm182_vm0, %v28850_v22  ;;  %v1858_v22 = vld [vmem:[#allocation2 + $0x378] sm:$0xff] }
 0x173   : > { %24925 = vmatpush3.bf16.msra.mxu0 %v29337_v5  ;;  %20891 = vmatprep.mubr.msk.f32.mxu0 %vm182_vm0, %v29039_v40  ;;  %v29376_v40 = vpack.c.bf16 %v1858_v22, %v1857_v20  ;;  %v29389_v20 = vpack.c.bf16 %v1940_v51, %v1939_v38  ;;  %v1941_v22 = vld [vmem:[#allocation2 + $0x3a0] sm:$0xff]  ;;  %v1943_v51 = vld [vmem:[#allocation2 + $0x3b0] sm:$0xff] }
 0x174   : > { %25113 = vmatpush3.bf16.msra.mxu1 %v29228_v26  ;;  %24927 = vmatprep.subr.bf16.mxu0 %v29348_v27 }
 0x175   : > { %25115 = vmatprep.subr.bf16.mxu1 %v29236_v3  ;;  %32730 = vst [vmem:[#allocation63_spill] sm:$0xff] %v29376_v40  ;;  %32732 = vst [vmem:[#allocation65_spill] sm:$0xff] %v29389_v20 }
 0x177   : > { %21101 = vmatmul.mubr.msk.f32.vlgmr.msra.gmra.mrb[0].mxu1 %vm182_vm0, %v28900_v28  ;;  %24929 = vmatpush3.bf16.msra.mxu0 %v29348_v27  ;;  %v29383_v28 = vpack.c.bf16 %v1938_v47, %v1937_v41  ;;  %v1942_v41 = vld [vmem:[#allocation2 + $0x3a8] sm:$0xff]  ;;  %v1944_v47 = vld [vmem:[#allocation2 + $0x3b8] sm:$0xff] }
 0x178   : > { %25117 = vmatpush3.bf16.msra.mxu1 %v29236_v3  ;;  %21119 = vmatprep.mubr.msk.f32.mxu1 %vm182_vm0, %v29222_v54  ;;  %v29400_v38 = vpack.c.bf16 %v1942_v41, %v1941_v22  ;;  %v2279_v22 = vld [vmem:[#allocation2 + $0x3c8] sm:$0xff] }
 0x179   : > { %24931 = vmatprep.subr.bf16.mxu0 %v29366_v33  ;;  %25119 = vmatprep.subr.bf16.mxu1 %v29242_v25  ;;  %32731 = vst [vmem:[#allocation64_spill] sm:$0xff] %v29383_v28 }
 0x17a   : > { %32733 = vst [vmem:[#allocation66_spill] sm:$0xff] %v29400_v38 }
 0x17b   : > { %24933 = vmatpush3.bf16.msra.mxu0 %v29366_v33 }
 0x17c   : > { %25121 = vmatpush3.bf16.msra.mxu1 %v29242_v25  ;;  %24935 = vmatprep.subr.bf16.mxu0 %v29376_v40 }
 0x17d   : > { %25123 = vmatprep.subr.bf16.mxu1 %v29253_v7 }
 0x17f   : > { %24937 = vmatpush3.bf16.msra.mxu0 %v29376_v40 }
 0x180   : > { %25125 = vmatpush3.bf16.msra.mxu1 %v29253_v7  ;;  %24939 = vmatprep.subr.bf16.mxu0 %v29383_v28 }
 0x181   : > { %25127 = vmatprep.subr.bf16.mxu1 %v29261_v4 }
 0x182   : > { %20892 = vmatmul.mubr.msk.f32.vlgmr.msra.gmra.mrb[0].mxu0 %vm182_vm0, %v29062_v58  ;;  %v29408_v58 = vpack.c.bf16 %v1944_v47, %v1943_v51  ;;  %v2281_v51 = vld [vmem:[#allocation2 + $0x3d8] sm:$0xff] }
 0x183   : > { %24941 = vmatpush3.bf16.msra.mxu0 %v29383_v28  ;;  %20910 = vmatprep.mubr.msk.f32.mxu0 %vm182_vm0, %v29073_v1  ;;  %v2278_v1 = vld [vmem:[#allocation2 + $0x3c0] sm:$0xff] }
 0x184   : > { %25129 = vmatpush3.bf16.msra.mxu1 %v29261_v4  ;;  %24943 = vmatprep.subr.bf16.mxu0 %v29389_v20  ;;  %32734 = vst [vmem:[#allocation67_spill] sm:$0xff] %v29408_v58  ;;  %v29415_v41 = vpack.c.bf16 %v2279_v22, %v2278_v1  ;;  %v2282_v4 = vld [vmem:[#allocation2 + $0x3e0] sm:$0xff] }
 0x185   : > { %25131 = vmatprep.subr.bf16.mxu1 %v29269_v62  ;;  %v28547_v1 = vld [vmem:[%s28782_s24 + $0x1a] sm:$0xff] }
 0x186   : > { %32735 = vst [vmem:[#allocation68_spill] sm:$0xff] %v29415_v41 }
 0x187   : > { %21120 = vmatmul.mubr.msk.f32.vlgmr.msra.gmra.mrb[0].mxu1 %vm182_vm0, %v29250_v48  ;;  %24945 = vmatpush3.bf16.msra.mxu0 %v29389_v20 }
 0x188   : > { %25133 = vmatpush3.bf16.msra.mxu1 %v29269_v62  ;;  %21138 = vmatprep.mubr.msk.f32.mxu1 %vm182_vm0, %v29288_v8  ;;  %v2280_v62 = vld [vmem:[#allocation2 + $0x3d0] sm:$0xff] }
 0x189   : > { %24947 = vmatprep.subr.bf16.mxu0 %v29400_v38  ;;  %25135 = vmatprep.subr.bf16.mxu1 %v29275_v14  ;;  %v29421_v47 = vpack.c.bf16 %v2281_v51, %v2280_v62  ;;  %v2284_v62 = vld [vmem:[#allocation2 + $0x3f0] sm:$0xff]  ;;  %v2285_v51 = vld [vmem:[#allocation2 + $0x3f8] sm:$0xff] }
 0x18b   : > { %24949 = vmatpush3.bf16.msra.mxu0 %v29400_v38  ;;  %32736 = vst [vmem:[#allocation69_spill] sm:$0xff] %v29421_v47 }
 0x18c   : > { %25137 = vmatpush3.bf16.msra.mxu1 %v29275_v14  ;;  %24951 = vmatprep.subr.bf16.mxu0 %v29408_v58  ;;  %v2283_v14 = vld [vmem:[#allocation2 + $0x3e8] sm:$0xff] }
 0x18d   : > { %25139 = vmatprep.subr.bf16.mxu1 %v29285_v36  ;;  %v29431_v22 = vpack.c.bf16 %v2283_v14, %v2282_v4  ;;  %v2365_v4 = vld [vmem:[#allocation2 + $0x408] sm:$0xff] }
 0x18f   : > { %24953 = vmatpush3.bf16.msra.mxu0 %v29408_v58  ;;  %32737 = vst [vmem:[#allocation70_spill] sm:$0xff] %v29431_v22 }
 0x190   : > { %25141 = vmatpush3.bf16.msra.mxu1 %v29285_v36  ;;  %25003 = vmatprep.subr.bf16.mxu0 %v29415_v41 }
 0x191   : > { %25143 = vmatprep.subr.bf16.mxu1 %v29295_v37 }
 0x192   : > { %20911 = vmatmul.mubr.msk.f32.vlgmr.msra.gmra.mrb[0].mxu0 %vm182_vm0, %v29098_v35  ;;  %v29439_v35 = vpack.c.bf16 %v2285_v51, %v2284_v62  ;;  %v2366_v62 = vld [vmem:[#allocation2 + $0x410] sm:$0xff]  ;;  %v2367_v51 = vld [vmem:[#allocation2 + $0x418] sm:$0xff] }
 0x193   : > { %25005 = vmatpush3.bf16.msra.mxu0 %v29415_v41  ;;  %20986 = vmatprep.mubr.msk.f32.mxu0 %vm182_vm0, %v28547_v1  ;;  %v2364_v1 = vld [vmem:[#allocation2 + $0x400] sm:$0xff] }
 0x194   : > { %25145 = vmatpush3.bf16.msra.mxu1 %v29295_v37  ;;  %25007 = vmatprep.subr.bf16.mxu0 %v29421_v47  ;;  %32738 = vst [vmem:[#allocation71_spill] sm:$0xff] %v29439_v35  ;;  %v29447_v14 = vpack.c.bf16 %v2365_v4, %v2364_v1  ;;  %v29453_v37 = vpack.c.bf16 %v2367_v51, %v2366_v62  ;;  %v2370_v4 = vld [vmem:[#allocation2 + $0x430] sm:$0xff]  ;;  %v2371_v62 = vld [vmem:[#allocation2 + $0x438] sm:$0xff]  ;;  %v29466_v51 = vpop.permute.xlu0 %3361 }
 0x195   : > { %25195 = vmatprep.subr.bf16.mxu1 %v28987_v60 }
 0x196   : > { %32739 = vst [vmem:[#allocation72_spill] sm:$0xff] %v29447_v14  ;;  %32740 = vst [vmem:[#allocation73_spill] sm:$0xff] %v29453_v37 }
 0x197   : > { %21139 = vmatmul.mubr.msk.f32.vlgmr.msra.gmra.mrb[0].mxu1 %vm182_vm0, %v29318_v15  ;;  %25009 = vmatpush3.bf16.msra.mxu0 %v29421_v47 }
 0x198   : > { %25197 = vmatpush3.bf16.msra.mxu1 %v28987_v60  ;;  %25011 = vmatprep.subr.bf16.mxu0 %v29431_v22  ;;  %v28548_v60 = vld [vmem:[%s28782_s24 + $0x22] sm:$0xff] }
 0x199   : > { %25199 = vmatprep.subr.bf16.mxu1 %v28993_v0  ;;  %21214 = vmatprep.mubr.msk.f32.mxu1 %vm182_vm0, %v28951_v50  ;;  %v2368_v50 = vld [vmem:[#allocation2 + $0x420] sm:$0xff] }
 0x19b   : > { %25013 = vmatpush3.bf16.msra.mxu0 %v29431_v22 }
 0x19c   : > { %25201 = vmatpush3.bf16.msra.mxu1 %v28993_v0  ;;  %25015 = vmatprep.subr.bf16.mxu0 %v29439_v35  ;;  %v2369_v0 = vld [vmem:[#allocation2 + $0x428] sm:$0xff] }
 0x19d   : > { %25203 = vmatprep.subr.bf16.mxu1 %v29002_v6  ;;  %v29463_v1 = vpack.c.bf16 %v2369_v0, %v2368_v50  ;;  %v2450_v0 = vld [vmem:[#allocation2 + $0x440] sm:$0xff]  ;;  %v2452_v50 = vld [vmem:[#allocation2 + $0x450] sm:$0xff] }
 0x19f   : > { %25017 = vmatpush3.bf16.msra.mxu0 %v29439_v35  ;;  %32741 = vst [vmem:[#allocation74_spill] sm:$0xff] %v29463_v1 }
 0x1a0   : > { %25205 = vmatpush3.bf16.msra.mxu1 %v29002_v6  ;;  %25019 = vmatprep.subr.bf16.mxu0 %v29447_v14 }
 0x1a1   : > { %25207 = vmatprep.subr.bf16.mxu1 %v29012_v11 }
 0x1a2   : > { %20987 = vmatmul.mubr.msk.f32.vlgmr.msra.gmra.mrb[0].mxu0 %vm182_vm0, %v28548_v60  ;;  %v29473_v60 = vpack.c.bf16 %v2371_v62, %v2370_v4  ;;  %v2453_v4 = vld [vmem:[#allocation2 + $0x458] sm:$0xff]  ;;  %v29485_v62 = vld [vmem:[%s28782_s24 + $0x49] sm:$0xff] }
 0x1a3   : > { %25021 = vmatpush3.bf16.msra.mxu0 %v29447_v14  ;;  %21005 = vmatprep.mubr.msk.f32.mxu0 %vm182_vm0, %v29139_v17  ;;  %v2451_v17 = vld [vmem:[#allocation2 + $0x448] sm:$0xff] }
 0x1a4   : > { %25209 = vmatpush3.bf16.msra.mxu1 %v29012_v11  ;;  %25023 = vmatprep.subr.bf16.mxu0 %v29453_v37  ;;  %32742 = vst [vmem:[#allocation75_spill] sm:$0xff] %v29473_v60  ;;  %v29516_v11 = vpop.permute.xlu0 %3446 }
 0x1a5   : > { %25211 = vmatprep.subr.bf16.mxu1 %v29020_v16  ;;  %5563 = vrot.lane.b32.xlu0 %v29485_v62, %s28674_s21 }
 0x1a7   : > { %25025 = vmatpush3.bf16.msra.mxu0 %v29453_v37  ;;  %21215 = vmatmul.mubr.msk.f32.vlgmr.msra.gmra.mrb[2].mxu1 %vm182_vm0, %v28960_v53  ;;  %v29481_v53 = vpack.c.bf16 %v2451_v17, %v2450_v0  ;;  %v2454_v0 = vld [vmem:[#allocation2 + $0x460] sm:$0xff]  ;;  %v2455_v17 = vld [vmem:[#allocation2 + $0x468] sm:$0xff] }
 0x1a8   : > { %25213 = vmatpush3.bf16.msra.mxu1 %v29020_v16  ;;  %25027 = vmatprep.subr.bf16.mxu0 %v29463_v1  ;;  %v29495_v16 = vld [vmem:[%s28782_s24 + $0x51] sm:$0xff] }
 0x1a9   : > { %25215 = vmatprep.subr.bf16.mxu1 %v29026_v29  ;;  %21233 = vmatprep.mubr.msk.f32.mxu1 %vm182_vm0, %v29466_v51  ;;  %32743 = vst [vmem:[#allocation76_spill] sm:$0xff] %v29481_v53  ;;  %32745 = vst [vmem:[#allocation78_spill] sm:$0xff] %v29495_v16 }
 0x1aa   : > { %5565 = vrot.lane.b32.xlu1 %v29495_v16, %s28674_s21  ;;  %5648 = vrot.lane.b32.xlu0 %v29485_v62, %s28675_s23 }
 0x1ab   : > { %25029 = vmatpush3.bf16.msra.mxu0 %v29463_v1 }
 0x1ac   : > { %25217 = vmatpush3.bf16.msra.mxu1 %v29026_v29  ;;  %25031 = vmatprep.subr.bf16.mxu0 %v29473_v60  ;;  %v29492_v29 = vpack.c.bf16 %v2453_v4, %v2452_v50  ;;  %v29508_v50 = vpop.permute.xlu1 %3363  ;;  %v29511_v4 = vpack.c.bf16 %v2455_v17, %v2454_v0  ;;  %v3019_v0 = vld [vmem:[#allocation2 + $0x480] sm:$0xff]  ;;  %v3020_v17 = vld [vmem:[#allocation2 + $0x488] sm:$0xff] }
 0x1ad   : > { %25219 = vmatprep.subr.bf16.mxu1 %v29034_v32 }
 0x1ae   : > { %32744 = vst [vmem:[#allocation77_spill] sm:$0xff] %v29492_v29  ;;  %32746 = vst [vmem:[#allocation79_spill] sm:$0xff] %v29511_v4  ;;  %5650 = vrot.lane.b32.xlu1 %v29495_v16, %s28675_s23  ;;  %v3023_v16 = vld [vmem:[#allocation2 + $0x4a0] sm:$0xff] }
 0x1af   : > { %25033 = vmatpush3.bf16.msra.mxu0 %v29473_v60 }
 0x1b0   : > { %25221 = vmatpush3.bf16.msra.mxu1 %v29034_v32  ;;  %25035 = vmatprep.subr.bf16.mxu0 %v29481_v53  ;;  %v2456_v32 = vld [vmem:[#allocation2 + $0x470] sm:$0xff] }
 0x1b1   : > { %25223 = vmatprep.subr.bf16.mxu1 %v29045_v21 }
 0x1b2   : > { %21006 = vmatmul.mubr.msk.f32.vlgmr.msra.gmra.mrb[0].mxu0 %vm182_vm0, %v29162_v55  ;;  %v2457_v55 = vld [vmem:[#allocation2 + $0x478] sm:$0xff] }
 0x1b3   : > { %25037 = vmatpush3.bf16.msra.mxu0 %v29481_v53  ;;  %21024 = vmatprep.mubr.msk.f32.mxu0 %vm182_vm0, %v29181_v31  ;;  %v29523_v31 = vpack.c.bf16 %v2457_v55, %v2456_v32  ;;  %v3021_v32 = vld [vmem:[#allocation2 + $0x490] sm:$0xff]  ;;  %v3022_v55 = vld [vmem:[#allocation2 + $0x498] sm:$0xff] }
 0x1b4   : > { %25225 = vmatpush3.bf16.msra.mxu1 %v29045_v21  ;;  %25039 = vmatprep.subr.bf16.mxu0 %v29492_v29  ;;  %v29531_v21 = vpack.c.bf16 %v3020_v17, %v3019_v0  ;;  %v28549_v0 = vld [vmem:[%s28782_s24 + $0x30] sm:$0xff]  ;;  %v29546_v17 = vpop.permute.xlu1 %3448 }
 0x1b5   : > { %25227 = vmatprep.subr.bf16.mxu1 %v29053_v45  ;;  %32747 = vst [vmem:[#allocation80_spill] sm:$0xff] %v29523_v31 }
 0x1b6   : > { %32748 = vst [vmem:[#allocation81_spill] sm:$0xff] %v29531_v21 }
 0x1b7   : > { %25041 = vmatpush3.bf16.msra.mxu0 %v29492_v29  ;;  %21234 = vmatmul.mubr.msk.f32.vlgmr.msra.gmra.mrb[2].mxu1 %vm182_vm0, %v29508_v50 }
 0x1b8   : > { %25229 = vmatpush3.bf16.msra.mxu1 %v29053_v45  ;;  %25043 = vmatprep.subr.bf16.mxu0 %v29511_v4  ;;  %v29537_v45 = vpack.c.bf16 %v3022_v55, %v3021_v32  ;;  %v3025_v55 = vld [vmem:[#allocation2 + $0x4b0] sm:$0xff] }
 0x1b9   : > { %25231 = vmatprep.subr.bf16.mxu1 %v29059_v52  ;;  %21252 = vmatprep.mubr.msk.f32.mxu1 %vm182_vm0, %v29516_v11 }
 0x1bb   : > { %25045 = vmatpush3.bf16.msra.mxu0 %v29511_v4 }
 0x1bc   : > { %25233 = vmatpush3.bf16.msra.mxu1 %v29059_v52  ;;  %25047 = vmatprep.subr.bf16.mxu0 %v29523_v31  ;;  %v3024_v52 = vld [vmem:[#allocation2 + $0x4a8] sm:$0xff] }
 0x1bd   : > { %25235 = vmatprep.subr.bf16.mxu1 %v29068_v59  ;;  %v29549_v32 = vpack.c.bf16 %v3024_v52, %v3023_v16  ;;  %v3106_v16 = vld [vmem:[#allocation2 + $0x4c8] sm:$0xff]  ;;  %v29561_v52 = vld [vmem:[%s28782_s24 + $0x31] sm:$0xff] }
 0x1bf   : > { %25049 = vmatpush3.bf16.msra.mxu0 %v29523_v31  ;;  %32749 = vst [vmem:[#allocation82_spill] sm:$0xff] %v29549_v32 }
 0x1c0   : > { %25237 = vmatpush3.bf16.msra.mxu1 %v29068_v59  ;;  %25147 = vmatprep.subr.bf16.mxu0 %v29531_v21  ;;  %v3026_v59 = vld [vmem:[#allocation2 + $0x4b8] sm:$0xff] }
 0x1c1   : > { %25239 = vmatprep.subr.bf16.mxu1 %v29079_v2 }
 0x1c2   : > { %21025 = vmatmul.mubr.msk.f32.vlgmr.msra.gmra.mrb[0].mxu0 %vm182_vm0, %v29212_v42  ;;  %v29557_v42 = vpack.c.bf16 %v3026_v59, %v3025_v55  ;;  %v3107_v59 = vld [vmem:[#allocation2 + $0x4d0] sm:$0xff]  ;;  %v3108_v55 = vld [vmem:[#allocation2 + $0x4d8] sm:$0xff] }
 0x1c3   : > { %25149 = vmatpush3.bf16.msra.mxu0 %v29531_v21  ;;  %21157 = vmatprep.mubr.msk.f32.mxu0 %vm182_vm0, %v28549_v0  ;;  %v3105_v0 = vld [vmem:[#allocation2 + $0x4c0] sm:$0xff] }
 0x1c4   : > { %25241 = vmatpush3.bf16.msra.mxu1 %v29079_v2  ;;  %25151 = vmatprep.subr.bf16.mxu0 %v29537_v45  ;;  %32750 = vst [vmem:[#allocation83_spill] sm:$0xff] %v29557_v42  ;;  %v29574_v2 = vpack.c.bf16 %v3108_v55, %v3107_v59  ;;  %v3111_v55 = vld [vmem:[#allocation2 + $0x4f0] sm:$0xff] }
 0x1c5   : > { %25243 = vmatprep.subr.bf16.mxu1 %v29303_v56 }
 0x1c6   : > { %32752 = vst [vmem:[#allocation85_spill] sm:$0xff] %v29574_v2 }
 0x1c7   : > { %25153 = vmatpush3.bf16.msra.mxu0 %v29537_v45  ;;  %21253 = vmatmul.mubr.msk.f32.vlgmr.msra.gmra.mrb[2].mxu1 %vm182_vm0, %v29546_v17 }
 0x1c8   : > { %25245 = vmatpush3.bf16.msra.mxu1 %v29303_v56  ;;  %25155 = vmatprep.subr.bf16.mxu0 %v29549_v32  ;;  %v29568_v56 = vpack.c.bf16 %v3106_v16, %v3105_v0  ;;  %v3109_v0 = vld [vmem:[#allocation2 + $0x4e0] sm:$0xff]  ;;  %v3110_v16 = vld [vmem:[#allocation2 + $0x4e8] sm:$0xff] }
 0x1c9   : > { %25247 = vmatprep.subr.bf16.mxu1 %v29309_v9  ;;  %21271 = vmatprep.mubr.msk.f32.mxu1 %vm182_vm0, %v29561_v52  ;;  %v29585_v59 = vpack.c.bf16 %v3110_v16, %v3109_v0  ;;  %v3192_v0 = vld [vmem:[#allocation2 + $0x508] sm:$0xff] }
 0x1ca   : > { %32751 = vst [vmem:[#allocation84_spill] sm:$0xff] %v29568_v56 }
 0x1cb   : > { %25157 = vmatpush3.bf16.msra.mxu0 %v29549_v32  ;;  %32753 = vst [vmem:[#allocation86_spill] sm:$0xff] %v29585_v59 }
 0x1cc   : > { %25249 = vmatpush3.bf16.msra.mxu1 %v29309_v9  ;;  %25159 = vmatprep.subr.bf16.mxu0 %v29557_v42  ;;  %v28551_v9 = vld [vmem:[%s28782_s24 + $0x38] sm:$0xff] }
 0x1cd   : > { %25251 = vmatprep.subr.bf16.mxu1 %v29321_v44 }
 0x1cf   : > { %25161 = vmatpush3.bf16.msra.mxu0 %v29557_v42  ;;  %v29588_v42 = vld [vmem:[%s28782_s24 + $0x39] sm:$0xff] }
 0x1d0   : > { %25253 = vmatpush3.bf16.msra.mxu1 %v29321_v44  ;;  %25163 = vmatprep.subr.bf16.mxu0 %v29568_v56  ;;  %v3112_v44 = vld [vmem:[#allocation2 + $0x4f8] sm:$0xff] }
 0x1d1   : > { %25255 = vmatprep.subr.bf16.mxu1 %v29329_v19 }
 0x1d2   : > { %21158 = vmatmul.mubr.msk.f32.vlgmr.msra.gmra.mrb[0].mxu0 %vm182_vm0, %v28551_v9  ;;  %v3191_v9 = vld [vmem:[#allocation2 + $0x500] sm:$0xff] }
 0x1d3   : > { %25165 = vmatpush3.bf16.msra.mxu0 %v29568_v56  ;;  %21176 = vmatprep.mubr.msk.f32.mxu0 %vm182_vm0, %v29222_v54  ;;  %v29596_v54 = vpack.c.bf16 %v3112_v44, %v3111_v55  ;;  %v29603_v16 = vpack.c.bf16 %v3192_v0, %v3191_v9  ;;  %v3194_v44 = vld [vmem:[#allocation2 + $0x518] sm:$0xff]  ;;  %v29607_v55 = vld [vmem:[%s28782_s24 + $0x4a] sm:$0xff]  ;;  %v3195_v9 = vld [vmem:[#allocation2 + $0x520] sm:$0xff] }
 0x1d4   : > { %25257 = vmatpush3.bf16.msra.mxu1 %v29329_v19  ;;  %25167 = vmatprep.subr.bf16.mxu0 %v29574_v2  ;;  %v29617_v19 = vld [vmem:[%s28782_s24 + $0x52] sm:$0xff]  ;;  %v3196_v0 = vld [vmem:[#allocation2 + $0x528] sm:$0xff] }
 0x1d5   : > { %25259 = vmatprep.subr.bf16.mxu1 %v29337_v5  ;;  %32754 = vst [vmem:[#allocation87_spill] sm:$0xff] %v29596_v54  ;;  %32755 = vst [vmem:[#allocation88_spill] sm:$0xff] %v29603_v16  ;;  %6280 = vrot.lane.b32.xlu0 %v29607_v55, %s28674_s21 }
 0x1d6   : > { %6282 = vrot.lane.b32.xlu1 %v29617_v19, %s28674_s21 }
 0x1d7   : > { %21272 = vmatmul.mubr.msk.f32.vlgmr.msra.gmra.mrb[0].mxu1 %vm182_vm0, %v29588_v42  ;;  %25169 = vmatpush3.bf16.msra.mxu0 %v29574_v2 }
 0x1d8   : > { %25261 = vmatpush3.bf16.msra.mxu1 %v29337_v5  ;;  %21290 = vmatprep.mubr.msk.f32.mxu1 %vm182_vm0, %v29466_v51  ;;  %v3193_v5 = vld [vmem:[#allocation2 + $0x510] sm:$0xff] }
 0x1d9   : > { %25171 = vmatprep.subr.bf16.mxu0 %v29585_v59  ;;  %25263 = vmatprep.subr.bf16.mxu1 %v29348_v27 }
 0x1da   : > { %6365 = vrot.lane.b32.xlu0 %v29607_v55, %s28675_s23  ;;  %6367 = vrot.lane.b32.xlu1 %v29617_v19, %s28675_s23 }
 0x1db   : > { %25173 = vmatpush3.bf16.msra.mxu0 %v29585_v59 }
 0x1dc   : > { %25265 = vmatpush3.bf16.msra.mxu1 %v29348_v27  ;;  %25175 = vmatprep.subr.bf16.mxu0 %v29596_v54  ;;  %v29614_v27 = vpack.c.bf16 %v3194_v44, %v3193_v5  ;;  %v29632_v5 = vpack.c.bf16 %v3196_v0, %v3195_v9  ;;  %v3197_v44 = vld [vmem:[#allocation2 + $0x530] sm:$0xff]  ;;  %v3763_v9 = vld [vmem:[#allocation2 + $0x540] sm:$0xff]  ;;  %v3764_v0 = vld [vmem:[#allocation2 + $0x548] sm:$0xff] }
 0x1dd   : > { %25267 = vmatprep.subr.bf16.mxu1 %v29366_v33 }
 0x1de   : > { %32756 = vst [vmem:[#allocation89_spill] sm:$0xff] %v29614_v27  ;;  %32757 = vst [vmem:[#allocation90_spill] sm:$0xff] %v29632_v5 }
 0x1df   : > { %25177 = vmatpush3.bf16.msra.mxu0 %v29596_v54 }
 0x1e0   : > { %25269 = vmatpush3.bf16.msra.mxu1 %v29366_v33  ;;  %25179 = vmatprep.subr.bf16.mxu0 %v29603_v16  ;;  %v3766_v33 = vld [vmem:[#allocation2 + $0x558] sm:$0xff] }
 0x1e1   : > { %25271 = vmatprep.subr.bf16.mxu1 %v29376_v40 }
 0x1e2   : > { %21177 = vmatmul.mubr.msk.f32.vlgmr.msra.gmra.mrb[0].mxu0 %vm182_vm0, %v29250_v48  ;;  %v3198_v48 = vld [vmem:[#allocation2 + $0x538] sm:$0xff] }
 0x1e3   : > { %25181 = vmatpush3.bf16.msra.mxu0 %v29603_v16  ;;  %21195 = vmatprep.mubr.msk.f32.mxu0 %vm182_vm0, %v29288_v8  ;;  %v29642_v8 = vpack.c.bf16 %v3198_v48, %v3197_v44  ;;  %v3767_v48 = vld [vmem:[#allocation2 + $0x560] sm:$0xff] }
 0x1e4   : > { %25273 = vmatpush3.bf16.msra.mxu1 %v29376_v40  ;;  %25183 = vmatprep.subr.bf16.mxu0 %v29614_v27  ;;  %v29649_v40 = vpack.c.bf16 %v3764_v0, %v3763_v9 }
 0x1e5   : > { %25275 = vmatprep.subr.bf16.mxu1 %v29383_v28  ;;  %32758 = vst [vmem:[#allocation91_spill] sm:$0xff] %v29642_v8 }
 0x1e6   : > { %32759 = vst [vmem:[#allocation92_spill] sm:$0xff] %v29649_v40 }
 0x1e7   : > { %21291 = vmatmul.mubr.msk.f32.vlgmr.msra.gmra.mrb[0].mxu1 %vm182_vm0, %v29508_v50  ;;  %25185 = vmatpush3.bf16.msra.mxu0 %v29614_v27 }
 0x1e8   : > { %25277 = vmatpush3.bf16.msra.mxu1 %v29383_v28  ;;  %21309 = vmatprep.mubr.msk.f32.mxu1 %vm182_vm0, %v29516_v11  ;;  %v3765_v28 = vld [vmem:[#allocation2 + $0x550] sm:$0xff] }
 0x1e9   : > { %25187 = vmatprep.subr.bf16.mxu0 %v29632_v5  ;;  %25279 = vmatprep.subr.bf16.mxu1 %v29389_v20  ;;  %v29655_v44 = vpack.c.bf16 %v3766_v33, %v3765_v28  ;;  %v3769_v33 = vld [vmem:[#allocation2 + $0x570] sm:$0xff]  ;;  %v3770_v28 = vld [vmem:[#allocation2 + $0x578] sm:$0xff] }
 0x1eb   : > { %25189 = vmatpush3.bf16.msra.mxu0 %v29632_v5  ;;  %32760 = vst [vmem:[#allocation93_spill] sm:$0xff] %v29655_v44 }
 0x1ec   : > { %25281 = vmatpush3.bf16.msra.mxu1 %v29389_v20  ;;  %25191 = vmatprep.subr.bf16.mxu0 %v29642_v8  ;;  %v3768_v20 = vld [vmem:[#allocation2 + $0x568] sm:$0xff] }
 0x1ed   : > { %25283 = vmatprep.subr.bf16.mxu1 %v29400_v38  ;;  %v29665_v9 = vpack.c.bf16 %v3768_v20, %v3767_v48  ;;  %v3849_v20 = vld [vmem:[#allocation2 + $0x580] sm:$0xff]  ;;  %v3851_v48 = vld [vmem:[#allocation2 + $0x590] sm:$0xff] }
 0x1ef   : > { %25193 = vmatpush3.bf16.msra.mxu0 %v29642_v8  ;;  %32761 = vst [vmem:[#allocation94_spill] sm:$0xff] %v29665_v9 }
 0x1f0   : > { %25285 = vmatpush3.bf16.msra.mxu1 %v29400_v38  ;;  %25291 = vmatprep.subr.bf16.mxu0 %v29649_v40 }
 0x1f1   : > { %25287 = vmatprep.subr.bf16.mxu1 %v29408_v58 }
 0x1f2   : > { %21196 = vmatmul.mubr.msk.f32.vlgmr.msra.gmra.mrb[0].mxu0 %vm182_vm0, %v29318_v15  ;;  %v29673_v15 = vpack.c.bf16 %v3770_v28, %v3769_v33  ;;  %v3852_v33 = vld [vmem:[#allocation2 + $0x598] sm:$0xff]  ;;  %v29685_v28 = vld [vmem:[%s28782_s24 + $0x60] sm:$0xff] }
 0x1f3   : > { %25293 = vmatpush3.bf16.msra.mxu0 %v29649_v40  ;;  %21328 = vmatprep.mubr.msk.f32.mxu0 %vm182_vm0, %v29561_v52  ;;  %v3850_v52 = vld [vmem:[#allocation2 + $0x588] sm:$0xff]  ;;  %32764 = vst [vmem:[#allocation97_spill] sm:$0xff] %v29685_v28 }
 0x1f4   : > { %25289 = vmatpush3.bf16.msra.mxu1 %v29408_v58  ;;  %25295 = vmatprep.subr.bf16.mxu0 %v29655_v44  ;;  %32762 = vst [vmem:[#allocation95_spill] sm:$0xff] %v29673_v15  ;;  %v29681_v0 = vpack.c.bf16 %v3850_v52, %v3849_v20  ;;  %v3853_v20 = vld [vmem:[#allocation2 + $0x5a0] sm:$0xff]  ;;  %v3854_v52 = vld [vmem:[#allocation2 + $0x5a8] sm:$0xff] }
 0x1f5   : > { %25339 = vmatprep.subr.bf16.mxu1 %v29087_v13  ;;  %6917 = vrot.lane.b32.xlu0 %v29685_v28, %s28674_s21  ;;  %v4512_v40 = vld [vmem:[#allocation2 + $0x628] sm:$0xff] }
 0x1f6   : > { %32763 = vst [vmem:[#allocation96_spill] sm:$0xff] %v29681_v0 }
 0x1f7   : > { %21310 = vmatmul.mubr.msk.f32.vlgmr.msra.gmra.mrb[0].mxu1 %vm182_vm0, %v29546_v17  ;;  %25297 = vmatpush3.bf16.msra.mxu0 %v29655_v44 }
 0x1f8   : > { %25341 = vmatpush3.bf16.msra.mxu1 %v29087_v13  ;;  %25299 = vmatprep.subr.bf16.mxu0 %v29665_v9 }
 0x1f9   : > { %25343 = vmatprep.subr.bf16.mxu1 %v29093_v30  ;;  %21385 = vmatprep.mubr.msk.f32.mxu1 %vm182_vm0, %v29165_v61  ;;  %v29692_v61 = vpack.c.bf16 %v3852_v33, %v3851_v48  ;;  %v29709_v48 = vpack.c.bf16 %v3854_v52, %v3853_v20  ;;  %v3855_v33 = vld [vmem:[#allocation2 + $0x5b0] sm:$0xff]  ;;  %v3935_v20 = vld [vmem:[#allocation2 + $0x5c0] sm:$0xff]  ;;  %v3936_v52 = vld [vmem:[#allocation2 + $0x5c8] sm:$0xff] }
 0x1fa   : > { %7079 = vrot.lane.b32.xlu0 %v29685_v28, %s28675_s23 }
 0x1fb   : > { %25301 = vmatpush3.bf16.msra.mxu0 %v29665_v9  ;;  %32765 = vst [vmem:[#allocation98_spill] sm:$0xff] %v29692_v61  ;;  %v29695_v9 = vld [vmem:[%s28782_s24 + $0x68] sm:$0xff]  ;;  %32767 = vst [vmem:[#allocation100_spill] sm:$0xff] %v29709_v48 }
 0x1fc   : > { %25345 = vmatpush3.bf16.msra.mxu1 %v29093_v30  ;;  %25303 = vmatprep.subr.bf16.mxu0 %v29673_v15  ;;  %32766 = vst [vmem:[#allocation99_spill] sm:$0xff] %v29695_v9 }
 0x1fd   : > { %25347 = vmatprep.subr.bf16.mxu1 %v29102_v39  ;;  %6919 = vrot.lane.b32.xlu1 %v29695_v9, %s28674_s21 }
 0x1ff   : > { %25305 = vmatpush3.bf16.msra.mxu0 %v29673_v15  ;;  %v3856_v15 = vld [vmem:[#allocation2 + $0x5b8] sm:$0xff] }
 0x200   : > { %25349 = vmatpush3.bf16.msra.mxu1 %v29102_v39  ;;  %25307 = vmatprep.subr.bf16.mxu0 %v29681_v0 }
 0x201   : > { %25351 = vmatprep.subr.bf16.mxu1 %v29112_v46  ;;  %7081 = vrot.lane.b32.xlu1 %v29695_v9, %s28675_s23  ;;  %v3937_v9 = vld [vmem:[#allocation2 + $0x5d0] sm:$0xff] }
 0x202   : > { %21329 = vmatmul.mubr.msk.f32.vlgmr.msra.gmra.mrb[0].mxu0 %vm182_vm0, %v29588_v42  ;;  %v29714_v42 = vpop.permute.xlu0 %4105 }
 0x203   : > { %25309 = vmatpush3.bf16.msra.mxu0 %v29681_v0  ;;  %21347 = vmatprep.mubr.msk.f32.mxu0 %vm182_vm0, %v29466_v51  ;;  %v29721_v51 = vpack.c.bf16 %v3856_v15, %v3855_v33  ;;  %v3938_v15 = vld [vmem:[#allocation2 + $0x5d8] sm:$0xff]  ;;  %v3940_v0 = vld [vmem:[#allocation2 + $0x5e8] sm:$0xff] }
 0x204   : > { %25353 = vmatpush3.bf16.msra.mxu1 %v29112_v46  ;;  %25311 = vmatprep.subr.bf16.mxu0 %v29692_v61  ;;  %v29735_v33 = vpack.c.bf16 %v3938_v15, %v3937_v9  ;;  %v3941_v15 = vld [vmem:[#allocation2 + $0x5f0] sm:$0xff] }
 0x205   : > { %25355 = vmatprep.subr.bf16.mxu1 %v29120_v23  ;;  %32768 = vst [vmem:[#allocation101_spill] sm:$0xff] %v29721_v51 }
 0x206   : > { %32770 = vst [vmem:[#allocation103_spill] sm:$0xff] %v29735_v33  ;;  %v29750_v28 = vpop.permute.xlu0 %4190 }
 0x207   : > { %25313 = vmatpush3.bf16.msra.mxu0 %v29692_v61  ;;  %21386 = vmatmul.mubr.msk.f32.vlgmr.msra.gmra.mrb[2].mxu1 %vm182_vm0, %v29174_v10  ;;  %v29729_v10 = vpack.c.bf16 %v3936_v52, %v3935_v20  ;;  %v32771_v61 = vld [vmem:[#allocation38_spill] sm:$0xff]  ;;  %v29744_v20 = vpop.permute.xlu1 %4107  ;;  %v32773_v52 = vld [vmem:[#allocation39_spill] sm:$0xff] }
 0x208   : > { %25357 = vmatpush3.bf16.msra.mxu1 %v29120_v23  ;;  %25315 = vmatprep.subr.bf16.mxu0 %v29709_v48 }
 0x209   : > { %25359 = vmatprep.subr.bf16.mxu1 %v29126_v24  ;;  %21404 = vmatprep.mubr.msk.f32.mxu1 %vm182_vm0, %v29714_v42  ;;  %32769 = vst [vmem:[#allocation102_spill] sm:$0xff] %v29729_v10 }
 0x20b   : > { %25317 = vmatpush3.bf16.msra.mxu0 %v29709_v48  ;;  %v3939_v48 = vld [vmem:[#allocation2 + $0x5e0] sm:$0xff] }
 0x20c   : > { %25361 = vmatpush3.bf16.msra.mxu1 %v29126_v24  ;;  %25319 = vmatprep.subr.bf16.mxu0 %v29721_v51  ;;  %v29747_v9 = vpack.c.bf16 %v3940_v0, %v3939_v48  ;;  %v4507_v0 = vld [vmem:[#allocation2 + $0x600] sm:$0xff]  ;;  %v4508_v48 = vld [vmem:[#allocation2 + $0x608] sm:$0xff] }
 0x20d   : > { %25363 = vmatprep.subr.bf16.mxu1 %v29134_v63 }
 0x20e   : > { %32772 = vst [vmem:[#allocation104_spill] sm:$0xff] %v29747_v9 }
 0x20f   : > { %25321 = vmatpush3.bf16.msra.mxu0 %v29721_v51  ;;  %v3942_v51 = vld [vmem:[#allocation2 + $0x5f8] sm:$0xff] }
 0x210   : > { %25365 = vmatpush3.bf16.msra.mxu1 %v29134_v63  ;;  %25323 = vmatprep.subr.bf16.mxu0 %v29729_v10 }
 0x211   : > { %25367 = vmatprep.subr.bf16.mxu1 %v32771_v61 }
 0x212   : > { %21348 = vmatmul.mubr.msk.f32.vlgmr.msra.gmra.mrb[0].mxu0 %vm182_vm0, %v29508_v50  ;;  %v32775_v50 = vld [vmem:[#allocation40_spill] sm:$0xff] }
 0x213   : > { %25325 = vmatpush3.bf16.msra.mxu0 %v29729_v10  ;;  %21366 = vmatprep.mubr.msk.f32.mxu0 %vm182_vm0, %v29516_v11  ;;  %v29757_v11 = vpack.c.bf16 %v3942_v51, %v3941_v15  ;;  %v32777_v10 = vld [vmem:[#allocation41_spill] sm:$0xff]  ;;  %v4509_v51 = vld [vmem:[#allocation2 + $0x610] sm:$0xff]  ;;  %v4510_v15 = vld [vmem:[#allocation2 + $0x618] sm:$0xff] }
 0x214   : > { %25369 = vmatpush3.bf16.msra.mxu1 %v32771_v61  ;;  %25327 = vmatprep.subr.bf16.mxu0 %v29735_v33  ;;  %v29771_v44 = vpack.c.bf16 %v4510_v15, %v4509_v51  ;;  %v4513_v15 = vld [vmem:[#allocation2 + $0x630] sm:$0xff] }
 0x215   : > { %25371 = vmatprep.subr.bf16.mxu1 %v32773_v52  ;;  %32774 = vst [vmem:[#allocation105_spill] sm:$0xff] %v29757_v11 }
 0x216   : > { %32778 = vst [vmem:[#allocation107_spill] sm:$0xff] %v29771_v44 }
 0x217   : > { %25329 = vmatpush3.bf16.msra.mxu0 %v29735_v33  ;;  %21405 = vmatmul.mubr.msk.f32.vlgmr.msra.gmra.mrb[2].mxu1 %vm182_vm0, %v29744_v20  ;;  %v29765_v33 = vpack.c.bf16 %v4508_v48, %v4507_v0  ;;  %v28553_v0 = vld [vmem:[%s28782_s24 + $0x32] sm:$0xff]  ;;  %v29780_v48 = vpop.permute.xlu1 %4192 }
 0x218   : > { %25373 = vmatpush3.bf16.msra.mxu1 %v32773_v52  ;;  %25331 = vmatprep.subr.bf16.mxu0 %v29747_v9 }
 0x219   : > { %25375 = vmatprep.subr.bf16.mxu1 %v32775_v50  ;;  %21423 = vmatprep.mubr.msk.f32.mxu1 %vm182_vm0, %v29750_v28  ;;  %32776 = vst [vmem:[#allocation106_spill] sm:$0xff] %v29765_v33 }
 0x21b   : > { %25333 = vmatpush3.bf16.msra.mxu0 %v29747_v9  ;;  %v4511_v9 = vld [vmem:[#allocation2 + $0x620] sm:$0xff] }
 0x21c   : > { %25377 = vmatpush3.bf16.msra.mxu1 %v32775_v50  ;;  %25335 = vmatprep.subr.bf16.mxu0 %v29757_v11  ;;  %v29783_v51 = vpack.c.bf16 %v4512_v40, %v4511_v9  ;;  %v4593_v40 = vld [vmem:[#allocation2 + $0x640] sm:$0xff]  ;;  %v4594_v9 = vld [vmem:[#allocation2 + $0x648] sm:$0xff] }
 0x21d   : > { %25379 = vmatprep.subr.bf16.mxu1 %v32777_v10 }
 0x21e   : > { %32779 = vst [vmem:[#allocation108_spill] sm:$0xff] %v29783_v51 }
 0x21f   : > { %25337 = vmatpush3.bf16.msra.mxu0 %v29757_v11  ;;  %v4514_v11 = vld [vmem:[#allocation2 + $0x638] sm:$0xff] }
 0x220   : > { %25381 = vmatpush3.bf16.msra.mxu1 %v32777_v10  ;;  %25435 = vmatprep.subr.bf16.mxu0 %v29765_v33 }
 0x221   : > { %25383 = vmatprep.subr.bf16.mxu1 %v29189_v34 }
 0x222   : > { %21367 = vmatmul.mubr.msk.f32.vlgmr.msra.gmra.mrb[0].mxu0 %vm182_vm0, %v29546_v17  ;;  %v29791_v17 = vpack.c.bf16 %v4514_v11, %v4513_v15  ;;  %v4596_v11 = vld [vmem:[#allocation2 + $0x658] sm:$0xff] }
 0x223   : > { %25437 = vmatpush3.bf16.msra.mxu0 %v29765_v33  ;;  %21499 = vmatprep.mubr.msk.f32.mxu0 %vm182_vm0, %v28553_v0  ;;  %v4595_v33 = vld [vmem:[#allocation2 + $0x650] sm:$0xff] }
 0x224   : > { %25385 = vmatpush3.bf16.msra.mxu1 %v29189_v34  ;;  %25439 = vmatprep.subr.bf16.mxu0 %v29771_v44  ;;  %32780 = vst [vmem:[#allocation109_spill] sm:$0xff] %v29791_v17  ;;  %v29804_v15 = vpack.c.bf16 %v4596_v11, %v4595_v33  ;;  %v4600_v11 = vld [vmem:[#allocation2 + $0x678] sm:$0xff] }
 0x225   : > { %25387 = vmatprep.subr.bf16.mxu1 %v29415_v41 }
 0x226   : > { %32782 = vst [vmem:[#allocation111_spill] sm:$0xff] %v29804_v15 }
 0x227   : > { %21424 = vmatmul.mubr.msk.f32.vlgmr.msra.gmra.mrb[2].mxu1 %vm182_vm0, %v29780_v48  ;;  %25441 = vmatpush3.bf16.msra.mxu0 %v29771_v44  ;;  %v29798_v44 = vpack.c.bf16 %v4594_v9, %v4593_v40  ;;  %v4598_v40 = vld [vmem:[#allocation2 + $0x668] sm:$0xff]  ;;  %v4599_v9 = vld [vmem:[#allocation2 + $0x670] sm:$0xff] }
 0x228   : > { %25389 = vmatpush3.bf16.msra.mxu1 %v29415_v41  ;;  %25443 = vmatprep.subr.bf16.mxu0 %v29783_v51 }
 0x229   : > { %25391 = vmatprep.subr.bf16.mxu1 %v29421_v47  ;;  %21442 = vmatprep.mubr.msk.f32.mxu1 %vm182_vm0, %v28553_v0  ;;  %32781 = vst [vmem:[#allocation110_spill] sm:$0xff] %v29798_v44  ;;  %v28554_v0 = vld [vmem:[%s28782_s24 + $0x3a] sm:$0xff] }
 0x22b   : > { %25445 = vmatpush3.bf16.msra.mxu0 %v29783_v51  ;;  %v4597_v51 = vld [vmem:[#allocation2 + $0x660] sm:$0xff] }
 0x22c   : > { %25393 = vmatpush3.bf16.msra.mxu1 %v29421_v47  ;;  %25447 = vmatprep.subr.bf16.mxu0 %v29791_v17  ;;  %v29815_v33 = vpack.c.bf16 %v4598_v40, %v4597_v51  ;;  %v4680_v51 = vld [vmem:[#allocation2 + $0x688] sm:$0xff]  ;;  %v4681_v40 = vld [vmem:[#allocation2 + $0x690] sm:$0xff] }
 0x22d   : > { %25395 = vmatprep.subr.bf16.mxu1 %v29431_v22 }
 0x22e   : > { %32783 = vst [vmem:[#allocation112_spill] sm:$0xff] %v29815_v33 }
 0x22f   : > { %25449 = vmatpush3.bf16.msra.mxu0 %v29791_v17  ;;  %v4679_v17 = vld [vmem:[#allocation2 + $0x680] sm:$0xff] }
 0x230   : > { %25397 = vmatpush3.bf16.msra.mxu1 %v29431_v22  ;;  %25451 = vmatprep.subr.bf16.mxu0 %v29798_v44 }
 0x231   : > { %25399 = vmatprep.subr.bf16.mxu1 %v29439_v35 }
 0x232   : > { %21500 = vmatmul.mubr.msk.f32.vlgmr.msra.gmra.mrb[0].mxu0 %vm182_vm0, %v28554_v0 }
 0x233   : > { %25453 = vmatpush3.bf16.msra.mxu0 %v29798_v44  ;;  %21518 = vmatprep.mubr.msk.f32.mxu0 %vm182_vm0, %v29714_v42  ;;  %v29822_v44 = vpack.c.bf16 %v4600_v11, %v4599_v9  ;;  %v4683_v11 = vld [vmem:[#allocation2 + $0x6a0] sm:$0xff] }
 0x234   : > { %25401 = vmatpush3.bf16.msra.mxu1 %v29439_v35  ;;  %25455 = vmatprep.subr.bf16.mxu0 %v29804_v15 }
 0x235   : > { %25403 = vmatprep.subr.bf16.mxu1 %v29447_v14  ;;  %32784 = vst [vmem:[#allocation113_spill] sm:$0xff] %v29822_v44 }
 0x237   : > { %21443 = vmatmul.mubr.msk.f32.vlgmr.msra.gmra.mrb[0].mxu1 %vm182_vm0, %v28554_v0  ;;  %25457 = vmatpush3.bf16.msra.mxu0 %v29804_v15  ;;  %v29829_v0 = vpack.c.bf16 %v4680_v51, %v4679_v17  ;;  %v4684_v17 = vld [vmem:[#allocation2 + $0x6a8] sm:$0xff]  ;;  %v32800_v15 = vld [vmem:[#allocation50_spill] sm:$0xff] }
 0x238   : > { %25405 = vmatpush3.bf16.msra.mxu1 %v29447_v14  ;;  %21461 = vmatprep.mubr.msk.f32.mxu1 %vm182_vm0, %v29714_v42  ;;  %v4682_v42 = vld [vmem:[#allocation2 + $0x698] sm:$0xff]  ;;  %v29846_v51 = vpack.c.bf16 %v4684_v17, %v4683_v11  ;;  %v32790_v11 = vld [vmem:[#allocation9_spill] sm:$0xff] }
 0x239   : > { %25407 = vmatprep.subr.bf16.mxu1 %v29453_v37  ;;  %25459 = vmatprep.subr.bf16.mxu0 %v29815_v33  ;;  %32785 = vst [vmem:[#allocation114_spill] sm:$0xff] %v29829_v0  ;;  %v29835_v9 = vpack.c.bf16 %v4682_v42, %v4681_v40  ;;  %v4685_v40 = vld [vmem:[#allocation2 + $0x6b0] sm:$0xff]  ;;  %v4686_v42 = vld [vmem:[#allocation2 + $0x6b8] sm:$0xff] }
 0x23a   : > { %32787 = vst [vmem:[#allocation116_spill] sm:$0xff] %v29846_v51  ;;  %v32791_v17 = vld [vmem:[#allocation11_spill] sm:$0xff] }
 0x23b   : > { %25461 = vmatpush3.bf16.msra.mxu0 %v29815_v33  ;;  %32786 = vst [vmem:[#allocation115_spill] sm:$0xff] %v29835_v9  ;;  %v29925_v33 = vld [vmem:[%s28782_s24 + $0x69] sm:$0xff] }
 0x23c   : > { %25409 = vmatpush3.bf16.msra.mxu1 %v29453_v37  ;;  %25463 = vmatprep.subr.bf16.mxu0 %v29822_v44  ;;  %32799 = vst [vmem:[#allocation118_spill] sm:$0xff] %v29925_v33 }
 0x23d   : > { %25411 = vmatprep.subr.bf16.mxu1 %v29463_v1  ;;  %7713 = vrot.lane.b32.xlu1 %v29925_v33, %s28674_s21 }
 0x23f   : > { %25465 = vmatpush3.bf16.msra.mxu0 %v29822_v44 }
 0x240   : > { %25413 = vmatpush3.bf16.msra.mxu1 %v29463_v1  ;;  %25467 = vmatprep.subr.bf16.mxu0 %v29829_v0  ;;  %v32807_v1 = vld [vmem:[#allocation54_spill] sm:$0xff] }
 0x241   : > { %25415 = vmatprep.subr.bf16.mxu1 %v29473_v60  ;;  %7798 = vrot.lane.b32.xlu1 %v29925_v33, %s28675_s23 }
 0x242   : > { %21519 = vmatmul.mubr.msk.f32.vlgmr.msra.gmra.mrb[0].mxu0 %vm182_vm0, %v29744_v20 }
 0x243   : > { %25469 = vmatpush3.bf16.msra.mxu0 %v29829_v0  ;;  %21537 = vmatprep.mubr.msk.f32.mxu0 %vm182_vm0, %v29750_v28  ;;  %v29854_v0 = vpack.c.bf16 %v4686_v42, %v4685_v40  ;;  %v32792_v40 = vld [vmem:[#allocation12_spill] sm:$0xff]  ;;  %v32793_v42 = vld [vmem:[#allocation13_spill] sm:$0xff] }
 0x244   : > { %25417 = vmatpush3.bf16.msra.mxu1 %v29473_v60  ;;  %25471 = vmatprep.subr.bf16.mxu0 %v29835_v9  ;;  %v32805_v60 = vld [vmem:[#allocation19_spill] sm:$0xff] }
 0x245   : > { %25419 = vmatprep.subr.bf16.mxu1 %v29481_v53  ;;  %32788 = vst [vmem:[#allocation117_spill] sm:$0xff] %v29854_v0 }
 0x247   : > { %21462 = vmatmul.mubr.msk.f32.vlgmr.msra.gmra.mrb[0].mxu1 %vm182_vm0, %v29744_v20  ;;  %25473 = vmatpush3.bf16.msra.mxu0 %v29835_v9  ;;  %v32789_v20 = vld [vmem:[#allocation8_spill] sm:$0xff] }
 0x248   : > { %25421 = vmatpush3.bf16.msra.mxu1 %v29481_v53  ;;  %21480 = vmatprep.mubr.msk.f32.mxu1 %vm182_vm0, %v29750_v28  ;;  %v29865_v28 = vpop.permute.xlu0 %4769  ;;  %v32798_v9 = vld [vmem:[#allocation16_spill] sm:$0xff] }
 0x249   : > { %25423 = vmatprep.subr.bf16.mxu1 %v29492_v29  ;;  %25475 = vmatprep.subr.bf16.mxu0 %v29846_v51  ;;  %v32804_v53 = vld [vmem:[#allocation52_spill] sm:$0xff] }
 0x24b   : > { %25477 = vmatpush3.bf16.msra.mxu0 %v29846_v51  ;;  %v32795_v51 = vld [vmem:[#allocation14_spill] sm:$0xff] }
 0x24c   : > { %25425 = vmatpush3.bf16.msra.mxu1 %v29492_v29  ;;  %25479 = vmatprep.subr.bf16.mxu0 %v29854_v0  ;;  %v29922_v44 = vpop.permute.xlu0 %4931  ;;  %v32802_v29 = vld [vmem:[#allocation51_spill] sm:$0xff] }
 0x24d   : > { %25427 = vmatprep.subr.bf16.mxu1 %v29511_v4 }
 0x24f   : > { %25481 = vmatpush3.bf16.msra.mxu0 %v29854_v0  ;;  %v32794_v0 = vld [vmem:[#allocation61_spill] sm:$0xff] }
 0x250   : > { %25429 = vmatpush3.bf16.msra.mxu1 %v29511_v4  ;;  %25483 = vmatprep.subr.bf16.mxu0 %v32789_v20  ;;  %v32801_v4 = vld [vmem:[#allocation17_spill] sm:$0xff] }
 0x251   : > { %25431 = vmatprep.subr.bf16.mxu1 %v29523_v31 }
 0x252   : > { %21538 = vmatmul.mubr.msk.f32.vlgmr.msra.gmra.mrb[0].mxu0 %vm182_vm0, %v29780_v48 }
 0x253   : > { %25485 = vmatpush3.bf16.msra.mxu0 %v32789_v20  ;;  %21556 = vmatprep.mubr.msk.f32.mxu0 %vm182_vm0, %v29865_v28 }
 0x254   : > { %25433 = vmatpush3.bf16.msra.mxu1 %v29523_v31  ;;  %25487 = vmatprep.subr.bf16.mxu0 %v32790_v11  ;;  %v28555_v31 = vld [vmem:[%s28782_s24 + $0x50] sm:$0xff] }
 0x255   : > { %25531 = vmatprep.subr.bf16.mxu1 %v29201_v49 }
 0x257   : > { %21481 = vmatmul.mubr.msk.f32.vlgmr.msra.gmra.mrb[0].mxu1 %vm182_vm0, %v29780_v48  ;;  %25489 = vmatpush3.bf16.msra.mxu0 %v32790_v11  ;;  %v29889_v48 = vpop.permute.xlu1 %4771 }
 0x258   : > { %25533 = vmatpush3.bf16.msra.mxu1 %v29201_v49  ;;  %25491 = vmatprep.subr.bf16.mxu0 %v28813_v12 }
 0x259   : > { %25535 = vmatprep.subr.bf16.mxu1 %v29207_v18  ;;  %21613 = vmatprep.mubr.msk.f32.mxu1 %vm182_vm0, %v29341_v57 }
 0x25b   : > { %25493 = vmatpush3.bf16.msra.mxu0 %v28813_v12  ;;  %v29955_v33 = vpop.permute.xlu1 %4933 }
 0x25c   : > { %25537 = vmatpush3.bf16.msra.mxu1 %v29207_v18  ;;  %25495 = vmatprep.subr.bf16.mxu0 %v32791_v17 }
 0x25d   : > { %25539 = vmatprep.subr.bf16.mxu1 %v29216_v43 }
 0x25f   : > { %25497 = vmatpush3.bf16.msra.mxu0 %v32791_v17 }
 0x260   : > { %25541 = vmatpush3.bf16.msra.mxu1 %v29216_v43  ;;  %25499 = vmatprep.subr.bf16.mxu0 %v32792_v40 }
 0x261   : > { %25543 = vmatprep.subr.bf16.mxu1 %v29228_v26 }
 0x262   : > { %21557 = vmatmul.mubr.msk.f32.vlgmr.msra.gmra.mrb[2].mxu0 %vm182_vm0, %v29889_v48 }
 0x263   : > { %25501 = vmatpush3.bf16.msra.mxu0 %v32792_v40  ;;  %21575 = vmatprep.mubr.msk.f32.mxu0 %vm182_vm0, %v29341_v57  ;;  %v32796_v57 = vld [vmem:[#allocation15_spill] sm:$0xff] }
 0x264   : > { %25545 = vmatpush3.bf16.msra.mxu1 %v29228_v26  ;;  %25503 = vmatprep.subr.bf16.mxu0 %v32793_v42 }
 0x265   : > { %25547 = vmatprep.subr.bf16.mxu1 %v29236_v3 }
 0x267   : > { %21614 = vmatmul.mubr.msk.f32.vlgmr.msra.gmra.mrb[2].mxu1 %vm182_vm0, %v32794_v0  ;;  %25505 = vmatpush3.bf16.msra.mxu0 %v32793_v42  ;;  %v29915_v0 = vld [vmem:[%s28782_s24 + $0x61] sm:$0xff] }
 0x268   : > { %25549 = vmatpush3.bf16.msra.mxu1 %v29236_v3  ;;  %21632 = vmatprep.mubr.msk.f32.mxu1 %vm182_vm0, %v29865_v28  ;;  %32797 = vst [vmem:[#allocation61_spill] sm:$0xff] %v29915_v0 }
 0x269   : > { %25507 = vmatprep.subr.bf16.mxu0 %v32795_v51  ;;  %25551 = vmatprep.subr.bf16.mxu1 %v29242_v25 }
 0x26a   : > { %7711 = vrot.lane.b32.xlu0 %v29915_v0, %s28674_s21 }
 0x26b   : > { %25509 = vmatpush3.bf16.msra.mxu0 %v32795_v51 }
 0x26c   : > { %25553 = vmatpush3.bf16.msra.mxu1 %v29242_v25  ;;  %25511 = vmatprep.subr.bf16.mxu0 %v32796_v57 }
 0x26d   : > { %25555 = vmatprep.subr.bf16.mxu1 %v29253_v7 }
 0x26e   : > { %7796 = vrot.lane.b32.xlu0 %v29915_v0, %s28675_s23  ;;  %v32803_v0 = vld [vmem:[#allocation18_spill] sm:$0xff] }
 0x26f   : > { %25513 = vmatpush3.bf16.msra.mxu0 %v32796_v57 }
 0x270   : > { %25557 = vmatpush3.bf16.msra.mxu1 %v29253_v7  ;;  %25515 = vmatprep.subr.bf16.mxu0 %v32798_v9 }
 0x271   : > { %25559 = vmatprep.subr.bf16.mxu1 %v32800_v15 }
 0x272   : > { %21576 = vmatmul.mubr.msk.f32.vlgmr.msra.gmra.mrb[2].mxu0 %vm182_vm0, %v28555_v31 }
 0x273   : > { %25517 = vmatpush3.bf16.msra.mxu0 %v32798_v9  ;;  %21594 = vmatprep.mubr.msk.f32.mxu0 %vm182_vm0, %v29922_v44 }
 0x274   : > { %25561 = vmatpush3.bf16.msra.mxu1 %v32800_v15  ;;  %25519 = vmatprep.subr.bf16.mxu0 %v32801_v4  ;;  %v32812_v15 = vld [vmem:[#allocation78_spill] sm:$0xff] }
 0x275   : > { %25563 = vmatprep.subr.bf16.mxu1 %v32802_v29 }
 0x277   : > { %21633 = vmatmul.mubr.msk.f32.vlgmr.msra.gmra.mrb[2].mxu1 %vm182_vm0, %v29889_v48  ;;  %25521 = vmatpush3.bf16.msra.mxu0 %v32801_v4 }
 0x278   : > { %25565 = vmatpush3.bf16.msra.mxu1 %v32802_v29  ;;  %25523 = vmatprep.subr.bf16.mxu0 %v32803_v0  ;;  %v32806_v29 = vld [vmem:[#allocation20_spill] sm:$0xff] }
 0x279   : > { %25567 = vmatprep.subr.bf16.mxu1 %v32804_v53  ;;  %21651 = vmatprep.mubr.msk.f32.mxu1 %vm182_vm0, %v29922_v44 }
 0x27b   : > { %25525 = vmatpush3.bf16.msra.mxu0 %v32803_v0 }
 0x27c   : > { %25569 = vmatpush3.bf16.msra.mxu1 %v32804_v53  ;;  %25527 = vmatprep.subr.bf16.mxu0 %v32805_v60  ;;  %v32808_v53 = vld [vmem:[#allocation21_spill] sm:$0xff] }
 0x27d   : > { %25571 = vmatprep.subr.bf16.mxu1 %v29285_v36 }
 0x27f   : > { %25529 = vmatpush3.bf16.msra.mxu0 %v32805_v60 }
 0x280   : > { %25573 = vmatpush3.bf16.msra.mxu1 %v29285_v36  ;;  %25627 = vmatprep.subr.bf16.mxu0 %v32806_v29  ;;  %v32811_v36 = vld [vmem:[#allocation83_spill] sm:$0xff] }
 0x281   : > { %25575 = vmatprep.subr.bf16.mxu1 %v32807_v1 }
 0x282   : > { %21595 = vmatmul.mubr.msk.f32.vlgmr.msra.gmra.mrb[2].mxu0 %vm182_vm0, %v29955_v33 }
 0x283   : > { %25629 = vmatpush3.bf16.msra.mxu0 %v32806_v29  ;;  %21727 = vmatprep.mubr.msk.f32.mxu0 %vm182_vm0, %v29485_v62  ;;  %v28556_v29 = vld [vmem:[%s28782_s24 + $0x48] sm:$0xff] }
 0x284   : > { %25577 = vmatpush3.bf16.msra.mxu1 %v32807_v1  ;;  %25631 = vmatprep.subr.bf16.mxu0 %v32808_v53  ;;  %v32809_v1 = vld [vmem:[#allocation23_spill] sm:$0xff] }
 0x285   : > { %25579 = vmatprep.subr.bf16.mxu1 %v29531_v21 }
 0x287   : > { %21652 = vmatmul.mubr.msk.f32.vlgmr.msra.gmra.mrb[2].mxu1 %vm182_vm0, %v29955_v33  ;;  %25633 = vmatpush3.bf16.msra.mxu0 %v32808_v53  ;;  %v29983_v53 = vpop.permute.xlu0 %5563 }
 0x288   : > { %25581 = vmatpush3.bf16.msra.mxu1 %v29531_v21  ;;  %25635 = vmatprep.subr.bf16.mxu0 %v29002_v6  ;;  %v32810_v21 = vld [vmem:[#allocation24_spill] sm:$0xff] }
 0x289   : > { %25583 = vmatprep.subr.bf16.mxu1 %v29537_v45  ;;  %21670 = vmatprep.mubr.msk.f32.mxu1 %vm182_vm0, %v28556_v29  ;;  %v32813_v29 = vld [vmem:[#allocation25_spill] sm:$0xff] }
 0x28b   : > { %25637 = vmatpush3.bf16.msra.mxu0 %v29002_v6 }
 0x28c   : > { %25585 = vmatpush3.bf16.msra.mxu1 %v29537_v45  ;;  %25639 = vmatprep.subr.bf16.mxu0 %v32809_v1 }
 0x28d   : > { %25587 = vmatprep.subr.bf16.mxu1 %v29549_v32 }
 0x28f   : > { %25641 = vmatpush3.bf16.msra.mxu0 %v32809_v1 }
 0x290   : > { %25589 = vmatpush3.bf16.msra.mxu1 %v29549_v32  ;;  %25643 = vmatprep.subr.bf16.mxu0 %v32810_v21  ;;  %v32814_v32 = vld [vmem:[#allocation26_spill] sm:$0xff] }
 0x291   : > { %25591 = vmatprep.subr.bf16.mxu1 %v32811_v36 }
 0x292   : > { %21728 = vmatmul.mubr.msk.f32.vlgmr.msra.gmra.mrb[2].mxu0 %vm182_vm0, %v32812_v15 }
 0x293   : > { %25645 = vmatpush3.bf16.msra.mxu0 %v32810_v21  ;;  %21746 = vmatprep.mubr.msk.f32.mxu0 %vm182_vm0, %v29983_v53 }
 0x294   : > { %25593 = vmatpush3.bf16.msra.mxu1 %v32811_v36  ;;  %25647 = vmatprep.subr.bf16.mxu0 %v32813_v29  ;;  %v32815_v36 = vld [vmem:[#allocation27_spill] sm:$0xff] }
 0x295   : > { %25595 = vmatprep.subr.bf16.mxu1 %v29568_v56 }
 0x297   : > { %21671 = vmatmul.mubr.msk.f32.vlgmr.msra.gmra.mrb[0].mxu1 %vm182_vm0, %v28555_v31  ;;  %25649 = vmatpush3.bf16.msra.mxu0 %v32813_v29  ;;  %v30006_v31 = vpop.permute.xlu1 %5565 }
 0x298   : > { %25597 = vmatpush3.bf16.msra.mxu1 %v29568_v56  ;;  %21689 = vmatprep.mubr.msk.f32.mxu1 %vm182_vm0, %v29865_v28  ;;  %v32816_v56 = vld [vmem:[#allocation28_spill] sm:$0xff]  ;;  %v30010_v28 = vpop.permute.xlu0 %5648 }
 0x299   : > { %25599 = vmatprep.subr.bf16.mxu1 %v29574_v2  ;;  %25651 = vmatprep.subr.bf16.mxu0 %v32814_v32 }
 0x29b   : > { %25653 = vmatpush3.bf16.msra.mxu0 %v32814_v32 }
 0x29c   : > { %25601 = vmatpush3.bf16.msra.mxu1 %v29574_v2  ;;  %25655 = vmatprep.subr.bf16.mxu0 %v32815_v36  ;;  %v32817_v2 = vld [vmem:[#allocation29_spill] sm:$0xff] }
 0x29d   : > { %25603 = vmatprep.subr.bf16.mxu1 %v29585_v59 }
 0x29f   : > { %25657 = vmatpush3.bf16.msra.mxu0 %v32815_v36 }
 0x2a0   : > { %25605 = vmatpush3.bf16.msra.mxu1 %v29585_v59  ;;  %25659 = vmatprep.subr.bf16.mxu0 %v32816_v56  ;;  %v32818_v59 = vld [vmem:[#allocation30_spill] sm:$0xff] }
 0x2a1   : > { %25607 = vmatprep.subr.bf16.mxu1 %v29596_v54 }
 0x2a2   : > { %21747 = vmatmul.mubr.msk.f32.vlgmr.msra.gmra.mrb[2].mxu0 %vm182_vm0, %v30006_v31 }
 0x2a3   : > { %25661 = vmatpush3.bf16.msra.mxu0 %v32816_v56  ;;  %21765 = vmatprep.mubr.msk.f32.mxu0 %vm182_vm0, %v30010_v28 }
 0x2a4   : > { %25609 = vmatpush3.bf16.msra.mxu1 %v29596_v54  ;;  %25663 = vmatprep.subr.bf16.mxu0 %v32817_v2  ;;  %v32819_v54 = vld [vmem:[#allocation31_spill] sm:$0xff] }
 0x2a5   : > { %25611 = vmatprep.subr.bf16.mxu1 %v29603_v16 }
 0x2a7   : > { %21690 = vmatmul.mubr.msk.f32.vlgmr.msra.gmra.mrb[0].mxu1 %vm182_vm0, %v29889_v48  ;;  %25665 = vmatpush3.bf16.msra.mxu0 %v32817_v2  ;;  %v30034_v48 = vpop.permute.xlu1 %5650 }
 0x2a8   : > { %25613 = vmatpush3.bf16.msra.mxu1 %v29603_v16  ;;  %21708 = vmatprep.mubr.msk.f32.mxu1 %vm182_vm0, %v29922_v44  ;;  %v32820_v44 = vld [vmem:[#allocation55_spill] sm:$0xff] }
 0x2a9   : > { %25615 = vmatprep.subr.bf16.mxu1 %v29614_v27  ;;  %25667 = vmatprep.subr.bf16.mxu0 %v32818_v59 }
 0x2ab   : > { %25669 = vmatpush3.bf16.msra.mxu0 %v32818_v59 }
 0x2ac   : > { %25617 = vmatpush3.bf16.msra.mxu1 %v29614_v27  ;;  %25671 = vmatprep.subr.bf16.mxu0 %v32819_v54 }
 0x2ad   : > { %25619 = vmatprep.subr.bf16.mxu1 %v29632_v5 }
 0x2af   : > { %25673 = vmatpush3.bf16.msra.mxu0 %v32819_v54 }
 0x2b0   : > { %25621 = vmatpush3.bf16.msra.mxu1 %v29632_v5  ;;  %25771 = vmatprep.subr.bf16.mxu0 %v29087_v13  ;;  %v32821_v5 = vld [vmem:[#allocation56_spill] sm:$0xff] }
 0x2b1   : > { %25623 = vmatprep.subr.bf16.mxu1 %v29642_v8 }
 0x2b2   : > { %21766 = vmatmul.mubr.msk.f32.vlgmr.msra.gmra.mrb[2].mxu0 %vm182_vm0, %v30034_v48 }
 0x2b3   : > { %25773 = vmatpush3.bf16.msra.mxu0 %v29087_v13  ;;  %21898 = vmatprep.mubr.msk.f32.mxu0 %vm182_vm0, %v29607_v55  ;;  %v32822_v55 = vld [vmem:[#allocation57_spill] sm:$0xff] }
 0x2b4   : > { %25625 = vmatpush3.bf16.msra.mxu1 %v29642_v8  ;;  %25775 = vmatprep.subr.bf16.mxu0 %v29093_v30 }
 0x2b5   : > { %25675 = vmatprep.subr.bf16.mxu1 %v32820_v44 }
 0x2b7   : > { %21709 = vmatmul.mubr.msk.f32.vlgmr.msra.gmra.mrb[0].mxu1 %vm182_vm0, %v29955_v33  ;;  %25777 = vmatpush3.bf16.msra.mxu0 %v29093_v30  ;;  %v30062_v33 = vpop.permute.xlu0 %6280  ;;  %v32823_v30 = vld [vmem:[#allocation58_spill] sm:$0xff] }
 0x2b8   : > { %25677 = vmatpush3.bf16.msra.mxu1 %v32820_v44  ;;  %25779 = vmatprep.subr.bf16.mxu0 %v29102_v39 }
 0x2b9   : > { %25679 = vmatprep.subr.bf16.mxu1 %v32821_v5  ;;  %21784 = vmatprep.mubr.msk.f32.mxu1 %vm182_vm0, %v29485_v62  ;;  %v32824_v62 = vld [vmem:[#allocation59_spill] sm:$0xff] }
 0x2bb   : > { %25781 = vmatpush3.bf16.msra.mxu0 %v29102_v39  ;;  %v32829_v39 = vld [vmem:[#allocation63_spill] sm:$0xff] }
 0x2bc   : > { %25681 = vmatpush3.bf16.msra.mxu1 %v32821_v5  ;;  %25783 = vmatprep.subr.bf16.mxu0 %v29112_v46 }
 0x2bd   : > { %25683 = vmatprep.subr.bf16.mxu1 %v32822_v55 }
 0x2bf   : > { %25785 = vmatpush3.bf16.msra.mxu0 %v29112_v46  ;;  %v30098_v46 = vld [vmem:[%s28782_s24 + $0x6a] sm:$0xff] }
 0x2c0   : > { %25685 = vmatpush3.bf16.msra.mxu1 %v32822_v55  ;;  %25787 = vmatprep.subr.bf16.mxu0 %v29120_v23  ;;  %32828 = vst [vmem:[#allocation119_spill] sm:$0xff] %v30098_v46 }
 0x2c1   : > { %25687 = vmatprep.subr.bf16.mxu1 %v32823_v30  ;;  %8430 = vrot.lane.b32.xlu1 %v30098_v46, %s28674_s21 }
 0x2c2   : > { %21899 = vmatmul.mubr.msk.f32.vlgmr.msra.gmra.mrb[2].mxu0 %vm182_vm0, %v29617_v19  ;;  %v32825_v19 = vld [vmem:[#allocation60_spill] sm:$0xff] }
 0x2c3   : > { %25789 = vmatpush3.bf16.msra.mxu0 %v29120_v23  ;;  %21917 = vmatprep.mubr.msk.f32.mxu0 %vm182_vm0, %v30062_v33  ;;  %v32826_v23 = vld [vmem:[#allocation62_spill] sm:$0xff] }
 0x2c4   : > { %25689 = vmatpush3.bf16.msra.mxu1 %v32823_v30  ;;  %25791 = vmatprep.subr.bf16.mxu0 %v29126_v24 }
 0x2c5   : > { %25691 = vmatprep.subr.bf16.mxu1 %v32824_v62  ;;  %8515 = vrot.lane.b32.xlu1 %v30098_v46, %s28675_s23 }
 0x2c7   : > { %21785 = vmatmul.mubr.msk.f32.vlgmr.msra.gmra.mrb[2].mxu1 %vm182_vm0, %v32812_v15  ;;  %25793 = vmatpush3.bf16.msra.mxu0 %v29126_v24  ;;  %v30086_v15 = vld [vmem:[%s28782_s24 + $0x62] sm:$0xff]  ;;  %v30091_v24 = vpop.permute.xlu1 %6282 }
 0x2c8   : > { %25693 = vmatpush3.bf16.msra.mxu1 %v32824_v62  ;;  %21803 = vmatprep.mubr.msk.f32.mxu1 %vm182_vm0, %v29983_v53  ;;  %32827 = vst [vmem:[#allocation78_spill] sm:$0xff] %v30086_v15 }
 0x2c9   : > { %25695 = vmatprep.subr.bf16.mxu1 %v32825_v19  ;;  %25795 = vmatprep.subr.bf16.mxu0 %v29134_v63 }
 0x2ca   : > { %8428 = vrot.lane.b32.xlu0 %v30086_v15, %s28674_s21 }
 0x2cb   : > { %25797 = vmatpush3.bf16.msra.mxu0 %v29134_v63  ;;  %v30095_v63 = vpop.permute.xlu0 %6365 }
 0x2cc   : > { %25697 = vmatpush3.bf16.msra.mxu1 %v32825_v19  ;;  %25799 = vmatprep.subr.bf16.mxu0 %v32771_v61 }
 0x2cd   : > { %25699 = vmatprep.subr.bf16.mxu1 %v32826_v23 }
 0x2ce   : > { %8513 = vrot.lane.b32.xlu0 %v30086_v15, %s28675_s23  ;;  %v32834_v15 = vld [vmem:[#allocation94_spill] sm:$0xff] }
 0x2cf   : > { %25801 = vmatpush3.bf16.msra.mxu0 %v32771_v61  ;;  %v32830_v61 = vld [vmem:[#allocation64_spill] sm:$0xff]  ;;  %v30132_v46 = vpop.permute.xlu0 %6917 }
 0x2d0   : > { %25701 = vmatpush3.bf16.msra.mxu1 %v32826_v23  ;;  %25803 = vmatprep.subr.bf16.mxu0 %v32773_v52 }
 0x2d1   : > { %25703 = vmatprep.subr.bf16.mxu1 %v32829_v39 }
 0x2d2   : > { %21918 = vmatmul.mubr.msk.f32.vlgmr.msra.gmra.mrb[2].mxu0 %vm182_vm0, %v30091_v24 }
 0x2d3   : > { %25805 = vmatpush3.bf16.msra.mxu0 %v32773_v52  ;;  %21936 = vmatprep.mubr.msk.f32.mxu0 %vm182_vm0, %v30095_v63  ;;  %v32831_v52 = vld [vmem:[#allocation65_spill] sm:$0xff] }
 0x2d4   : > { %25705 = vmatpush3.bf16.msra.mxu1 %v32829_v39  ;;  %25807 = vmatprep.subr.bf16.mxu0 %v32775_v50 }
 0x2d5   : > { %25707 = vmatprep.subr.bf16.mxu1 %v32830_v61 }
 0x2d7   : > { %21804 = vmatmul.mubr.msk.f32.vlgmr.msra.gmra.mrb[2].mxu1 %vm182_vm0, %v30006_v31  ;;  %25809 = vmatpush3.bf16.msra.mxu0 %v32775_v50  ;;  %v30128_v50 = vpop.permute.xlu1 %6367 }
 0x2d8   : > { %25709 = vmatpush3.bf16.msra.mxu1 %v32830_v61  ;;  %21822 = vmatprep.mubr.msk.f32.mxu1 %vm182_vm0, %v30010_v28 }
 0x2d9   : > { %25711 = vmatprep.subr.bf16.mxu1 %v32831_v52  ;;  %25811 = vmatprep.subr.bf16.mxu0 %v32777_v10 }
 0x2db   : > { %25813 = vmatpush3.bf16.msra.mxu0 %v32777_v10  ;;  %v32833_v10 = vld [vmem:[#allocation93_spill] sm:$0xff] }
 0x2dc   : > { %25713 = vmatpush3.bf16.msra.mxu1 %v32831_v52  ;;  %25815 = vmatprep.subr.bf16.mxu0 %v29189_v34 }
 0x2dd   : > { %25715 = vmatprep.subr.bf16.mxu1 %v29400_v38 }
 0x2df   : > { %25817 = vmatpush3.bf16.msra.mxu0 %v29189_v34  ;;  %v32832_v34 = vld [vmem:[#allocation92_spill] sm:$0xff] }
 0x2e0   : > { %25717 = vmatpush3.bf16.msra.mxu1 %v29400_v38  ;;  %25915 = vmatprep.subr.bf16.mxu0 %v32789_v20 }
 0x2e1   : > { %25719 = vmatprep.subr.bf16.mxu1 %v29408_v58 }
 0x2e2   : > { %21937 = vmatmul.mubr.msk.f32.vlgmr.msra.gmra.mrb[2].mxu0 %vm182_vm0, %v30128_v50 }
 0x2e3   : > { %25917 = vmatpush3.bf16.msra.mxu0 %v32789_v20  ;;  %22069 = vmatprep.mubr.msk.f32.mxu0 %vm182_vm0, %v30132_v46  ;;  %v28557_v20 = vld [vmem:[%s28782_s24 + $0x49] sm:$0xff] }
 0x2e4   : > { %25721 = vmatpush3.bf16.msra.mxu1 %v29408_v58  ;;  %25919 = vmatprep.subr.bf16.mxu0 %v32790_v11 }
 0x2e5   : > { %25723 = vmatprep.subr.bf16.mxu1 %v32832_v34 }
 0x2e7   : > { %21823 = vmatmul.mubr.msk.f32.vlgmr.msra.gmra.mrb[2].mxu1 %vm182_vm0, %v30034_v48  ;;  %25921 = vmatpush3.bf16.msra.mxu0 %v32790_v11  ;;  %v30156_v11 = vpop.permute.xlu1 %6919 }
 0x2e8   : > { %25725 = vmatpush3.bf16.msra.mxu1 %v32832_v34  ;;  %25923 = vmatprep.subr.bf16.mxu0 %v28813_v12  ;;  %v32835_v34 = vld [vmem:[#allocation95_spill] sm:$0xff] }
 0x2e9   : > { %25727 = vmatprep.subr.bf16.mxu1 %v32833_v10  ;;  %21841 = vmatprep.mubr.msk.f32.mxu1 %vm182_vm0, %v28557_v20  ;;  %v32836_v20 = vld [vmem:[#allocation97_spill] sm:$0xff] }
 0x2eb   : > { %25925 = vmatpush3.bf16.msra.mxu0 %v28813_v12  ;;  %v28558_v12 = vld [vmem:[%s28782_s24 + $0x51] sm:$0xff] }
 0x2ec   : > { %25729 = vmatpush3.bf16.msra.mxu1 %v32833_v10  ;;  %25927 = vmatprep.subr.bf16.mxu0 %v32791_v17 }
 0x2ed   : > { %25731 = vmatprep.subr.bf16.mxu1 %v32834_v15 }
 0x2ef   : > { %25929 = vmatpush3.bf16.msra.mxu0 %v32791_v17  ;;  %v32837_v17 = vld [vmem:[#allocation96_spill] sm:$0xff] }
 0x2f0   : > { %25733 = vmatpush3.bf16.msra.mxu1 %v32834_v15  ;;  %25931 = vmatprep.subr.bf16.mxu0 %v32792_v40 }
 0x2f1   : > { %25735 = vmatprep.subr.bf16.mxu1 %v32835_v34 }
 0x2f2   : > { %22070 = vmatmul.mubr.msk.f32.vlgmr.msra.gmra.mrb[4].mxu0 %vm182_vm0, %v30156_v11 }
 0x2f3   : > { %25933 = vmatpush3.bf16.msra.mxu0 %v32792_v40  ;;  %22088 = vmatprep.mubr.msk.f32.mxu0 %vm182_vm0, %v32836_v20  ;;  %v32838_v40 = vld [vmem:[#allocation98_spill] sm:$0xff] }
 0x2f4   : > { %25737 = vmatpush3.bf16.msra.mxu1 %v32835_v34  ;;  %25935 = vmatprep.subr.bf16.mxu0 %v32793_v42  ;;  %v32839_v34 = vld [vmem:[#allocation100_spill] sm:$0xff] }
 0x2f5   : > { %25739 = vmatprep.subr.bf16.mxu1 %v32837_v17 }
 0x2f7   : > { %21842 = vmatmul.mubr.msk.f32.vlgmr.msra.gmra.mrb[0].mxu1 %vm182_vm0, %v28558_v12  ;;  %25937 = vmatpush3.bf16.msra.mxu0 %v32793_v42  ;;  %v30184_v12 = vpop.permute.xlu0 %7079  ;;  %v32841_v42 = vld [vmem:[#allocation99_spill] sm:$0xff] }
 0x2f8   : > { %25741 = vmatpush3.bf16.msra.mxu1 %v32837_v17  ;;  %21860 = vmatprep.mubr.msk.f32.mxu1 %vm182_vm0, %v29983_v53  ;;  %v32840_v53 = vld [vmem:[#allocation101_spill] sm:$0xff] }
 0x2f9   : > { %25743 = vmatprep.subr.bf16.mxu1 %v32838_v40  ;;  %25939 = vmatprep.subr.bf16.mxu0 %v32795_v51 }
 0x2fb   : > { %25941 = vmatpush3.bf16.msra.mxu0 %v32795_v51  ;;  %v32844_v51 = vld [vmem:[#allocation104_spill] sm:$0xff] }
 0x2fc   : > { %25745 = vmatpush3.bf16.msra.mxu1 %v32838_v40  ;;  %25943 = vmatprep.subr.bf16.mxu0 %v32796_v57 }
 0x2fd   : > { %25747 = vmatprep.subr.bf16.mxu1 %v32839_v34 }
 0x2ff   : > { %25945 = vmatpush3.bf16.msra.mxu0 %v32796_v57  ;;  %v32842_v57 = vld [vmem:[#allocation102_spill] sm:$0xff] }
 0x300   : > { %25749 = vmatpush3.bf16.msra.mxu1 %v32839_v34  ;;  %25947 = vmatprep.subr.bf16.mxu0 %v32798_v9 }
 0x301   : > { %25751 = vmatprep.subr.bf16.mxu1 %v32840_v53 }
 0x302   : > { %22089 = vmatmul.mubr.msk.f32.vlgmr.msra.gmra.mrb[4].mxu0 %vm182_vm0, %v32841_v42 }
 0x303   : > { %25949 = vmatpush3.bf16.msra.mxu0 %v32798_v9  ;;  %22107 = vmatprep.mubr.msk.f32.mxu0 %vm182_vm0, %v30184_v12  ;;  %v32843_v9 = vld [vmem:[#allocation103_spill] sm:$0xff] }
 0x304   : > { %25753 = vmatpush3.bf16.msra.mxu1 %v32840_v53  ;;  %25951 = vmatprep.subr.bf16.mxu0 %v32801_v4 }
 0x305   : > { %25755 = vmatprep.subr.bf16.mxu1 %v32842_v57 }
 0x307   : > { %21861 = vmatmul.mubr.msk.f32.vlgmr.msra.gmra.mrb[0].mxu1 %vm182_vm0, %v30006_v31  ;;  %25953 = vmatpush3.bf16.msra.mxu0 %v32801_v4  ;;  %v30208_v31 = vpop.permute.xlu1 %7081  ;;  %v32859_v4 = vld [vmem:[#allocation79_spill] sm:$0xff] }
 0x308   : > { %25757 = vmatpush3.bf16.msra.mxu1 %v32842_v57  ;;  %21879 = vmatprep.mubr.msk.f32.mxu1 %vm182_vm0, %v30010_v28  ;;  %v32845_v28 = vld [vmem:[#allocation105_spill] sm:$0xff] }
 0x309   : > { %25759 = vmatprep.subr.bf16.mxu1 %v32843_v9  ;;  %25955 = vmatprep.subr.bf16.mxu0 %v32803_v0 }
 0x30b   : > { %25957 = vmatpush3.bf16.msra.mxu0 %v32803_v0  ;;  %v32855_v0 = vld [vmem:[#allocation76_spill] sm:$0xff] }
 0x30c   : > { %25761 = vmatpush3.bf16.msra.mxu1 %v32843_v9  ;;  %25959 = vmatprep.subr.bf16.mxu0 %v32805_v60 }
 0x30d   : > { %25763 = vmatprep.subr.bf16.mxu1 %v32844_v51 }
 0x30f   : > { %25961 = vmatpush3.bf16.msra.mxu0 %v32805_v60  ;;  %v32853_v60 = vld [vmem:[#allocation75_spill] sm:$0xff] }
 0x310   : > { %25765 = vmatpush3.bf16.msra.mxu1 %v32844_v51  ;;  %25963 = vmatprep.subr.bf16.mxu0 %v29201_v49 }
 0x311   : > { %25767 = vmatprep.subr.bf16.mxu1 %v32845_v28 }
 0x312   : > { %22108 = vmatmul.mubr.msk.f32.vlgmr.msra.gmra.mrb[4].mxu0 %vm182_vm0, %v30208_v31 }
 0x313   : > { %25965 = vmatpush3.bf16.msra.mxu0 %v29201_v49  ;;  %22126 = vmatprep.mubr.msk.f32.mxu0 %vm182_vm0, %v32836_v20  ;;  %v30228_v20 = vld [vmem:[%s28782_s24 + $0x4a] sm:$0xff] }
 0x314   : > { %25769 = vmatpush3.bf16.msra.mxu1 %v32845_v28  ;;  %25967 = vmatprep.subr.bf16.mxu0 %v29207_v18 }
 0x315   : > { %25819 = vmatprep.subr.bf16.mxu1 %v29415_v41 }
 0x317   : > { %21880 = vmatmul.mubr.msk.f32.vlgmr.msra.gmra.mrb[0].mxu1 %vm182_vm0, %v30034_v48  ;;  %25969 = vmatpush3.bf16.msra.mxu0 %v29207_v18  ;;  %v30236_v48 = vld [vmem:[%s28782_s24 + $0x78] sm:$0xff]  ;;  %v30251_v18 = vld [vmem:[%s28782_s24 + $0x80] sm:$0xff] }
 0x318   : > { %25821 = vmatpush3.bf16.msra.mxu1 %v29415_v41  ;;  %25971 = vmatprep.subr.bf16.mxu0 %v29216_v43  ;;  %32846 = vst [vmem:[#allocation97_spill] sm:$0xff] %v30236_v48  ;;  %32848 = vst [vmem:[#allocation120_spill] sm:$0xff] %v30251_v18 }
 0x319   : > { %25823 = vmatprep.subr.bf16.mxu1 %v29421_v47  ;;  %21955 = vmatprep.mubr.msk.f32.mxu1 %vm182_vm0, %v30228_v20 }
 0x31a   : > { %9065 = vrot.lane.b32.xlu0 %v30236_v48, %s28674_s21 }
 0x31b   : > { %25973 = vmatpush3.bf16.msra.mxu0 %v29216_v43  ;;  %v30248_v43 = vld [vmem:[%s28782_s24 + $0x90] sm:$0xff] }
 0x31c   : > { %25825 = vmatpush3.bf16.msra.mxu1 %v29421_v47  ;;  %25975 = vmatprep.subr.bf16.mxu0 %v29228_v26  ;;  %32847 = vst [vmem:[#allocation99_spill] sm:$0xff] %v30248_v43 }
 0x31d   : > { %25827 = vmatprep.subr.bf16.mxu1 %v29431_v22  ;;  %11213 = vrot.lane.b32.xlu1 %v30248_v43, %s28674_s21 }
 0x31e   : > { %9067 = vrot.lane.b32.xlu0 %v30251_v18, %s28674_s21 }
 0x31f   : > { %25977 = vmatpush3.bf16.msra.mxu0 %v29228_v26  ;;  %v30266_v26 = vld [vmem:[%s28782_s24 + $0x98] sm:$0xff] }
 0x320   : > { %25829 = vmatpush3.bf16.msra.mxu1 %v29431_v22  ;;  %25979 = vmatprep.subr.bf16.mxu0 %v29236_v3  ;;  %32849 = vst [vmem:[#allocation121_spill] sm:$0xff] %v30266_v26 }
 0x321   : > { %25831 = vmatprep.subr.bf16.mxu1 %v29439_v35  ;;  %11215 = vrot.lane.b32.xlu1 %v30266_v26, %s28674_s21 }
 0x322   : > { %22127 = vmatmul.mubr.msk.f32.vlgmr.msra.gmra.mrb[2].mxu0 %vm182_vm0, %v32841_v42  ;;  %9227 = vrot.lane.b32.xlu0 %v30236_v48, %s28675_s23  ;;  %v32864_v48 = vld [vmem:[#allocation106_spill] sm:$0xff] }
 0x323   : > { %25981 = vmatpush3.bf16.msra.mxu0 %v29236_v3  ;;  %22145 = vmatprep.mubr.msk.f32.mxu0 %vm182_vm0, %v30132_v46  ;;  %v30278_v3 = vld [vmem:[%s28782_s24 + $0x52] sm:$0xff] }
 0x324   : > { %25833 = vmatpush3.bf16.msra.mxu1 %v29439_v35  ;;  %25983 = vmatprep.subr.bf16.mxu0 %v29242_v25 }
 0x325   : > { %v21539_v49 = vpop.f32.mrb[0].mxu0  ;;  %25835 = vmatprep.subr.bf16.mxu1 %v29447_v14  ;;  %11375 = vrot.lane.b32.xlu1 %v30248_v43, %s28675_s23  ;;  %v32863_v43 = vld [vmem:[#allocation21_spill] sm:$0xff] }
 0x326   : > { %17730 = vst [vmem:[%s30271_s27 + $0x8] sm:$0xff] %v21539_v49  ;;  %v4753_v42 = vpop.f32.mrb[1].mxu0  ;;  %9229 = vrot.lane.b32.xlu0 %v30251_v18, %s28675_s23  ;;  %v32850_v49 = vld [vmem:[#allocation50_spill] sm:$0xff]  ;;  %v32861_v18 = vld [vmem:[#allocation80_spill] sm:$0xff] }
 0x327   : > { %17729 = vst [vmem:[%s30271_s27] sm:$0xff] %v4753_v42  ;;  %21956 = vmatmul.mubr.msk.f32.vlgmr.msra.gmra.mrb[2].mxu1 %vm182_vm0, %v30278_v3  ;;  %25985 = vmatpush3.bf16.msra.mxu0 %v29242_v25  ;;  %v32851_v42 = vld [vmem:[#allocation74_spill] sm:$0xff]  ;;  %v32852_v25 = vld [vmem:[#allocation51_spill] sm:$0xff] }
 0x328   : > { %25837 = vmatpush3.bf16.msra.mxu1 %v29447_v14  ;;  %21974 = vmatprep.mubr.msk.f32.mxu1 %vm182_vm0, %v30062_v33 }
 0x329   : > { %25839 = vmatprep.subr.bf16.mxu1 %v29453_v37  ;;  %25987 = vmatprep.subr.bf16.mxu0 %v29253_v7 }
 0x32a   : > { %11377 = vrot.lane.b32.xlu1 %v30266_v26, %s28675_s23  ;;  %v32858_v26 = vld [vmem:[#allocation54_spill] sm:$0xff] }
 0x32b   : > { %25989 = vmatpush3.bf16.msra.mxu0 %v29253_v7  ;;  %v32854_v7 = vld [vmem:[#allocation52_spill] sm:$0xff] }
 0x32c   : > { %25841 = vmatpush3.bf16.msra.mxu1 %v29453_v37  ;;  %25991 = vmatprep.subr.bf16.mxu0 %v32850_v49 }
 0x32d   : > { %25843 = vmatprep.subr.bf16.mxu1 %v32851_v42 }
 0x32f   : > { %25993 = vmatpush3.bf16.msra.mxu0 %v32850_v49  ;;  %v32857_v49 = vld [vmem:[#allocation53_spill] sm:$0xff] }
 0x330   : > { %25845 = vmatpush3.bf16.msra.mxu1 %v32851_v42  ;;  %25995 = vmatprep.subr.bf16.mxu0 %v32852_v25 }
 0x331   : > { %25847 = vmatprep.subr.bf16.mxu1 %v32853_v60 }
 0x332   : > { %22146 = vmatmul.mubr.msk.f32.vlgmr.msra.gmra.mrb[2].mxu0 %vm182_vm0, %v30156_v11 }
 0x333   : > { %25997 = vmatpush3.bf16.msra.mxu0 %v32852_v25  ;;  %22164 = vmatprep.mubr.msk.f32.mxu0 %vm182_vm0, %v30184_v12  ;;  %v32856_v25 = vld [vmem:[#allocation77_spill] sm:$0xff] }
 0x334   : > { %25849 = vmatpush3.bf16.msra.mxu1 %v32853_v60  ;;  %25999 = vmatprep.subr.bf16.mxu0 %v32854_v7 }
 0x335   : > { %25851 = vmatprep.subr.bf16.mxu1 %v32855_v0 }
 0x337   : > { %21975 = vmatmul.mubr.msk.f32.vlgmr.msra.gmra.mrb[2].mxu1 %vm182_vm0, %v30091_v24  ;;  %26001 = vmatpush3.bf16.msra.mxu0 %v32854_v7  ;;  %v32860_v7 = vld [vmem:[#allocation20_spill] sm:$0xff] }
 0x338   : > { %25853 = vmatpush3.bf16.msra.mxu1 %v32855_v0  ;;  %21993 = vmatprep.mubr.msk.f32.mxu1 %vm182_vm0, %v30095_v63 }
 0x339   : > { %25855 = vmatprep.subr.bf16.mxu1 %v32856_v25  ;;  %26003 = vmatprep.subr.bf16.mxu0 %v32857_v49 }
 0x33b   : > { %26005 = vmatpush3.bf16.msra.mxu0 %v32857_v49  ;;  %v32862_v49 = vld [vmem:[#allocation61_spill] sm:$0xff] }
 0x33c   : > { %25857 = vmatpush3.bf16.msra.mxu1 %v32856_v25  ;;  %26007 = vmatprep.subr.bf16.mxu0 %v32858_v26 }
 0x33d   : > { %25859 = vmatprep.subr.bf16.mxu1 %v32859_v4 }
 0x33f   : > { %26009 = vmatpush3.bf16.msra.mxu0 %v32858_v26  ;;  %v32865_v26 = vld [vmem:[#allocation107_spill] sm:$0xff] }
 0x340   : > { %25861 = vmatpush3.bf16.msra.mxu1 %v32859_v4  ;;  %26059 = vmatprep.subr.bf16.mxu0 %v32860_v7  ;;  %v32868_v4 = vld [vmem:[#allocation118_spill] sm:$0xff] }
 0x341   : > { %25863 = vmatprep.subr.bf16.mxu1 %v32861_v18 }
 0x342   : > { %22165 = vmatmul.mubr.msk.f32.vlgmr.msra.gmra.mrb[2].mxu0 %vm182_vm0, %v30208_v31 }
 0x343   : > { %26061 = vmatpush3.bf16.msra.mxu0 %v32860_v7  ;;  %22240 = vmatprep.mubr.msk.f32.mxu0 %vm182_vm0, %v32862_v49  ;;  %v32866_v7 = vld [vmem:[#allocation108_spill] sm:$0xff] }
 0x344   : > { %25865 = vmatpush3.bf16.msra.mxu1 %v32861_v18  ;;  %26063 = vmatprep.subr.bf16.mxu0 %v32863_v43  ;;  %v32867_v18 = vld [vmem:[#allocation109_spill] sm:$0xff] }
 0x345   : > { %25867 = vmatprep.subr.bf16.mxu1 %v32864_v48 }
 0x347   : > { %21994 = vmatmul.mubr.msk.f32.vlgmr.msra.gmra.mrb[2].mxu1 %vm182_vm0, %v30128_v50  ;;  %26065 = vmatpush3.bf16.msra.mxu0 %v32863_v43  ;;  %v30349_v43 = vpop.permute.xlu0 %7711 }
 0x348   : > { %25869 = vmatpush3.bf16.msra.mxu1 %v32864_v48  ;;  %26067 = vmatprep.subr.bf16.mxu0 %v29002_v6 }
 0x349   : > { %25871 = vmatprep.subr.bf16.mxu1 %v32865_v26  ;;  %22012 = vmatprep.mubr.msk.f32.mxu1 %vm182_vm0, %v30228_v20  ;;  %v32869_v20 = vld [vmem:[#allocation110_spill] sm:$0xff] }
 0x34b   : > { %26069 = vmatpush3.bf16.msra.mxu0 %v29002_v6  ;;  %v32873_v6 = vld [vmem:[#allocation114_spill] sm:$0xff] }
 0x34c   : > { %25873 = vmatpush3.bf16.msra.mxu1 %v32865_v26  ;;  %26071 = vmatprep.subr.bf16.mxu0 %v32809_v1 }
 0x34d   : > { %25875 = vmatprep.subr.bf16.mxu1 %v32866_v7 }
 0x34f   : > { %26073 = vmatpush3.bf16.msra.mxu0 %v32809_v1  ;;  %v32872_v1 = vld [vmem:[#allocation113_spill] sm:$0xff] }
 0x350   : > { %25877 = vmatpush3.bf16.msra.mxu1 %v32866_v7  ;;  %26075 = vmatprep.subr.bf16.mxu0 %v32810_v21 }
 0x351   : > { %25879 = vmatprep.subr.bf16.mxu1 %v32867_v18 }
 0x352   : > { %22241 = vmatmul.mubr.msk.f32.vlgmr.msra.gmra.mrb[4].mxu0 %vm182_vm0, %v32868_v4 }
 0x353   : > { %26077 = vmatpush3.bf16.msra.mxu0 %v32810_v21  ;;  %22259 = vmatprep.mubr.msk.f32.mxu0 %vm182_vm0, %v30349_v43  ;;  %v32870_v21 = vld [vmem:[#allocation111_spill] sm:$0xff] }
 0x354   : > { %25881 = vmatpush3.bf16.msra.mxu1 %v32867_v18  ;;  %26079 = vmatprep.subr.bf16.mxu0 %v32813_v29 }
 0x355   : > { %25883 = vmatprep.subr.bf16.mxu1 %v32869_v20 }
 0x357   : > { %22013 = vmatmul.mubr.msk.f32.vlgmr.msra.gmra.mrb[0].mxu1 %vm182_vm0, %v30278_v3  ;;  %26081 = vmatpush3.bf16.msra.mxu0 %v32813_v29  ;;  %v32871_v3 = vld [vmem:[#allocation112_spill] sm:$0xff]  ;;  %v30373_v29 = vpop.permute.xlu1 %7713 }
 0x358   : > { %25885 = vmatpush3.bf16.msra.mxu1 %v32869_v20  ;;  %22031 = vmatprep.mubr.msk.f32.mxu1 %vm182_vm0, %v30062_v33  ;;  %v30377_v33 = vpop.permute.xlu0 %7796 }
 0x359   : > { %25887 = vmatprep.subr.bf16.mxu1 %v32870_v21  ;;  %26083 = vmatprep.subr.bf16.mxu0 %v32814_v32 }
 0x35b   : > { %26085 = vmatpush3.bf16.msra.mxu0 %v32814_v32  ;;  %v30383_v32 = vld [vmem:[%s28782_s24 + $0x91] sm:$0xff] }
 0x35c   : > { %25889 = vmatpush3.bf16.msra.mxu1 %v32870_v21  ;;  %26087 = vmatprep.subr.bf16.mxu0 %v32815_v36 }
 0x35d   : > { %25891 = vmatprep.subr.bf16.mxu1 %v32871_v3  ;;  %12007 = vrot.lane.b32.xlu0 %v30383_v32, %s28674_s21 }
 0x35f   : > { %26089 = vmatpush3.bf16.msra.mxu0 %v32815_v36  ;;  %v30391_v36 = vld [vmem:[%s28782_s24 + $0x99] sm:$0xff] }
 0x360   : > { %25893 = vmatpush3.bf16.msra.mxu1 %v32871_v3  ;;  %26091 = vmatprep.subr.bf16.mxu0 %v32816_v56 }
 0x361   : > { %25895 = vmatprep.subr.bf16.mxu1 %v32872_v1  ;;  %12009 = vrot.lane.b32.xlu1 %v30391_v36, %s28674_s21 }
 0x362   : > { %22260 = vmatmul.mubr.msk.f32.vlgmr.msra.gmra.mrb[4].mxu0 %vm182_vm0, %v30373_v29  ;;  %12092 = vrot.lane.b32.xlu0 %v30383_v32, %s28675_s23 }
 0x363   : > { %26093 = vmatpush3.bf16.msra.mxu0 %v32816_v56  ;;  %22278 = vmatprep.mubr.msk.f32.mxu0 %vm182_vm0, %v30377_v33  ;;  %v32874_v56 = vld [vmem:[#allocation115_spill] sm:$0xff] }
 0x364   : > { %25897 = vmatpush3.bf16.msra.mxu1 %v32872_v1  ;;  %26095 = vmatprep.subr.bf16.mxu0 %v32817_v2 }
 0x365   : > { %25899 = vmatprep.subr.bf16.mxu1 %v32873_v6  ;;  %12094 = vrot.lane.b32.xlu1 %v30391_v36, %s28675_s23 }
 0x367   : > { %22032 = vmatmul.mubr.msk.f32.vlgmr.msra.gmra.mrb[0].mxu1 %vm182_vm0, %v30091_v24  ;;  %26097 = vmatpush3.bf16.msra.mxu0 %v32817_v2  ;;  %v32875_v24 = vld [vmem:[#allocation116_spill] sm:$0xff]  ;;  %v32876_v2 = vld [vmem:[#allocation117_spill] sm:$0xff] }
 0x368   : > { %25901 = vmatpush3.bf16.msra.mxu1 %v32873_v6  ;;  %22050 = vmatprep.mubr.msk.f32.mxu1 %vm182_vm0, %v30095_v63  ;;  %v30415_v63 = vpop.permute.xlu1 %7798 }
 0x369   : > { %25903 = vmatprep.subr.bf16.mxu1 %v32874_v56  ;;  %26099 = vmatprep.subr.bf16.mxu0 %v32818_v59 }
 0x36b   : > { %26101 = vmatpush3.bf16.msra.mxu0 %v32818_v59  ;;  %v32878_v59 = vld [vmem:[#allocation82_spill] sm:$0xff] }
 0x36c   : > { %25905 = vmatpush3.bf16.msra.mxu1 %v32874_v56  ;;  %26103 = vmatprep.subr.bf16.mxu0 %v32819_v54 }
 0x36d   : > { %25907 = vmatprep.subr.bf16.mxu1 %v32875_v24 }
 0x36f   : > { %26105 = vmatpush3.bf16.msra.mxu0 %v32819_v54  ;;  %v32877_v54 = vld [vmem:[#allocation81_spill] sm:$0xff] }
 0x370   : > { %25909 = vmatpush3.bf16.msra.mxu1 %v32875_v24  ;;  %26107 = vmatprep.subr.bf16.mxu0 %v32820_v44 }
 0x371   : > { %25911 = vmatprep.subr.bf16.mxu1 %v32876_v2 }
 0x372   : > { %22279 = vmatmul.mubr.msk.f32.vlgmr.msra.gmra.mrb[4].mxu0 %vm182_vm0, %v30415_v63 }
 0x373   : > { %26109 = vmatpush3.bf16.msra.mxu0 %v32820_v44  ;;  %22297 = vmatprep.mubr.msk.f32.mxu0 %vm182_vm0, %v32862_v49  ;;  %v28561_v44 = vld [vmem:[%s28782_s24 + $0x60] sm:$0xff] }
 0x374   : > { %25913 = vmatpush3.bf16.msra.mxu1 %v32876_v2  ;;  %26111 = vmatprep.subr.bf16.mxu0 %v32821_v5 }
 0x375   : > { %26011 = vmatprep.subr.bf16.mxu1 %v32877_v54 }
 0x377   : > { %22051 = vmatmul.mubr.msk.f32.vlgmr.msra.gmra.mrb[0].mxu1 %vm182_vm0, %v30128_v50  ;;  %26113 = vmatpush3.bf16.msra.mxu0 %v32821_v5  ;;  %v32879_v50 = vld [vmem:[#allocation83_spill] sm:$0xff]  ;;  %v32896_v5 = vld [vmem:[#allocation38_spill] sm:$0xff] }
 0x378   : > { %26013 = vmatpush3.bf16.msra.mxu1 %v32877_v54  ;;  %26115 = vmatprep.subr.bf16.mxu0 %v32822_v55 }
 0x379   : > { %26015 = vmatprep.subr.bf16.mxu1 %v29537_v45  ;;  %22183 = vmatprep.mubr.msk.f32.mxu1 %vm182_vm0, %v28561_v44  ;;  %v32880_v44 = vld [vmem:[#allocation84_spill] sm:$0xff] }
 0x37b   : > { %26117 = vmatpush3.bf16.msra.mxu0 %v32822_v55  ;;  %v32882_v55 = vld [vmem:[#allocation86_spill] sm:$0xff] }
 0x37c   : > { %26017 = vmatpush3.bf16.msra.mxu1 %v29537_v45  ;;  %26119 = vmatprep.subr.bf16.mxu0 %v32823_v30 }
 0x37d   : > { %26019 = vmatprep.subr.bf16.mxu1 %v32878_v59 }
 0x37f   : > { %26121 = vmatpush3.bf16.msra.mxu0 %v32823_v30  ;;  %v28562_v30 = vld [vmem:[%s28782_s24 + $0x68] sm:$0xff] }
 0x380   : > { %26021 = vmatpush3.bf16.msra.mxu1 %v32878_v59  ;;  %26123 = vmatprep.subr.bf16.mxu0 %v32824_v62 }
 0x381   : > { %26023 = vmatprep.subr.bf16.mxu1 %v32879_v50 }
 0x382   : > { %22298 = vmatmul.mubr.msk.f32.vlgmr.msra.gmra.mrb[2].mxu0 %vm182_vm0, %v32868_v4 }
 0x383   : > { %26125 = vmatpush3.bf16.msra.mxu0 %v32824_v62  ;;  %22316 = vmatprep.mubr.msk.f32.mxu0 %vm182_vm0, %v30349_v43  ;;  %v32881_v62 = vld [vmem:[#allocation85_spill] sm:$0xff] }
 0x384   : > { %26025 = vmatpush3.bf16.msra.mxu1 %v32879_v50  ;;  %26127 = vmatprep.subr.bf16.mxu0 %v32825_v19 }
 0x385   : > { %26027 = vmatprep.subr.bf16.mxu1 %v32880_v44 }
 0x387   : > { %22184 = vmatmul.mubr.msk.f32.vlgmr.msra.gmra.mrb[2].mxu1 %vm182_vm0, %v28562_v30  ;;  %26129 = vmatpush3.bf16.msra.mxu0 %v32825_v19  ;;  %v32883_v30 = vld [vmem:[#allocation87_spill] sm:$0xff] }
 0x388   : > { %26029 = vmatpush3.bf16.msra.mxu1 %v32880_v44  ;;  %22202 = vmatprep.mubr.msk.f32.mxu1 %vm182_vm0, %v30132_v46  ;;  %v30469_v46 = vld [vmem:[%s28782_s24 + $0x92] sm:$0xff] }
 0x389   : > { %26031 = vmatprep.subr.bf16.mxu1 %v32881_v62  ;;  %26131 = vmatprep.subr.bf16.mxu0 %v32826_v23  ;;  %v32893_v19 = vld [vmem:[#allocation119_spill] sm:$0xff] }
 0x38a   : > { %12724 = vrot.lane.b32.xlu0 %v30469_v46, %s28674_s21 }
 0x38b   : > { %26133 = vmatpush3.bf16.msra.mxu0 %v32826_v23  ;;  %v32891_v23 = vld [vmem:[#allocation95_spill] sm:$0xff] }
 0x38c   : > { %26033 = vmatpush3.bf16.msra.mxu1 %v32881_v62  ;;  %26135 = vmatprep.subr.bf16.mxu0 %v32829_v39 }
 0x38d   : > { %26035 = vmatprep.subr.bf16.mxu1 %v32882_v55 }
 0x38e   : > { %12809 = vrot.lane.b32.xlu0 %v30469_v46, %s28675_s23 }
 0x38f   : > { %26137 = vmatpush3.bf16.msra.mxu0 %v32829_v39  ;;  %v30481_v39 = vld [vmem:[%s28782_s24 + $0x9a] sm:$0xff] }
 0x390   : > { %26037 = vmatpush3.bf16.msra.mxu1 %v32882_v55  ;;  %26139 = vmatprep.subr.bf16.mxu0 %v32830_v61 }
 0x391   : > { %26039 = vmatprep.subr.bf16.mxu1 %v32883_v30  ;;  %12726 = vrot.lane.b32.xlu1 %v30481_v39, %s28674_s21 }
 0x392   : > { %22317 = vmatmul.mubr.msk.f32.vlgmr.msra.gmra.mrb[2].mxu0 %vm182_vm0, %v30373_v29 }
 0x393   : > { %26141 = vmatpush3.bf16.msra.mxu0 %v32830_v61  ;;  %22335 = vmatprep.mubr.msk.f32.mxu0 %vm182_vm0, %v30377_v33  ;;  %v32889_v61 = vld [vmem:[#allocation34_spill] sm:$0xff] }
 0x394   : > { %26041 = vmatpush3.bf16.msra.mxu1 %v32883_v30  ;;  %26143 = vmatprep.subr.bf16.mxu0 %v32831_v52 }
 0x395   : > { %26043 = vmatprep.subr.bf16.mxu1 %v29603_v16  ;;  %12811 = vrot.lane.b32.xlu1 %v30481_v39, %s28675_s23 }
 0x397   : > { %22203 = vmatmul.mubr.msk.f32.vlgmr.msra.gmra.mrb[2].mxu1 %vm182_vm0, %v30156_v11  ;;  %26145 = vmatpush3.bf16.msra.mxu0 %v32831_v52  ;;  %v32884_v11 = vld [vmem:[#allocation90_spill] sm:$0xff]  ;;  %v32887_v52 = vld [vmem:[#allocation92_spill] sm:$0xff] }
 0x398   : > { %26045 = vmatpush3.bf16.msra.mxu1 %v29603_v16  ;;  %22221 = vmatprep.mubr.msk.f32.mxu1 %vm182_vm0, %v30184_v12  ;;  %v32885_v12 = vld [vmem:[#allocation78_spill] sm:$0xff] }
 0x399   : > { %26047 = vmatprep.subr.bf16.mxu1 %v29614_v27  ;;  %26147 = vmatprep.subr.bf16.mxu0 %v29400_v38 }
 0x39b   : > { %26149 = vmatpush3.bf16.msra.mxu0 %v29400_v38  ;;  %v32886_v38 = vld [vmem:[#allocation32_spill] sm:$0xff] }
 0x39c   : > { %26049 = vmatpush3.bf16.msra.mxu1 %v29614_v27  ;;  %26151 = vmatprep.subr.bf16.mxu0 %v29408_v58 }
 0x39d   : > { %26051 = vmatprep.subr.bf16.mxu1 %v32884_v11 }
 0x39f   : > { %26153 = vmatpush3.bf16.msra.mxu0 %v29408_v58  ;;  %v32888_v58 = vld [vmem:[#allocation33_spill] sm:$0xff] }
 0x3a0   : > { %26053 = vmatpush3.bf16.msra.mxu1 %v32884_v11  ;;  %26203 = vmatprep.subr.bf16.mxu0 %v29087_v13 }
 0x3a1   : > { %26055 = vmatprep.subr.bf16.mxu1 %v29642_v8 }
 0x3a2   : > { %22336 = vmatmul.mubr.msk.f32.vlgmr.msra.gmra.mrb[2].mxu0 %vm182_vm0, %v30415_v63 }
 0x3a3   : > { %26205 = vmatpush3.bf16.msra.mxu0 %v29087_v13  ;;  %22411 = vmatprep.mubr.msk.f32.mxu0 %vm182_vm0, %v32885_v12 }
 0x3a4   : > { %26057 = vmatpush3.bf16.msra.mxu1 %v29642_v8  ;;  %26207 = vmatprep.subr.bf16.mxu0 %v32886_v38 }
 0x3a5   : > { %26155 = vmatprep.subr.bf16.mxu1 %v32887_v52 }
 0x3a7   : > { %22222 = vmatmul.mubr.msk.f32.vlgmr.msra.gmra.mrb[2].mxu1 %vm182_vm0, %v30208_v31  ;;  %26209 = vmatpush3.bf16.msra.mxu0 %v32886_v38  ;;  %v32890_v31 = vld [vmem:[#allocation35_spill] sm:$0xff] }
 0x3a8   : > { %26157 = vmatpush3.bf16.msra.mxu1 %v32887_v52  ;;  %26211 = vmatprep.subr.bf16.mxu0 %v32888_v58  ;;  %v30529_v52 = vpop.permute.xlu0 %8428 }
 0x3a9   : > { %26159 = vmatprep.subr.bf16.mxu1 %v32833_v10  ;;  %22354 = vmatprep.mubr.msk.f32.mxu1 %vm182_vm0, %v32862_v49  ;;  %v30533_v49 = vld [vmem:[%s28782_s24 + $0xa8] sm:$0xff] }
 0x3aa   : > { %32892 = vst [vmem:[#allocation61_spill] sm:$0xff] %v30533_v49  ;;  %13361 = vrot.lane.b32.xlu0 %v30533_v49, %s28674_s21 }
 0x3ab   : > { %26213 = vmatpush3.bf16.msra.mxu0 %v32888_v58 }
 0x3ac   : > { %26161 = vmatpush3.bf16.msra.mxu1 %v32833_v10  ;;  %26215 = vmatprep.subr.bf16.mxu0 %v32889_v61  ;;  %v30545_v10 = vld [vmem:[%s28782_s24 + $0xb0] sm:$0xff]  ;;  %v30572_v8 = vpop.permute.xlu0 %8513 }
 0x3ad   : > { %26163 = vmatprep.subr.bf16.mxu1 %v32834_v15  ;;  %13363 = vrot.lane.b32.xlu1 %v30545_v10, %s28674_s21 }
 0x3af   : > { %26217 = vmatpush3.bf16.msra.mxu0 %v32889_v61 }
 0x3b0   : > { %26165 = vmatpush3.bf16.msra.mxu1 %v32834_v15  ;;  %26219 = vmatprep.subr.bf16.mxu0 %v32890_v31  ;;  %v32894_v15 = vld [vmem:[#allocation36_spill] sm:$0xff] }
 0x3b1   : > { %26167 = vmatprep.subr.bf16.mxu1 %v32891_v23 }
 0x3b2   : > { %22412 = vmatmul.mubr.msk.f32.vlgmr.msra.gmra.mrb[4].mxu0 %vm182_vm0, %v32893_v19 }
 0x3b3   : > { %26221 = vmatpush3.bf16.msra.mxu0 %v32890_v31  ;;  %22430 = vmatprep.mubr.msk.f32.mxu0 %vm182_vm0, %v30529_v52 }
 0x3b4   : > { %26169 = vmatpush3.bf16.msra.mxu1 %v32891_v23  ;;  %26223 = vmatprep.subr.bf16.mxu0 %v32894_v15  ;;  %v32895_v23 = vld [vmem:[#allocation37_spill] sm:$0xff] }
 0x3b5   : > { %26171 = vmatprep.subr.bf16.mxu1 %v32837_v17 }
 0x3b7   : > { %22355 = vmatmul.mubr.msk.f32.vlgmr.msra.gmra.mrb[2].mxu1 %vm182_vm0, %v32868_v4  ;;  %26225 = vmatpush3.bf16.msra.mxu0 %v32894_v15  ;;  %v30563_v4 = vld [vmem:[%s28782_s24 + $0x79] sm:$0xff] }
 0x3b8   : > { %26173 = vmatpush3.bf16.msra.mxu1 %v32837_v17  ;;  %22373 = vmatprep.mubr.msk.f32.mxu1 %vm182_vm0, %v30349_v43  ;;  %v30568_v43 = vpop.permute.xlu1 %8430  ;;  %v32897_v17 = vld [vmem:[#allocation39_spill] sm:$0xff] }
 0x3b9   : > { %26175 = vmatprep.subr.bf16.mxu1 %v32838_v40  ;;  %26227 = vmatprep.subr.bf16.mxu0 %v32895_v23 }
 0x3ba   : > { %9859 = vrot.lane.b32.xlu0 %v30563_v4, %s28674_s21 }
 0x3bb   : > { %26229 = vmatpush3.bf16.msra.mxu0 %v32895_v23 }
 0x3bc   : > { %26177 = vmatpush3.bf16.msra.mxu1 %v32838_v40  ;;  %26231 = vmatprep.subr.bf16.mxu0 %v32896_v5  ;;  %v30575_v40 = vld [vmem:[%s28782_s24 + $0x81] sm:$0xff] }
 0x3bd   : > { %26179 = vmatprep.subr.bf16.mxu1 %v32839_v34  ;;  %9861 = vrot.lane.b32.xlu1 %v30575_v40, %s28674_s21 }
 0x3be   : > { %9944 = vrot.lane.b32.xlu0 %v30563_v4, %s28675_s23 }
 0x3bf   : > { %26233 = vmatpush3.bf16.msra.mxu0 %v32896_v5 }
 0x3c0   : > { %26181 = vmatpush3.bf16.msra.mxu1 %v32839_v34  ;;  %26235 = vmatprep.subr.bf16.mxu0 %v32897_v17  ;;  %v32898_v34 = vld [vmem:[#allocation40_spill] sm:$0xff] }
 0x3c1   : > { %26183 = vmatprep.subr.bf16.mxu1 %v32840_v53  ;;  %13523 = vrot.lane.b32.xlu1 %v30533_v49, %s28675_s23  ;;  %v32900_v49 = vld [vmem:[#allocation42_spill] sm:$0xff] }
 0x3c2   : > { %22431 = vmatmul.mubr.msk.f32.vlgmr.msra.gmra.mrb[4].mxu0 %vm182_vm0, %v30568_v43  ;;  %9946 = vrot.lane.b32.xlu0 %v30575_v40, %s28675_s23 }
 0x3c3   : > { %26237 = vmatpush3.bf16.msra.mxu0 %v32897_v17  ;;  %22449 = vmatprep.mubr.msk.f32.mxu0 %vm182_vm0, %v30572_v8 }
 0x3c4   : > { %26185 = vmatpush3.bf16.msra.mxu1 %v32840_v53  ;;  %26239 = vmatprep.subr.bf16.mxu0 %v32898_v34  ;;  %v32899_v53 = vld [vmem:[#allocation41_spill] sm:$0xff] }
 0x3c5   : > { %26187 = vmatprep.subr.bf16.mxu1 %v32842_v57  ;;  %13525 = vrot.lane.b32.xlu1 %v30545_v10, %s28675_s23 }
 0x3c7   : > { %22374 = vmatmul.mubr.msk.f32.vlgmr.msra.gmra.mrb[2].mxu1 %vm182_vm0, %v30373_v29  ;;  %26241 = vmatpush3.bf16.msra.mxu0 %v32898_v34  ;;  %v30609_v29 = vpop.permute.xlu1 %8515 }
 0x3c8   : > { %26189 = vmatpush3.bf16.msra.mxu1 %v32842_v57  ;;  %22392 = vmatprep.mubr.msk.f32.mxu1 %vm182_vm0, %v30377_v33  ;;  %v32903_v33 = vld [vmem:[#allocation8_spill] sm:$0xff] }
 0x3c9   : > { %26191 = vmatprep.subr.bf16.mxu1 %v32843_v9  ;;  %26243 = vmatprep.subr.bf16.mxu0 %v32899_v53 }
 0x3cb   : > { %26245 = vmatpush3.bf16.msra.mxu0 %v32899_v53 }
 0x3cc   : > { %26193 = vmatpush3.bf16.msra.mxu1 %v32843_v9  ;;  %26247 = vmatprep.subr.bf16.mxu0 %v32900_v49  ;;  %v32938_v9 = vld [vmem:[#allocation25_spill] sm:$0xff] }
 0x3cd   : > { %26195 = vmatprep.subr.bf16.mxu1 %v32844_v51 }
 0x3cf   : > { %26249 = vmatpush3.bf16.msra.mxu0 %v32900_v49 }
 0x3d0   : > { %26197 = vmatpush3.bf16.msra.mxu1 %v32844_v51  ;;  %26251 = vmatprep.subr.bf16.mxu0 %v29415_v41  ;;  %v32937_v51 = vld [vmem:[#allocation49_spill] sm:$0xff] }
 0x3d1   : > { %26199 = vmatprep.subr.bf16.mxu1 %v32845_v28 }
 0x3d2   : > { %22450 = vmatmul.mubr.msk.f32.vlgmr.msra.gmra.mrb[4].mxu0 %vm182_vm0, %v30609_v29 }
 0x3d3   : > { %26253 = vmatpush3.bf16.msra.mxu0 %v29415_v41  ;;  %22468 = vmatprep.mubr.msk.f32.mxu0 %vm182_vm0, %v32885_v12  ;;  %v32935_v41 = vld [vmem:[#allocation24_spill] sm:$0xff] }
 0x3d4   : > { %26201 = vmatpush3.bf16.msra.mxu1 %v32845_v28  ;;  %26255 = vmatprep.subr.bf16.mxu0 %v29421_v47 }
 0x3d5   : > { %26299 = vmatprep.subr.bf16.mxu1 %v32864_v48 }
 0x3d7   : > { %22393 = vmatmul.mubr.msk.f32.vlgmr.msra.gmra.mrb[2].mxu1 %vm182_vm0, %v30415_v63  ;;  %26257 = vmatpush3.bf16.msra.mxu0 %v29421_v47  ;;  %v32904_v63 = vld [vmem:[#allocation9_spill] sm:$0xff]  ;;  %v32933_v47 = vld [vmem:[#allocation23_spill] sm:$0xff] }
 0x3d8   : > { %26301 = vmatpush3.bf16.msra.mxu1 %v32864_v48  ;;  %26259 = vmatprep.subr.bf16.mxu0 %v29431_v22 }
 0x3d9   : > { %26303 = vmatprep.subr.bf16.mxu1 %v32865_v26  ;;  %22525 = vmatprep.mubr.msk.f32.mxu1 %vm182_vm0, %v32885_v12  ;;  %v30696_v12 = vpop.permute.xlu1 %11213 }
 0x3da   : > { %32905 = vst [vmem:[#allocation118_spill] sm:$0xff] %v30696_v12 }
 0x3db   : > { %26261 = vmatpush3.bf16.msra.mxu0 %v29431_v22  ;;  %v32931_v22 = vld [vmem:[#allocation22_spill] sm:$0xff] }
 0x3dc   : > { %26305 = vmatpush3.bf16.msra.mxu1 %v32865_v26  ;;  %26263 = vmatprep.subr.bf16.mxu0 %v29439_v35  ;;  %v30757_v26 = vld [vmem:[%s28782_s24 + $0xb1] sm:$0xff] }
 0x3dd   : > { %26307 = vmatprep.subr.bf16.mxu1 %v32866_v7  ;;  %32919 = vst [vmem:[#allocation32_spill] sm:$0xff] %v30757_v26  ;;  %14157 = vrot.lane.b32.xlu1 %v30757_v26, %s28674_s21 }
 0x3df   : > { %26265 = vmatpush3.bf16.msra.mxu0 %v29439_v35  ;;  %v32930_v35 = vld [vmem:[#allocation46_spill] sm:$0xff] }
 0x3e0   : > { %26309 = vmatpush3.bf16.msra.mxu1 %v32866_v7  ;;  %26267 = vmatprep.subr.bf16.mxu0 %v29447_v14  ;;  %v32918_v7 = vld [vmem:[#allocation17_spill] sm:$0xff] }
 0x3e1   : > { %26311 = vmatprep.subr.bf16.mxu1 %v32867_v18  ;;  %14242 = vrot.lane.b32.xlu1 %v30757_v26, %s28675_s23 }
 0x3e2   : > { %22469 = vmatmul.mubr.msk.f32.vlgmr.msra.gmra.mrb[2].mxu0 %vm182_vm0, %v32893_v19 }
 0x3e3   : > { %26269 = vmatpush3.bf16.msra.mxu0 %v29447_v14  ;;  %22487 = vmatprep.mubr.msk.f32.mxu0 %vm182_vm0, %v30529_v52  ;;  %v32929_v14 = vld [vmem:[#allocation21_spill] sm:$0xff] }
 0x3e4   : > { %26313 = vmatpush3.bf16.msra.mxu1 %v32867_v18  ;;  %26271 = vmatprep.subr.bf16.mxu0 %v29453_v37 }
 0x3e5   : > { %26315 = vmatprep.subr.bf16.mxu1 %v32869_v20 }
 0x3e7   : > { %22526 = vmatmul.mubr.msk.f32.vlgmr.msra.gmra.mrb[2].mxu1 %vm182_vm0, %v32893_v19  ;;  %26273 = vmatpush3.bf16.msra.mxu0 %v29453_v37  ;;  %v32902_v19 = vld [vmem:[#allocation80_spill] sm:$0xff]  ;;  %v32928_v37 = vld [vmem:[#allocation45_spill] sm:$0xff] }
 0x3e8   : > { %26317 = vmatpush3.bf16.msra.mxu1 %v32869_v20  ;;  %22544 = vmatprep.mubr.msk.f32.mxu1 %vm182_vm0, %v30529_v52  ;;  %v32901_v52 = vld [vmem:[#allocation79_spill] sm:$0xff]  ;;  %v30743_v20 = vld [vmem:[%s28782_s24 + $0xa9] sm:$0xff] }
 0x3e9   : > { %26275 = vmatprep.subr.bf16.mxu0 %v32851_v42  ;;  %26319 = vmatprep.subr.bf16.mxu1 %v32870_v21  ;;  %32916 = vst [vmem:[#allocation78_spill] sm:$0xff] %v30743_v20 }
 0x3ea   : > { %14155 = vrot.lane.b32.xlu0 %v30743_v20, %s28674_s21 }
 0x3eb   : > { %26277 = vmatpush3.bf16.msra.mxu0 %v32851_v42  ;;  %v32927_v42 = vld [vmem:[#allocation20_spill] sm:$0xff] }
 0x3ec   : > { %26321 = vmatpush3.bf16.msra.mxu1 %v32870_v21  ;;  %26279 = vmatprep.subr.bf16.mxu0 %v32853_v60  ;;  %v32914_v21 = vld [vmem:[#allocation15_spill] sm:$0xff] }
 0x3ed   : > { %26323 = vmatprep.subr.bf16.mxu1 %v32871_v3 }
 0x3ee   : > { %14240 = vrot.lane.b32.xlu0 %v30743_v20, %s28675_s23  ;;  %v32939_v20 = vld [vmem:[#allocation50_spill] sm:$0xff] }
 0x3ef   : > { %26281 = vmatpush3.bf16.msra.mxu0 %v32853_v60  ;;  %v32926_v60 = vld [vmem:[#allocation44_spill] sm:$0xff] }
 0x3f0   : > { %26325 = vmatpush3.bf16.msra.mxu1 %v32871_v3  ;;  %26283 = vmatprep.subr.bf16.mxu0 %v32855_v0  ;;  %v32913_v3 = vld [vmem:[#allocation99_spill] sm:$0xff] }
 0x3f1   : > { %26327 = vmatprep.subr.bf16.mxu1 %v32872_v1 }
 0x3f2   : > { %22488 = vmatmul.mubr.msk.f32.vlgmr.msra.gmra.mrb[2].mxu0 %vm182_vm0, %v30568_v43 }
 0x3f3   : > { %26285 = vmatpush3.bf16.msra.mxu0 %v32855_v0  ;;  %22506 = vmatprep.mubr.msk.f32.mxu0 %vm182_vm0, %v30572_v8  ;;  %v32924_v0 = vld [vmem:[#allocation43_spill] sm:$0xff] }
 0x3f4   : > { %26329 = vmatpush3.bf16.msra.mxu1 %v32872_v1  ;;  %26287 = vmatprep.subr.bf16.mxu0 %v32856_v25  ;;  %v32912_v1 = vld [vmem:[#allocation14_spill] sm:$0xff] }
 0x3f5   : > { %26331 = vmatprep.subr.bf16.mxu1 %v32873_v6 }
 0x3f7   : > { %22545 = vmatmul.mubr.msk.f32.vlgmr.msra.gmra.mrb[2].mxu1 %vm182_vm0, %v30568_v43  ;;  %26289 = vmatpush3.bf16.msra.mxu0 %v32856_v25  ;;  %v32906_v43 = vld [vmem:[#allocation10_spill] sm:$0xff]  ;;  %v32923_v25 = vld [vmem:[#allocation19_spill] sm:$0xff] }
 0x3f8   : > { %26333 = vmatpush3.bf16.msra.mxu1 %v32873_v6  ;;  %22563 = vmatprep.mubr.msk.f32.mxu1 %vm182_vm0, %v30572_v8  ;;  %v30688_v8 = vpop.permute.xlu0 %9065  ;;  %v32911_v6 = vld [vmem:[#allocation13_spill] sm:$0xff] }
 0x3f9   : > { %26291 = vmatprep.subr.bf16.mxu0 %v32901_v52  ;;  %26335 = vmatprep.subr.bf16.mxu1 %v32874_v56 }
 0x3fb   : > { %26293 = vmatpush3.bf16.msra.mxu0 %v32901_v52  ;;  %v32922_v52 = vld [vmem:[#allocation18_spill] sm:$0xff] }
 0x3fc   : > { %26337 = vmatpush3.bf16.msra.mxu1 %v32874_v56  ;;  %26295 = vmatprep.subr.bf16.mxu0 %v32902_v19  ;;  %v30722_v56 = vpop.permute.xlu1 %11215 }
 0x3fd   : > { %26339 = vmatprep.subr.bf16.mxu1 %v32875_v24  ;;  %32910 = vst [vmem:[#allocation81_spill] sm:$0xff] %v30722_v56 }
 0x3ff   : > { %26297 = vmatpush3.bf16.msra.mxu0 %v32902_v19  ;;  %v32921_v19 = vld [vmem:[#allocation121_spill] sm:$0xff] }
 0x400   : > { %26341 = vmatpush3.bf16.msra.mxu1 %v32875_v24  ;;  %26347 = vmatprep.subr.bf16.mxu0 %v32903_v33  ;;  %v32908_v24 = vld [vmem:[#allocation12_spill] sm:$0xff]  ;;  %v30762_v48 = vpop.permute.xlu1 %11375 }
 0x401   : > { %26343 = vmatprep.subr.bf16.mxu1 %v32876_v2  ;;  %32920 = vst [vmem:[#allocation33_spill] sm:$0xff] %v30762_v48 }
 0x402   : > { %22507 = vmatmul.mubr.msk.f32.vlgmr.msra.gmra.mrb[2].mxu0 %vm182_vm0, %v30609_v29 }
 0x403   : > { %26349 = vmatpush3.bf16.msra.mxu0 %v32903_v33  ;;  %22582 = vmatprep.mubr.msk.f32.mxu0 %vm182_vm0, %v30688_v8 }
 0x404   : > { %26345 = vmatpush3.bf16.msra.mxu1 %v32876_v2  ;;  %26351 = vmatprep.subr.bf16.mxu0 %v32904_v63  ;;  %v32907_v2 = vld [vmem:[#allocation11_spill] sm:$0xff] }
 0x405   : > { %26779 = vmatprep.subr.bf16.mxu1 %v32903_v33 }
 0x407   : > { %22564 = vmatmul.mubr.msk.f32.vlgmr.msra.gmra.mrb[2].mxu1 %vm182_vm0, %v30609_v29  ;;  %26353 = vmatpush3.bf16.msra.mxu0 %v32904_v63  ;;  %v30711_v29 = vpop.permute.xlu0 %9067 }
 0x408   : > { %26781 = vmatpush3.bf16.msra.mxu1 %v32903_v33  ;;  %26355 = vmatprep.subr.bf16.mxu0 %v32906_v43 }
 0x409   : > { %26783 = vmatprep.subr.bf16.mxu1 %v32904_v63  ;;  %23095 = vmatprep.mubr.msk.f32.mxu1 %vm182_vm0, %v30696_v12  ;;  %v32909_v12 = vld [vmem:[#allocation97_spill] sm:$0xff] }
 0x40b   : > { %26357 = vmatpush3.bf16.msra.mxu0 %v32906_v43  ;;  %v30747_v18 = vpop.permute.xlu0 %9227 }
 0x40c   : > { %26785 = vmatpush3.bf16.msra.mxu1 %v32904_v63  ;;  %26359 = vmatprep.subr.bf16.mxu0 %v32907_v2 }
 0x40d   : > { %26787 = vmatprep.subr.bf16.mxu1 %v32906_v43 }
 0x40f   : > { %26361 = vmatpush3.bf16.msra.mxu0 %v32907_v2 }
 0x410   : > { %26789 = vmatpush3.bf16.msra.mxu1 %v32906_v43  ;;  %26363 = vmatprep.subr.bf16.mxu0 %v32908_v24 }
 0x411   : > { %26791 = vmatprep.subr.bf16.mxu1 %v32907_v2 }
 0x412   : > { %22583 = vmatmul.mubr.msk.f32.vlgmr.msra.gmra.mrb[6].mxu0 %vm182_vm0, %v30711_v29 }
 0x413   : > { %26365 = vmatpush3.bf16.msra.mxu0 %v32908_v24  ;;  %22601 = vmatprep.mubr.msk.f32.mxu0 %vm182_vm0, %v32909_v12 }
 0x414   : > { %26793 = vmatpush3.bf16.msra.mxu1 %v32907_v2  ;;  %26367 = vmatprep.subr.bf16.mxu0 %v32911_v6 }
 0x415   : > { %26795 = vmatprep.subr.bf16.mxu1 %v32908_v24 }
 0x417   : > { %26369 = vmatpush3.bf16.msra.mxu0 %v32911_v6  ;;  %23096 = vmatmul.mubr.msk.f32.vlgmr.msra.gmra.mrb[4].mxu1 %vm182_vm0, %v30722_v56  ;;  %v32915_v56 = vld [vmem:[#allocation16_spill] sm:$0xff] }
 0x418   : > { %26797 = vmatpush3.bf16.msra.mxu1 %v32908_v24  ;;  %26371 = vmatprep.subr.bf16.mxu0 %v32912_v1 }
 0x419   : > { %26799 = vmatprep.subr.bf16.mxu1 %v32911_v6  ;;  %23114 = vmatprep.mubr.msk.f32.mxu1 %vm182_vm0, %v32913_v3  ;;  %v32917_v3 = vld [vmem:[#allocation120_spill] sm:$0xff] }
 0x41b   : > { %26373 = vmatpush3.bf16.msra.mxu0 %v32912_v1 }
 0x41c   : > { %26801 = vmatpush3.bf16.msra.mxu1 %v32911_v6  ;;  %26375 = vmatprep.subr.bf16.mxu0 %v32914_v21 }
 0x41d   : > { %26803 = vmatprep.subr.bf16.mxu1 %v32912_v1 }
 0x41f   : > { %26377 = vmatpush3.bf16.msra.mxu0 %v32914_v21 }
 0x420   : > { %26805 = vmatpush3.bf16.msra.mxu1 %v32912_v1  ;;  %26379 = vmatprep.subr.bf16.mxu0 %v32915_v56 }
 0x421   : > { %26807 = vmatprep.subr.bf16.mxu1 %v32914_v21 }
 0x422   : > { %22602 = vmatmul.mubr.msk.f32.vlgmr.msra.gmra.mrb[6].mxu0 %vm182_vm0, %v32917_v3 }
 0x423   : > { %26381 = vmatpush3.bf16.msra.mxu0 %v32915_v56  ;;  %22620 = vmatprep.mubr.msk.f32.mxu0 %vm182_vm0, %v30747_v18 }
 0x424   : > { %26809 = vmatpush3.bf16.msra.mxu1 %v32914_v21  ;;  %26383 = vmatprep.subr.bf16.mxu0 %v32918_v7 }
 0x425   : > { %26811 = vmatprep.subr.bf16.mxu1 %v32915_v56 }
 0x427   : > { %26385 = vmatpush3.bf16.msra.mxu0 %v32918_v7  ;;  %23115 = vmatmul.mubr.msk.f32.vlgmr.msra.gmra.mrb[4].mxu1 %vm182_vm0, %v32921_v19  ;;  %v30781_v19 = vpop.permute.xlu0 %9229 }
 0x428   : > { %26813 = vmatpush3.bf16.msra.mxu1 %v32915_v56  ;;  %26387 = vmatprep.subr.bf16.mxu0 %v32922_v52 }
 0x429   : > { %26815 = vmatprep.subr.bf16.mxu1 %v32918_v7  ;;  %23133 = vmatprep.mubr.msk.f32.mxu1 %vm182_vm0, %v30762_v48  ;;  %v30792_v48 = vpop.permute.xlu1 %11377 }
 0x42a   : > { %32925 = vst [vmem:[#allocation34_spill] sm:$0xff] %v30792_v48 }
 0x42b   : > { %26389 = vmatpush3.bf16.msra.mxu0 %v32922_v52  ;;  %v30820_v28 = vpop.permute.xlu0 %12007 }
 0x42c   : > { %26817 = vmatpush3.bf16.msra.mxu1 %v32918_v7  ;;  %26391 = vmatprep.subr.bf16.mxu0 %v32923_v25  ;;  %32936 = vst [vmem:[#allocation35_spill] sm:$0xff] %v30820_v28 }
 0x42d   : > { %26819 = vmatprep.subr.bf16.mxu1 %v32922_v52 }
 0x42f   : > { %26393 = vmatpush3.bf16.msra.mxu0 %v32923_v25 }
 0x430   : > { %26821 = vmatpush3.bf16.msra.mxu1 %v32922_v52  ;;  %26395 = vmatprep.subr.bf16.mxu0 %v32924_v0 }
 0x431   : > { %26823 = vmatprep.subr.bf16.mxu1 %v32923_v25 }
 0x432   : > { %22621 = vmatmul.mubr.msk.f32.vlgmr.msra.gmra.mrb[6].mxu0 %vm182_vm0, %v30781_v19 }
 0x433   : > { %26397 = vmatpush3.bf16.msra.mxu0 %v32924_v0  ;;  %22639 = vmatprep.mubr.msk.f32.mxu0 %vm182_vm0, %v32909_v12 }
 0x434   : > { %26825 = vmatpush3.bf16.msra.mxu1 %v32923_v25  ;;  %26399 = vmatprep.subr.bf16.mxu0 %v32926_v60 }
 0x435   : > { %26923 = vmatprep.subr.bf16.mxu1 %v32927_v42 }
 0x437   : > { %26401 = vmatpush3.bf16.msra.mxu0 %v32926_v60  ;;  %23134 = vmatmul.mubr.msk.f32.vlgmr.msra.gmra.mrb[4].mxu1 %vm182_vm0, %v30792_v48  ;;  %v32932_v48 = vld [vmem:[#allocation47_spill] sm:$0xff] }
 0x438   : > { %26925 = vmatpush3.bf16.msra.mxu1 %v32927_v42  ;;  %26403 = vmatprep.subr.bf16.mxu0 %v32928_v37 }
 0x439   : > { %26927 = vmatprep.subr.bf16.mxu1 %v32929_v14  ;;  %23266 = vmatprep.mubr.msk.f32.mxu1 %vm182_vm0, %v30383_v32  ;;  %v32934_v32 = vld [vmem:[#allocation48_spill] sm:$0xff] }
 0x43b   : > { %26405 = vmatpush3.bf16.msra.mxu0 %v32928_v37  ;;  %v32952_v37 = vld [vmem:[#allocation30_spill] sm:$0xff] }
 0x43c   : > { %26929 = vmatpush3.bf16.msra.mxu1 %v32929_v14  ;;  %26407 = vmatprep.subr.bf16.mxu0 %v32930_v35 }
 0x43d   : > { %26931 = vmatprep.subr.bf16.mxu1 %v32931_v22 }
 0x43f   : > { %26409 = vmatpush3.bf16.msra.mxu0 %v32930_v35  ;;  %v30864_v35 = vpop.permute.xlu0 %12092 }
 0x440   : > { %26933 = vmatpush3.bf16.msra.mxu1 %v32931_v22  ;;  %26411 = vmatprep.subr.bf16.mxu0 %v32932_v48  ;;  %32948 = vst [vmem:[#allocation38_spill] sm:$0xff] %v30864_v35 }
 0x441   : > { %26935 = vmatprep.subr.bf16.mxu1 %v32933_v47 }
 0x442   : > { %22640 = vmatmul.mubr.msk.f32.vlgmr.msra.gmra.mrb[4].mxu0 %vm182_vm0, %v32917_v3 }
 0x443   : > { %26413 = vmatpush3.bf16.msra.mxu0 %v32932_v48  ;;  %22658 = vmatprep.mubr.msk.f32.mxu0 %vm182_vm0, %v30688_v8  ;;  %v32947_v48 = vld [vmem:[#allocation28_spill] sm:$0xff] }
 0x444   : > { %26937 = vmatpush3.bf16.msra.mxu1 %v32933_v47  ;;  %26415 = vmatprep.subr.bf16.mxu0 %v32934_v32 }
 0x445   : > { %26939 = vmatprep.subr.bf16.mxu1 %v32935_v41 }
 0x447   : > { %26417 = vmatpush3.bf16.msra.mxu0 %v32934_v32  ;;  %23267 = vmatmul.mubr.msk.f32.vlgmr.msra.gmra.mrb[4].mxu1 %vm182_vm0, %v30391_v36  ;;  %v32940_v36 = vld [vmem:[#allocation26_spill] sm:$0xff]  ;;  %v30837_v32 = vld [vmem:[%s28782_s24 + $0x7a] sm:$0xff] }
 0x448   : > { %26941 = vmatpush3.bf16.msra.mxu1 %v32935_v41  ;;  %26419 = vmatprep.subr.bf16.mxu0 %v32937_v51  ;;  %32941 = vst [vmem:[#allocation119_spill] sm:$0xff] %v30837_v32 }
 0x449   : > { %26943 = vmatprep.subr.bf16.mxu1 %v32938_v9  ;;  %23285 = vmatprep.mubr.msk.f32.mxu1 %vm182_vm0, %v30820_v28  ;;  %v30845_v28 = vld [vmem:[%s28782_s24 + $0x82] sm:$0xff] }
 0x44a   : > { %v22052_v57 = vpop.f32.mrb[0].mxu1  ;;  %10576 = vrot.lane.b32.xlu0 %v30837_v32, %s28674_s21  ;;  %32943 = vst [vmem:[#allocation36_spill] sm:$0xff] %v30845_v28  ;;  %10578 = vrot.lane.b32.xlu1 %v30845_v28, %s28674_s21 }
 0x44b   : > { %18335 = vst [vmem:[%s30271_s27 + $0x18] sm:$0xff] %v22052_v57  ;;  %v6901_v26 = vpop.f32.mrb[1].mxu1  ;;  %26421 = vmatpush3.bf16.msra.mxu0 %v32937_v51  ;;  %v32942_v57 = vld [vmem:[#allocation51_spill] sm:$0xff]  ;;  %v32946_v51 = vld [vmem:[#allocation52_spill] sm:$0xff] }
 0x44c   : > { %18334 = vst [vmem:[%s30271_s27 + $0x10] sm:$0xff] %v6901_v26  ;;  %26945 = vmatpush3.bf16.msra.mxu1 %v32938_v9  ;;  %26423 = vmatprep.subr.bf16.mxu0 %v32939_v20  ;;  %v32944_v26 = vld [vmem:[#allocation27_spill] sm:$0xff] }
 0x44d   : > { %26947 = vmatprep.subr.bf16.mxu1 %v32940_v36 }
 0x44e   : > { %10661 = vrot.lane.b32.xlu0 %v30837_v32, %s28675_s23  ;;  %10663 = vrot.lane.b32.xlu1 %v30845_v28, %s28675_s23  ;;  %v32949_v32 = vld [vmem:[#allocation53_spill] sm:$0xff]  ;;  %v32951_v28 = vld [vmem:[#allocation54_spill] sm:$0xff] }
 0x44f   : > { %26425 = vmatpush3.bf16.msra.mxu0 %v32939_v20  ;;  %v30858_v20 = vpop.permute.xlu1 %12009 }
 0x450   : > { %26949 = vmatpush3.bf16.msra.mxu1 %v32940_v36  ;;  %26427 = vmatprep.subr.bf16.mxu0 %v32942_v57  ;;  %32945 = vst [vmem:[#allocation37_spill] sm:$0xff] %v30858_v20 }
 0x451   : > { %26951 = vmatprep.subr.bf16.mxu1 %v32944_v26 }
 0x452   : > { %22659 = vmatmul.mubr.msk.f32.vlgmr.msra.gmra.mrb[4].mxu0 %vm182_vm0, %v30711_v29 }
 0x453   : > { %26429 = vmatpush3.bf16.msra.mxu0 %v32942_v57  ;;  %22677 = vmatprep.mubr.msk.f32.mxu0 %vm182_vm0, %v30747_v18  ;;  %v32950_v57 = vld [vmem:[#allocation29_spill] sm:$0xff] }
 0x454   : > { %26953 = vmatpush3.bf16.msra.mxu1 %v32944_v26  ;;  %26431 = vmatprep.subr.bf16.mxu0 %v32946_v51 }
 0x455   : > { %26955 = vmatprep.subr.bf16.mxu1 %v32947_v48 }
 0x457   : > { %26433 = vmatpush3.bf16.msra.mxu0 %v32946_v51  ;;  %23286 = vmatmul.mubr.msk.f32.vlgmr.msra.gmra.mrb[4].mxu1 %vm182_vm0, %v30858_v20  ;;  %v32953_v20 = vld [vmem:[#allocation31_spill] sm:$0xff] }
 0x458   : > { %26957 = vmatpush3.bf16.msra.mxu1 %v32947_v48  ;;  %26435 = vmatprep.subr.bf16.mxu0 %v32949_v32 }
 0x459   : > { %26959 = vmatprep.subr.bf16.mxu1 %v32950_v57  ;;  %23304 = vmatprep.mubr.msk.f32.mxu1 %vm182_vm0, %v30864_v35  ;;  %v30888_v35 = vpop.permute.xlu1 %12094 }
 0x45a   : > { %32954 = vst [vmem:[#allocation39_spill] sm:$0xff] %v30888_v35 }
 0x45b   : > { %26437 = vmatpush3.bf16.msra.mxu0 %v32949_v32 }
 0x45c   : > { %26961 = vmatpush3.bf16.msra.mxu1 %v32950_v57  ;;  %26439 = vmatprep.subr.bf16.mxu0 %v32951_v28 }
 0x45d   : > { %26963 = vmatprep.subr.bf16.mxu1 %v32952_v37 }
 0x45f   : > { %26441 = vmatpush3.bf16.msra.mxu0 %v32951_v28 }
 0x460   : > { %26965 = vmatpush3.bf16.msra.mxu1 %v32952_v37  ;;  %26443 = vmatprep.subr.bf16.mxu0 %v32877_v54 }
 0x461   : > { %26967 = vmatprep.subr.bf16.mxu1 %v32953_v20 }
 0x462   : > { %22678 = vmatmul.mubr.msk.f32.vlgmr.msra.gmra.mrb[4].mxu0 %vm182_vm0, %v30781_v19 }
 0x463   : > { %26445 = vmatpush3.bf16.msra.mxu0 %v32877_v54  ;;  %22696 = vmatprep.mubr.msk.f32.mxu0 %vm182_vm0, %v32909_v12  ;;  %v30947_v12 = vld [vmem:[%s28782_s24 + $0xb2] sm:$0xff] }
 0x464   : > { %26969 = vmatpush3.bf16.msra.mxu1 %v32953_v20  ;;  %26447 = vmatprep.subr.bf16.mxu0 %v29537_v45 }
 0x465   : > { %27067 = vmatprep.subr.bf16.mxu1 %v29087_v13  ;;  %14874 = vrot.lane.b32.xlu1 %v30947_v12, %s28674_s21 }
 0x467   : > { %26449 = vmatpush3.bf16.msra.mxu0 %v29537_v45  ;;  %23305 = vmatmul.mubr.msk.f32.vlgmr.msra.gmra.mrb[4].mxu1 %vm182_vm0, %v30888_v35  ;;  %v32974_v35 = vld [vmem:[#allocation62_spill] sm:$0xff] }
 0x468   : > { %27069 = vmatpush3.bf16.msra.mxu1 %v29087_v13  ;;  %26451 = vmatprep.subr.bf16.mxu0 %v32878_v59 }
 0x469   : > { %27071 = vmatprep.subr.bf16.mxu1 %v32886_v38  ;;  %23437 = vmatprep.mubr.msk.f32.mxu1 %vm182_vm0, %v30469_v46  ;;  %v30916_v46 = vpop.permute.xlu0 %12724 }
 0x46a   : > { %32955 = vst [vmem:[#allocation40_spill] sm:$0xff] %v30916_v46  ;;  %14959 = vrot.lane.b32.xlu1 %v30947_v12, %s28675_s23 }
 0x46b   : > { %26453 = vmatpush3.bf16.msra.mxu0 %v32878_v59  ;;  %v32986_v59 = vld [vmem:[#allocation94_spill] sm:$0xff] }
 0x46c   : > { %27073 = vmatpush3.bf16.msra.mxu1 %v32886_v38  ;;  %26455 = vmatprep.subr.bf16.mxu0 %v32879_v50 }
 0x46d   : > { %27075 = vmatprep.subr.bf16.mxu1 %v32888_v58 }
 0x46f   : > { %26457 = vmatpush3.bf16.msra.mxu0 %v32879_v50  ;;  %v32985_v50 = vld [vmem:[#allocation93_spill] sm:$0xff] }
 0x470   : > { %27077 = vmatpush3.bf16.msra.mxu1 %v32888_v58  ;;  %26459 = vmatprep.subr.bf16.mxu0 %v32880_v44 }
 0x471   : > { %27079 = vmatprep.subr.bf16.mxu1 %v32889_v61 }
 0x472   : > { %22697 = vmatmul.mubr.msk.f32.vlgmr.msra.gmra.mrb[2].mxu0 %vm182_vm0, %v32917_v3 }
 0x473   : > { %26461 = vmatpush3.bf16.msra.mxu0 %v32880_v44  ;;  %22715 = vmatprep.mubr.msk.f32.mxu0 %vm182_vm0, %v30688_v8  ;;  %v30943_v8 = vpop.permute.xlu1 %12726  ;;  %v32982_v44 = vld [vmem:[#allocation66_spill] sm:$0xff] }
 0x474   : > { %27081 = vmatpush3.bf16.msra.mxu1 %v32889_v61  ;;  %26463 = vmatprep.subr.bf16.mxu0 %v32881_v62  ;;  %32956 = vst [vmem:[#allocation41_spill] sm:$0xff] %v30943_v8 }
 0x475   : > { %27083 = vmatprep.subr.bf16.mxu1 %v32890_v31 }
 0x477   : > { %26465 = vmatpush3.bf16.msra.mxu0 %v32881_v62  ;;  %23438 = vmatmul.mubr.msk.f32.vlgmr.msra.gmra.mrb[4].mxu1 %vm182_vm0, %v30481_v39  ;;  %v30937_v39 = vld [vmem:[%s28782_s24 + $0xaa] sm:$0xff]  ;;  %v30982_v3 = vpop.permute.xlu1 %12811  ;;  %v32981_v62 = vld [vmem:[#allocation51_spill] sm:$0xff] }
 0x478   : > { %27085 = vmatpush3.bf16.msra.mxu1 %v32890_v31  ;;  %26467 = vmatprep.subr.bf16.mxu0 %v32882_v55  ;;  %32959 = vst [vmem:[#allocation8_spill] sm:$0xff] %v30982_v3 }
 0x479   : > { %27087 = vmatprep.subr.bf16.mxu1 %v32894_v15  ;;  %23456 = vmatprep.mubr.msk.f32.mxu1 %vm182_vm0, %v30916_v46  ;;  %v32973_v46 = vld [vmem:[#allocation47_spill] sm:$0xff] }
 0x47a   : > { %14872 = vrot.lane.b32.xlu0 %v30937_v39, %s28674_s21 }
 0x47b   : > { %26469 = vmatpush3.bf16.msra.mxu0 %v32882_v55  ;;  %v31127_v55 = vld [vmem:[%s28782_s24 + $0xc8] sm:$0xff] }
 0x47c   : > { %27089 = vmatpush3.bf16.msra.mxu1 %v32894_v15  ;;  %26471 = vmatprep.subr.bf16.mxu0 %v32883_v30 }
 0x47d   : > { %27091 = vmatprep.subr.bf16.mxu1 %v32895_v23  ;;  %15592 = vrot.lane.b32.xlu1 %v31127_v55, %s28674_s21 }
 0x47e   : > { %14957 = vrot.lane.b32.xlu0 %v30937_v39, %s28675_s23 }
 0x47f   : > { %26473 = vmatpush3.bf16.msra.mxu0 %v32883_v30  ;;  %v32979_v30 = vld [vmem:[#allocation50_spill] sm:$0xff] }
 0x480   : > { %27093 = vmatpush3.bf16.msra.mxu1 %v32895_v23  ;;  %26475 = vmatprep.subr.bf16.mxu0 %v29603_v16 }
 0x481   : > { %27095 = vmatprep.subr.bf16.mxu1 %v32896_v5  ;;  %15677 = vrot.lane.b32.xlu1 %v31127_v55, %s28675_s23 }
 0x482   : > { %22716 = vmatmul.mubr.msk.f32.vlgmr.msra.gmra.mrb[2].mxu0 %vm182_vm0, %v30711_v29  ;;  %v30952_v29 = vpop.permute.xlu0 %12809 }
 0x483   : > { %26477 = vmatpush3.bf16.msra.mxu0 %v29603_v16  ;;  %22734 = vmatprep.mubr.msk.f32.mxu0 %vm182_vm0, %v30747_v18  ;;  %32957 = vst [vmem:[#allocation42_spill] sm:$0xff] %v30952_v29  ;;  %v32958_v18 = vld [vmem:[#allocation91_spill] sm:$0xff]  ;;  %v32977_v16 = vld [vmem:[#allocation49_spill] sm:$0xff] }
 0x484   : > { %27097 = vmatpush3.bf16.msra.mxu1 %v32896_v5  ;;  %26479 = vmatprep.subr.bf16.mxu0 %v29614_v27 }
 0x485   : > { %27099 = vmatprep.subr.bf16.mxu1 %v32897_v17 }
 0x487   : > { %26481 = vmatpush3.bf16.msra.mxu0 %v29614_v27  ;;  %23457 = vmatmul.mubr.msk.f32.vlgmr.msra.gmra.mrb[4].mxu1 %vm182_vm0, %v30943_v8  ;;  %v32971_v8 = vld [vmem:[#allocation46_spill] sm:$0xff] }
 0x488   : > { %27101 = vmatpush3.bf16.msra.mxu1 %v32897_v17  ;;  %26483 = vmatprep.subr.bf16.mxu0 %v32884_v11 }
 0x489   : > { %27103 = vmatprep.subr.bf16.mxu1 %v32898_v34  ;;  %23475 = vmatprep.mubr.msk.f32.mxu1 %vm182_vm0, %v30952_v29  ;;  %v30986_v29 = vpop.permute.xlu0 %13361 }
 0x48a   : > { %32960 = vst [vmem:[#allocation9_spill] sm:$0xff] %v30986_v29 }
 0x48b   : > { %26485 = vmatpush3.bf16.msra.mxu0 %v32884_v11 }
 0x48c   : > { %27105 = vmatpush3.bf16.msra.mxu1 %v32898_v34  ;;  %26487 = vmatprep.subr.bf16.mxu0 %v32958_v18 }
 0x48d   : > { %27107 = vmatprep.subr.bf16.mxu1 %v32899_v53 }
 0x48f   : > { %26489 = vmatpush3.bf16.msra.mxu0 %v32958_v18  ;;  %v32975_v18 = vld [vmem:[#allocation48_spill] sm:$0xff] }
 0x490   : > { %27109 = vmatpush3.bf16.msra.mxu1 %v32899_v53  ;;  %26491 = vmatprep.subr.bf16.mxu0 %v32927_v42 }
 0x491   : > { %27111 = vmatprep.subr.bf16.mxu1 %v32900_v49 }
 0x492   : > { %22735 = vmatmul.mubr.msk.f32.vlgmr.msra.gmra.mrb[2].mxu0 %vm182_vm0, %v30781_v19  ;;  %v32969_v19 = vld [vmem:[#allocation45_spill] sm:$0xff] }
 0x493   : > { %26493 = vmatpush3.bf16.msra.mxu0 %v32927_v42  ;;  %22753 = vmatprep.mubr.msk.f32.mxu0 %vm182_vm0, %v30563_v4 }
 0x494   : > { %27113 = vmatpush3.bf16.msra.mxu1 %v32900_v49  ;;  %26495 = vmatprep.subr.bf16.mxu0 %v32929_v14 }
 0x495   : > { %27211 = vmatprep.subr.bf16.mxu1 %v32903_v33 }
 0x497   : > { %26497 = vmatpush3.bf16.msra.mxu0 %v32929_v14  ;;  %23476 = vmatmul.mubr.msk.f32.vlgmr.msra.gmra.mrb[4].mxu1 %vm182_vm0, %v30982_v3  ;;  %v32970_v3 = vld [vmem:[#allocation59_spill] sm:$0xff] }
 0x498   : > { %27213 = vmatpush3.bf16.msra.mxu1 %v32903_v33  ;;  %26499 = vmatprep.subr.bf16.mxu0 %v32931_v22  ;;  %v31003_v33 = vpop.permute.xlu0 %9859 }
 0x499   : > { %27215 = vmatprep.subr.bf16.mxu1 %v32904_v63  ;;  %23608 = vmatprep.mubr.msk.f32.mxu1 %vm182_vm0, %v30986_v29 }
 0x49b   : > { %26501 = vmatpush3.bf16.msra.mxu0 %v32931_v22 }
 0x49c   : > { %27217 = vmatpush3.bf16.msra.mxu1 %v32904_v63  ;;  %26503 = vmatprep.subr.bf16.mxu0 %v32933_v47  ;;  %v31012_v63 = vpop.permute.xlu1 %13363 }
 0x49d   : > { %27219 = vmatprep.subr.bf16.mxu1 %v32906_v43  ;;  %32961 = vst [vmem:[#allocation10_spill] sm:$0xff] %v31012_v63 }
 0x49f   : > { %26505 = vmatpush3.bf16.msra.mxu0 %v32933_v47 }
 0x4a0   : > { %27221 = vmatpush3.bf16.msra.mxu1 %v32906_v43  ;;  %26507 = vmatprep.subr.bf16.mxu0 %v32935_v41  ;;  %v32962_v43 = vld [vmem:[#allocation61_spill] sm:$0xff] }
 0x4a1   : > { %27223 = vmatprep.subr.bf16.mxu1 %v32907_v2 }
 0x4a2   : > { %22754 = vmatmul.mubr.msk.f32.vlgmr.msra.gmra.mrb[6].mxu0 %vm182_vm0, %v30575_v40 }
 0x4a3   : > { %26509 = vmatpush3.bf16.msra.mxu0 %v32935_v41  ;;  %22772 = vmatprep.mubr.msk.f32.mxu0 %vm182_vm0, %v31003_v33 }
 0x4a4   : > { %27225 = vmatpush3.bf16.msra.mxu1 %v32907_v2  ;;  %26511 = vmatprep.subr.bf16.mxu0 %v32938_v9  ;;  %v31029_v2 = vpop.permute.xlu1 %9861 }
 0x4a5   : > { %27227 = vmatprep.subr.bf16.mxu1 %v32908_v24 }
 0x4a7   : > { %26513 = vmatpush3.bf16.msra.mxu0 %v32938_v9  ;;  %23609 = vmatmul.mubr.msk.f32.vlgmr.msra.gmra.mrb[6].mxu1 %vm182_vm0, %v31012_v63 }
 0x4a8   : > { %27229 = vmatpush3.bf16.msra.mxu1 %v32908_v24  ;;  %26515 = vmatprep.subr.bf16.mxu0 %v32940_v36  ;;  %v31036_v24 = vpop.permute.xlu0 %9944 }
 0x4a9   : > { %27231 = vmatprep.subr.bf16.mxu1 %v32911_v6  ;;  %23627 = vmatprep.mubr.msk.f32.mxu1 %vm182_vm0, %v32962_v43 }
 0x4ab   : > { %26517 = vmatpush3.bf16.msra.mxu0 %v32940_v36 }
 0x4ac   : > { %27233 = vmatpush3.bf16.msra.mxu1 %v32911_v6  ;;  %26519 = vmatprep.subr.bf16.mxu0 %v32944_v26  ;;  %v31044_v6 = vpop.permute.xlu1 %13523 }
 0x4ad   : > { %27235 = vmatprep.subr.bf16.mxu1 %v32912_v1  ;;  %32963 = vst [vmem:[#allocation11_spill] sm:$0xff] %v31044_v6 }
 0x4af   : > { %26521 = vmatpush3.bf16.msra.mxu0 %v32944_v26 }
 0x4b0   : > { %27237 = vmatpush3.bf16.msra.mxu1 %v32912_v1  ;;  %26523 = vmatprep.subr.bf16.mxu0 %v32947_v48  ;;  %v32966_v1 = vld [vmem:[#allocation56_spill] sm:$0xff] }
 0x4b1   : > { %27239 = vmatprep.subr.bf16.mxu1 %v32914_v21 }
 0x4b2   : > { %22773 = vmatmul.mubr.msk.f32.vlgmr.msra.gmra.mrb[6].mxu0 %vm182_vm0, %v31029_v2 }
 0x4b3   : > { %26525 = vmatpush3.bf16.msra.mxu0 %v32947_v48  ;;  %22791 = vmatprep.mubr.msk.f32.mxu0 %vm182_vm0, %v31036_v24 }
 0x4b4   : > { %27241 = vmatpush3.bf16.msra.mxu1 %v32914_v21  ;;  %26527 = vmatprep.subr.bf16.mxu0 %v32950_v57  ;;  %v31059_v21 = vpop.permute.xlu0 %9946 }
 0x4b5   : > { %27243 = vmatprep.subr.bf16.mxu1 %v32915_v56 }
 0x4b7   : > { %26529 = vmatpush3.bf16.msra.mxu0 %v32950_v57  ;;  %23628 = vmatmul.mubr.msk.f32.vlgmr.msra.gmra.mrb[6].mxu1 %vm182_vm0, %v30545_v10 }
 0x4b8   : > { %27245 = vmatpush3.bf16.msra.mxu1 %v32915_v56  ;;  %26531 = vmatprep.subr.bf16.mxu0 %v32952_v37  ;;  %v32964_v56 = vld [vmem:[#allocation55_spill] sm:$0xff] }
 0x4b9   : > { %27247 = vmatprep.subr.bf16.mxu1 %v32918_v7  ;;  %23646 = vmatprep.mubr.msk.f32.mxu1 %vm182_vm0, %v31044_v6 }
 0x4bb   : > { %26533 = vmatpush3.bf16.msra.mxu0 %v32952_v37 }
 0x4bc   : > { %27249 = vmatpush3.bf16.msra.mxu1 %v32918_v7  ;;  %26535 = vmatprep.subr.bf16.mxu0 %v32953_v20  ;;  %v31070_v7 = vpop.permute.xlu1 %13525 }
 0x4bd   : > { %27251 = vmatprep.subr.bf16.mxu1 %v32922_v52  ;;  %32965 = vst [vmem:[#allocation12_spill] sm:$0xff] %v31070_v7 }
 0x4bf   : > { %26537 = vmatpush3.bf16.msra.mxu0 %v32953_v20 }
 0x4c0   : > { %27253 = vmatpush3.bf16.msra.mxu1 %v32922_v52  ;;  %26539 = vmatprep.subr.bf16.mxu0 %v32964_v56  ;;  %v32967_v52 = vld [vmem:[#allocation57_spill] sm:$0xff] }
 0x4c1   : > { %27255 = vmatprep.subr.bf16.mxu1 %v32923_v25 }
 0x4c2   : > { %22792 = vmatmul.mubr.msk.f32.vlgmr.msra.gmra.mrb[6].mxu0 %vm182_vm0, %v31059_v21 }
 0x4c3   : > { %26541 = vmatpush3.bf16.msra.mxu0 %v32964_v56  ;;  %22810 = vmatprep.mubr.msk.f32.mxu0 %vm182_vm0, %v30563_v4 }
 0x4c4   : > { %27257 = vmatpush3.bf16.msra.mxu1 %v32923_v25  ;;  %26543 = vmatprep.subr.bf16.mxu0 %v32966_v1  ;;  %v32968_v25 = vld [vmem:[#allocation58_spill] sm:$0xff] }
 0x4c5   : > { %27259 = vmatprep.subr.bf16.mxu1 %v32924_v0 }
 0x4c7   : > { %26545 = vmatpush3.bf16.msra.mxu0 %v32966_v1  ;;  %23647 = vmatmul.mubr.msk.f32.vlgmr.msra.gmra.mrb[6].mxu1 %vm182_vm0, %v31070_v7 }
 0x4c8   : > { %27261 = vmatpush3.bf16.msra.mxu1 %v32924_v0  ;;  %26547 = vmatprep.subr.bf16.mxu0 %v32967_v52 }
 0x4c9   : > { %27263 = vmatprep.subr.bf16.mxu1 %v32926_v60  ;;  %23665 = vmatprep.mubr.msk.f32.mxu1 %vm182_vm0, %v32962_v43  ;;  %v32972_v43 = vld [vmem:[#allocation60_spill] sm:$0xff] }
 0x4cb   : > { %26549 = vmatpush3.bf16.msra.mxu0 %v32967_v52 }
 0x4cc   : > { %27265 = vmatpush3.bf16.msra.mxu1 %v32926_v60  ;;  %26551 = vmatprep.subr.bf16.mxu0 %v32968_v25 }
 0x4cd   : > { %27267 = vmatprep.subr.bf16.mxu1 %v32969_v19 }
 0x4cf   : > { %26553 = vmatpush3.bf16.msra.mxu0 %v32968_v25 }
 0x4d0   : > { %27269 = vmatpush3.bf16.msra.mxu1 %v32969_v19  ;;  %26555 = vmatprep.subr.bf16.mxu0 %v32970_v3 }
 0x4d1   : > { %27271 = vmatprep.subr.bf16.mxu1 %v32971_v8 }
 0x4d2   : > { %22811 = vmatmul.mubr.msk.f32.vlgmr.msra.gmra.mrb[4].mxu0 %vm182_vm0, %v30575_v40 }
 0x4d3   : > { %26557 = vmatpush3.bf16.msra.mxu0 %v32970_v3  ;;  %22829 = vmatprep.mubr.msk.f32.mxu0 %vm182_vm0, %v31003_v33 }
 0x4d4   : > { %27273 = vmatpush3.bf16.msra.mxu1 %v32971_v8  ;;  %26559 = vmatprep.subr.bf16.mxu0 %v32972_v43 }
 0x4d5   : > { %27275 = vmatprep.subr.bf16.mxu1 %v32973_v46 }
 0x4d7   : > { %23666 = vmatmul.mubr.msk.f32.vlgmr.msra.gmra.mrb[4].mxu1 %vm182_vm0, %v30545_v10  ;;  %26561 = vmatpush3.bf16.msra.mxu0 %v32972_v43  ;;  %v32976_v10 = vld [vmem:[#allocation63_spill] sm:$0xff] }
 0x4d8   : > { %27277 = vmatpush3.bf16.msra.mxu1 %v32973_v46  ;;  %23684 = vmatprep.mubr.msk.f32.mxu1 %vm182_vm0, %v30986_v29  ;;  %v32978_v29 = vld [vmem:[#allocation64_spill] sm:$0xff] }
 0x4d9   : > { %26563 = vmatprep.subr.bf16.mxu0 %v32974_v35  ;;  %27279 = vmatprep.subr.bf16.mxu1 %v32975_v18 }
 0x4da   : > { %v22565_v11 = vpop.f32.mrb[2].mxu1 }
 0x4db   : > { %18337 = vst [vmem:[%s30271_s27 + $0x28] sm:$0xff] %v22565_v11  ;;  %v9049_v27 = vpop.f32.mrb[3].mxu1  ;;  %26565 = vmatpush3.bf16.msra.mxu0 %v32974_v35  ;;  %v31119_v11 = vld [vmem:[%s28782_s24 + $0xc0] sm:$0xff] }
 0x4dc   : > { %18336 = vst [vmem:[%s30271_s27 + $0x20] sm:$0xff] %v9049_v27  ;;  %27281 = vmatpush3.bf16.msra.mxu1 %v32975_v18  ;;  %26567 = vmatprep.subr.bf16.mxu0 %v32976_v10  ;;  %v32980_v27 = vld [vmem:[#allocation65_spill] sm:$0xff] }
 0x4dd   : > { %27283 = vmatprep.subr.bf16.mxu1 %v32977_v16  ;;  %15590 = vrot.lane.b32.xlu0 %v31119_v11, %s28674_s21 }
 0x4df   : > { %26569 = vmatpush3.bf16.msra.mxu0 %v32976_v10 }
 0x4e0   : > { %27285 = vmatpush3.bf16.msra.mxu1 %v32977_v16  ;;  %26571 = vmatprep.subr.bf16.mxu0 %v32978_v29 }
 0x4e1   : > { %27287 = vmatprep.subr.bf16.mxu1 %v32979_v30  ;;  %15675 = vrot.lane.b32.xlu0 %v31119_v11, %s28675_s23 }
 0x4e2   : > { %22830 = vmatmul.mubr.msk.f32.vlgmr.msra.gmra.mrb[4].mxu0 %vm182_vm0, %v31029_v2 }
 0x4e3   : > { %26573 = vmatpush3.bf16.msra.mxu0 %v32978_v29  ;;  %22848 = vmatprep.mubr.msk.f32.mxu0 %vm182_vm0, %v31036_v24 }
 0x4e4   : > { %27289 = vmatpush3.bf16.msra.mxu1 %v32979_v30  ;;  %26575 = vmatprep.subr.bf16.mxu0 %v32980_v27 }
 0x4e5   : > { %27291 = vmatprep.subr.bf16.mxu1 %v32981_v62 }
 0x4e7   : > { %23685 = vmatmul.mubr.msk.f32.vlgmr.msra.gmra.mrb[4].mxu1 %vm182_vm0, %v31012_v63  ;;  %26577 = vmatpush3.bf16.msra.mxu0 %v32980_v27  ;;  %v32983_v63 = vld [vmem:[#allocation67_spill] sm:$0xff] }
 0x4e8   : > { %27293 = vmatpush3.bf16.msra.mxu1 %v32981_v62  ;;  %23703 = vmatprep.mubr.msk.f32.mxu1 %vm182_vm0, %v31044_v6  ;;  %v32984_v6 = vld [vmem:[#allocation92_spill] sm:$0xff] }
 0x4e9   : > { %26579 = vmatprep.subr.bf16.mxu0 %v32982_v44  ;;  %27295 = vmatprep.subr.bf16.mxu1 %v32946_v51 }
 0x4eb   : > { %26581 = vmatpush3.bf16.msra.mxu0 %v32982_v44 }
 0x4ec   : > { %27297 = vmatpush3.bf16.msra.mxu1 %v32946_v51  ;;  %26583 = vmatprep.subr.bf16.mxu0 %v32983_v63 }
 0x4ed   : > { %27299 = vmatprep.subr.bf16.mxu1 %v32949_v32 }
 0x4ef   : > { %26585 = vmatpush3.bf16.msra.mxu0 %v32983_v63 }
 0x4f0   : > { %27301 = vmatpush3.bf16.msra.mxu1 %v32949_v32  ;;  %26587 = vmatprep.subr.bf16.mxu0 %v32984_v6 }
 0x4f1   : > { %27303 = vmatprep.subr.bf16.mxu1 %v32951_v28 }
 0x4f2   : > { %22849 = vmatmul.mubr.msk.f32.vlgmr.msra.gmra.mrb[4].mxu0 %vm182_vm0, %v31059_v21 }
 0x4f3   : > { %26589 = vmatpush3.bf16.msra.mxu0 %v32984_v6  ;;  %22867 = vmatprep.mubr.msk.f32.mxu0 %vm182_vm0, %v30563_v4  ;;  %v32987_v6 = vld [vmem:[#allocation78_spill] sm:$0xff]  ;;  %v32988_v4 = vld [vmem:[#allocation95_spill] sm:$0xff] }
 0x4f4   : > { %27305 = vmatpush3.bf16.msra.mxu1 %v32951_v28  ;;  %26591 = vmatprep.subr.bf16.mxu0 %v32985_v50 }
 0x4f5   : > { %27355 = vmatprep.subr.bf16.mxu1 %v32927_v42 }
 0x4f7   : > { %23704 = vmatmul.mubr.msk.f32.vlgmr.msra.gmra.mrb[4].mxu1 %vm182_vm0, %v31070_v7  ;;  %26593 = vmatpush3.bf16.msra.mxu0 %v32985_v50  ;;  %v31186_v7 = vpop.permute.xlu0 %14155 }
 0x4f8   : > { %27357 = vmatpush3.bf16.msra.mxu1 %v32927_v42  ;;  %26595 = vmatprep.subr.bf16.mxu0 %v32986_v59  ;;  %v32989_v42 = vld [vmem:[#allocation96_spill] sm:$0xff]  ;;  %32991 = vst [vmem:[#allocation97_spill] sm:$0xff] %v31186_v7 }
 0x4f9   : > { %27359 = vmatprep.subr.bf16.mxu1 %v32929_v14  ;;  %23779 = vmatprep.mubr.msk.f32.mxu1 %vm182_vm0, %v32987_v6 }
 0x4fb   : > { %26597 = vmatpush3.bf16.msra.mxu0 %v32986_v59 }
 0x4fc   : > { %27361 = vmatpush3.bf16.msra.mxu1 %v32929_v14  ;;  %26599 = vmatprep.subr.bf16.mxu0 %v32988_v4  ;;  %v32990_v14 = vld [vmem:[#allocation98_spill] sm:$0xff] }
 0x4fd   : > { %27363 = vmatprep.subr.bf16.mxu1 %v32931_v22 }
 0x4ff   : > { %26601 = vmatpush3.bf16.msra.mxu0 %v32988_v4 }
 0x500   : > { %27365 = vmatpush3.bf16.msra.mxu1 %v32931_v22  ;;  %26603 = vmatprep.subr.bf16.mxu0 %v32989_v42  ;;  %v32992_v22 = vld [vmem:[#allocation32_spill] sm:$0xff] }
 0x501   : > { %27367 = vmatprep.subr.bf16.mxu1 %v32933_v47 }
 0x502   : > { %22868 = vmatmul.mubr.msk.f32.vlgmr.msra.gmra.mrb[2].mxu0 %vm182_vm0, %v30575_v40  ;;  %v32993_v40 = vld [vmem:[#allocation100_spill] sm:$0xff] }
 0x503   : > { %26605 = vmatpush3.bf16.msra.mxu0 %v32989_v42  ;;  %22886 = vmatprep.mubr.msk.f32.mxu0 %vm182_vm0, %v31003_v33  ;;  %v32997_v33 = vld [vmem:[#allocation103_spill] sm:$0xff] }
 0x504   : > { %27369 = vmatpush3.bf16.msra.mxu1 %v32933_v47  ;;  %26607 = vmatprep.subr.bf16.mxu0 %v32990_v14  ;;  %v32994_v47 = vld [vmem:[#allocation101_spill] sm:$0xff] }
 0x505   : > { %27371 = vmatprep.subr.bf16.mxu1 %v32935_v41 }
 0x507   : > { %26609 = vmatpush3.bf16.msra.mxu0 %v32990_v14  ;;  %23780 = vmatmul.mubr.msk.f32.vlgmr.msra.gmra.mrb[6].mxu1 %vm182_vm0, %v32992_v22 }
 0x508   : > { %27373 = vmatpush3.bf16.msra.mxu1 %v32935_v41  ;;  %26611 = vmatprep.subr.bf16.mxu0 %v32993_v40  ;;  %v32995_v41 = vld [vmem:[#allocation102_spill] sm:$0xff] }
 0x509   : > { %27375 = vmatprep.subr.bf16.mxu1 %v32938_v9  ;;  %23798 = vmatprep.mubr.msk.f32.mxu1 %vm182_vm0, %v31186_v7 }
 0x50b   : > { %26613 = vmatpush3.bf16.msra.mxu0 %v32993_v40 }
 0x50c   : > { %27377 = vmatpush3.bf16.msra.mxu1 %v32938_v9  ;;  %26615 = vmatprep.subr.bf16.mxu0 %v32994_v47  ;;  %v31210_v9 = vpop.permute.xlu1 %14157 }
 0x50d   : > { %27379 = vmatprep.subr.bf16.mxu1 %v32940_v36  ;;  %32996 = vst [vmem:[#allocation13_spill] sm:$0xff] %v31210_v9 }
 0x50f   : > { %26617 = vmatpush3.bf16.msra.mxu0 %v32994_v47  ;;  %v33019_v47 = vld [vmem:[#allocation107_spill] sm:$0xff] }
 0x510   : > { %27381 = vmatpush3.bf16.msra.mxu1 %v32940_v36  ;;  %26619 = vmatprep.subr.bf16.mxu0 %v32995_v41  ;;  %v31214_v36 = vpop.permute.xlu0 %14240 }
 0x511   : > { %27383 = vmatprep.subr.bf16.mxu1 %v32944_v26  ;;  %32998 = vst [vmem:[#allocation14_spill] sm:$0xff] %v31214_v36 }
 0x512   : > { %22887 = vmatmul.mubr.msk.f32.vlgmr.msra.gmra.mrb[2].mxu0 %vm182_vm0, %v31029_v2  ;;  %v32999_v2 = vld [vmem:[#allocation104_spill] sm:$0xff] }
 0x513   : > { %26621 = vmatpush3.bf16.msra.mxu0 %v32995_v41  ;;  %22905 = vmatprep.mubr.msk.f32.mxu0 %vm182_vm0, %v31036_v24  ;;  %v33016_v41 = vld [vmem:[#allocation79_spill] sm:$0xff] }
 0x514   : > { %27385 = vmatpush3.bf16.msra.mxu1 %v32944_v26  ;;  %26623 = vmatprep.subr.bf16.mxu0 %v32997_v33  ;;  %v33000_v26 = vld [vmem:[#allocation105_spill] sm:$0xff] }
 0x515   : > { %27387 = vmatprep.subr.bf16.mxu1 %v32947_v48 }
 0x517   : > { %26625 = vmatpush3.bf16.msra.mxu0 %v32997_v33  ;;  %23799 = vmatmul.mubr.msk.f32.vlgmr.msra.gmra.mrb[6].mxu1 %vm182_vm0, %v31210_v9  ;;  %v33014_v33 = vld [vmem:[#allocation77_spill] sm:$0xff] }
 0x518   : > { %27389 = vmatpush3.bf16.msra.mxu1 %v32947_v48  ;;  %26627 = vmatprep.subr.bf16.mxu0 %v32999_v2  ;;  %v33001_v48 = vld [vmem:[#allocation119_spill] sm:$0xff] }
 0x519   : > { %27391 = vmatprep.subr.bf16.mxu1 %v32950_v57  ;;  %23817 = vmatprep.mubr.msk.f32.mxu1 %vm182_vm0, %v31214_v36 }
 0x51b   : > { %26629 = vmatpush3.bf16.msra.mxu0 %v32999_v2  ;;  %v33007_v2 = vld [vmem:[#allocation71_spill] sm:$0xff] }
 0x51c   : > { %27393 = vmatpush3.bf16.msra.mxu1 %v32950_v57  ;;  %26631 = vmatprep.subr.bf16.mxu0 %v33000_v26  ;;  %v31238_v57 = vpop.permute.xlu1 %14242 }
 0x51d   : > { %27395 = vmatprep.subr.bf16.mxu1 %v32952_v37  ;;  %33002 = vst [vmem:[#allocation99_spill] sm:$0xff] %v31238_v57 }
 0x51f   : > { %26633 = vmatpush3.bf16.msra.mxu0 %v33000_v26  ;;  %v33006_v26 = vld [vmem:[#allocation70_spill] sm:$0xff] }
 0x520   : > { %27397 = vmatpush3.bf16.msra.mxu1 %v32952_v37  ;;  %26635 = vmatprep.subr.bf16.mxu0 %v29087_v13  ;;  %v31257_v37 = vpop.permute.xlu0 %10576  ;;  %v31281_v24 = vpop.permute.xlu1 %10578 }
 0x521   : > { %27399 = vmatprep.subr.bf16.mxu1 %v32953_v20 }
 0x522   : > { %22906 = vmatmul.mubr.msk.f32.vlgmr.msra.gmra.mrb[2].mxu0 %vm182_vm0, %v31059_v21  ;;  %v31291_v21 = vld [vmem:[%s28782_s24 + $0xc1] sm:$0xff] }
 0x523   : > { %26637 = vmatpush3.bf16.msra.mxu0 %v29087_v13  ;;  %22924 = vmatprep.mubr.msk.f32.mxu0 %vm182_vm0, %v33001_v48 }
 0x524   : > { %27401 = vmatpush3.bf16.msra.mxu1 %v32953_v20  ;;  %26639 = vmatprep.subr.bf16.mxu0 %v32886_v38  ;;  %v33003_v20 = vld [vmem:[#allocation36_spill] sm:$0xff] }
 0x525   : > { %27403 = vmatprep.subr.bf16.mxu1 %v32964_v56  ;;  %16076 = vrot.lane.b32.xlu0 %v31291_v21, %s28674_s21 }
 0x527   : > { %26641 = vmatpush3.bf16.msra.mxu0 %v32886_v38  ;;  %23818 = vmatmul.mubr.msk.f32.vlgmr.msra.gmra.mrb[6].mxu1 %vm182_vm0, %v31238_v57 }
 0x528   : > { %27405 = vmatpush3.bf16.msra.mxu1 %v32964_v56  ;;  %26643 = vmatprep.subr.bf16.mxu0 %v32888_v58 }
 0x529   : > { %27407 = vmatprep.subr.bf16.mxu1 %v32966_v1  ;;  %23836 = vmatprep.mubr.msk.f32.mxu1 %vm182_vm0, %v32987_v6  ;;  %v31285_v6 = vpop.permute.xlu0 %10661 }
 0x52a   : > { %16161 = vrot.lane.b32.xlu0 %v31291_v21, %s28675_s23 }
 0x52b   : > { %26645 = vmatpush3.bf16.msra.mxu0 %v32888_v58 }
 0x52c   : > { %27409 = vmatpush3.bf16.msra.mxu1 %v32966_v1  ;;  %26647 = vmatprep.subr.bf16.mxu0 %v32889_v61 }
 0x52d   : > { %27411 = vmatprep.subr.bf16.mxu1 %v32967_v52 }
 0x52f   : > { %26649 = vmatpush3.bf16.msra.mxu0 %v32889_v61 }
 0x530   : > { %27413 = vmatpush3.bf16.msra.mxu1 %v32967_v52  ;;  %26651 = vmatprep.subr.bf16.mxu0 %v32890_v31 }
 0x531   : > { %27415 = vmatprep.subr.bf16.mxu1 %v32968_v25 }
 0x532   : > { %22925 = vmatmul.mubr.msk.f32.vlgmr.msra.gmra.mrb[6].mxu0 %vm182_vm0, %v33003_v20 }
 0x533   : > { %26653 = vmatpush3.bf16.msra.mxu0 %v32890_v31  ;;  %22943 = vmatprep.mubr.msk.f32.mxu0 %vm182_vm0, %v31257_v37 }
 0x534   : > { %27417 = vmatpush3.bf16.msra.mxu1 %v32968_v25  ;;  %26655 = vmatprep.subr.bf16.mxu0 %v32894_v15 }
 0x535   : > { %27419 = vmatprep.subr.bf16.mxu1 %v32970_v3 }
 0x537   : > { %23837 = vmatmul.mubr.msk.f32.vlgmr.msra.gmra.mrb[4].mxu1 %vm182_vm0, %v32992_v22  ;;  %26657 = vmatpush3.bf16.msra.mxu0 %v32894_v15  ;;  %v31299_v22 = vld [vmem:[%s28782_s24 + $0xc9] sm:$0xff] }
 0x538   : > { %27421 = vmatpush3.bf16.msra.mxu1 %v32970_v3  ;;  %23855 = vmatprep.mubr.msk.f32.mxu1 %vm182_vm0, %v31186_v7  ;;  %v33005_v7 = vld [vmem:[#allocation69_spill] sm:$0xff] }
 0x539   : > { %26659 = vmatprep.subr.bf16.mxu0 %v32895_v23  ;;  %27423 = vmatprep.subr.bf16.mxu1 %v32972_v43 }
 0x53a   : > { %16078 = vrot.lane.b32.xlu1 %v31299_v22, %s28674_s21 }
 0x53b   : > { %26661 = vmatpush3.bf16.msra.mxu0 %v32895_v23 }
 0x53c   : > { %27425 = vmatpush3.bf16.msra.mxu1 %v32972_v43  ;;  %26663 = vmatprep.subr.bf16.mxu0 %v32896_v5 }
 0x53d   : > { %27427 = vmatprep.subr.bf16.mxu1 %v32974_v35 }
 0x53e   : > { %16163 = vrot.lane.b32.xlu1 %v31299_v22, %s28675_s23 }
 0x53f   : > { %26665 = vmatpush3.bf16.msra.mxu0 %v32896_v5 }
 0x540   : > { %27429 = vmatpush3.bf16.msra.mxu1 %v32974_v35  ;;  %26667 = vmatprep.subr.bf16.mxu0 %v32897_v17 }
 0x541   : > { %27431 = vmatprep.subr.bf16.mxu1 %v32976_v10 }
 0x542   : > { %22944 = vmatmul.mubr.msk.f32.vlgmr.msra.gmra.mrb[6].mxu0 %vm182_vm0, %v31281_v24 }
 0x543   : > { %26669 = vmatpush3.bf16.msra.mxu0 %v32897_v17  ;;  %22962 = vmatprep.mubr.msk.f32.mxu0 %vm182_vm0, %v31285_v6 }
 0x544   : > { %27433 = vmatpush3.bf16.msra.mxu1 %v32976_v10  ;;  %26671 = vmatprep.subr.bf16.mxu0 %v32898_v34 }
 0x545   : > { %27435 = vmatprep.subr.bf16.mxu1 %v32978_v29 }
 0x547   : > { %23856 = vmatmul.mubr.msk.f32.vlgmr.msra.gmra.mrb[4].mxu1 %vm182_vm0, %v31210_v9  ;;  %26673 = vmatpush3.bf16.msra.mxu0 %v32898_v34  ;;  %v33004_v9 = vld [vmem:[#allocation68_spill] sm:$0xff] }
 0x548   : > { %27437 = vmatpush3.bf16.msra.mxu1 %v32978_v29  ;;  %23874 = vmatprep.mubr.msk.f32.mxu1 %vm182_vm0, %v31214_v36  ;;  %v31323_v36 = vpop.permute.xlu1 %10663 }
 0x549   : > { %26675 = vmatprep.subr.bf16.mxu0 %v32899_v53  ;;  %27439 = vmatprep.subr.bf16.mxu1 %v32980_v27 }
 0x54b   : > { %26677 = vmatpush3.bf16.msra.mxu0 %v32899_v53 }
 0x54c   : > { %27441 = vmatpush3.bf16.msra.mxu1 %v32980_v27  ;;  %26679 = vmatprep.subr.bf16.mxu0 %v32900_v49 }
 0x54d   : > { %27443 = vmatprep.subr.bf16.mxu1 %v32982_v44 }
 0x54f   : > { %26681 = vmatpush3.bf16.msra.mxu0 %v32900_v49 }
 0x550   : > { %27445 = vmatpush3.bf16.msra.mxu1 %v32982_v44  ;;  %26683 = vmatprep.subr.bf16.mxu0 %v33004_v9 }
 0x551   : > { %27447 = vmatprep.subr.bf16.mxu1 %v32983_v63 }
 0x552   : > { %22963 = vmatmul.mubr.msk.f32.vlgmr.msra.gmra.mrb[6].mxu0 %vm182_vm0, %v31323_v36 }
 0x553   : > { %26685 = vmatpush3.bf16.msra.mxu0 %v33004_v9  ;;  %22981 = vmatprep.mubr.msk.f32.mxu0 %vm182_vm0, %v33001_v48 }
 0x554   : > { %27449 = vmatpush3.bf16.msra.mxu1 %v32983_v63  ;;  %26687 = vmatprep.subr.bf16.mxu0 %v33005_v7 }
 0x555   : > { %27499 = vmatprep.subr.bf16.mxu1 %v29087_v13 }
 0x557   : > { %23875 = vmatmul.mubr.msk.f32.vlgmr.msra.gmra.mrb[4].mxu1 %vm182_vm0, %v31238_v57  ;;  %26689 = vmatpush3.bf16.msra.mxu0 %v33005_v7  ;;  %v31360_v57 = vpop.permute.xlu0 %14872 }
 0x558   : > { %27501 = vmatpush3.bf16.msra.mxu1 %v29087_v13  ;;  %26691 = vmatprep.subr.bf16.mxu0 %v33006_v26  ;;  %v33008_v13 = vld [vmem:[#allocation72_spill] sm:$0xff]  ;;  %33010 = vst [vmem:[#allocation15_spill] sm:$0xff] %v31360_v57 }
 0x559   : > { %27503 = vmatprep.subr.bf16.mxu1 %v32886_v38  ;;  %23950 = vmatprep.mubr.msk.f32.mxu1 %vm182_vm0, %v30937_v39 }
 0x55b   : > { %26693 = vmatpush3.bf16.msra.mxu0 %v33006_v26 }
 0x55c   : > { %27505 = vmatpush3.bf16.msra.mxu1 %v32886_v38  ;;  %26695 = vmatprep.subr.bf16.mxu0 %v33007_v2  ;;  %v33009_v38 = vld [vmem:[#allocation73_spill] sm:$0xff] }
 0x55d   : > { %27507 = vmatprep.subr.bf16.mxu1 %v32888_v58 }
 0x55f   : > { %26697 = vmatpush3.bf16.msra.mxu0 %v33007_v2 }
 0x560   : > { %27509 = vmatpush3.bf16.msra.mxu1 %v32888_v58  ;;  %26699 = vmatprep.subr.bf16.mxu0 %v33008_v13  ;;  %v33011_v58 = vld [vmem:[#allocation74_spill] sm:$0xff] }
 0x561   : > { %27511 = vmatprep.subr.bf16.mxu1 %v32889_v61 }
 0x562   : > { %22982 = vmatmul.mubr.msk.f32.vlgmr.msra.gmra.mrb[4].mxu0 %vm182_vm0, %v33003_v20 }
 0x563   : > { %26701 = vmatpush3.bf16.msra.mxu0 %v33008_v13  ;;  %23000 = vmatprep.mubr.msk.f32.mxu0 %vm182_vm0, %v31257_v37 }
 0x564   : > { %27513 = vmatpush3.bf16.msra.mxu1 %v32889_v61  ;;  %26703 = vmatprep.subr.bf16.mxu0 %v33009_v38  ;;  %v33012_v61 = vld [vmem:[#allocation75_spill] sm:$0xff] }
 0x565   : > { %27515 = vmatprep.subr.bf16.mxu1 %v32890_v31 }
 0x567   : > { %26705 = vmatpush3.bf16.msra.mxu0 %v33009_v38  ;;  %23951 = vmatmul.mubr.msk.f32.vlgmr.msra.gmra.mrb[6].mxu1 %vm182_vm0, %v30947_v12 }
 0x568   : > { %27517 = vmatpush3.bf16.msra.mxu1 %v32890_v31  ;;  %26707 = vmatprep.subr.bf16.mxu0 %v33011_v58  ;;  %v33013_v31 = vld [vmem:[#allocation76_spill] sm:$0xff] }
 0x569   : > { %27519 = vmatprep.subr.bf16.mxu1 %v32894_v15  ;;  %23969 = vmatprep.mubr.msk.f32.mxu1 %vm182_vm0, %v31360_v57 }
 0x56b   : > { %26709 = vmatpush3.bf16.msra.mxu0 %v33011_v58 }
 0x56c   : > { %27521 = vmatpush3.bf16.msra.mxu1 %v32894_v15  ;;  %26711 = vmatprep.subr.bf16.mxu0 %v33012_v61  ;;  %v31384_v15 = vpop.permute.xlu1 %14874 }
 0x56d   : > { %27523 = vmatprep.subr.bf16.mxu1 %v32895_v23 }
 0x56f   : > { %26713 = vmatpush3.bf16.msra.mxu0 %v33012_v61 }
 0x570   : > { %27525 = vmatpush3.bf16.msra.mxu1 %v32895_v23  ;;  %26715 = vmatprep.subr.bf16.mxu0 %v33013_v31  ;;  %v31388_v23 = vpop.permute.xlu0 %14957 }
 0x571   : > { %27527 = vmatprep.subr.bf16.mxu1 %v32896_v5  ;;  %33015 = vst [vmem:[#allocation16_spill] sm:$0xff] %v31388_v23 }
 0x572   : > { %23001 = vmatmul.mubr.msk.f32.vlgmr.msra.gmra.mrb[4].mxu0 %vm182_vm0, %v31281_v24 }
 0x573   : > { %26717 = vmatpush3.bf16.msra.mxu0 %v33013_v31  ;;  %23019 = vmatprep.mubr.msk.f32.mxu0 %vm182_vm0, %v31285_v6 }
 0x574   : > { %27529 = vmatpush3.bf16.msra.mxu1 %v32896_v5  ;;  %26719 = vmatprep.subr.bf16.mxu0 %v33014_v33  ;;  %v33017_v5 = vld [vmem:[#allocation80_spill] sm:$0xff] }
 0x575   : > { %27531 = vmatprep.subr.bf16.mxu1 %v32897_v17 }
 0x577   : > { %26721 = vmatpush3.bf16.msra.mxu0 %v33014_v33  ;;  %23970 = vmatmul.mubr.msk.f32.vlgmr.msra.gmra.mrb[6].mxu1 %vm182_vm0, %v31384_v15 }
 0x578   : > { %27533 = vmatpush3.bf16.msra.mxu1 %v32897_v17  ;;  %26723 = vmatprep.subr.bf16.mxu0 %v33016_v41  ;;  %v33018_v17 = vld [vmem:[#allocation106_spill] sm:$0xff] }
 0x579   : > { %27535 = vmatprep.subr.bf16.mxu1 %v32898_v34  ;;  %23988 = vmatprep.mubr.msk.f32.mxu1 %vm182_vm0, %v31388_v23 }
 0x57b   : > { %26725 = vmatpush3.bf16.msra.mxu0 %v33016_v41 }
 0x57c   : > { %27537 = vmatpush3.bf16.msra.mxu1 %v32898_v34  ;;  %26727 = vmatprep.subr.bf16.mxu0 %v33017_v5  ;;  %v31412_v34 = vpop.permute.xlu1 %14959 }
 0x57d   : > { %27539 = vmatprep.subr.bf16.mxu1 %v32899_v53 }
 0x57f   : > { %26729 = vmatpush3.bf16.msra.mxu0 %v33017_v5 }
 0x580   : > { %27541 = vmatpush3.bf16.msra.mxu1 %v32899_v53  ;;  %26731 = vmatprep.subr.bf16.mxu0 %v33018_v17  ;;  %v33020_v53 = vld [vmem:[#allocation108_spill] sm:$0xff] }
 0x581   : > { %27543 = vmatprep.subr.bf16.mxu1 %v32900_v49 }
 0x582   : > { %23020 = vmatmul.mubr.msk.f32.vlgmr.msra.gmra.mrb[4].mxu0 %vm182_vm0, %v31323_v36 }
 0x583   : > { %26733 = vmatpush3.bf16.msra.mxu0 %v33018_v17  ;;  %23038 = vmatprep.mubr.msk.f32.mxu0 %vm182_vm0, %v33001_v48  ;;  %v33022_v48 = vld [vmem:[#allocation110_spill] sm:$0xff] }
 0x584   : > { %27545 = vmatpush3.bf16.msra.mxu1 %v32900_v49  ;;  %26735 = vmatprep.subr.bf16.mxu0 %v33019_v47  ;;  %v33021_v49 = vld [vmem:[#allocation109_spill] sm:$0xff] }
 0x585   : > { %27547 = vmatprep.subr.bf16.mxu1 %v33004_v9 }
 0x587   : > { %26737 = vmatpush3.bf16.msra.mxu0 %v33019_v47  ;;  %23989 = vmatmul.mubr.msk.f32.vlgmr.msra.gmra.mrb[6].mxu1 %vm182_vm0, %v31412_v34 }
 0x588   : > { %27549 = vmatpush3.bf16.msra.mxu1 %v33004_v9  ;;  %26739 = vmatprep.subr.bf16.mxu0 %v33020_v53 }
 0x589   : > { %27551 = vmatprep.subr.bf16.mxu1 %v33005_v7  ;;  %24007 = vmatprep.mubr.msk.f32.mxu1 %vm182_vm0, %v30937_v39  ;;  %v33023_v39 = vld [vmem:[#allocation111_spill] sm:$0xff] }
 0x58b   : > { %26741 = vmatpush3.bf16.msra.mxu0 %v33020_v53 }
 0x58c   : > { %27553 = vmatpush3.bf16.msra.mxu1 %v33005_v7  ;;  %26743 = vmatprep.subr.bf16.mxu0 %v33021_v49 }
 0x58d   : > { %27555 = vmatprep.subr.bf16.mxu1 %v33006_v26 }
 0x58f   : > { %26745 = vmatpush3.bf16.msra.mxu0 %v33021_v49 }
 0x590   : > { %27557 = vmatpush3.bf16.msra.mxu1 %v33006_v26  ;;  %26747 = vmatprep.subr.bf16.mxu0 %v33022_v48 }
 0x591   : > { %27559 = vmatprep.subr.bf16.mxu1 %v33007_v2 }
 0x592   : > { %23039 = vmatmul.mubr.msk.f32.vlgmr.msra.gmra.mrb[2].mxu0 %vm182_vm0, %v33003_v20  ;;  %v33024_v20 = vld [vmem:[#allocation112_spill] sm:$0xff] }
 0x593   : > { %26749 = vmatpush3.bf16.msra.mxu0 %v33022_v48  ;;  %23057 = vmatprep.mubr.msk.f32.mxu0 %vm182_vm0, %v31257_v37  ;;  %v33025_v37 = vld [vmem:[#allocation113_spill] sm:$0xff] }
 0x594   : > { %27561 = vmatpush3.bf16.msra.mxu1 %v33007_v2  ;;  %26751 = vmatprep.subr.bf16.mxu0 %v33023_v39 }
 0x595   : > { %27563 = vmatprep.subr.bf16.mxu1 %v33008_v13 }
 0x597   : > { %24008 = vmatmul.mubr.msk.f32.vlgmr.msra.gmra.mrb[4].mxu1 %vm182_vm0, %v30947_v12  ;;  %26753 = vmatpush3.bf16.msra.mxu0 %v33023_v39  ;;  %v33026_v12 = vld [vmem:[#allocation114_spill] sm:$0xff] }
 0x598   : > { %27565 = vmatpush3.bf16.msra.mxu1 %v33008_v13  ;;  %24026 = vmatprep.mubr.msk.f32.mxu1 %vm182_vm0, %v31360_v57  ;;  %v31459_v57 = vld [vmem:[%s28782_s24 + $0xc2] sm:$0xff] }
 0x599   : > { %26755 = vmatprep.subr.bf16.mxu0 %v33024_v20  ;;  %27567 = vmatprep.subr.bf16.mxu1 %v33009_v38 }
 0x59a   : > { %16562 = vrot.lane.b32.xlu0 %v31459_v57, %s28674_s21 }
 0x59b   : > { %26757 = vmatpush3.bf16.msra.mxu0 %v33024_v20  ;;  %v33027_v20 = vld [vmem:[#allocation115_spill] sm:$0xff] }
 0x59c   : > { %27569 = vmatpush3.bf16.msra.mxu1 %v33009_v38  ;;  %26759 = vmatprep.subr.bf16.mxu0 %v33025_v37 }
 0x59d   : > { %27571 = vmatprep.subr.bf16.mxu1 %v33011_v58 }
 0x59e   : > { %16647 = vrot.lane.b32.xlu0 %v31459_v57, %s28675_s23 }
 0x59f   : > { %26761 = vmatpush3.bf16.msra.mxu0 %v33025_v37  ;;  %v31467_v37 = vld [vmem:[%s28782_s24 + $0xca] sm:$0xff] }
 0x5a0   : > { %27573 = vmatpush3.bf16.msra.mxu1 %v33011_v58  ;;  %26763 = vmatprep.subr.bf16.mxu0 %v33026_v12 }
 0x5a1   : > { %27575 = vmatprep.subr.bf16.mxu1 %v33012_v61  ;;  %16564 = vrot.lane.b32.xlu1 %v31467_v37, %s28674_s21 }
 0x5a2   : > { %23058 = vmatmul.mubr.msk.f32.vlgmr.msra.gmra.mrb[2].mxu0 %vm182_vm0, %v31281_v24  ;;  %v33028_v24 = vld [vmem:[#allocation116_spill] sm:$0xff] }
 0x5a3   : > { %26765 = vmatpush3.bf16.msra.mxu0 %v33026_v12  ;;  %23076 = vmatprep.mubr.msk.f32.mxu0 %vm182_vm0, %v31285_v6  ;;  %v33029_v6 = vld [vmem:[#allocation117_spill] sm:$0xff] }
 0x5a4   : > { %27577 = vmatpush3.bf16.msra.mxu1 %v33012_v61  ;;  %26767 = vmatprep.subr.bf16.mxu0 %v33027_v20 }
 0x5a5   : > { %27579 = vmatprep.subr.bf16.mxu1 %v33013_v31  ;;  %16649 = vrot.lane.b32.xlu1 %v31467_v37, %s28675_s23 }
 0x5a7   : > { %24027 = vmatmul.mubr.msk.f32.vlgmr.msra.gmra.mrb[4].mxu1 %vm182_vm0, %v31384_v15  ;;  %26769 = vmatpush3.bf16.msra.mxu0 %v33027_v20 }
 0x5a8   : > { %27581 = vmatpush3.bf16.msra.mxu1 %v33013_v31  ;;  %24045 = vmatprep.mubr.msk.f32.mxu1 %vm182_vm0, %v31388_v23  ;;  %v31498_v23 = vld [vmem:[%s28782_s24 + $0x90] sm:$0xff] }
 0x5a9   : > { %26771 = vmatprep.subr.bf16.mxu0 %v33028_v24  ;;  %27583 = vmatprep.subr.bf16.mxu1 %v33014_v33 }
 0x5ab   : > { %26773 = vmatpush3.bf16.msra.mxu0 %v33028_v24 }
 0x5ac   : > { %27585 = vmatpush3.bf16.msra.mxu1 %v33014_v33  ;;  %26775 = vmatprep.subr.bf16.mxu0 %v33029_v6 }
 0x5ad   : > { %27587 = vmatprep.subr.bf16.mxu1 %v33016_v41 }
 0x5af   : > { %26777 = vmatpush3.bf16.msra.mxu0 %v33029_v6 }
 0x5b0   : > { %27589 = vmatpush3.bf16.msra.mxu1 %v33016_v41  ;;  %26827 = vmatprep.subr.bf16.mxu0 %v32924_v0 }
 0x5b1   : > { %27591 = vmatprep.subr.bf16.mxu1 %v33017_v5 }
 0x5b2   : > { %23077 = vmatmul.mubr.msk.f32.vlgmr.msra.gmra.mrb[2].mxu0 %vm182_vm0, %v31323_v36  ;;  %v33038_v36 = vld [vmem:[#allocation86_spill] sm:$0xff] }
 0x5b3   : > { %26829 = vmatpush3.bf16.msra.mxu0 %v32924_v0  ;;  %23152 = vmatprep.mubr.msk.f32.mxu0 %vm182_vm0, %v31498_v23 }
 0x5b4   : > { %27593 = vmatpush3.bf16.msra.mxu1 %v33017_v5  ;;  %26831 = vmatprep.subr.bf16.mxu0 %v32926_v60 }
 0x5b5   : > { %27643 = vmatprep.subr.bf16.mxu1 %v32924_v0 }
 0x5b7   : > { %24046 = vmatmul.mubr.msk.f32.vlgmr.msra.gmra.mrb[4].mxu1 %vm182_vm0, %v31412_v34  ;;  %26833 = vmatpush3.bf16.msra.mxu0 %v32926_v60 }
 0x5b8   : > { %27645 = vmatpush3.bf16.msra.mxu1 %v32924_v0  ;;  %26835 = vmatprep.subr.bf16.mxu0 %v32969_v19  ;;  %v31522_v0 = vld [vmem:[%s28782_s24 + $0x98] sm:$0xff] }
 0x5b9   : > { %27647 = vmatprep.subr.bf16.mxu1 %v32926_v60  ;;  %24121 = vmatprep.mubr.msk.f32.mxu1 %vm182_vm0, %v31119_v11 }
 0x5bb   : > { %26837 = vmatpush3.bf16.msra.mxu0 %v32969_v19 }
 0x5bc   : > { %27649 = vmatpush3.bf16.msra.mxu1 %v32926_v60  ;;  %26839 = vmatprep.subr.bf16.mxu0 %v32971_v8  ;;  %v33030_v60 = vld [vmem:[#allocation118_spill] sm:$0xff] }
 0x5bd   : > { %27651 = vmatprep.subr.bf16.mxu1 %v32969_v19 }
 0x5bf   : > { %26841 = vmatpush3.bf16.msra.mxu0 %v32971_v8 }
 0x5c0   : > { %27653 = vmatpush3.bf16.msra.mxu1 %v32969_v19  ;;  %26843 = vmatprep.subr.bf16.mxu0 %v32973_v46  ;;  %v31532_v19 = vpop.permute.xlu0 %15590 }
 0x5c1   : > { %27655 = vmatprep.subr.bf16.mxu1 %v32971_v8 }
 0x5c2   : > { %23153 = vmatmul.mubr.msk.f32.vlgmr.msra.gmra.mrb[6].mxu0 %vm182_vm0, %v31522_v0 }
 0x5c3   : > { %26845 = vmatpush3.bf16.msra.mxu0 %v32973_v46  ;;  %23171 = vmatprep.mubr.msk.f32.mxu0 %vm182_vm0, %v33030_v60 }
 0x5c4   : > { %27657 = vmatpush3.bf16.msra.mxu1 %v32971_v8  ;;  %26847 = vmatprep.subr.bf16.mxu0 %v32975_v18  ;;  %v33032_v8 = vld [vmem:[#allocation33_spill] sm:$0xff] }
 0x5c5   : > { %27659 = vmatprep.subr.bf16.mxu1 %v32973_v46 }
 0x5c7   : > { %26849 = vmatpush3.bf16.msra.mxu0 %v32975_v18  ;;  %24122 = vmatmul.mubr.msk.f32.vlgmr.msra.gmra.mrb[6].mxu1 %vm182_vm0, %v31127_v55 }
 0x5c8   : > { %27661 = vmatpush3.bf16.msra.mxu1 %v32973_v46  ;;  %26851 = vmatprep.subr.bf16.mxu0 %v32977_v16  ;;  %v33031_v46 = vld [vmem:[#allocation81_spill] sm:$0xff] }
 0x5c9   : > { %27663 = vmatprep.subr.bf16.mxu1 %v32975_v18  ;;  %24140 = vmatprep.mubr.msk.f32.mxu1 %vm182_vm0, %v31532_v19 }
 0x5cb   : > { %26853 = vmatpush3.bf16.msra.mxu0 %v32977_v16 }
 0x5cc   : > { %27665 = vmatpush3.bf16.msra.mxu1 %v32975_v18  ;;  %26855 = vmatprep.subr.bf16.mxu0 %v32979_v30  ;;  %v31556_v18 = vpop.permute.xlu1 %15592 }
 0x5cd   : > { %27667 = vmatprep.subr.bf16.mxu1 %v32977_v16 }
 0x5cf   : > { %26857 = vmatpush3.bf16.msra.mxu0 %v32979_v30 }
 0x5d0   : > { %27669 = vmatpush3.bf16.msra.mxu1 %v32977_v16  ;;  %26859 = vmatprep.subr.bf16.mxu0 %v32981_v62  ;;  %v31560_v16 = vpop.permute.xlu0 %15675 }
 0x5d1   : > { %27671 = vmatprep.subr.bf16.mxu1 %v32979_v30 }
 0x5d2   : > { %23172 = vmatmul.mubr.msk.f32.vlgmr.msra.gmra.mrb[6].mxu0 %vm182_vm0, %v33031_v46 }
 0x5d3   : > { %26861 = vmatpush3.bf16.msra.mxu0 %v32981_v62  ;;  %23190 = vmatprep.mubr.msk.f32.mxu0 %vm182_vm0, %v33032_v8 }
 0x5d4   : > { %27673 = vmatpush3.bf16.msra.mxu1 %v32979_v30  ;;  %26863 = vmatprep.subr.bf16.mxu0 %v32946_v51  ;;  %v33034_v30 = vld [vmem:[#allocation82_spill] sm:$0xff] }
 0x5d5   : > { %27675 = vmatprep.subr.bf16.mxu1 %v32981_v62 }
 0x5d7   : > { %26865 = vmatpush3.bf16.msra.mxu0 %v32946_v51  ;;  %24141 = vmatmul.mubr.msk.f32.vlgmr.msra.gmra.mrb[6].mxu1 %vm182_vm0, %v31556_v18 }
 0x5d8   : > { %27677 = vmatpush3.bf16.msra.mxu1 %v32981_v62  ;;  %26867 = vmatprep.subr.bf16.mxu0 %v32949_v32  ;;  %v33033_v62 = vld [vmem:[#allocation34_spill] sm:$0xff] }
 0x5d9   : > { %27679 = vmatprep.subr.bf16.mxu1 %v32946_v51  ;;  %24159 = vmatprep.mubr.msk.f32.mxu1 %vm182_vm0, %v31560_v16 }
 0x5db   : > { %26869 = vmatpush3.bf16.msra.mxu0 %v32949_v32 }
 0x5dc   : > { %27681 = vmatpush3.bf16.msra.mxu1 %v32946_v51  ;;  %26871 = vmatprep.subr.bf16.mxu0 %v32951_v28  ;;  %v31584_v51 = vpop.permute.xlu1 %15677 }
 0x5dd   : > { %27683 = vmatprep.subr.bf16.mxu1 %v32949_v32 }
 0x5df   : > { %26873 = vmatpush3.bf16.msra.mxu0 %v32951_v28 }
 0x5e0   : > { %27685 = vmatpush3.bf16.msra.mxu1 %v32949_v32  ;;  %26875 = vmatprep.subr.bf16.mxu0 %v32877_v54  ;;  %v33036_v32 = vld [vmem:[#allocation84_spill] sm:$0xff] }
 0x5e1   : > { %27687 = vmatprep.subr.bf16.mxu1 %v32951_v28 }
 0x5e2   : > { %23191 = vmatmul.mubr.msk.f32.vlgmr.msra.gmra.mrb[6].mxu0 %vm182_vm0, %v33033_v62 }
 0x5e3   : > { %26877 = vmatpush3.bf16.msra.mxu0 %v32877_v54  ;;  %23209 = vmatprep.mubr.msk.f32.mxu0 %vm182_vm0, %v31498_v23  ;;  %v33039_v23 = vld [vmem:[#allocation87_spill] sm:$0xff] }
 0x5e4   : > { %27689 = vmatpush3.bf16.msra.mxu1 %v32951_v28  ;;  %26879 = vmatprep.subr.bf16.mxu0 %v29537_v45  ;;  %v33035_v28 = vld [vmem:[#allocation83_spill] sm:$0xff] }
 0x5e5   : > { %27691 = vmatprep.subr.bf16.mxu1 %v32877_v54 }
 0x5e7   : > { %26881 = vmatpush3.bf16.msra.mxu0 %v29537_v45  ;;  %24160 = vmatmul.mubr.msk.f32.vlgmr.msra.gmra.mrb[6].mxu1 %vm182_vm0, %v31584_v51 }
 0x5e8   : > { %27693 = vmatpush3.bf16.msra.mxu1 %v32877_v54  ;;  %26883 = vmatprep.subr.bf16.mxu0 %v33034_v30 }
 0x5e9   : > { %27695 = vmatprep.subr.bf16.mxu1 %v29537_v45  ;;  %24178 = vmatprep.mubr.msk.f32.mxu1 %vm182_vm0, %v31119_v11  ;;  %v33037_v11 = vld [vmem:[#allocation85_spill] sm:$0xff] }
 0x5eb   : > { %26885 = vmatpush3.bf16.msra.mxu0 %v33034_v30 }
 0x5ec   : > { %27697 = vmatpush3.bf16.msra.mxu1 %v29537_v45  ;;  %26887 = vmatprep.subr.bf16.mxu0 %v33035_v28 }
 0x5ed   : > { %27699 = vmatprep.subr.bf16.mxu1 %v33034_v30 }
 0x5ef   : > { %26889 = vmatpush3.bf16.msra.mxu0 %v33035_v28 }
 0x5f0   : > { %27701 = vmatpush3.bf16.msra.mxu1 %v33034_v30  ;;  %26891 = vmatprep.subr.bf16.mxu0 %v33036_v32 }
 0x5f1   : > { %27703 = vmatprep.subr.bf16.mxu1 %v33035_v28 }
 0x5f2   : > { %23210 = vmatmul.mubr.msk.f32.vlgmr.msra.gmra.mrb[4].mxu0 %vm182_vm0, %v31522_v0  ;;  %v31631_v0 = vld [vmem:[%s28782_s24 + $0xd8] sm:$0xff] }
 0x5f3   : > { %26893 = vmatpush3.bf16.msra.mxu0 %v33036_v32  ;;  %23228 = vmatprep.mubr.msk.f32.mxu0 %vm182_vm0, %v33030_v60  ;;  %v33041_v60 = vld [vmem:[#allocation89_spill] sm:$0xff] }
 0x5f4   : > { %27705 = vmatpush3.bf16.msra.mxu1 %v33035_v28  ;;  %26895 = vmatprep.subr.bf16.mxu0 %v33037_v11 }
 0x5f5   : > { %27707 = vmatprep.subr.bf16.mxu1 %v33036_v32  ;;  %17049 = vrot.lane.b32.xlu0 %v31631_v0, %s28674_s21 }
 0x5f7   : > { %24179 = vmatmul.mubr.msk.f32.vlgmr.msra.gmra.mrb[4].mxu1 %vm182_vm0, %v31127_v55  ;;  %26897 = vmatpush3.bf16.msra.mxu0 %v33037_v11  ;;  %v33040_v55 = vld [vmem:[#allocation88_spill] sm:$0xff] }
 0x5f8   : > { %27709 = vmatpush3.bf16.msra.mxu1 %v33036_v32  ;;  %24197 = vmatprep.mubr.msk.f32.mxu1 %vm182_vm0, %v31532_v19  ;;  %v31639_v19 = vld [vmem:[%s28782_s24 + $0xe0] sm:$0xff] }
 0x5f9   : > { %26899 = vmatprep.subr.bf16.mxu0 %v33038_v36  ;;  %27711 = vmatprep.subr.bf16.mxu1 %v33037_v11 }
 0x5fa   : > { %17051 = vrot.lane.b32.xlu1 %v31639_v19, %s28674_s21  ;;  %17134 = vrot.lane.b32.xlu0 %v31631_v0, %s28675_s23 }
 0x5fb   : > { %26901 = vmatpush3.bf16.msra.mxu0 %v33038_v36 }
 0x5fc   : > { %27713 = vmatpush3.bf16.msra.mxu1 %v33037_v11  ;;  %26903 = vmatprep.subr.bf16.mxu0 %v33039_v23 }
 0x5fd   : > { %27715 = vmatprep.subr.bf16.mxu1 %v33038_v36 }
 0x5fe   : > { %17136 = vrot.lane.b32.xlu1 %v31639_v19, %s28675_s23 }
 0x5ff   : > { %26905 = vmatpush3.bf16.msra.mxu0 %v33039_v23 }
 0x600   : > { %27717 = vmatpush3.bf16.msra.mxu1 %v33038_v36  ;;  %26907 = vmatprep.subr.bf16.mxu0 %v33040_v55 }
 0x601   : > { %27719 = vmatprep.subr.bf16.mxu1 %v33039_v23 }
 0x602   : > { %23229 = vmatmul.mubr.msk.f32.vlgmr.msra.gmra.mrb[4].mxu0 %vm182_vm0, %v33031_v46  ;;  %v33042_v46 = vld [vmem:[#allocation90_spill] sm:$0xff] }
 0x603   : > { %26909 = vmatpush3.bf16.msra.mxu0 %v33040_v55  ;;  %23247 = vmatprep.mubr.msk.f32.mxu0 %vm182_vm0, %v33032_v8  ;;  %v33043_v8 = vld [vmem:[#allocation91_spill] sm:$0xff] }
 0x604   : > { %27721 = vmatpush3.bf16.msra.mxu1 %v33039_v23  ;;  %26911 = vmatprep.subr.bf16.mxu0 %v33041_v60 }
 0x605   : > { %27723 = vmatprep.subr.bf16.mxu1 %v33040_v55 }
 0x607   : > { %24198 = vmatmul.mubr.msk.f32.vlgmr.msra.gmra.mrb[4].mxu1 %vm182_vm0, %v31556_v18  ;;  %26913 = vmatpush3.bf16.msra.mxu0 %v33041_v60  ;;  %v31670_v18 = vld [vmem:[%s28782_s24 + $0x91] sm:$0xff] }
 0x608   : > { %27725 = vmatpush3.bf16.msra.mxu1 %v33040_v55  ;;  %24216 = vmatprep.mubr.msk.f32.mxu1 %vm182_vm0, %v31560_v16  ;;  %v31731_v16 = vpop.permute.xlu1 %16078 }
 0x609   : > { %26915 = vmatprep.subr.bf16.mxu0 %v33042_v46  ;;  %27727 = vmatprep.subr.bf16.mxu1 %v33041_v60 }
 0x60b   : > { %26917 = vmatpush3.bf16.msra.mxu0 %v33042_v46 }
 0x60c   : > { %27729 = vmatpush3.bf16.msra.mxu1 %v33041_v60  ;;  %26919 = vmatprep.subr.bf16.mxu0 %v33043_v8 }
 0x60d   : > { %27731 = vmatprep.subr.bf16.mxu1 %v33042_v46 }
 0x60f   : > { %26921 = vmatpush3.bf16.msra.mxu0 %v33043_v8 }
 0x610   : > { %27733 = vmatpush3.bf16.msra.mxu1 %v33042_v46  ;;  %26971 = vmatprep.subr.bf16.mxu0 %v32964_v56 }
 0x611   : > { %27735 = vmatprep.subr.bf16.mxu1 %v33043_v8 }
 0x612   : > { %23248 = vmatmul.mubr.msk.f32.vlgmr.msra.gmra.mrb[4].mxu0 %vm182_vm0, %v33033_v62 }
 0x613   : > { %26973 = vmatpush3.bf16.msra.mxu0 %v32964_v56  ;;  %23323 = vmatprep.mubr.msk.f32.mxu0 %vm182_vm0, %v31670_v18 }
 0x614   : > { %27737 = vmatpush3.bf16.msra.mxu1 %v33043_v8  ;;  %26975 = vmatprep.subr.bf16.mxu0 %v32966_v1 }
 0x615   : > { %27739 = vmatprep.subr.bf16.mxu1 %v32964_v56 }
 0x617   : > { %24217 = vmatmul.mubr.msk.f32.vlgmr.msra.gmra.mrb[4].mxu1 %vm182_vm0, %v31584_v51  ;;  %26977 = vmatpush3.bf16.msra.mxu0 %v32966_v1  ;;  %v31825_v51 = vld [vmem:[%s28782_s24 + $0xe2] sm:$0xff] }
 0x618   : > { %27741 = vmatpush3.bf16.msra.mxu1 %v32964_v56  ;;  %26979 = vmatprep.subr.bf16.mxu0 %v32967_v52  ;;  %v31694_v56 = vld [vmem:[%s28782_s24 + $0x99] sm:$0xff] }
 0x619   : > { %27743 = vmatprep.subr.bf16.mxu1 %v32966_v1  ;;  %24235 = vmatprep.mubr.msk.f32.mxu1 %vm182_vm0, %v31291_v21 }
 0x61b   : > { %26981 = vmatpush3.bf16.msra.mxu0 %v32967_v52 }
 0x61c   : > { %27745 = vmatpush3.bf16.msra.mxu1 %v32966_v1  ;;  %26983 = vmatprep.subr.bf16.mxu0 %v32968_v25  ;;  %v33044_v1 = vld [vmem:[#allocation35_spill] sm:$0xff] }
 0x61d   : > { %27747 = vmatprep.subr.bf16.mxu1 %v32967_v52 }
 0x61f   : > { %26985 = vmatpush3.bf16.msra.mxu0 %v32968_v25 }
 0x620   : > { %27749 = vmatpush3.bf16.msra.mxu1 %v32967_v52  ;;  %26987 = vmatprep.subr.bf16.mxu0 %v32970_v3  ;;  %v31704_v52 = vpop.permute.xlu0 %16076 }
 0x621   : > { %27751 = vmatprep.subr.bf16.mxu1 %v32968_v25 }
 0x622   : > { %23324 = vmatmul.mubr.msk.f32.vlgmr.msra.gmra.mrb[6].mxu0 %vm182_vm0, %v31694_v56 }
 0x623   : > { %26989 = vmatpush3.bf16.msra.mxu0 %v32970_v3  ;;  %23342 = vmatprep.mubr.msk.f32.mxu0 %vm182_vm0, %v33044_v1 }
 0x624   : > { %27753 = vmatpush3.bf16.msra.mxu1 %v32968_v25  ;;  %26991 = vmatprep.subr.bf16.mxu0 %v32972_v43  ;;  %v31725_v25 = vld [vmem:[%s28782_s24 + $0xd9] sm:$0xff]  ;;  %v31740_v62 = vpop.permute.xlu0 %16161 }
 0x625   : > { %27755 = vmatprep.subr.bf16.mxu1 %v32970_v3  ;;  %17304 = vrot.lane.b32.xlu0 %v31725_v25, %s28674_s21 }
 0x627   : > { %26993 = vmatpush3.bf16.msra.mxu0 %v32972_v43  ;;  %24236 = vmatmul.mubr.msk.f32.vlgmr.msra.gmra.mrb[6].mxu1 %vm182_vm0, %v31299_v22 }
 0x628   : > { %27757 = vmatpush3.bf16.msra.mxu1 %v32970_v3  ;;  %26995 = vmatprep.subr.bf16.mxu0 %v32974_v35  ;;  %v33045_v3 = vld [vmem:[#allocation37_spill] sm:$0xff] }
 0x629   : > { %27759 = vmatprep.subr.bf16.mxu1 %v32972_v43  ;;  %24254 = vmatprep.mubr.msk.f32.mxu1 %vm182_vm0, %v31704_v52 }
 0x62a   : > { %17389 = vrot.lane.b32.xlu0 %v31725_v25, %s28675_s23 }
 0x62b   : > { %26997 = vmatpush3.bf16.msra.mxu0 %v32974_v35 }
 0x62c   : > { %27761 = vmatpush3.bf16.msra.mxu1 %v32972_v43  ;;  %26999 = vmatprep.subr.bf16.mxu0 %v32976_v10  ;;  %v33046_v43 = vld [vmem:[#allocation38_spill] sm:$0xff] }
 0x62d   : > { %27763 = vmatprep.subr.bf16.mxu1 %v32974_v35 }
 0x62f   : > { %27001 = vmatpush3.bf16.msra.mxu0 %v32976_v10 }
 0x630   : > { %27765 = vmatpush3.bf16.msra.mxu1 %v32974_v35  ;;  %27003 = vmatprep.subr.bf16.mxu0 %v32978_v29  ;;  %v31735_v35 = vld [vmem:[%s28782_s24 + $0xe1] sm:$0xff] }
 0x631   : > { %27767 = vmatprep.subr.bf16.mxu1 %v32976_v10  ;;  %17306 = vrot.lane.b32.xlu1 %v31735_v35, %s28674_s21 }
 0x632   : > { %23343 = vmatmul.mubr.msk.f32.vlgmr.msra.gmra.mrb[6].mxu0 %vm182_vm0, %v33045_v3 }
 0x633   : > { %27005 = vmatpush3.bf16.msra.mxu0 %v32978_v29  ;;  %23361 = vmatprep.mubr.msk.f32.mxu0 %vm182_vm0, %v33046_v43 }
 0x634   : > { %27769 = vmatpush3.bf16.msra.mxu1 %v32976_v10  ;;  %27007 = vmatprep.subr.bf16.mxu0 %v32980_v27  ;;  %v33048_v10 = vld [vmem:[#allocation39_spill] sm:$0xff] }
 0x635   : > { %27771 = vmatprep.subr.bf16.mxu1 %v32978_v29  ;;  %17391 = vrot.lane.b32.xlu1 %v31735_v35, %s28675_s23 }
 0x637   : > { %27009 = vmatpush3.bf16.msra.mxu0 %v32980_v27  ;;  %24255 = vmatmul.mubr.msk.f32.vlgmr.msra.gmra.mrb[6].mxu1 %vm182_vm0, %v31731_v16 }
 0x638   : > { %27773 = vmatpush3.bf16.msra.mxu1 %v32978_v29  ;;  %27011 = vmatprep.subr.bf16.mxu0 %v32982_v44  ;;  %v33047_v29 = vld [vmem:[#allocation92_spill] sm:$0xff] }
 0x639   : > { %27775 = vmatprep.subr.bf16.mxu1 %v32980_v27  ;;  %24273 = vmatprep.mubr.msk.f32.mxu1 %vm182_vm0, %v31740_v62 }
 0x63a   : > { %17561 = vrot.lane.b32.xlu1 %v31825_v51, %s28674_s21 }
 0x63b   : > { %27013 = vmatpush3.bf16.msra.mxu0 %v32982_v44 }
 0x63c   : > { %27777 = vmatpush3.bf16.msra.mxu1 %v32980_v27  ;;  %27015 = vmatprep.subr.bf16.mxu0 %v32983_v63  ;;  %v31770_v27 = vpop.permute.xlu1 %16163 }
 0x63d   : > { %27779 = vmatprep.subr.bf16.mxu1 %v32982_v44 }
 0x63e   : > { %17646 = vrot.lane.b32.xlu1 %v31825_v51, %s28675_s23 }
 0x63f   : > { %27017 = vmatpush3.bf16.msra.mxu0 %v32983_v63 }
 0x640   : > { %27781 = vmatpush3.bf16.msra.mxu1 %v32982_v44  ;;  %27019 = vmatprep.subr.bf16.mxu0 %v33047_v29  ;;  %v33049_v44 = vld [vmem:[#allocation101_spill] sm:$0xff] }
 0x641   : > { %27783 = vmatprep.subr.bf16.mxu1 %v32983_v63 }
 0x642   : > { %23362 = vmatmul.mubr.msk.f32.vlgmr.msra.gmra.mrb[6].mxu0 %vm182_vm0, %v33048_v10 }
 0x643   : > { %27021 = vmatpush3.bf16.msra.mxu0 %v33047_v29  ;;  %23380 = vmatprep.mubr.msk.f32.mxu0 %vm182_vm0, %v31670_v18  ;;  %v33052_v18 = vld [vmem:[#allocation104_spill] sm:$0xff] }
 0x644   : > { %27785 = vmatpush3.bf16.msra.mxu1 %v32983_v63  ;;  %27023 = vmatprep.subr.bf16.mxu0 %v32985_v50  ;;  %v33050_v63 = vld [vmem:[#allocation102_spill] sm:$0xff] }
 0x645   : > { %27787 = vmatprep.subr.bf16.mxu1 %v33047_v29 }
 0x647   : > { %27025 = vmatpush3.bf16.msra.mxu0 %v32985_v50  ;;  %24274 = vmatmul.mubr.msk.f32.vlgmr.msra.gmra.mrb[6].mxu1 %vm182_vm0, %v31770_v27 }
 0x648   : > { %27789 = vmatpush3.bf16.msra.mxu1 %v33047_v29  ;;  %27027 = vmatprep.subr.bf16.mxu0 %v32986_v59 }
 0x649   : > { %27791 = vmatprep.subr.bf16.mxu1 %v32985_v50  ;;  %24292 = vmatprep.mubr.msk.f32.mxu1 %vm182_vm0, %v31291_v21  ;;  %v31817_v21 = vld [vmem:[%s28782_s24 + $0xda] sm:$0xff] }
 0x64a   : > { %17559 = vrot.lane.b32.xlu0 %v31817_v21, %s28674_s21 }
 0x64b   : > { %27029 = vmatpush3.bf16.msra.mxu0 %v32986_v59 }
 0x64c   : > { %27793 = vmatpush3.bf16.msra.mxu1 %v32985_v50  ;;  %27031 = vmatprep.subr.bf16.mxu0 %v32988_v4 }
 0x64d   : > { %27795 = vmatprep.subr.bf16.mxu1 %v32986_v59 }
 0x64e   : > { %17644 = vrot.lane.b32.xlu0 %v31817_v21, %s28675_s23 }
 0x64f   : > { %27033 = vmatpush3.bf16.msra.mxu0 %v32988_v4 }
 0x650   : > { %27797 = vmatpush3.bf16.msra.mxu1 %v32986_v59  ;;  %27035 = vmatprep.subr.bf16.mxu0 %v32989_v42 }
 0x651   : > { %27799 = vmatprep.subr.bf16.mxu1 %v32988_v4 }
 0x652   : > { %23381 = vmatmul.mubr.msk.f32.vlgmr.msra.gmra.mrb[4].mxu0 %vm182_vm0, %v31694_v56  ;;  %v33053_v56 = vld [vmem:[#allocation105_spill] sm:$0xff] }
 0x653   : > { %27037 = vmatpush3.bf16.msra.mxu0 %v32989_v42  ;;  %23399 = vmatprep.mubr.msk.f32.mxu0 %vm182_vm0, %v33044_v1  ;;  %v31856_v1 = vld [vmem:[%s28782_s24 + $0x92] sm:$0xff] }
 0x654   : > { %27801 = vmatpush3.bf16.msra.mxu1 %v32988_v4  ;;  %27039 = vmatprep.subr.bf16.mxu0 %v32990_v14 }
 0x655   : > { %27803 = vmatprep.subr.bf16.mxu1 %v32989_v42 }
 0x657   : > { %24293 = vmatmul.mubr.msk.f32.vlgmr.msra.gmra.mrb[4].mxu1 %vm182_vm0, %v31299_v22  ;;  %27041 = vmatpush3.bf16.msra.mxu0 %v32990_v14  ;;  %v33051_v22 = vld [vmem:[#allocation103_spill] sm:$0xff] }
 0x658   : > { %27805 = vmatpush3.bf16.msra.mxu1 %v32989_v42  ;;  %24311 = vmatprep.mubr.msk.f32.mxu1 %vm182_vm0, %v31704_v52 }
 0x659   : > { %27043 = vmatprep.subr.bf16.mxu0 %v32993_v40  ;;  %27807 = vmatprep.subr.bf16.mxu1 %v32990_v14 }
 0x65b   : > { %27045 = vmatpush3.bf16.msra.mxu0 %v32993_v40 }
 0x65c   : > { %27809 = vmatpush3.bf16.msra.mxu1 %v32990_v14  ;;  %27047 = vmatprep.subr.bf16.mxu0 %v33049_v44 }
 0x65d   : > { %27811 = vmatprep.subr.bf16.mxu1 %v32993_v40 }
 0x65f   : > { %27049 = vmatpush3.bf16.msra.mxu0 %v33049_v44 }
 0x660   : > { %27813 = vmatpush3.bf16.msra.mxu1 %v32993_v40  ;;  %27051 = vmatprep.subr.bf16.mxu0 %v33050_v63 }
 0x661   : > { %27815 = vmatprep.subr.bf16.mxu1 %v33049_v44 }
 0x662   : > { %23400 = vmatmul.mubr.msk.f32.vlgmr.msra.gmra.mrb[4].mxu0 %vm182_vm0, %v33045_v3  ;;  %v31891_v3 = vpop.permute.xlu0 %16562 }
 0x663   : > { %27053 = vmatpush3.bf16.msra.mxu0 %v33050_v63  ;;  %23418 = vmatprep.mubr.msk.f32.mxu0 %vm182_vm0, %v33046_v43 }
 0x664   : > { %27817 = vmatpush3.bf16.msra.mxu1 %v33049_v44  ;;  %27055 = vmatprep.subr.bf16.mxu0 %v33051_v22 }
 0x665   : > { %27819 = vmatprep.subr.bf16.mxu1 %v33050_v63 }
 0x667   : > { %24312 = vmatmul.mubr.msk.f32.vlgmr.msra.gmra.mrb[4].mxu1 %vm182_vm0, %v31731_v16  ;;  %27057 = vmatpush3.bf16.msra.mxu0 %v33051_v22 }
 0x668   : > { %27821 = vmatpush3.bf16.msra.mxu1 %v33050_v63  ;;  %24330 = vmatprep.mubr.msk.f32.mxu1 %vm182_vm0, %v31740_v62 }
 0x669   : > { %27059 = vmatprep.subr.bf16.mxu0 %v33052_v18  ;;  %27823 = vmatprep.subr.bf16.mxu1 %v33051_v22 }
 0x66b   : > { %27061 = vmatpush3.bf16.msra.mxu0 %v33052_v18 }
 0x66c   : > { %27825 = vmatpush3.bf16.msra.mxu1 %v33051_v22  ;;  %27063 = vmatprep.subr.bf16.mxu0 %v33053_v56 }
 0x66d   : > { %27827 = vmatprep.subr.bf16.mxu1 %v33052_v18 }
 0x66f   : > { %27065 = vmatpush3.bf16.msra.mxu0 %v33053_v56 }
 0x670   : > { %27829 = vmatpush3.bf16.msra.mxu1 %v33052_v18  ;;  %27115 = vmatprep.subr.bf16.mxu0 %v33004_v9 }
 0x671   : > { %27831 = vmatprep.subr.bf16.mxu1 %v33053_v56 }
 0x672   : > { %23419 = vmatmul.mubr.msk.f32.vlgmr.msra.gmra.mrb[4].mxu0 %vm182_vm0, %v33048_v10 }
 0x673   : > { %27117 = vmatpush3.bf16.msra.mxu0 %v33004_v9  ;;  %23494 = vmatprep.mubr.msk.f32.mxu0 %vm182_vm0, %v31856_v1 }
 0x674   : > { %27833 = vmatpush3.bf16.msra.mxu1 %v33053_v56  ;;  %27119 = vmatprep.subr.bf16.mxu0 %v33005_v7 }
 0x675   : > { %27835 = vmatprep.subr.bf16.mxu1 %v33004_v9 }
 0x677   : > { %24331 = vmatmul.mubr.msk.f32.vlgmr.msra.gmra.mrb[4].mxu1 %vm182_vm0, %v31770_v27  ;;  %27121 = vmatpush3.bf16.msra.mxu0 %v33005_v7 }
 0x678   : > { %27837 = vmatpush3.bf16.msra.mxu1 %v33004_v9  ;;  %27123 = vmatprep.subr.bf16.mxu0 %v33006_v26  ;;  %v31880_v9 = vld [vmem:[%s28782_s24 + $0x9a] sm:$0xff] }
 0x679   : > { %27839 = vmatprep.subr.bf16.mxu1 %v33005_v7  ;;  %24349 = vmatprep.mubr.msk.f32.mxu1 %vm182_vm0, %v31459_v57 }
 0x67b   : > { %27125 = vmatpush3.bf16.msra.mxu0 %v33006_v26 }
 0x67c   : > { %27841 = vmatpush3.bf16.msra.mxu1 %v33005_v7  ;;  %27127 = vmatprep.subr.bf16.mxu0 %v33007_v2  ;;  %v33054_v7 = vld [vmem:[#allocation40_spill] sm:$0xff] }
 0x67d   : > { %27843 = vmatprep.subr.bf16.mxu1 %v33006_v26 }
 0x67f   : > { %27129 = vmatpush3.bf16.msra.mxu0 %v33007_v2 }
 0x680   : > { %27845 = vmatpush3.bf16.msra.mxu1 %v33006_v26  ;;  %27131 = vmatprep.subr.bf16.mxu0 %v33008_v13 }
 0x681   : > { %27847 = vmatprep.subr.bf16.mxu1 %v33007_v2 }
 0x682   : > { %23495 = vmatmul.mubr.msk.f32.vlgmr.msra.gmra.mrb[6].mxu0 %vm182_vm0, %v31880_v9 }
 0x683   : > { %27133 = vmatpush3.bf16.msra.mxu0 %v33008_v13  ;;  %23513 = vmatprep.mubr.msk.f32.mxu0 %vm182_vm0, %v33054_v7 }
 0x684   : > { %27849 = vmatpush3.bf16.msra.mxu1 %v33007_v2  ;;  %27135 = vmatprep.subr.bf16.mxu0 %v33009_v38  ;;  %v33055_v2 = vld [vmem:[#allocation41_spill] sm:$0xff] }
 0x685   : > { %v23078_v52 = vpop.f32.mrb[2].mxu0  ;;  %27851 = vmatprep.subr.bf16.mxu1 %v33008_v13 }
 0x686   : > { %18339 = vst [vmem:[%s30271_s27 + $0x38] sm:$0xff] %v23078_v52  ;;  %v11197_v26 = vpop.f32.mrb[3].mxu0 }
 0x687   : > { %18338 = vst [vmem:[%s30271_s27 + $0x30] sm:$0xff] %v11197_v26  ;;  %27137 = vmatpush3.bf16.msra.mxu0 %v33009_v38  ;;  %24350 = vmatmul.mubr.msk.f32.vlgmr.msra.gmra.mrb[6].mxu1 %vm182_vm0, %v31467_v37 }
 0x688   : > { %27853 = vmatpush3.bf16.msra.mxu1 %v33008_v13  ;;  %27139 = vmatprep.subr.bf16.mxu0 %v33011_v58  ;;  %v33056_v13 = vld [vmem:[#allocation42_spill] sm:$0xff] }
 0x689   : > { %27855 = vmatprep.subr.bf16.mxu1 %v33009_v38  ;;  %24368 = vmatprep.mubr.msk.f32.mxu1 %vm182_vm0, %v31891_v3 }
 0x68b   : > { %27141 = vmatpush3.bf16.msra.mxu0 %v33011_v58 }
 0x68c   : > { %27857 = vmatpush3.bf16.msra.mxu1 %v33009_v38  ;;  %27143 = vmatprep.subr.bf16.mxu0 %v33012_v61  ;;  %v31916_v38 = vpop.permute.xlu1 %16564 }
 0x68d   : > { %27859 = vmatprep.subr.bf16.mxu1 %v33011_v58 }
 0x68f   : > { %27145 = vmatpush3.bf16.msra.mxu0 %v33012_v61 }
 0x690   : > { %27861 = vmatpush3.bf16.msra.mxu1 %v33011_v58  ;;  %27147 = vmatprep.subr.bf16.mxu0 %v33013_v31  ;;  %v31920_v58 = vpop.permute.xlu0 %16647 }
 0x691   : > { %27863 = vmatprep.subr.bf16.mxu1 %v33012_v61 }
 0x692   : > { %23514 = vmatmul.mubr.msk.f32.vlgmr.msra.gmra.mrb[6].mxu0 %vm182_vm0, %v33055_v2 }
 0x693   : > { %27149 = vmatpush3.bf16.msra.mxu0 %v33013_v31  ;;  %23532 = vmatprep.mubr.msk.f32.mxu0 %vm182_vm0, %v33056_v13 }
 0x694   : > { %27865 = vmatpush3.bf16.msra.mxu1 %v33012_v61  ;;  %27151 = vmatprep.subr.bf16.mxu0 %v33014_v33  ;;  %v33057_v61 = vld [vmem:[#allocation8_spill] sm:$0xff] }
 0x695   : > { %27867 = vmatprep.subr.bf16.mxu1 %v33013_v31 }
 0x697   : > { %27153 = vmatpush3.bf16.msra.mxu0 %v33014_v33  ;;  %24369 = vmatmul.mubr.msk.f32.vlgmr.msra.gmra.mrb[6].mxu1 %vm182_vm0, %v31916_v38 }
 0x698   : > { %27869 = vmatpush3.bf16.msra.mxu1 %v33013_v31  ;;  %27155 = vmatprep.subr.bf16.mxu0 %v33016_v41  ;;  %v28569_v31 = vld [vmem:[%s28782_s24 + $0xa8] sm:$0xff] }
 0x699   : > { %27871 = vmatprep.subr.bf16.mxu1 %v33014_v33  ;;  %24387 = vmatprep.mubr.msk.f32.mxu1 %vm182_vm0, %v31920_v58 }
 0x69b   : > { %27157 = vmatpush3.bf16.msra.mxu0 %v33016_v41 }
 0x69c   : > { %27873 = vmatpush3.bf16.msra.mxu1 %v33014_v33  ;;  %27159 = vmatprep.subr.bf16.mxu0 %v33017_v5  ;;  %v31944_v33 = vpop.permute.xlu1 %16649 }
 0x69d   : > { %27875 = vmatprep.subr.bf16.mxu1 %v33016_v41 }
 0x69f   : > { %27161 = vmatpush3.bf16.msra.mxu0 %v33017_v5 }
 0x6a0   : > { %27877 = vmatpush3.bf16.msra.mxu1 %v33016_v41  ;;  %27163 = vmatprep.subr.bf16.mxu0 %v33018_v17  ;;  %v33058_v41 = vld [vmem:[#allocation112_spill] sm:$0xff] }
 0x6a1   : > { %27879 = vmatprep.subr.bf16.mxu1 %v33017_v5 }
 0x6a2   : > { %23533 = vmatmul.mubr.msk.f32.vlgmr.msra.gmra.mrb[6].mxu0 %vm182_vm0, %v33057_v61 }
 0x6a3   : > { %27165 = vmatpush3.bf16.msra.mxu0 %v33018_v17  ;;  %23551 = vmatprep.mubr.msk.f32.mxu0 %vm182_vm0, %v31856_v1 }
 0x6a4   : > { %27881 = vmatpush3.bf16.msra.mxu1 %v33017_v5  ;;  %27167 = vmatprep.subr.bf16.mxu0 %v33019_v47  ;;  %v33060_v5 = vld [vmem:[#allocation9_spill] sm:$0xff] }
 0x6a5   : > { %27883 = vmatprep.subr.bf16.mxu1 %v33018_v17 }
 0x6a7   : > { %27169 = vmatpush3.bf16.msra.mxu0 %v33019_v47  ;;  %24388 = vmatmul.mubr.msk.f32.vlgmr.msra.gmra.mrb[6].mxu1 %vm182_vm0, %v31944_v33 }
 0x6a8   : > { %27885 = vmatpush3.bf16.msra.mxu1 %v33018_v17  ;;  %27171 = vmatprep.subr.bf16.mxu0 %v33020_v53 }
 0x6a9   : > { %27887 = vmatprep.subr.bf16.mxu1 %v33019_v47  ;;  %24406 = vmatprep.mubr.msk.f32.mxu1 %vm182_vm0, %v31459_v57  ;;  %v33059_v57 = vld [vmem:[#allocation113_spill] sm:$0xff] }
 0x6ab   : > { %27173 = vmatpush3.bf16.msra.mxu0 %v33020_v53 }
 0x6ac   : > { %27889 = vmatpush3.bf16.msra.mxu1 %v33019_v47  ;;  %27175 = vmatprep.subr.bf16.mxu0 %v33021_v49 }
 0x6ad   : > { %27891 = vmatprep.subr.bf16.mxu1 %v33020_v53 }
 0x6af   : > { %27177 = vmatpush3.bf16.msra.mxu0 %v33021_v49 }
 0x6b0   : > { %27893 = vmatpush3.bf16.msra.mxu1 %v33020_v53  ;;  %27179 = vmatprep.subr.bf16.mxu0 %v33022_v48 }
 0x6b1   : > { %27895 = vmatprep.subr.bf16.mxu1 %v33021_v49 }
 0x6b2   : > { %23552 = vmatmul.mubr.msk.f32.vlgmr.msra.gmra.mrb[4].mxu0 %vm182_vm0, %v31880_v9 }
 0x6b3   : > { %27181 = vmatpush3.bf16.msra.mxu0 %v33022_v48  ;;  %23570 = vmatprep.mubr.msk.f32.mxu0 %vm182_vm0, %v33054_v7 }
 0x6b4   : > { %27897 = vmatpush3.bf16.msra.mxu1 %v33021_v49  ;;  %27183 = vmatprep.subr.bf16.mxu0 %v33023_v39 }
 0x6b5   : > { %27899 = vmatprep.subr.bf16.mxu1 %v33022_v48 }
 0x6b7   : > { %24407 = vmatmul.mubr.msk.f32.vlgmr.msra.gmra.mrb[4].mxu1 %vm182_vm0, %v31467_v37  ;;  %27185 = vmatpush3.bf16.msra.mxu0 %v33023_v39  ;;  %v33061_v37 = vld [vmem:[#allocation10_spill] sm:$0xff] }
 0x6b8   : > { %27901 = vmatpush3.bf16.msra.mxu1 %v33022_v48  ;;  %24425 = vmatprep.mubr.msk.f32.mxu1 %vm182_vm0, %v31891_v3 }
 0x6b9   : > { %27187 = vmatprep.subr.bf16.mxu0 %v33058_v41  ;;  %27903 = vmatprep.subr.bf16.mxu1 %v33023_v39 }
 0x6bb   : > { %27189 = vmatpush3.bf16.msra.mxu0 %v33058_v41 }
 0x6bc   : > { %27905 = vmatpush3.bf16.msra.mxu1 %v33023_v39  ;;  %27191 = vmatprep.subr.bf16.mxu0 %v33059_v57 }
 0x6bd   : > { %27907 = vmatprep.subr.bf16.mxu1 %v33058_v41 }
 0x6bf   : > { %27193 = vmatpush3.bf16.msra.mxu0 %v33059_v57 }
 0x6c0   : > { %27909 = vmatpush3.bf16.msra.mxu1 %v33058_v41  ;;  %27195 = vmatprep.subr.bf16.mxu0 %v33026_v12 }
 0x6c1   : > { %27911 = vmatprep.subr.bf16.mxu1 %v33059_v57 }
 0x6c2   : > { %23571 = vmatmul.mubr.msk.f32.vlgmr.msra.gmra.mrb[4].mxu0 %vm182_vm0, %v33055_v2 }
 0x6c3   : > { %27197 = vmatpush3.bf16.msra.mxu0 %v33026_v12  ;;  %23589 = vmatprep.mubr.msk.f32.mxu0 %vm182_vm0, %v33056_v13 }
 0x6c4   : > { %27913 = vmatpush3.bf16.msra.mxu1 %v33059_v57  ;;  %27199 = vmatprep.subr.bf16.mxu0 %v33027_v20 }
 0x6c5   : > { %27915 = vmatprep.subr.bf16.mxu1 %v33026_v12 }
 0x6c7   : > { %24426 = vmatmul.mubr.msk.f32.vlgmr.msra.gmra.mrb[4].mxu1 %vm182_vm0, %v31916_v38  ;;  %27201 = vmatpush3.bf16.msra.mxu0 %v33027_v20 }
 0x6c8   : > { %27917 = vmatpush3.bf16.msra.mxu1 %v33026_v12  ;;  %24444 = vmatprep.mubr.msk.f32.mxu1 %vm182_vm0, %v31920_v58 }
 0x6c9   : > { %27203 = vmatprep.subr.bf16.mxu0 %v33028_v24  ;;  %27919 = vmatprep.subr.bf16.mxu1 %v33027_v20 }
 0x6cb   : > { %27205 = vmatpush3.bf16.msra.mxu0 %v33028_v24 }
 0x6cc   : > { %27921 = vmatpush3.bf16.msra.mxu1 %v33027_v20  ;;  %27207 = vmatprep.subr.bf16.mxu0 %v33029_v6 }
 0x6cd   : > { %27923 = vmatprep.subr.bf16.mxu1 %v33028_v24 }
 0x6cf   : > { %27209 = vmatpush3.bf16.msra.mxu0 %v33029_v6 }
 0x6d0   : > { %27925 = vmatpush3.bf16.msra.mxu1 %v33028_v24  ;;  %27307 = vmatprep.subr.bf16.mxu0 %v32877_v54 }
 0x6d1   : > { %27927 = vmatprep.subr.bf16.mxu1 %v33029_v6 }
 0x6d2   : > { %23590 = vmatmul.mubr.msk.f32.vlgmr.msra.gmra.mrb[4].mxu0 %vm182_vm0, %v33057_v61 }
 0x6d3   : > { %27309 = vmatpush3.bf16.msra.mxu0 %v32877_v54  ;;  %23722 = vmatprep.mubr.msk.f32.mxu0 %vm182_vm0, %v28569_v31 }
 0x6d4   : > { %27929 = vmatpush3.bf16.msra.mxu1 %v33029_v6  ;;  %27311 = vmatprep.subr.bf16.mxu0 %v29537_v45 }
 0x6d5   : > { %27931 = vmatprep.subr.bf16.mxu1 %v32877_v54 }
 0x6d7   : > { %24445 = vmatmul.mubr.msk.f32.vlgmr.msra.gmra.mrb[4].mxu1 %vm182_vm0, %v31944_v33  ;;  %27313 = vmatpush3.bf16.msra.mxu0 %v29537_v45 }
 0x6d8   : > { %27933 = vmatpush3.bf16.msra.mxu1 %v32877_v54  ;;  %27315 = vmatprep.subr.bf16.mxu0 %v33034_v30  ;;  %v28570_v54 = vld [vmem:[%s28782_s24 + $0xb0] sm:$0xff] }
 0x6d9   : > { %27935 = vmatprep.subr.bf16.mxu1 %v29537_v45  ;;  %24463 = vmatprep.mubr.msk.f32.mxu1 %vm182_vm0, %v31631_v0  ;;  %v33064_v0 = vld [vmem:[#allocation97_spill] sm:$0xff] }
 0x6db   : > { %27317 = vmatpush3.bf16.msra.mxu0 %v33034_v30 }
 0x6dc   : > { %27937 = vmatpush3.bf16.msra.mxu1 %v29537_v45  ;;  %27319 = vmatprep.subr.bf16.mxu0 %v33035_v28  ;;  %v17050_v45 = vpop.permute.xlu0 %17049 }
 0x6dd   : > { %27939 = vmatprep.subr.bf16.mxu1 %v33034_v30 }
 0x6df   : > { %27321 = vmatpush3.bf16.msra.mxu0 %v33035_v28 }
 0x6e0   : > { %27941 = vmatpush3.bf16.msra.mxu1 %v33034_v30  ;;  %27323 = vmatprep.subr.bf16.mxu0 %v33036_v32  ;;  %v33062_v30 = vld [vmem:[#allocation11_spill] sm:$0xff] }
 0x6e1   : > { %27943 = vmatprep.subr.bf16.mxu1 %v33035_v28 }
 0x6e2   : > { %23723 = vmatmul.mubr.msk.f32.vlgmr.msra.gmra.mrb[6].mxu0 %vm182_vm0, %v28570_v54 }
 0x6e3   : > { %27325 = vmatpush3.bf16.msra.mxu0 %v33036_v32  ;;  %23741 = vmatprep.mubr.msk.f32.mxu0 %vm182_vm0, %v33060_v5 }
 0x6e4   : > { %27945 = vmatpush3.bf16.msra.mxu1 %v33035_v28  ;;  %27327 = vmatprep.subr.bf16.mxu0 %v33037_v11  ;;  %v17052_v28 = vpop.permute.xlu1 %17051 }
 0x6e5   : > { %27947 = vmatprep.subr.bf16.mxu1 %v33036_v32 }
 0x6e7   : > { %27329 = vmatpush3.bf16.msra.mxu0 %v33037_v11  ;;  %24464 = vmatmul.mubr.msk.f32.vlgmr.msra.gmra.mrb[6].mxu1 %vm182_vm0, %v31639_v19 }
 0x6e8   : > { %27949 = vmatpush3.bf16.msra.mxu1 %v33036_v32  ;;  %27331 = vmatprep.subr.bf16.mxu0 %v33038_v36  ;;  %v17135_v32 = vpop.permute.xlu0 %17134 }
 0x6e9   : > { %27951 = vmatprep.subr.bf16.mxu1 %v33037_v11  ;;  %24482 = vmatprep.mubr.msk.f32.mxu1 %vm182_vm0, %v17050_v45 }
 0x6eb   : > { %27333 = vmatpush3.bf16.msra.mxu0 %v33038_v36 }
 0x6ec   : > { %27953 = vmatpush3.bf16.msra.mxu1 %v33037_v11  ;;  %27335 = vmatprep.subr.bf16.mxu0 %v33039_v23  ;;  %v33063_v11 = vld [vmem:[#allocation12_spill] sm:$0xff] }
 0x6ed   : > { %27955 = vmatprep.subr.bf16.mxu1 %v33038_v36 }
 0x6ef   : > { %27337 = vmatpush3.bf16.msra.mxu0 %v33039_v23 }
 0x6f0   : > { %27957 = vmatpush3.bf16.msra.mxu1 %v33038_v36  ;;  %27339 = vmatprep.subr.bf16.mxu0 %v33040_v55  ;;  %v28571_v36 = vld [vmem:[%s28782_s24 + $0xa9] sm:$0xff] }
 0x6f1   : > { %27959 = vmatprep.subr.bf16.mxu1 %v33039_v23 }
 0x6f2   : > { %23742 = vmatmul.mubr.msk.f32.vlgmr.msra.gmra.mrb[6].mxu0 %vm182_vm0, %v33061_v37 }
 0x6f3   : > { %27341 = vmatpush3.bf16.msra.mxu0 %v33040_v55  ;;  %23760 = vmatprep.mubr.msk.f32.mxu0 %vm182_vm0, %v33062_v30 }
 0x6f4   : > { %27961 = vmatpush3.bf16.msra.mxu1 %v33039_v23  ;;  %27343 = vmatprep.subr.bf16.mxu0 %v33041_v60  ;;  %v17137_v23 = vpop.permute.xlu1 %17136 }
 0x6f5   : > { %27963 = vmatprep.subr.bf16.mxu1 %v33040_v55 }
 0x6f7   : > { %27345 = vmatpush3.bf16.msra.mxu0 %v33041_v60  ;;  %24483 = vmatmul.mubr.msk.f32.vlgmr.msra.gmra.mrb[6].mxu1 %vm182_vm0, %v17052_v28 }
 0x6f8   : > { %27965 = vmatpush3.bf16.msra.mxu1 %v33040_v55  ;;  %27347 = vmatprep.subr.bf16.mxu0 %v33042_v46  ;;  %v28572_v55 = vld [vmem:[%s28782_s24 + $0xb1] sm:$0xff] }
 0x6f9   : > { %27967 = vmatprep.subr.bf16.mxu1 %v33041_v60  ;;  %24501 = vmatprep.mubr.msk.f32.mxu1 %vm182_vm0, %v17135_v32 }
 0x6fb   : > { %27349 = vmatpush3.bf16.msra.mxu0 %v33042_v46 }
 0x6fc   : > { %27969 = vmatpush3.bf16.msra.mxu1 %v33041_v60  ;;  %27351 = vmatprep.subr.bf16.mxu0 %v33043_v8  ;;  %v28573_v60 = vld [vmem:[%s28782_s24 + $0xaa] sm:$0xff] }
 0x6fd   : > { %27971 = vmatprep.subr.bf16.mxu1 %v33042_v46 }
 0x6ff   : > { %27353 = vmatpush3.bf16.msra.mxu0 %v33043_v8 }
 0x700   : > { %27973 = vmatpush3.bf16.msra.mxu1 %v33042_v46  ;;  %27451 = vmatprep.subr.bf16.mxu0 %v33047_v29  ;;  %v33068_v46 = vld [vmem:[#allocation15_spill] sm:$0xff] }
 0x701   : > { %27975 = vmatprep.subr.bf16.mxu1 %v33043_v8 }
 0x702   : > { %23761 = vmatmul.mubr.msk.f32.vlgmr.msra.gmra.mrb[6].mxu0 %vm182_vm0, %v33063_v11 }
 0x703   : > { %27453 = vmatpush3.bf16.msra.mxu0 %v33047_v29  ;;  %23893 = vmatprep.mubr.msk.f32.mxu0 %vm182_vm0, %v28571_v36 }
 0x704   : > { %27977 = vmatpush3.bf16.msra.mxu1 %v33043_v8  ;;  %27455 = vmatprep.subr.bf16.mxu0 %v32985_v50 }
 0x705   : > { %27979 = vmatprep.subr.bf16.mxu1 %v33047_v29 }
 0x707   : > { %27457 = vmatpush3.bf16.msra.mxu0 %v32985_v50  ;;  %24502 = vmatmul.mubr.msk.f32.vlgmr.msra.gmra.mrb[6].mxu1 %vm182_vm0, %v17137_v23 }
 0x708   : > { %27981 = vmatpush3.bf16.msra.mxu1 %v33047_v29  ;;  %27459 = vmatprep.subr.bf16.mxu0 %v32986_v59 }
 0x709   : > { %27983 = vmatprep.subr.bf16.mxu1 %v32985_v50  ;;  %24520 = vmatprep.mubr.msk.f32.mxu1 %vm182_vm0, %v31725_v25 }
 0x70b   : > { %27461 = vmatpush3.bf16.msra.mxu0 %v32986_v59 }
 0x70c   : > { %27985 = vmatpush3.bf16.msra.mxu1 %v32985_v50  ;;  %27463 = vmatprep.subr.bf16.mxu0 %v32988_v4  ;;  %v17305_v50 = vpop.permute.xlu0 %17304 }
 0x70d   : > { %27987 = vmatprep.subr.bf16.mxu1 %v32986_v59 }
 0x70f   : > { %27465 = vmatpush3.bf16.msra.mxu0 %v32988_v4 }
 0x710   : > { %27989 = vmatpush3.bf16.msra.mxu1 %v32986_v59  ;;  %27467 = vmatprep.subr.bf16.mxu0 %v32989_v42  ;;  %v33065_v59 = vld [vmem:[#allocation13_spill] sm:$0xff] }
 0x711   : > { %27991 = vmatprep.subr.bf16.mxu1 %v32988_v4 }
 0x712   : > { %23894 = vmatmul.mubr.msk.f32.vlgmr.msra.gmra.mrb[6].mxu0 %vm182_vm0, %v28572_v55 }
 0x713   : > { %27469 = vmatpush3.bf16.msra.mxu0 %v32989_v42  ;;  %23912 = vmatprep.mubr.msk.f32.mxu0 %vm182_vm0, %v33064_v0 }
 0x714   : > { %27993 = vmatpush3.bf16.msra.mxu1 %v32988_v4  ;;  %27471 = vmatprep.subr.bf16.mxu0 %v32990_v14  ;;  %v33066_v4 = vld [vmem:[#allocation14_spill] sm:$0xff] }
 0x715   : > { %27995 = vmatprep.subr.bf16.mxu1 %v32989_v42 }
 0x717   : > { %27473 = vmatpush3.bf16.msra.mxu0 %v32990_v14  ;;  %24521 = vmatmul.mubr.msk.f32.vlgmr.msra.gmra.mrb[6].mxu1 %vm182_vm0, %v31735_v35 }
 0x718   : > { %27997 = vmatpush3.bf16.msra.mxu1 %v32989_v42  ;;  %27475 = vmatprep.subr.bf16.mxu0 %v32993_v40  ;;  %v17307_v42 = vpop.permute.xlu1 %17306 }
 0x719   : > { %27999 = vmatprep.subr.bf16.mxu1 %v32990_v14  ;;  %24539 = vmatprep.mubr.msk.f32.mxu1 %vm182_vm0, %v17305_v50 }
 0x71b   : > { %27477 = vmatpush3.bf16.msra.mxu0 %v32993_v40 }
 0x71c   : > { %28001 = vmatpush3.bf16.msra.mxu1 %v32990_v14  ;;  %27479 = vmatprep.subr.bf16.mxu0 %v33049_v44  ;;  %v17390_v14 = vpop.permute.xlu0 %17389  ;;  %v17392_v19 = vpop.permute.xlu1 %17391 }
 0x71d   : > { %28003 = vmatprep.subr.bf16.mxu1 %v32993_v40 }
 0x71f   : > { %27481 = vmatpush3.bf16.msra.mxu0 %v33049_v44 }
 0x720   : > { %28005 = vmatpush3.bf16.msra.mxu1 %v32993_v40  ;;  %27483 = vmatprep.subr.bf16.mxu0 %v33050_v63  ;;  %v33067_v40 = vld [vmem:[#allocation99_spill] sm:$0xff] }
 0x721   : > { %28007 = vmatprep.subr.bf16.mxu1 %v33049_v44 }
 0x722   : > { %23913 = vmatmul.mubr.msk.f32.vlgmr.msra.gmra.mrb[6].mxu0 %vm182_vm0, %v33065_v59 }
 0x723   : > { %27485 = vmatpush3.bf16.msra.mxu0 %v33050_v63  ;;  %23931 = vmatprep.mubr.msk.f32.mxu0 %vm182_vm0, %v33066_v4 }
 0x724   : > { %28009 = vmatpush3.bf16.msra.mxu1 %v33049_v44  ;;  %27487 = vmatprep.subr.bf16.mxu0 %v33051_v22 }
 0x725   : > { %28011 = vmatprep.subr.bf16.mxu1 %v33050_v63 }
 0x727   : > { %27489 = vmatpush3.bf16.msra.mxu0 %v33051_v22  ;;  %24540 = vmatmul.mubr.msk.f32.vlgmr.msra.gmra.mrb[6].mxu1 %vm182_vm0, %v17307_v42 }
 0x728   : > { %28013 = vmatpush3.bf16.msra.mxu1 %v33050_v63  ;;  %27491 = vmatprep.subr.bf16.mxu0 %v33052_v18 }
 0x729   : > { %28015 = vmatprep.subr.bf16.mxu1 %v33051_v22  ;;  %24558 = vmatprep.mubr.msk.f32.mxu1 %vm182_vm0, %v17390_v14 }
 0x72b   : > { %27493 = vmatpush3.bf16.msra.mxu0 %v33052_v18 }
 0x72c   : > { %28017 = vmatpush3.bf16.msra.mxu1 %v33051_v22  ;;  %27495 = vmatprep.subr.bf16.mxu0 %v33053_v56 }
 0x72d   : > { %28019 = vmatprep.subr.bf16.mxu1 %v33052_v18 }
 0x72f   : > { %27497 = vmatpush3.bf16.msra.mxu0 %v33053_v56 }
 0x730   : > { %28021 = vmatpush3.bf16.msra.mxu1 %v33052_v18  ;;  %27595 = vmatprep.subr.bf16.mxu0 %v33018_v17 }
 0x731   : > { %28023 = vmatprep.subr.bf16.mxu1 %v33053_v56 }
 0x732   : > { %23932 = vmatmul.mubr.msk.f32.vlgmr.msra.gmra.mrb[6].mxu0 %vm182_vm0, %v33067_v40 }
 0x733   : > { %27597 = vmatpush3.bf16.msra.mxu0 %v33018_v17  ;;  %24064 = vmatprep.mubr.msk.f32.mxu0 %vm182_vm0, %v28573_v60 }
 0x734   : > { %28025 = vmatpush3.bf16.msra.mxu1 %v33053_v56  ;;  %27599 = vmatprep.subr.bf16.mxu0 %v33019_v47 }
 0x735   : > { %28027 = vmatprep.subr.bf16.mxu1 %v33018_v17 }
 0x737   : > { %27601 = vmatpush3.bf16.msra.mxu0 %v33019_v47  ;;  %24559 = vmatmul.mubr.msk.f32.vlgmr.msra.gmra.mrb[6].mxu1 %vm182_vm0, %v17392_v19 }
 0x738   : > { %28029 = vmatpush3.bf16.msra.mxu1 %v33018_v17  ;;  %27603 = vmatprep.subr.bf16.mxu0 %v33020_v53  ;;  %v28574_v17 = vld [vmem:[%s28782_s24 + $0xb2] sm:$0xff] }
 0x739   : > { %28031 = vmatprep.subr.bf16.mxu1 %v33019_v47  ;;  %24577 = vmatprep.mubr.msk.f32.mxu1 %vm182_vm0, %v31817_v21 }
 0x73b   : > { %27605 = vmatpush3.bf16.msra.mxu0 %v33020_v53 }
 0x73c   : > { %28033 = vmatpush3.bf16.msra.mxu1 %v33019_v47  ;;  %27607 = vmatprep.subr.bf16.mxu0 %v33021_v49  ;;  %v17560_v47 = vpop.permute.xlu0 %17559 }
 0x73d   : > { %28035 = vmatprep.subr.bf16.mxu1 %v33020_v53 }
 0x73f   : > { %27609 = vmatpush3.bf16.msra.mxu0 %v33021_v49 }
 0x740   : > { %28037 = vmatpush3.bf16.msra.mxu1 %v33020_v53  ;;  %27611 = vmatprep.subr.bf16.mxu0 %v33022_v48  ;;  %v33069_v53 = vld [vmem:[#allocation16_spill] sm:$0xff] }
 0x741   : > { %28039 = vmatprep.subr.bf16.mxu1 %v33021_v49 }
 0x742   : > { %24065 = vmatmul.mubr.msk.f32.vlgmr.msra.gmra.mrb[6].mxu0 %vm182_vm0, %v28574_v17 }
 0x743   : > { %27613 = vmatpush3.bf16.msra.mxu0 %v33022_v48  ;;  %24083 = vmatprep.mubr.msk.f32.mxu0 %vm182_vm0, %v33068_v46 }
 0x744   : > { %28041 = vmatpush3.bf16.msra.mxu1 %v33021_v49  ;;  %27615 = vmatprep.subr.bf16.mxu0 %v33023_v39  ;;  %v17562_v49 = vpop.permute.xlu1 %17561 }
 0x745   : > { %28043 = vmatprep.subr.bf16.mxu1 %v33022_v48 }
 0x747   : > { %27617 = vmatpush3.bf16.msra.mxu0 %v33023_v39  ;;  %24578 = vmatmul.mubr.msk.f32.vlgmr.msra.gmra.mrb[6].mxu1 %vm182_vm0, %v31825_v51 }
 0x748   : > { %28045 = vmatpush3.bf16.msra.mxu1 %v33022_v48  ;;  %27619 = vmatprep.subr.bf16.mxu0 %v33058_v41  ;;  %v17645_v48 = vpop.permute.xlu0 %17644 }
 0x749   : > { %28047 = vmatprep.subr.bf16.mxu1 %v33023_v39  ;;  %24596 = vmatprep.mubr.msk.f32.mxu1 %vm182_vm0, %v17560_v47 }
 0x74b   : > { %27621 = vmatpush3.bf16.msra.mxu0 %v33058_v41 }
 0x74c   : > { %28049 = vmatpush3.bf16.msra.mxu1 %v33023_v39  ;;  %27623 = vmatprep.subr.bf16.mxu0 %v33059_v57 }
 0x74d   : > { %28051 = vmatprep.subr.bf16.mxu1 %v33058_v41 }
 0x74f   : > { %27625 = vmatpush3.bf16.msra.mxu0 %v33059_v57 }
 0x750   : > { %28053 = vmatpush3.bf16.msra.mxu1 %v33058_v41  ;;  %27627 = vmatprep.subr.bf16.mxu0 %v33026_v12 }
 0x751   : > { %28055 = vmatprep.subr.bf16.mxu1 %v33059_v57 }
 0x752   : > { %24084 = vmatmul.mubr.msk.f32.vlgmr.msra.gmra.mrb[6].mxu0 %vm182_vm0, %v31384_v15  ;;  %v17647_v15 = vpop.permute.xlu1 %17646 }
 0x753   : > { %27629 = vmatpush3.bf16.msra.mxu0 %v33026_v12  ;;  %24102 = vmatprep.mubr.msk.f32.mxu0 %vm182_vm0, %v33069_v53 }
 0x754   : > { %28057 = vmatpush3.bf16.msra.mxu1 %v33059_v57  ;;  %27631 = vmatprep.subr.bf16.mxu0 %v33027_v20 }
 0x755   : > { %28059 = vmatprep.subr.bf16.mxu1 %v33026_v12 }
 0x757   : > { %27633 = vmatpush3.bf16.msra.mxu0 %v33027_v20  ;;  %24597 = vmatmul.mubr.msk.f32.vlgmr.msra.gmra.mrb[6].mxu1 %vm182_vm0, %v17562_v49 }
 0x758   : > { %28061 = vmatpush3.bf16.msra.mxu1 %v33026_v12  ;;  %27635 = vmatprep.subr.bf16.mxu0 %v33028_v24 }
 0x759   : > { %28063 = vmatprep.subr.bf16.mxu1 %v33027_v20  ;;  %24615 = vmatprep.mubr.msk.f32.mxu1 %vm182_vm0, %v17645_v48 }
 0x75b   : > { %27637 = vmatpush3.bf16.msra.mxu0 %v33028_v24 }
 0x75c   : > { %28065 = vmatpush3.bf16.msra.mxu1 %v33027_v20  ;;  %27639 = vmatprep.subr.bf16.mxu0 %v33029_v6 }
 0x75d   : > { %28067 = vmatprep.subr.bf16.mxu1 %v33028_v24 }
 0x75f   : > { %27641 = vmatpush3.bf16.msra.mxu0 %v33029_v6 }
 0x760   : > { %28069 = vmatpush3.bf16.msra.mxu1 %v33028_v24 }
 0x761   : > { %28071 = vmatprep.subr.bf16.mxu1 %v33029_v6 }
 0x762   : > { %24103 = vmatmul.mubr.msk.f32.vlgmr.msra.gmra.mrb[6].mxu0 %vm182_vm0, %v31412_v34 }
 0x764   : > { %28073 = vmatpush3.bf16.msra.mxu1 %v33029_v6 }
 0x767   : > { %24616 = vmatmul.mubr.msk.f32.vlgmr.msra.gmra.mrb[6].mxu1 %vm182_vm0, %v17647_v15 }
 0x7a5   : > { %v23591_v39 = vpop.f32.mrb[4].mxu0 }
 0x7a6   : > { %18341 = vst [vmem:[%s30271_s27 + $0x48] sm:$0xff] %v23591_v39  ;;  %v13345_v20 = vpop.f32.mrb[5].mxu0 }
 0x7a7   : > { %18340 = vst [vmem:[%s30271_s27 + $0x40] sm:$0xff] %v13345_v20 }
 0x7aa   : > { %v24446_v12 = vpop.f32.mrb[4].mxu1 }
 0x7ab   : > { %18345 = vst [vmem:[%s30271_s27 + $0x68] sm:$0xff] %v24446_v12  ;;  %v16952_v24 = vpop.f32.mrb[5].mxu1 }
 0x7ac   : > { %18344 = vst [vmem:[%s30271_s27 + $0x60] sm:$0xff] %v16952_v24 }
 0x835   : > { %v24104_v34 = vpop.f32.mrb[6].mxu0 }
 0x836   : > { %18343 = vst [vmem:[%s30271_s27 + $0x58] sm:$0xff] %v24104_v34  ;;  %v15493_v8 = vpop.f32.mrb[7].mxu0 }
 0x837   : > { %18342 = vst [vmem:[%s30271_s27 + $0x50] sm:$0xff] %v15493_v8 }
 0x83a   : > { %v24617_v6 = vpop.f32.mrb[6].mxu1 }
 0x83b   : > { %18347 = vst [vmem:[%s30271_s27 + $0x78] sm:$0xff] %v24617_v6  ;;  %v17718_v25 = vpop.f32.mrb[7].mxu1 }
 0x83c   : > { %18346 = vst [vmem:[%s30271_s27 + $0x70] sm:$0xff] %v17718_v25 }
 0x83d   : > { %28616 = shalt.err (!%p28613_p7)
}
 0x83e   : > { %s28617_s14 = scalar_lea.hbm %s32231_s4, 2048  ;;  %s28621_s22 = scalar_lea.hbm %s32282_s2, 4096 }
 0x83f   : > { %p28618_p8 = scmp.ne.s32.totalorder %s32231_s4, %s28617_s14  ;;  %p28622_p1 = scmp.lt.u32.totalorder %s32231_s4, %s32282_s2 }
 0x840   : > { %p28623_p0 = scmp.lt.u32.totalorder %s28621_s22, %s28617_s14  ;;  %p28625_p6 = scmp.lt.u32.totalorder %s28617_s14, %s32231_s4 }
 0x841   : > { %p28619_p11 = pnand %p28618_p8, %p33070_p9 }
 0x842   : > { %p28624_p5 = por %p28623_p0, %p28622_p1 }
 0x843   : > { %p28620_p13 = pneg %p28619_p11 }
 0x844   : > { %p28626_p10 = por %p28625_p6, %p28624_p5 }
 0x846   : > { %p28627_p12 = pnand %p28626_p10, %p28620_p13 }
 0x848   : > { %28630 = shalt.err (!%p28627_p12)
}
 0x849   : > { %s28677_s23 = smov 128   ;;  %s28678_s25 = smov 8  }
 0x84a   : > { %28495 = dma.vmem_to_hbm [thread:$0]  (%p33070_p9), %s32233_s29, 2048, %s32231_s4, %s32239_s5, %s28677_s23, %s28677_s23, %s28678_s25  }
 0x84b PF: > { %p28507_p2 = scmp.ge.s32.totalorder %s28669_s12, 2  ;;  %s17781_s26 = sand.u32 1, %s28657_s9  }
 0x84c   : > { %p33071_p3 = scmp.ne.s32.totalorder %s32669_s20, 0  ;;  %s17782_s27 = scalar_lea.sflag [#allocation4], %s17781_s26 }
 0x84e   : > { %p28502_p4 = pnand %p28507_p2, %p33071_p3 }
 0x850   : > { %28652 = dma.done.wait (!%p28502_p4), %s17782_s27, 2048  }
 0x851   : > { %28654 = vsyncadd (!%p28502_p4), %s17782_s27, 4294965248  ;;  %p13_p7 = scmp.ge.s32.totalorder %s28719_s15, 4   ;;  %s33072_s9 = smov %s28661_s10 }
 0x852   : > { %s33073_s10 = smov %s28665_s11  ;;  %s33074_s11 = smov %s28730_s18 }
 0x853   : > { %s33075_s12 = smov %s28719_s15  ;;  %15 = sbr.rel (!%p13_p7) target bundleno = 4 (0x4), region = 110 }
 0x85a   :  { %17787 = vsyncpa [#allocation3], 1 }
 0x85b   :  { %17789 = vsyncpa [#allocation3 + $0x1], 1 }
 0x85c   :  { %17790 = vsyncpa [#allocation4], 1 }
 0x85d   :  { %17792 = vsyncpa [#allocation4 + $0x1], 1 }

</bundles_post_ra>
